<compile_context>
chip_gen: v7x
topology: tpu7x:2x2x1
jax: 0.10.0
libtpu: 0.0.40
codegen_flags: <defaults>
</compile_context>

<pallas_src>
import functools
import math

import jax
import jax.numpy as jnp
from jax import lax
from jax.experimental import pallas as pl
from jax.experimental.pallas import tpu as pltpu

F32 = jnp.float32
BF16 = jnp.bfloat16

# The reference BERT implementation uses a custom LayerNorm:
#   a_2 * (x - mean) / (std + eps) + b_2, torch-style unbiased std, eps = 1e-6.
LN_EPS = 1e-6


# ----------------------------- shared math helpers ----------------------------

def _layernorm(x, gamma, beta, eps=LN_EPS):
    """BERT-pytorch style LayerNorm: unbiased std, eps added outside the sqrt."""
    n = x.shape[-1]
    mu = jnp.mean(x, axis=-1, keepdims=True)
    var = jnp.sum((x - mu) ** 2, axis=-1, keepdims=True) / (n - 1)
    inv = 1.0 / (jnp.sqrt(var) + eps)
    return gamma * (x - mu) * inv + beta


def _gelu(x):
    # BERT-style tanh-approximation GELU.
    # TODO(synk): switch to erf-based GELU if the PyTorch module uses nn.GELU default.
    # TODO(synk): compute GELU / softmax p,alpha in bf16 on v6e/v7x (bf16 VPU/EUP).
    return 0.5 * x * (1.0 + jnp.tanh(0.7978845608028654 * (x + 0.044715 * x * x * x)))


# ------------------------- kernel 1: LN1 + fused QKV --------------------------

def _qkv_kernel(x_ref, g_ref, b_ref, w_ref, bias_ref, q_ref, k_ref, v_ref,
                *, num_heads, head_dim):
    y = _layernorm(x_ref[0], g_ref[...], b_ref[...])            # f32 statistics
    qkv = jnp.dot(y.astype(BF16), w_ref[...],
                  preferred_element_type=F32) + bias_ref[...]   # (TR, 3H) f32
    hidden = num_heads * head_dim
    # TODO(synk): pack 2 heads per store when head_dim < 128 to keep stores lane-dense.
    for h in range(num_heads):
        lo = h * head_dim
        q_ref[0, h] = qkv[:, lo:lo + head_dim].astype(BF16)     # pre-scaled by 1/sqrt(dh)
        k_ref[0, h] = qkv[:, hidden + lo:hidden + lo + head_dim].astype(BF16)
        v_ref[0, h] = qkv[:, 2 * hidden + lo:2 * hidden + lo + head_dim].astype(BF16)


# ----- kernel 2: flash attention (head grid axis) + per-head Wo + residual -----

def _attn_kernel(x_ref, q_ref, k_ref, v_ref, wo_ref, bo_ref, o_ref,
                 m_ref, l_ref, ctx_ref, acc_ref, *, num_heads):
    h = pl.program_id(2)
    ki = pl.program_id(3)
    nk = pl.num_programs(3)

    @pl.when(jnp.logical_and(h == 0, ki == 0))
    def _():                               # fresh (b, q-tile): zero the Wo accumulator
        acc_ref[...] = jnp.zeros(acc_ref.shape, acc_ref.dtype)

    @pl.when(ki == 0)
    def _():                               # fresh head: reset online-softmax state
        m_ref[...] = jnp.full(m_ref.shape, -jnp.inf, m_ref.dtype)
        l_ref[...] = jnp.zeros(l_ref.shape, l_ref.dtype)
        ctx_ref[...] = jnp.zeros(ctx_ref.shape, ctx_ref.dtype)

    q = q_ref[0, 0]                        # (TQ, dh) bf16, already scaled by 1/sqrt(dh)
    k = k_ref[0, 0]                        # (TK, dh) bf16
    v = v_ref[0, 0]                        # (TK, dh) bf16

    # TODO(synk): attention-mask support (the reference forward uses mask=None).
    s = lax.dot_general(q, k, (((1,), (1,)), ((), ())),
                        preferred_element_type=F32)              # (TQ, TK) f32

    m_prev = m_ref[...]                                          # (TQ, 128) lane-broadcast
    m_next = jnp.maximum(m_prev, jnp.max(s, axis=-1, keepdims=True))
    alpha = jnp.exp(m_prev - m_next)                             # (TQ, 128)
    p = jnp.exp(s - m_next[:, :1])                               # (TQ, TK)
    l_ref[...] = alpha * l_ref[...] + jnp.sum(p, axis=-1, keepdims=True)
    ctx_ref[...] = alpha[:, :1] * ctx_ref[...] + jnp.dot(
        p.astype(BF16), v, preferred_element_type=F32)           # (TQ, dh)
    m_ref[...] = m_next

    @pl.when(ki == nk - 1)
    def _():                               # head finished: project into the (TQ, H) accumulator
        inv_l = pl.reciprocal(l_ref[...][:, :1])                 # exact; once per head
        ctx = (ctx_ref[...] * inv_l).astype(BF16)
        acc_ref[...] += jnp.dot(ctx, wo_ref[0], preferred_element_type=F32)

    @pl.when(jnp.logical_and(h == num_heads - 1, ki == nk - 1))
    def _():                               # all heads done: bias + residual, one dense store
        o_ref[0] = x_ref[0] + acc_ref[...] + bo_ref[...]


# ---------------- kernel 3: LN2 + FFN (d_ff reduction axis) + residual --------

def _ffn_kernel(x_ref, g_ref, b_ref, w1_ref, b1_ref, w2_ref, b2_ref, o_ref,
                ln_ref, acc_ref):
    f = pl.program_id(2)
    nf = pl.num_programs(2)

    @pl.when(f == 0)
    def _():
        ln_ref[...] = _layernorm(x_ref[0], g_ref[...], b_ref[...]).astype(BF16)
        acc_ref[...] = jnp.zeros(acc_ref.shape, acc_ref.dtype)

    ff = jnp.dot(ln_ref[...], w1_ref[...], preferred_element_type=F32) + b1_ref[...]
    ff = _gelu(ff)                                               # (TR, TF) f32
    acc_ref[...] += jnp.dot(ff.astype(BF16), w2_ref[...], preferred_element_type=F32)

    @pl.when(f == nf - 1)
    def _():
        o_ref[0] = x_ref[0] + acc_ref[...] + b2_ref[...]


# --------------------------------- wrapper ------------------------------------

def _bspec(block_shape, index_map, single_buffer=False):
    if single_buffer:
        return pl.BlockSpec(block_shape, index_map, pipeline_mode=pl.Buffered(1))
    return pl.BlockSpec(block_shape, index_map)


def _const_spec(arr, single_buffer=False):
    """Full-array block whose index is constant across the grid (weights)."""
    zeros = (0,) * arr.ndim
    return _bspec(arr.shape, lambda *_: zeros, single_buffer)


def _pick_sublane_tile(n, target):
    """Largest multiple-of-8 divisor of n that is <= target (else n itself)."""
    if n <= target:
        return n
    for t in range(target, 7, -1):
        if n % t == 0 and t % 8 == 0:
            return t
    return n


def _pick_lane_tile(n, target):
    """Largest multiple-of-128 divisor of n that is <= target (else n itself)."""
    if n <= target:
        return n
    for t in range(target, 127, -1):
        if n % t == 0 and t % 128 == 0:
            return t
    return n


def _vmem_limit_bytes():
    """Per-generation VMEM budget (v5e/v6e: 128 MiB/TC, v7x: 64 MiB/TC)."""
    cap = 128 * 1024 * 1024
    try:
        cap = int(getattr(pltpu.get_tpu_info(), "vmem_capacity_bytes", cap)) or cap
    except Exception:
        pass
    return int(max(32 * 1024 * 1024,
                   min(cap - 16 * 1024 * 1024, 100 * 1024 * 1024)))


def transformer_block(x, params, *, num_heads,
                      tq=128, tk=256, tr=256, tf=512,
                      single_buffer_invariants=True):
    """x: (B, S, H) f32.  Linear weights stored as (in_features, out_features)."""
    B, S, H = x.shape
    assert H % num_heads == 0
    dh = H // num_heads
    d_ff = params["w1"].shape[1]
    sm_scale = 1.0 / math.sqrt(dh)
    sb = single_buffer_invariants

    # Fuse Q|K|V into one (H, 3H) matmul; fold 1/sqrt(dh) into the Q columns.
    wqkv = jnp.concatenate(
        [params["wq"] * sm_scale, params["wk"], params["wv"]], axis=1).astype(BF16)
    bqkv = jnp.concatenate(
        [params["bq"] * sm_scale, params["bk"], params["bv"]], axis=1)         # f32
    wo_h = params["wo"].astype(BF16).reshape(num_heads, dh, H)  # per-head Wo row slabs
    bo = params["bo"]
    w1 = params["w1"].astype(BF16)
    w2 = params["w2"].astype(BF16)
    b1, b2 = params["b1"], params["b2"]
    g1, be1 = params["ln1_g"], params["ln1_b"]
    g2, be2 = params["ln2_g"], params["ln2_b"]

    TR = _pick_sublane_tile(S, tr)      # row tile: LN/QKV and FFN kernels
    TQ = _pick_sublane_tile(S, tq)      # attention q tile
    TK = _pick_sublane_tile(S, tk)      # attention kv tile
    TF = _pick_lane_tile(d_ff, tf)      # FFN d_ff reduction tile
    n_r, n_q, n_k, n_f = S // TR, S // TQ, S // TK, d_ff // TF

    vmem = _vmem_limit_bytes()

    # ----- kernel 1: LN1 + fused QKV projection -> (B, nh, S, dh) bf16 -----
    q, k, v = pl.pallas_call(
        functools.partial(_qkv_kernel, num_heads=num_heads, head_dim=dh),
        out_shape=tuple(jax.ShapeDtypeStruct((B, num_heads, S, dh), BF16)
                        for _ in range(3)),
        grid=(B, n_r),
        in_specs=[pl.BlockSpec((1, TR, H), lambda b, r: (b, r, 0)),
                  _const_spec(g1, sb), _const_spec(be1, sb),
                  _const_spec(wqkv, sb), _const_spec(bqkv, sb)],
        out_specs=tuple(pl.BlockSpec((1, num_heads, TR, dh), lambda b, r: (b, 0, r, 0))
                        for _ in range(3)),
        compiler_params=pltpu.CompilerParams(
            dimension_semantics=("parallel", "parallel"),
            vmem_limit_bytes=vmem),
    )(x, g1, be1, wqkv, bqkv)

    # ----- kernel 2: flash attention over (B, q tiles, heads, kv tiles) -----
    x1 = pl.pallas_call(
        functools.partial(_attn_kernel, num_heads=num_heads),
        out_shape=jax.ShapeDtypeStruct((B, S, H), F32),
        grid=(B, n_q, num_heads, n_k),
        in_specs=[
            _bspec((1, TQ, H), lambda b, qi, h, ki: (b, qi, 0), sb),          # residual x
            pl.BlockSpec((1, 1, TQ, dh), lambda b, qi, h, ki: (b, h, qi, 0)),  # q[h]
            pl.BlockSpec((1, 1, TK, dh), lambda b, qi, h, ki: (b, h, ki, 0)),  # k[h]
            pl.BlockSpec((1, 1, TK, dh), lambda b, qi, h, ki: (b, h, ki, 0)),  # v[h]
            pl.BlockSpec((1, dh, H), lambda b, qi, h, ki: (h, 0, 0)),          # Wo[h]
            _const_spec(bo, sb),
        ],
        out_specs=pl.BlockSpec((1, TQ, H), lambda b, qi, h, ki: (b, qi, 0)),
        scratch_shapes=[pltpu.VMEM((TQ, 128), F32),   # running max m (lane-broadcast)
                        pltpu.VMEM((TQ, 128), F32),   # running denom l (lane-broadcast)
                        pltpu.VMEM((TQ, dh), F32),    # per-head unnormalized context
                        pltpu.VMEM((TQ, H), F32)],    # lane-dense Wo accumulator
        compiler_params=pltpu.CompilerParams(
            dimension_semantics=("parallel", "parallel", "arbitrary", "arbitrary"),
            vmem_limit_bytes=vmem),
    )(x, q, k, v, wo_h, bo)

    # ----- kernel 3: LN2 + FFN (d_ff-tiled reduction) + residual -----
    out = pl.pallas_call(
        _ffn_kernel,
        out_shape=jax.ShapeDtypeStruct((B, S, H), F32),
        grid=(B, n_r, n_f),
        in_specs=[
            _bspec((1, TR, H), lambda b, r, f: (b, r, 0), sb),                # residual x1
            _const_spec(g2, sb), _const_spec(be2, sb),
            pl.BlockSpec((H, TF), lambda b, r, f: (0, f)),                    # W1 col tile
            pl.BlockSpec((1, TF), lambda b, r, f: (0, f)),                    # b1 tile
            pl.BlockSpec((TF, H), lambda b, r, f: (f, 0)),                    # W2 row tile
            _const_spec(b2, sb),
        ],
        out_specs=pl.BlockSpec((1, TR, H), lambda b, r, f: (b, r, 0)),
        scratch_shapes=[pltpu.VMEM((TR, H), BF16),    # LayerNorm2 activations
                        pltpu.VMEM((TR, H), F32)],    # W2 partial-product accumulator
        compiler_params=pltpu.CompilerParams(
            dimension_semantics=("parallel", "parallel", "arbitrary"),
            vmem_limit_bytes=vmem),
    )(x1, g2, be2, w1, b1, w2, b2)

    return out


# ------------------------------ param init ------------------------------------

def init_params(key, hidden, d_ff):
    ks = jax.random.split(key, 6)
    scale = 0.02

    def lin(k, fan_in, fan_out):
        return scale * jax.random.normal(k, (fan_in, fan_out), F32)

    return {
        "wq": lin(ks[0], hidden, hidden), "bq": jnp.zeros((1, hidden), F32),
        "wk": lin(ks[1], hidden, hidden), "bk": jnp.zeros((1, hidden), F32),
        "wv": lin(ks[2], hidden, hidden), "bv": jnp.zeros((1, hidden), F32),
        "wo": lin(ks[3], hidden, hidden), "bo": jnp.zeros((1, hidden), F32),
        "ln1_g": jnp.ones((1, hidden), F32), "ln1_b": jnp.zeros((1, hidden), F32),
        "w1": lin(ks[4], hidden, d_ff), "b1": jnp.zeros((1, d_ff), F32),
        "w2": lin(ks[5], d_ff, hidden), "b2": jnp.zeros((1, hidden), F32),
        "ln2_g": jnp.ones((1, hidden), F32), "ln2_b": jnp.zeros((1, hidden), F32),
    }


# ------------------------ pure-JAX f32 reference (sanity) ---------------------

def reference(x, p, num_heads):
    B, S, H = x.shape
    dh = H // num_heads
    h1 = _layernorm(x, p["ln1_g"], p["ln1_b"])
    q = h1 @ p["wq"] + p["bq"]
    k = h1 @ p["wk"] + p["bk"]
    v = h1 @ p["wv"] + p["bv"]
    qh = q.reshape(B, S, num_heads, dh).transpose(0, 2, 1, 3)
    kh = k.reshape(B, S, num_heads, dh).transpose(0, 2, 1, 3)
    vh = v.reshape(B, S, num_heads, dh).transpose(0, 2, 1, 3)
    s = jnp.einsum('bhqd,bhkd->bhqk', qh, kh) / jnp.sqrt(jnp.float32(dh))
    pr = jax.nn.softmax(s, axis=-1)
    ctx = jnp.einsum('bhqk,bhkd->bhqd', pr, vh).transpose(0, 2, 1, 3).reshape(B, S, H)
    x1 = x + ctx @ p["wo"] + p["bo"]
    h2 = _layernorm(x1, p["ln2_g"], p["ln2_b"])
    ff = _gelu(h2 @ p["w1"] + p["b1"]) @ p["w2"] + p["b2"]
    return x1 + ff


# ----------------------------------- main --------------------------------------

if __name__ == "__main__":
    # Module defaults: hidden_units=256, num_heads=4, d_ff=1024.  S=512 keeps the
    # run tiny but exercises multi-tile q/kv, the head grid axis and d_ff tiling
    # (at seq=8/hidden=32 every dim is below one (8,128) tile and nothing is tested).
    B, S, H = 2, 512, 256
    NUM_HEADS = 4
    D_FF = 4 * H  # 1024

    key = jax.random.PRNGKey(0)
    k_x, k_p = jax.random.split(key)
    x = jax.random.normal(k_x, (B, S, H), F32)
    params = init_params(k_p, H, D_FF)

    run = functools.partial(transformer_block, x, params, num_heads=NUM_HEADS)
    try:
        out = jax.block_until_ready(run())
    except Exception:
        # pl.Buffered(1) single-buffering is only a pipelining hint; retry without
        # it if this JAX/Mosaic build rejects single-buffered BlockSpecs.
        out = jax.block_until_ready(run(single_buffer_invariants=False))

    ref = reference(x, params, NUM_HEADS)
    assert out.shape == (B, S, H)
    # bf16 MXU operands vs. the f32 reference -> loose tolerance.
    assert jnp.allclose(out, ref, atol=2e-2, rtol=2e-2), "mismatch vs reference"

    print("KERNEL_OK")
</pallas_src>

<mosaic_0001>
module attributes {stable_mosaic.version = 11 : i64} {
  func.func @_qkv_kernel(%arg0: i32, %arg1: i32, %arg2: memref<1x256x256xf32, #tpu.memory_space<vmem>>, %arg3: memref<1x256xf32, #tpu.memory_space<vmem>>, %arg4: memref<1x256xf32, #tpu.memory_space<vmem>>, %arg5: memref<256x768xbf16, #tpu.memory_space<vmem>>, %arg6: memref<1x768xf32, #tpu.memory_space<vmem>>, %arg7: memref<1x4x256x64xbf16, #tpu.memory_space<vmem>>, %arg8: memref<1x4x256x64xbf16, #tpu.memory_space<vmem>>, %arg9: memref<1x4x256x64xbf16, #tpu.memory_space<vmem>>) attributes {dimension_semantics = [#tpu.dimension_semantics<parallel>, #tpu.dimension_semantics<parallel>], iteration_bounds = array<i64: 2, 2>, scalar_prefetch = 0 : i64, scratch_operands = 0 : i64, tpu.core_type = #tpu.core_type<tc>, window_params = [{transform_indices = @transform_0, window_bounds = array<i64: 1, 256, 256>}, {pipeline_mode = #tpu.pipeline_mode<synchronous>, transform_indices = @transform_1, window_bounds = array<i64: 1, 256>}, {pipeline_mode = #tpu.pipeline_mode<synchronous>, transform_indices = @transform_2, window_bounds = array<i64: 1, 256>}, {pipeline_mode = #tpu.pipeline_mode<synchronous>, transform_indices = @transform_3, window_bounds = array<i64: 256, 768>}, {pipeline_mode = #tpu.pipeline_mode<synchronous>, transform_indices = @transform_4, window_bounds = array<i64: 1, 768>}, {transform_indices = @transform_5, window_bounds = array<i64: 1, 4, 256, 64>}, {transform_indices = @transform_6, window_bounds = array<i64: 1, 4, 256, 64>}, {transform_indices = @transform_7, window_bounds = array<i64: 1, 4, 256, 64>}]} {
    %c0 = arith.constant 0 : index
    %c0_0 = arith.constant 0 : index
    %c0_1 = arith.constant 0 : index
    %0 = vector.load %arg2[%c0, %c0_0, %c0_1] : memref<1x256x256xf32, #tpu.memory_space<vmem>>, vector<1x256x256xf32>
    %1 = vector.shape_cast %0 : vector<1x256x256xf32> to vector<256x256xf32>
    %c0_2 = arith.constant 0 : index
    %c0_3 = arith.constant 0 : index
    %2 = vector.load %arg3[%c0_2, %c0_3] : memref<1x256xf32, #tpu.memory_space<vmem>>, vector<1x256xf32>
    %c0_4 = arith.constant 0 : index
    %c0_5 = arith.constant 0 : index
    %3 = vector.load %arg4[%c0_4, %c0_5] : memref<1x256xf32, #tpu.memory_space<vmem>>, vector<1x256xf32>
    %cst = arith.constant dense<0.000000e+00> : vector<256xf32>
    %4 = vector.multi_reduction <add>, %1, %cst [1] : vector<256x256xf32> to vector<256xf32>
    %5 = vector.shape_cast %4 : vector<256xf32> to vector<256x1xf32>
    %cst_6 = arith.constant 2.560000e+02 : f32
    %6 = vector.broadcast %cst_6 : f32 to vector<256x1xf32>
    %7 = arith.divf %5, %6 : vector<256x1xf32>
    %8 = vector.broadcast %7 : vector<256x1xf32> to vector<256x256xf32>
    %9 = arith.subf %1, %8 : vector<256x256xf32>
    %10 = arith.mulf %9, %9 : vector<256x256xf32>
    %cst_7 = arith.constant dense<0.000000e+00> : vector<256xf32>
    %11 = vector.multi_reduction <add>, %10, %cst_7 [1] : vector<256x256xf32> to vector<256xf32>
    %12 = vector.shape_cast %11 : vector<256xf32> to vector<256x1xf32>
    %cst_8 = arith.constant 2.550000e+02 : f32
    %13 = vector.broadcast %cst_8 : f32 to vector<256x1xf32>
    %14 = arith.divf %12, %13 : vector<256x1xf32>
    %15 = math.sqrt %14 : vector<256x1xf32>
    %cst_9 = arith.constant 9.99999997E-7 : f32
    %16 = vector.broadcast %cst_9 : f32 to vector<256x1xf32>
    %17 = arith.addf %15, %16 : vector<256x1xf32>
    %cst_10 = arith.constant 1.000000e+00 : f32
    %18 = vector.broadcast %cst_10 : f32 to vector<256x1xf32>
    %19 = arith.divf %18, %17 : vector<256x1xf32>
    %20 = vector.broadcast %7 : vector<256x1xf32> to vector<256x256xf32>
    %21 = arith.subf %1, %20 : vector<256x256xf32>
    %22 = vector.broadcast %2 : vector<1x256xf32> to vector<256x256xf32>
    %23 = arith.mulf %22, %21 : vector<256x256xf32>
    %24 = vector.broadcast %19 : vector<256x1xf32> to vector<256x256xf32>
    %25 = arith.mulf %23, %24 : vector<256x256xf32>
    %26 = vector.broadcast %3 : vector<1x256xf32> to vector<256x256xf32>
    %27 = arith.addf %25, %26 : vector<256x256xf32>
    %28 = arith.truncf %27 : vector<256x256xf32> to vector<256x256xbf16>
    %c0_11 = arith.constant 0 : index
    %c0_12 = arith.constant 0 : index
    %29 = vector.load %arg5[%c0_11, %c0_12] : memref<256x768xbf16, #tpu.memory_space<vmem>>, vector<256x768xbf16>
    %cst_13 = arith.constant dense<0.000000e+00> : vector<256x768xf32>
    %30 = tpu.matmul %28, %29, %cst_13 {dimension_numbers = #tpu.dot_dimension_numbers<[1], [0], [0], [1], [0, 0, 1, 1], [], []>} : vector<256x256xbf16>, vector<256x768xbf16>, vector<256x768xf32> -> vector<256x768xf32>
    %c0_14 = arith.constant 0 : index
    %c0_15 = arith.constant 0 : index
    %31 = vector.load %arg6[%c0_14, %c0_15] : memref<1x768xf32, #tpu.memory_space<vmem>>, vector<1x768xf32>
    %32 = vector.broadcast %31 : vector<1x768xf32> to vector<256x768xf32>
    %33 = arith.addf %30, %32 : vector<256x768xf32>
    %34 = vector.extract_strided_slice %33 {offsets = [0, 0], sizes = [256, 64], strides = [1, 1]} : vector<256x768xf32> to vector<256x64xf32>
    %35 = arith.truncf %34 : vector<256x64xf32> to vector<256x64xbf16>
    %c0_16 = arith.constant 0 : index
    %c0_17 = arith.constant 0 : index
    %c0_18 = arith.constant 0 : index
    %c0_19 = arith.constant 0 : index
    %36 = vector.load %arg7[%c0_16, %c0_17, %c0_18, %c0_19] : memref<1x4x256x64xbf16, #tpu.memory_space<vmem>>, vector<1x1x256x64xbf16>
    %37 = vector.shape_cast %36 : vector<1x1x256x64xbf16> to vector<256x64xbf16>
    %38 = vector.shape_cast %35 : vector<256x64xbf16> to vector<1x1x256x64xbf16>
    tpu.vector_store %arg7[%c0_16, %c0_17, %c0_18, %c0_19], %38 {strides = array<i32>} : memref<1x4x256x64xbf16, #tpu.memory_space<vmem>>, vector<1x1x256x64xbf16>,
    %39 = vector.extract_strided_slice %33 {offsets = [0, 256], sizes = [256, 64], strides = [1, 1]} : vector<256x768xf32> to vector<256x64xf32>
    %40 = arith.truncf %39 : vector<256x64xf32> to vector<256x64xbf16>
    %c0_20 = arith.constant 0 : index
    %c0_21 = arith.constant 0 : index
    %c0_22 = arith.constant 0 : index
    %c0_23 = arith.constant 0 : index
    %41 = vector.load %arg8[%c0_20, %c0_21, %c0_22, %c0_23] : memref<1x4x256x64xbf16, #tpu.memory_space<vmem>>, vector<1x1x256x64xbf16>
    %42 = vector.shape_cast %41 : vector<1x1x256x64xbf16> to vector<256x64xbf16>
    %43 = vector.shape_cast %40 : vector<256x64xbf16> to vector<1x1x256x64xbf16>
    tpu.vector_store %arg8[%c0_20, %c0_21, %c0_22, %c0_23], %43 {strides = array<i32>} : memref<1x4x256x64xbf16, #tpu.memory_space<vmem>>, vector<1x1x256x64xbf16>,
    %44 = vector.extract_strided_slice %33 {offsets = [0, 512], sizes = [256, 64], strides = [1, 1]} : vector<256x768xf32> to vector<256x64xf32>
    %45 = arith.truncf %44 : vector<256x64xf32> to vector<256x64xbf16>
    %c0_24 = arith.constant 0 : index
    %c0_25 = arith.constant 0 : index
    %c0_26 = arith.constant 0 : index
    %c0_27 = arith.constant 0 : index
    %46 = vector.load %arg9[%c0_24, %c0_25, %c0_26, %c0_27] : memref<1x4x256x64xbf16, #tpu.memory_space<vmem>>, vector<1x1x256x64xbf16>
    %47 = vector.shape_cast %46 : vector<1x1x256x64xbf16> to vector<256x64xbf16>
    %48 = vector.shape_cast %45 : vector<256x64xbf16> to vector<1x1x256x64xbf16>
    tpu.vector_store %arg9[%c0_24, %c0_25, %c0_26, %c0_27], %48 {strides = array<i32>} : memref<1x4x256x64xbf16, #tpu.memory_space<vmem>>, vector<1x1x256x64xbf16>,
    %49 = vector.extract_strided_slice %33 {offsets = [0, 64], sizes = [256, 64], strides = [1, 1]} : vector<256x768xf32> to vector<256x64xf32>
    %50 = arith.truncf %49 : vector<256x64xf32> to vector<256x64xbf16>
    %c0_28 = arith.constant 0 : index
    %c1 = arith.constant 1 : index
    %c0_29 = arith.constant 0 : index
    %c0_30 = arith.constant 0 : index
    %51 = vector.load %arg7[%c0_28, %c1, %c0_29, %c0_30] : memref<1x4x256x64xbf16, #tpu.memory_space<vmem>>, vector<1x1x256x64xbf16>
    %52 = vector.shape_cast %51 : vector<1x1x256x64xbf16> to vector<256x64xbf16>
    %53 = vector.shape_cast %50 : vector<256x64xbf16> to vector<1x1x256x64xbf16>
    tpu.vector_store %arg7[%c0_28, %c1, %c0_29, %c0_30], %53 {strides = array<i32>} : memref<1x4x256x64xbf16, #tpu.memory_space<vmem>>, vector<1x1x256x64xbf16>,
    %54 = vector.extract_strided_slice %33 {offsets = [0, 320], sizes = [256, 64], strides = [1, 1]} : vector<256x768xf32> to vector<256x64xf32>
    %55 = arith.truncf %54 : vector<256x64xf32> to vector<256x64xbf16>
    %c0_31 = arith.constant 0 : index
    %c1_32 = arith.constant 1 : index
    %c0_33 = arith.constant 0 : index
    %c0_34 = arith.constant 0 : index
    %56 = vector.load %arg8[%c0_31, %c1_32, %c0_33, %c0_34] : memref<1x4x256x64xbf16, #tpu.memory_space<vmem>>, vector<1x1x256x64xbf16>
    %57 = vector.shape_cast %56 : vector<1x1x256x64xbf16> to vector<256x64xbf16>
    %58 = vector.shape_cast %55 : vector<256x64xbf16> to vector<1x1x256x64xbf16>
    tpu.vector_store %arg8[%c0_31, %c1_32, %c0_33, %c0_34], %58 {strides = array<i32>} : memref<1x4x256x64xbf16, #tpu.memory_space<vmem>>, vector<1x1x256x64xbf16>,
    %59 = vector.extract_strided_slice %33 {offsets = [0, 576], sizes = [256, 64], strides = [1, 1]} : vector<256x768xf32> to vector<256x64xf32>
    %60 = arith.truncf %59 : vector<256x64xf32> to vector<256x64xbf16>
    %c0_35 = arith.constant 0 : index
    %c1_36 = arith.constant 1 : index
    %c0_37 = arith.constant 0 : index
    %c0_38 = arith.constant 0 : index
    %61 = vector.load %arg9[%c0_35, %c1_36, %c0_37, %c0_38] : memref<1x4x256x64xbf16, #tpu.memory_space<vmem>>, vector<1x1x256x64xbf16>
    %62 = vector.shape_cast %61 : vector<1x1x256x64xbf16> to vector<256x64xbf16>
    %63 = vector.shape_cast %60 : vector<256x64xbf16> to vector<1x1x256x64xbf16>
    tpu.vector_store %arg9[%c0_35, %c1_36, %c0_37, %c0_38], %63 {strides = array<i32>} : memref<1x4x256x64xbf16, #tpu.memory_space<vmem>>, vector<1x1x256x64xbf16>,
    %64 = vector.extract_strided_slice %33 {offsets = [0, 128], sizes = [256, 64], strides = [1, 1]} : vector<256x768xf32> to vector<256x64xf32>
    %65 = arith.truncf %64 : vector<256x64xf32> to vector<256x64xbf16>
    %c0_39 = arith.constant 0 : index
    %c2 = arith.constant 2 : index
    %c0_40 = arith.constant 0 : index
    %c0_41 = arith.constant 0 : index
    %66 = vector.load %arg7[%c0_39, %c2, %c0_40, %c0_41] : memref<1x4x256x64xbf16, #tpu.memory_space<vmem>>, vector<1x1x256x64xbf16>
    %67 = vector.shape_cast %66 : vector<1x1x256x64xbf16> to vector<256x64xbf16>
    %68 = vector.shape_cast %65 : vector<256x64xbf16> to vector<1x1x256x64xbf16>
    tpu.vector_store %arg7[%c0_39, %c2, %c0_40, %c0_41], %68 {strides = array<i32>} : memref<1x4x256x64xbf16, #tpu.memory_space<vmem>>, vector<1x1x256x64xbf16>,
    %69 = vector.extract_strided_slice %33 {offsets = [0, 384], sizes = [256, 64], strides = [1, 1]} : vector<256x768xf32> to vector<256x64xf32>
    %70 = arith.truncf %69 : vector<256x64xf32> to vector<256x64xbf16>
    %c0_42 = arith.constant 0 : index
    %c2_43 = arith.constant 2 : index
    %c0_44 = arith.constant 0 : index
    %c0_45 = arith.constant 0 : index
    %71 = vector.load %arg8[%c0_42, %c2_43, %c0_44, %c0_45] : memref<1x4x256x64xbf16, #tpu.memory_space<vmem>>, vector<1x1x256x64xbf16>
    %72 = vector.shape_cast %71 : vector<1x1x256x64xbf16> to vector<256x64xbf16>
    %73 = vector.shape_cast %70 : vector<256x64xbf16> to vector<1x1x256x64xbf16>
    tpu.vector_store %arg8[%c0_42, %c2_43, %c0_44, %c0_45], %73 {strides = array<i32>} : memref<1x4x256x64xbf16, #tpu.memory_space<vmem>>, vector<1x1x256x64xbf16>,
    %74 = vector.extract_strided_slice %33 {offsets = [0, 640], sizes = [256, 64], strides = [1, 1]} : vector<256x768xf32> to vector<256x64xf32>
    %75 = arith.truncf %74 : vector<256x64xf32> to vector<256x64xbf16>
    %c0_46 = arith.constant 0 : index
    %c2_47 = arith.constant 2 : index
    %c0_48 = arith.constant 0 : index
    %c0_49 = arith.constant 0 : index
    %76 = vector.load %arg9[%c0_46, %c2_47, %c0_48, %c0_49] : memref<1x4x256x64xbf16, #tpu.memory_space<vmem>>, vector<1x1x256x64xbf16>
    %77 = vector.shape_cast %76 : vector<1x1x256x64xbf16> to vector<256x64xbf16>
    %78 = vector.shape_cast %75 : vector<256x64xbf16> to vector<1x1x256x64xbf16>
    tpu.vector_store %arg9[%c0_46, %c2_47, %c0_48, %c0_49], %78 {strides = array<i32>} : memref<1x4x256x64xbf16, #tpu.memory_space<vmem>>, vector<1x1x256x64xbf16>,
    %79 = vector.extract_strided_slice %33 {offsets = [0, 192], sizes = [256, 64], strides = [1, 1]} : vector<256x768xf32> to vector<256x64xf32>
    %80 = arith.truncf %79 : vector<256x64xf32> to vector<256x64xbf16>
    %c0_50 = arith.constant 0 : index
    %c3 = arith.constant 3 : index
    %c0_51 = arith.constant 0 : index
    %c0_52 = arith.constant 0 : index
    %81 = vector.load %arg7[%c0_50, %c3, %c0_51, %c0_52] : memref<1x4x256x64xbf16, #tpu.memory_space<vmem>>, vector<1x1x256x64xbf16>
    %82 = vector.shape_cast %81 : vector<1x1x256x64xbf16> to vector<256x64xbf16>
    %83 = vector.shape_cast %80 : vector<256x64xbf16> to vector<1x1x256x64xbf16>
    tpu.vector_store %arg7[%c0_50, %c3, %c0_51, %c0_52], %83 {strides = array<i32>} : memref<1x4x256x64xbf16, #tpu.memory_space<vmem>>, vector<1x1x256x64xbf16>,
    %84 = vector.extract_strided_slice %33 {offsets = [0, 448], sizes = [256, 64], strides = [1, 1]} : vector<256x768xf32> to vector<256x64xf32>
    %85 = arith.truncf %84 : vector<256x64xf32> to vector<256x64xbf16>
    %c0_53 = arith.constant 0 : index
    %c3_54 = arith.constant 3 : index
    %c0_55 = arith.constant 0 : index
    %c0_56 = arith.constant 0 : index
    %86 = vector.load %arg8[%c0_53, %c3_54, %c0_55, %c0_56] : memref<1x4x256x64xbf16, #tpu.memory_space<vmem>>, vector<1x1x256x64xbf16>
    %87 = vector.shape_cast %86 : vector<1x1x256x64xbf16> to vector<256x64xbf16>
    %88 = vector.shape_cast %85 : vector<256x64xbf16> to vector<1x1x256x64xbf16>
    tpu.vector_store %arg8[%c0_53, %c3_54, %c0_55, %c0_56], %88 {strides = array<i32>} : memref<1x4x256x64xbf16, #tpu.memory_space<vmem>>, vector<1x1x256x64xbf16>,
    %89 = vector.extract_strided_slice %33 {offsets = [0, 704], sizes = [256, 64], strides = [1, 1]} : vector<256x768xf32> to vector<256x64xf32>
    %90 = arith.truncf %89 : vector<256x64xf32> to vector<256x64xbf16>
    %c0_57 = arith.constant 0 : index
    %c3_58 = arith.constant 3 : index
    %c0_59 = arith.constant 0 : index
    %c0_60 = arith.constant 0 : index
    %91 = vector.load %arg9[%c0_57, %c3_58, %c0_59, %c0_60] : memref<1x4x256x64xbf16, #tpu.memory_space<vmem>>, vector<1x1x256x64xbf16>
    %92 = vector.shape_cast %91 : vector<1x1x256x64xbf16> to vector<256x64xbf16>
    %93 = vector.shape_cast %90 : vector<256x64xbf16> to vector<1x1x256x64xbf16>
    tpu.vector_store %arg9[%c0_57, %c3_58, %c0_59, %c0_60], %93 {strides = array<i32>} : memref<1x4x256x64xbf16, #tpu.memory_space<vmem>>, vector<1x1x256x64xbf16>,
    return
  }
  func.func @transform_0(%arg0: i32, %arg1: i32) -> (i32, i32, i32) {
    %c0_i32 = arith.constant 0 : i32
    %c0_i32_0 = arith.constant 0 : i32
    return %arg0, %arg1, %c0_i32 : i32, i32, i32
  }
  func.func @transform_1(%arg0: i32, %arg1: i32) -> (i32, i32) {
    %c0_i32 = arith.constant 0 : i32
    %c0_i32_0 = arith.constant 0 : i32
    %c0_i32_1 = arith.constant 0 : i32
    return %c0_i32, %c0_i32_0 : i32, i32
  }
  func.func @transform_2(%arg0: i32, %arg1: i32) -> (i32, i32) {
    %c0_i32 = arith.constant 0 : i32
    %c0_i32_0 = arith.constant 0 : i32
    %c0_i32_1 = arith.constant 0 : i32
    return %c0_i32, %c0_i32_0 : i32, i32
  }
  func.func @transform_3(%arg0: i32, %arg1: i32) -> (i32, i32) {
    %c0_i32 = arith.constant 0 : i32
    %c0_i32_0 = arith.constant 0 : i32
    %c0_i32_1 = arith.constant 0 : i32
    return %c0_i32, %c0_i32_0 : i32, i32
  }
  func.func @transform_4(%arg0: i32, %arg1: i32) -> (i32, i32) {
    %c0_i32 = arith.constant 0 : i32
    %c0_i32_0 = arith.constant 0 : i32
    %c0_i32_1 = arith.constant 0 : i32
    return %c0_i32, %c0_i32_0 : i32, i32
  }
  func.func @transform_5(%arg0: i32, %arg1: i32) -> (i32, i32, i32, i32) {
    %c0_i32 = arith.constant 0 : i32
    %c0_i32_0 = arith.constant 0 : i32
    %c0_i32_1 = arith.constant 0 : i32
    return %arg0, %c0_i32, %arg1, %c0_i32_0 : i32, i32, i32, i32
  }
  func.func @transform_6(%arg0: i32, %arg1: i32) -> (i32, i32, i32, i32) {
    %c0_i32 = arith.constant 0 : i32
    %c0_i32_0 = arith.constant 0 : i32
    %c0_i32_1 = arith.constant 0 : i32
    return %arg0, %c0_i32, %arg1, %c0_i32_0 : i32, i32, i32, i32
  }
  func.func @transform_7(%arg0: i32, %arg1: i32) -> (i32, i32, i32, i32) {
    %c0_i32 = arith.constant 0 : i32
    %c0_i32_0 = arith.constant 0 : i32
    %c0_i32_1 = arith.constant 0 : i32
    return %arg0, %c0_i32, %arg1, %c0_i32_0 : i32, i32, i32, i32
  }
}

module attributes {stable_mosaic.version = 11 : i64} {
  func.func @_qkv_kernel(%arg0: i32, %arg1: i32, %arg2: memref<1x256x256xf32, #tpu.memory_space<vmem>>, %arg3: memref<1x256xf32, #tpu.memory_space<vmem>>, %arg4: memref<1x256xf32, #tpu.memory_space<vmem>>, %arg5: memref<256x768xbf16, #tpu.memory_space<vmem>>, %arg6: memref<1x768xf32, #tpu.memory_space<vmem>>, %arg7: memref<1x4x256x64xbf16, #tpu.memory_space<vmem>>, %arg8: memref<1x4x256x64xbf16, #tpu.memory_space<vmem>>, %arg9: memref<1x4x256x64xbf16, #tpu.memory_space<vmem>>) attributes {dimension_semantics = [#tpu.dimension_semantics<parallel>, #tpu.dimension_semantics<parallel>], iteration_bounds = array<i64: 2, 2>, scalar_prefetch = 0 : i64, scratch_operands = 0 : i64, tpu.core_type = #tpu.core_type<tc>, window_params = [{transform_indices = @transform_0, window_bounds = array<i64: 1, 256, 256>}, {pipeline_mode = #tpu.pipeline_mode<synchronous>, transform_indices = @transform_1, window_bounds = array<i64: 1, 256>}, {pipeline_mode = #tpu.pipeline_mode<synchronous>, transform_indices = @transform_2, window_bounds = array<i64: 1, 256>}, {pipeline_mode = #tpu.pipeline_mode<synchronous>, transform_indices = @transform_3, window_bounds = array<i64: 256, 768>}, {pipeline_mode = #tpu.pipeline_mode<synchronous>, transform_indices = @transform_4, window_bounds = array<i64: 1, 768>}, {transform_indices = @transform_5, window_bounds = array<i64: 1, 4, 256, 64>}, {transform_indices = @transform_6, window_bounds = array<i64: 1, 4, 256, 64>}, {transform_indices = @transform_7, window_bounds = array<i64: 1, 4, 256, 64>}]} {
    %c0 = arith.constant 0 : index
    %c0_0 = arith.constant 0 : index
    %c0_1 = arith.constant 0 : index
    %0 = vector.load %arg2[%c0, %c0_0, %c0_1] : memref<1x256x256xf32, #tpu.memory_space<vmem>>, vector<1x256x256xf32>
    %1 = vector.shape_cast %0 : vector<1x256x256xf32> to vector<256x256xf32>
    %c0_2 = arith.constant 0 : index
    %c0_3 = arith.constant 0 : index
    %2 = vector.load %arg3[%c0_2, %c0_3] : memref<1x256xf32, #tpu.memory_space<vmem>>, vector<1x256xf32>
    %c0_4 = arith.constant 0 : index
    %c0_5 = arith.constant 0 : index
    %3 = vector.load %arg4[%c0_4, %c0_5] : memref<1x256xf32, #tpu.memory_space<vmem>>, vector<1x256xf32>
    %cst = arith.constant dense<0.000000e+00> : vector<256xf32>
    %4 = vector.multi_reduction <add>, %1, %cst [1] : vector<256x256xf32> to vector<256xf32>
    %5 = vector.shape_cast %4 : vector<256xf32> to vector<256x1xf32>
    %cst_6 = arith.constant 2.560000e+02 : f32
    %6 = vector.broadcast %cst_6 : f32 to vector<256x1xf32>
    %7 = arith.divf %5, %6 : vector<256x1xf32>
    %8 = vector.broadcast %7 : vector<256x1xf32> to vector<256x256xf32>
    %9 = arith.subf %1, %8 : vector<256x256xf32>
    %10 = arith.mulf %9, %9 : vector<256x256xf32>
    %cst_7 = arith.constant dense<0.000000e+00> : vector<256xf32>
    %11 = vector.multi_reduction <add>, %10, %cst_7 [1] : vector<256x256xf32> to vector<256xf32>
    %12 = vector.shape_cast %11 : vector<256xf32> to vector<256x1xf32>
    %cst_8 = arith.constant 2.550000e+02 : f32
    %13 = vector.broadcast %cst_8 : f32 to vector<256x1xf32>
    %14 = arith.divf %12, %13 : vector<256x1xf32>
    %15 = math.sqrt %14 : vector<256x1xf32>
    %cst_9 = arith.constant 9.99999997E-7 : f32
    %16 = vector.broadcast %cst_9 : f32 to vector<256x1xf32>
    %17 = arith.addf %15, %16 : vector<256x1xf32>
    %cst_10 = arith.constant 1.000000e+00 : f32
    %18 = vector.broadcast %cst_10 : f32 to vector<256x1xf32>
    %19 = arith.divf %18, %17 : vector<256x1xf32>
    %20 = vector.broadcast %7 : vector<256x1xf32> to vector<256x256xf32>
    %21 = arith.subf %1, %20 : vector<256x256xf32>
    %22 = vector.broadcast %2 : vector<1x256xf32> to vector<256x256xf32>
    %23 = arith.mulf %22, %21 : vector<256x256xf32>
    %24 = vector.broadcast %19 : vector<256x1xf32> to vector<256x256xf32>
    %25 = arith.mulf %23, %24 : vector<256x256xf32>
    %26 = vector.broadcast %3 : vector<1x256xf32> to vector<256x256xf32>
    %27 = arith.addf %25, %26 : vector<256x256xf32>
    %28 = arith.truncf %27 : vector<256x256xf32> to vector<256x256xbf16>
    %c0_11 = arith.constant 0 : index
    %c0_12 = arith.constant 0 : index
    %29 = vector.load %arg5[%c0_11, %c0_12] : memref<256x768xbf16, #tpu.memory_space<vmem>>, vector<256x768xbf16>
    %cst_13 = arith.constant dense<0.000000e+00> : vector<256x768xf32>
    %30 = tpu.matmul %28, %29, %cst_13 {dimension_numbers = #tpu.dot_dimension_numbers<[1], [0], [0], [1], [0, 0, 1, 1], [], []>} : vector<256x256xbf16>, vector<256x768xbf16>, vector<256x768xf32> -> vector<256x768xf32>
    %c0_14 = arith.constant 0 : index
    %c0_15 = arith.constant 0 : index
    %31 = vector.load %arg6[%c0_14, %c0_15] : memref<1x768xf32, #tpu.memory_space<vmem>>, vector<1x768xf32>
    %32 = vector.broadcast %31 : vector<1x768xf32> to vector<256x768xf32>
    %33 = arith.addf %30, %32 : vector<256x768xf32>
    %34 = vector.extract_strided_slice %33 {offsets = [0, 0], sizes = [256, 64], strides = [1, 1]} : vector<256x768xf32> to vector<256x64xf32>
    %35 = arith.truncf %34 : vector<256x64xf32> to vector<256x64xbf16>
    %c0_16 = arith.constant 0 : index
    %c0_17 = arith.constant 0 : index
    %c0_18 = arith.constant 0 : index
    %c0_19 = arith.constant 0 : index
    %36 = vector.load %arg7[%c0_16, %c0_17, %c0_18, %c0_19] : memref<1x4x256x64xbf16, #tpu.memory_space<vmem>>, vector<1x1x256x64xbf16>
    %37 = vector.shape_cast %36 : vector<1x1x256x64xbf16> to vector<256x64xbf16>
    %38 = vector.shape_cast %35 : vector<256x64xbf16> to vector<1x1x256x64xbf16>
    tpu.vector_store %arg7[%c0_16, %c0_17, %c0_18, %c0_19], %38 {strides = array<i32>} : memref<1x4x256x64xbf16, #tpu.memory_space<vmem>>, vector<1x1x256x64xbf16>,
    %39 = vector.extract_strided_slice %33 {offsets = [0, 256], sizes = [256, 64], strides = [1, 1]} : vector<256x768xf32> to vector<256x64xf32>
    %40 = arith.truncf %39 : vector<256x64xf32> to vector<256x64xbf16>
    %c0_20 = arith.constant 0 : index
    %c0_21 = arith.constant 0 : index
    %c0_22 = arith.constant 0 : index
    %c0_23 = arith.constant 0 : index
    %41 = vector.load %arg8[%c0_20, %c0_21, %c0_22, %c0_23] : memref<1x4x256x64xbf16, #tpu.memory_space<vmem>>, vector<1x1x256x64xbf16>
    %42 = vector.shape_cast %41 : vector<1x1x256x64xbf16> to vector<256x64xbf16>
    %43 = vector.shape_cast %40 : vector<256x64xbf16> to vector<1x1x256x64xbf16>
    tpu.vector_store %arg8[%c0_20, %c0_21, %c0_22, %c0_23], %43 {strides = array<i32>} : memref<1x4x256x64xbf16, #tpu.memory_space<vmem>>, vector<1x1x256x64xbf16>,
    %44 = vector.extract_strided_slice %33 {offsets = [0, 512], sizes = [256, 64], strides = [1, 1]} : vector<256x768xf32> to vector<256x64xf32>
    %45 = arith.truncf %44 : vector<256x64xf32> to vector<256x64xbf16>
    %c0_24 = arith.constant 0 : index
    %c0_25 = arith.constant 0 : index
    %c0_26 = arith.constant 0 : index
    %c0_27 = arith.constant 0 : index
    %46 = vector.load %arg9[%c0_24, %c0_25, %c0_26, %c0_27] : memref<1x4x256x64xbf16, #tpu.memory_space<vmem>>, vector<1x1x256x64xbf16>
    %47 = vector.shape_cast %46 : vector<1x1x256x64xbf16> to vector<256x64xbf16>
    %48 = vector.shape_cast %45 : vector<256x64xbf16> to vector<1x1x256x64xbf16>
    tpu.vector_store %arg9[%c0_24, %c0_25, %c0_26, %c0_27], %48 {strides = array<i32>} : memref<1x4x256x64xbf16, #tpu.memory_space<vmem>>, vector<1x1x256x64xbf16>,
    %49 = vector.extract_strided_slice %33 {offsets = [0, 64], sizes = [256, 64], strides = [1, 1]} : vector<256x768xf32> to vector<256x64xf32>
    %50 = arith.truncf %49 : vector<256x64xf32> to vector<256x64xbf16>
    %c0_28 = arith.constant 0 : index
    %c1 = arith.constant 1 : index
    %c0_29 = arith.constant 0 : index
    %c0_30 = arith.constant 0 : index
    %51 = vector.load %arg7[%c0_28, %c1, %c0_29, %c0_30] : memref<1x4x256x64xbf16, #tpu.memory_space<vmem>>, vector<1x1x256x64xbf16>
    %52 = vector.shape_cast %51 : vector<1x1x256x64xbf16> to vector<256x64xbf16>
    %53 = vector.shape_cast %50 : vector<256x64xbf16> to vector<1x1x256x64xbf16>
    tpu.vector_store %arg7[%c0_28, %c1, %c0_29, %c0_30], %53 {strides = array<i32>} : memref<1x4x256x64xbf16, #tpu.memory_space<vmem>>, vector<1x1x256x64xbf16>,
    %54 = vector.extract_strided_slice %33 {offsets = [0, 320], sizes = [256, 64], strides = [1, 1]} : vector<256x768xf32> to vector<256x64xf32>
    %55 = arith.truncf %54 : vector<256x64xf32> to vector<256x64xbf16>
    %c0_31 = arith.constant 0 : index
    %c1_32 = arith.constant 1 : index
    %c0_33 = arith.constant 0 : index
    %c0_34 = arith.constant 0 : index
    %56 = vector.load %arg8[%c0_31, %c1_32, %c0_33, %c0_34] : memref<1x4x256x64xbf16, #tpu.memory_space<vmem>>, vector<1x1x256x64xbf16>
    %57 = vector.shape_cast %56 : vector<1x1x256x64xbf16> to vector<256x64xbf16>
    %58 = vector.shape_cast %55 : vector<256x64xbf16> to vector<1x1x256x64xbf16>
    tpu.vector_store %arg8[%c0_31, %c1_32, %c0_33, %c0_34], %58 {strides = array<i32>} : memref<1x4x256x64xbf16, #tpu.memory_space<vmem>>, vector<1x1x256x64xbf16>,
    %59 = vector.extract_strided_slice %33 {offsets = [0, 576], sizes = [256, 64], strides = [1, 1]} : vector<256x768xf32> to vector<256x64xf32>
    %60 = arith.truncf %59 : vector<256x64xf32> to vector<256x64xbf16>
    %c0_35 = arith.constant 0 : index
    %c1_36 = arith.constant 1 : index
    %c0_37 = arith.constant 0 : index
    %c0_38 = arith.constant 0 : index
    %61 = vector.load %arg9[%c0_35, %c1_36, %c0_37, %c0_38] : memref<1x4x256x64xbf16, #tpu.memory_space<vmem>>, vector<1x1x256x64xbf16>
    %62 = vector.shape_cast %61 : vector<1x1x256x64xbf16> to vector<256x64xbf16>
    %63 = vector.shape_cast %60 : vector<256x64xbf16> to vector<1x1x256x64xbf16>
    tpu.vector_store %arg9[%c0_35, %c1_36, %c0_37, %c0_38], %63 {strides = array<i32>} : memref<1x4x256x64xbf16, #tpu.memory_space<vmem>>, vector<1x1x256x64xbf16>,
    %64 = vector.extract_strided_slice %33 {offsets = [0, 128], sizes = [256, 64], strides = [1, 1]} : vector<256x768xf32> to vector<256x64xf32>
    %65 = arith.truncf %64 : vector<256x64xf32> to vector<256x64xbf16>
    %c0_39 = arith.constant 0 : index
    %c2 = arith.constant 2 : index
    %c0_40 = arith.constant 0 : index
    %c0_41 = arith.constant 0 : index
    %66 = vector.load %arg7[%c0_39, %c2, %c0_40, %c0_41] : memref<1x4x256x64xbf16, #tpu.memory_space<vmem>>, vector<1x1x256x64xbf16>
    %67 = vector.shape_cast %66 : vector<1x1x256x64xbf16> to vector<256x64xbf16>
    %68 = vector.shape_cast %65 : vector<256x64xbf16> to vector<1x1x256x64xbf16>
    tpu.vector_store %arg7[%c0_39, %c2, %c0_40, %c0_41], %68 {strides = array<i32>} : memref<1x4x256x64xbf16, #tpu.memory_space<vmem>>, vector<1x1x256x64xbf16>,
    %69 = vector.extract_strided_slice %33 {offsets = [0, 384], sizes = [256, 64], strides = [1, 1]} : vector<256x768xf32> to vector<256x64xf32>
    %70 = arith.truncf %69 : vector<256x64xf32> to vector<256x64xbf16>
    %c0_42 = arith.constant 0 : index
    %c2_43 = arith.constant 2 : index
    %c0_44 = arith.constant 0 : index
    %c0_45 = arith.constant 0 : index
    %71 = vector.load %arg8[%c0_42, %c2_43, %c0_44, %c0_45] : memref<1x4x256x64xbf16, #tpu.memory_space<vmem>>, vector<1x1x256x64xbf16>
    %72 = vector.shape_cast %71 : vector<1x1x256x64xbf16> to vector<256x64xbf16>
    %73 = vector.shape_cast %70 : vector<256x64xbf16> to vector<1x1x256x64xbf16>
    tpu.vector_store %arg8[%c0_42, %c2_43, %c0_44, %c0_45], %73 {strides = array<i32>} : memref<1x4x256x64xbf16, #tpu.memory_space<vmem>>, vector<1x1x256x64xbf16>,
    %74 = vector.extract_strided_slice %33 {offsets = [0, 640], sizes = [256, 64], strides = [1, 1]} : vector<256x768xf32> to vector<256x64xf32>
    %75 = arith.truncf %74 : vector<256x64xf32> to vector<256x64xbf16>
    %c0_46 = arith.constant 0 : index
    %c2_47 = arith.constant 2 : index
    %c0_48 = arith.constant 0 : index
    %c0_49 = arith.constant 0 : index
    %76 = vector.load %arg9[%c0_46, %c2_47, %c0_48, %c0_49] : memref<1x4x256x64xbf16, #tpu.memory_space<vmem>>, vector<1x1x256x64xbf16>
    %77 = vector.shape_cast %76 : vector<1x1x256x64xbf16> to vector<256x64xbf16>
    %78 = vector.shape_cast %75 : vector<256x64xbf16> to vector<1x1x256x64xbf16>
    tpu.vector_store %arg9[%c0_46, %c2_47, %c0_48, %c0_49], %78 {strides = array<i32>} : memref<1x4x256x64xbf16, #tpu.memory_space<vmem>>, vector<1x1x256x64xbf16>,
    %79 = vector.extract_strided_slice %33 {offsets = [0, 192], sizes = [256, 64], strides = [1, 1]} : vector<256x768xf32> to vector<256x64xf32>
    %80 = arith.truncf %79 : vector<256x64xf32> to vector<256x64xbf16>
    %c0_50 = arith.constant 0 : index
    %c3 = arith.constant 3 : index
    %c0_51 = arith.constant 0 : index
    %c0_52 = arith.constant 0 : index
    %81 = vector.load %arg7[%c0_50, %c3, %c0_51, %c0_52] : memref<1x4x256x64xbf16, #tpu.memory_space<vmem>>, vector<1x1x256x64xbf16>
    %82 = vector.shape_cast %81 : vector<1x1x256x64xbf16> to vector<256x64xbf16>
    %83 = vector.shape_cast %80 : vector<256x64xbf16> to vector<1x1x256x64xbf16>
    tpu.vector_store %arg7[%c0_50, %c3, %c0_51, %c0_52], %83 {strides = array<i32>} : memref<1x4x256x64xbf16, #tpu.memory_space<vmem>>, vector<1x1x256x64xbf16>,
    %84 = vector.extract_strided_slice %33 {offsets = [0, 448], sizes = [256, 64], strides = [1, 1]} : vector<256x768xf32> to vector<256x64xf32>
    %85 = arith.truncf %84 : vector<256x64xf32> to vector<256x64xbf16>
    %c0_53 = arith.constant 0 : index
    %c3_54 = arith.constant 3 : index
    %c0_55 = arith.constant 0 : index
    %c0_56 = arith.constant 0 : index
    %86 = vector.load %arg8[%c0_53, %c3_54, %c0_55, %c0_56] : memref<1x4x256x64xbf16, #tpu.memory_space<vmem>>, vector<1x1x256x64xbf16>
    %87 = vector.shape_cast %86 : vector<1x1x256x64xbf16> to vector<256x64xbf16>
    %88 = vector.shape_cast %85 : vector<256x64xbf16> to vector<1x1x256x64xbf16>
    tpu.vector_store %arg8[%c0_53, %c3_54, %c0_55, %c0_56], %88 {strides = array<i32>} : memref<1x4x256x64xbf16, #tpu.memory_space<vmem>>, vector<1x1x256x64xbf16>,
    %89 = vector.extract_strided_slice %33 {offsets = [0, 704], sizes = [256, 64], strides = [1, 1]} : vector<256x768xf32> to vector<256x64xf32>
    %90 = arith.truncf %89 : vector<256x64xf32> to vector<256x64xbf16>
    %c0_57 = arith.constant 0 : index
    %c3_58 = arith.constant 3 : index
    %c0_59 = arith.constant 0 : index
    %c0_60 = arith.constant 0 : index
    %91 = vector.load %arg9[%c0_57, %c3_58, %c0_59, %c0_60] : memref<1x4x256x64xbf16, #tpu.memory_space<vmem>>, vector<1x1x256x64xbf16>
    %92 = vector.shape_cast %91 : vector<1x1x256x64xbf16> to vector<256x64xbf16>
    %93 = vector.shape_cast %90 : vector<256x64xbf16> to vector<1x1x256x64xbf16>
    tpu.vector_store %arg9[%c0_57, %c3_58, %c0_59, %c0_60], %93 {strides = array<i32>} : memref<1x4x256x64xbf16, #tpu.memory_space<vmem>>, vector<1x1x256x64xbf16>,
    return
  }
  func.func @transform_0(%arg0: i32, %arg1: i32) -> (i32, i32, i32) {
    %c0_i32 = arith.constant 0 : i32
    %c0_i32_0 = arith.constant 0 : i32
    return %arg0, %arg1, %c0_i32 : i32, i32, i32
  }
  func.func @transform_1(%arg0: i32, %arg1: i32) -> (i32, i32) {
    %c0_i32 = arith.constant 0 : i32
    %c0_i32_0 = arith.constant 0 : i32
    %c0_i32_1 = arith.constant 0 : i32
    return %c0_i32, %c0_i32_0 : i32, i32
  }
  func.func @transform_2(%arg0: i32, %arg1: i32) -> (i32, i32) {
    %c0_i32 = arith.constant 0 : i32
    %c0_i32_0 = arith.constant 0 : i32
    %c0_i32_1 = arith.constant 0 : i32
    return %c0_i32, %c0_i32_0 : i32, i32
  }
  func.func @transform_3(%arg0: i32, %arg1: i32) -> (i32, i32) {
    %c0_i32 = arith.constant 0 : i32
    %c0_i32_0 = arith.constant 0 : i32
    %c0_i32_1 = arith.constant 0 : i32
    return %c0_i32, %c0_i32_0 : i32, i32
  }
  func.func @transform_4(%arg0: i32, %arg1: i32) -> (i32, i32) {
    %c0_i32 = arith.constant 0 : i32
    %c0_i32_0 = arith.constant 0 : i32
    %c0_i32_1 = arith.constant 0 : i32
    return %c0_i32, %c0_i32_0 : i32, i32
  }
  func.func @transform_5(%arg0: i32, %arg1: i32) -> (i32, i32, i32, i32) {
    %c0_i32 = arith.constant 0 : i32
    %c0_i32_0 = arith.constant 0 : i32
    %c0_i32_1 = arith.constant 0 : i32
    return %arg0, %c0_i32, %arg1, %c0_i32_0 : i32, i32, i32, i32
  }
  func.func @transform_6(%arg0: i32, %arg1: i32) -> (i32, i32, i32, i32) {
    %c0_i32 = arith.constant 0 : i32
    %c0_i32_0 = arith.constant 0 : i32
    %c0_i32_1 = arith.constant 0 : i32
    return %arg0, %c0_i32, %arg1, %c0_i32_0 : i32, i32, i32, i32
  }
  func.func @transform_7(%arg0: i32, %arg1: i32) -> (i32, i32, i32, i32) {
    %c0_i32 = arith.constant 0 : i32
    %c0_i32_0 = arith.constant 0 : i32
    %c0_i32_1 = arith.constant 0 : i32
    return %arg0, %c0_i32, %arg1, %c0_i32_0 : i32, i32, i32, i32
  }
}

</mosaic_0001>

<bundles_post_ra>
// kernel: tpu_custom_call.1
= control target key start
LH: loop header
LB: loop body
LE: loop exit
PB: predicated region body
PF: predicated region fallthrough
CT: control target
= control target key end

     0   :  { %s9973_s0 = inlined_call_operand.hbm [shape: f32[2,512,256], index: 0, kind: input, shape index: {}]   ;;  %s9974_s1 = inlined_call_operand.hbm [shape: f32[1,256], index: 1, kind: input, shape index: {}]   ;;  %s9975_s2 = inlined_call_operand.hbm [shape: f32[1,256], index: 2, kind: input, shape index: {}]   ;;  %s9976_s3 = inlined_call_operand.hbm [shape: bf16[256,768], index: 3, kind: input, shape index: {}]   ;;  %s9977_s4 = inlined_call_operand.hbm [shape: f32[1,768], index: 4, kind: input, shape index: {}]   ;;  %s9978_s5 = inlined_call_operand.hbm [shape: bf16[2,4,512,64], index: 5, kind: output, shape index: {0}]   ;;  %s9979_s6 = inlined_call_operand.hbm [shape: bf16[2,4,512,64], index: 6, kind: output, shape index: {1}]   ;;  %s9980_s7 = inlined_call_operand.hbm [shape: bf16[2,4,512,64], index: 7, kind: output, shape index: {2}]  }
   0x1   :  { %10057 = sst [smem:[#allocation82_spill]] %s9974_s1 }
   0x2   :  { %10058 = sst [smem:[#allocation83_spill]] %s9975_s2 }
   0x3   :  { %10059 = sst [smem:[#allocation84_spill]] %s9976_s3 }
   0x4   :  { %10060 = sst [smem:[#allocation85_spill]] %s9977_s4 }
   0x5   :  { %10061 = sst [smem:[#allocation86_spill]] %s9979_s6 }
   0x6   :  { %10062 = sst [smem:[#allocation87_spill]] %s9980_s7 }
   0x7   :  { %13 = vsyncpa [#allocation3], 0 }
   0x8   :  { %15 = vsyncpa [#allocation3 + $0x1], 0 }
   0x9   :  { %16 = vsyncpa [#allocation6], 0 }
   0xa   :  { %17 = vsyncpa [#allocation9], 0 }
   0xb   :  { %18 = vsyncpa [#allocation4], 0 }
   0xc   :  { %20 = vsyncpa [#allocation4 + $0x1], 0 }
   0xd   :  { %21 = vsyncpa [#allocation13], 0 }
   0xe   :  { %23 = vsyncpa [#allocation13 + $0x1], 0  ;;  %s6260_s24 = smov 0   ;;  %s6262_s25 = smov 0  }
   0xf   :  { %s6264_s26 = smov 0   ;;  %s6266_s27 = smov 0  }
  0x10   :  { %s6268_s28 = smov 0   ;;  %s6270_s29 = smov 0  }
  0x11   :  { %s6272_s30 = smov 0   ;;  %s6274_s8 = smov 0  }
  0x12 LB: > { %10063 = sst [smem:[#allocation26_spill]] %s6159_s24  ;;  %s6301_s9 = sadd.s32 4294967295, %s6187_s8   ;;  %s6187_s8 = sphi %s6274_s8, %s29_s8   ;;  %s6183_s30 = sphi %s6272_s30, %s10349_s30   ;;  %s6179_s29 = sphi %s6270_s29, %s10348_s29   ;;  %s6175_s28 = sphi %s6268_s28, %s10347_s28   ;;  %s6171_s27 = sphi %s6266_s27, %s10346_s27   ;;  %s6167_s26 = sphi %s6264_s26, %s10345_s26   ;;  %s6163_s25 = sphi %s6262_s25, %s10344_s25   ;;  %s6159_s24 = sphi %s6260_s24, %s10343_s24  }
  0x13   : > { %s9981_s10 = sadd.s32 4294967294, %s6187_s8   ;;  %p63_p0 = scmp.ne.s32.totalorder %s6163_s25, %s6159_s24 }
  0x14   : > { %p9983_p1 = scmp.eq.s32.totalorder %s6301_s9, 0  ;;  %p179_p3 = scmp.eq.s32.totalorder %s9981_s10, 3 }
  0x15   : > { %p4683_p5 = scmp.ge.s32.totalorder %s6187_s8, 1  ;;  %p242_p7 = scmp.lt.s32.totalorder %s6187_s8, 5 }
  0x16   : > { %p6312_p4 = por %p9983_p1, %p63_p0  ;;  %p6317_p6 = por %p179_p3, %p63_p0 }
  0x17   : > { %p6322_p8 = pnand %p4683_p5, %p242_p7  ;;  %s6189_s14 = smov [#allocation5]  }
  0x18   : > { %s10064_s11 = scalar_select %p6312_p4, 1, 0 }
  0x19   : > { %s10065_s12 = scalar_select %p6317_p6, 1, 0 }
  0x1a   : > { %s10067_s13 = scalar_select %p6322_p8, 1, 0 }
  0x1b   : > { %10066 = sst [smem:[#allocation27_spill]] %s10065_s12  ;;  %s255_s15 = sshll.u32 %s6189_s14, 4  ;;  %s256_s15 = int_to_ptr.vmem [resolvable:$true] %s255_s15 }
  0x1c   : > { %p5560_p9 = pneg %p6322_p8  ;;  %s6190_s16 = smov [#allocation8]  }
  0x1d   : > { %s276_s17 = sshll.u32 %s6190_s16, 4  ;;  %s6191_s19 = smov [#allocation7]   ;;  %s6334_s17 = int_to_ptr.vmem [resolvable:$true] %s276_s17 }
  0x1e   : > { %p6330_p10 = pnand %p5560_p9, %p9983_p1  ;;  %s6336_s20 = sshll.u32 %s6191_s19, 4  ;;  %s267_s20 = int_to_ptr.vmem [resolvable:$true] %s6336_s20 }
  0x1f   : > { %s10069_s1 = sld [smem:[#allocation82_spill]] }
  0x20   : > { %p6346_p12 = pneg %p6330_p10 }
  0x25   : > { %s5963_s23 = scalar_lea.hbm %s10069_s1, 32 }
  0x26   : > { %p5964_p11 = scmp.ne.s32.totalorder %s10069_s1, %s5963_s23  ;;  %p5970_p3 = scmp.lt.u32.totalorder %s5963_s23, %s10069_s1 }
  0x28   : > { %p5966_p13 = pnand %p6346_p12, %p5964_p11 }
  0x2a   : > { %p5967_p0 = pneg %p5966_p13 }
  0x2c   : > { %p5972_p5 = pnand %p5970_p3, %p5967_p0 }
  0x2e   : > { %5975 = shalt.err (!%p5972_p5)
}
  0x2f   : > { %s5976_s21 = scalar_lea.vmem %s256_s15, 32  ;;  %p5984_p2 = scmp.lt.s32.totalorder %s256_s15, %s256_s15 }
  0x30   : > { %p5977_p7 = scmp.ne.s32.totalorder %s256_s15, %s5976_s21  ;;  %p5985_p6 = scmp.lt.s32.totalorder %s5976_s21, %s5976_s21 }
  0x32   : > { %p5979_p9 = pnand %p5977_p7, %p6346_p12  ;;  %p5986_p4 = por %p5985_p6, %p5984_p2 }
  0x34   : > { %p5980_p1 = pneg %p5979_p9 }
  0x36   : > { %p5987_p8 = pnand %p5986_p4, %p5980_p1 }
  0x38   : > { %5990 = shalt.err (!%p5987_p8)
}
  0x39   : > { %5563 = dma.hbm_to_vmem [thread:$0]  (!%p6330_p10), %s10069_s1, 32, %s256_s15, [#allocation6]  }
  0x3a   : > { %s10071_s3 = sld [smem:[#allocation84_spill]] }
  0x40   : > { %s5991_s14 = scalar_lea.hbm %s10071_s3, 12288 }
  0x41   : > { %p5992_p11 = scmp.ne.s32.totalorder %s10071_s3, %s5991_s14  ;;  %p5998_p1 = scmp.lt.u32.totalorder %s5991_s14, %s10071_s3 }
  0x43   : > { %p5994_p13 = pnand %p5992_p11, %p6346_p12 }
  0x45   : > { %p5995_p2 = pneg %p5994_p13 }
  0x47   : > { %p6000_p4 = pnand %p5998_p1, %p5995_p2 }
  0x49   : > { %6003 = shalt.err (!%p6000_p4)
}
  0x4a   : > { %s6004_s15 = scalar_lea.vmem %s6334_s17, 12288  ;;  %p6012_p3 = scmp.lt.s32.totalorder %s6334_s17, %s6334_s17 }
  0x4b   : > { %p6005_p6 = scmp.ne.s32.totalorder %s6334_s17, %s6004_s15  ;;  %p6013_p5 = scmp.lt.s32.totalorder %s6004_s15, %s6004_s15 }
  0x4d   : > { %p6007_p8 = pnand %p6005_p6, %p6346_p12  ;;  %p6014_p7 = por %p6013_p5, %p6012_p3 }
  0x4f   : > { %p6008_p0 = pneg %p6007_p8 }
  0x51   : > { %p6015_p9 = pnand %p6014_p7, %p6008_p0 }
  0x53   : > { %6018 = shalt.err (!%p6015_p9)
}
  0x54   : > { %s6192_s24 = smov 384   ;;  %s6193_s7 = smov 24  }
  0x55   : > { %5569 = dma.hbm_to_vmem [thread:$0]  (!%p6330_p10), %s10071_s3, 12288, %s6334_s17, [#allocation9], %s6192_s24, %s6192_s24, %s6193_s7  }
  0x56   : > { %s10072_s2 = sld [smem:[#allocation83_spill]] }
  0x5c   : > { %s6019_s14 = scalar_lea.hbm %s10072_s2, 32 }
  0x5d   : > { %p6020_p11 = scmp.ne.s32.totalorder %s10072_s2, %s6019_s14  ;;  %p6026_p1 = scmp.lt.u32.totalorder %s6019_s14, %s10072_s2 }
  0x5f   : > { %p6022_p13 = pnand %p6020_p11, %p6346_p12 }
  0x61   : > { %p6023_p2 = pneg %p6022_p13 }
  0x63   : > { %p6028_p4 = pnand %p6026_p1, %p6023_p2 }
  0x65   : > { %6031 = shalt.err (!%p6028_p4)
}
  0x66   : > { %s6032_s10 = scalar_lea.vmem %s267_s20, 32  ;;  %p6040_p3 = scmp.lt.s32.totalorder %s267_s20, %s267_s20 }
  0x67   : > { %p6033_p6 = scmp.ne.s32.totalorder %s267_s20, %s6032_s10  ;;  %p6041_p5 = scmp.lt.s32.totalorder %s6032_s10, %s6032_s10 }
  0x69   : > { %p6035_p8 = pnand %p6033_p6, %p6346_p12  ;;  %p6042_p7 = por %p6041_p5, %p6040_p3 }
  0x6b   : > { %p6036_p0 = pneg %p6035_p8 }
  0x6d   : > { %p6043_p9 = pnand %p6042_p7, %p6036_p0 }
  0x6f   : > { %6046 = shalt.err (!%p6043_p9)
}
  0x70   : > { %5566 = dma.hbm_to_vmem [thread:$0]  (!%p6330_p10), %s10072_s2, 32, %s267_s20, [#allocation6]  }
  0x71   : > { %s6194_s1 = smov [#allocation10]   ;;  %s10073_s4 = sld [smem:[#allocation85_spill]] }
  0x72   : > { %s290_s7 = sshll.u32 %s6194_s1, 4  ;;  %s291_s7 = int_to_ptr.vmem [resolvable:$true] %s290_s7 }
  0x77   : > { %s6047_s23 = scalar_lea.hbm %s10073_s4, 96 }
  0x78   : > { %p6048_p11 = scmp.ne.s32.totalorder %s10073_s4, %s6047_s23  ;;  %p6054_p1 = scmp.lt.u32.totalorder %s6047_s23, %s10073_s4 }
  0x7a   : > { %p6050_p13 = pnand %p6048_p11, %p6346_p12 }
  0x7c   : > { %p6051_p2 = pneg %p6050_p13 }
  0x7e   : > { %p6056_p4 = pnand %p6054_p1, %p6051_p2 }
  0x80   : > { %6059 = shalt.err (!%p6056_p4)
}
  0x81   : > { %s6060_s20 = scalar_lea.vmem %s291_s7, 96  ;;  %p6068_p3 = scmp.lt.s32.totalorder %s291_s7, %s291_s7 }
  0x82   : > { %p6061_p6 = scmp.ne.s32.totalorder %s291_s7, %s6060_s20  ;;  %p6069_p5 = scmp.lt.s32.totalorder %s6060_s20, %s6060_s20 }
  0x84   : > { %p6063_p8 = pnand %p6061_p6, %p6346_p12  ;;  %p6070_p7 = por %p6069_p5, %p6068_p3 }
  0x86   : > { %p6064_p0 = pneg %p6063_p8 }
  0x88   : > { %p6071_p9 = pnand %p6070_p7, %p6064_p0 }
  0x8a   : > { %6074 = shalt.err (!%p6071_p9)
}
  0x8b   : > { %5572 = dma.hbm_to_vmem [thread:$0]  (!%p6330_p10), %s10073_s4, 96, %s291_s7, [#allocation9]  }
  0x8c   : > { %s38_s16 = sadd.s32 1, %s6179_s29  ;;  %s41_s24 = sadd.s32 1, %s6183_s30 }
  0x8d   : > { %p39_p12 = scmp.ge.s32.totalorder %s38_s16, 2  ;;  %s50_s18 = sadd.s32 1, %s6167_s26 }
  0x8e   : > { %p57_p11 = scmp.ne.s32.totalorder %s6167_s26, %s6163_s25  ;;  %p58_p13 = scmp.eq.s32.totalorder %s6187_s8, 0 }
  0x8f   : > { %s10351_s16 = smov (%p39_p12, %s38_s16), 0  ;;  %s10353_s24 = smov (!%p39_p12, %s41_s24), %s6183_s30 }
  0x90   : > { %10074 = sst [smem:[#allocation28_spill]] %s10351_s16  ;;  %s46_s1 = ssub.s32 %s6179_s29, %s10351_s16 }
  0x91   : > { %p6433_p2 = por %p58_p13, %p57_p11  ;;  %p43_p10 = scmp.ge.s32.totalorder %s10353_s24, 2 }
  0x92   : > { %p10076_p1 = scmp.eq.s32.totalorder %s6301_s9, 3  ;;  %p5591_p6 = scmp.lt.s32.totalorder %s6187_s8, 4 }
  0x93   : > { %s301_s12 = sand.u32 1, %s6167_s26   ;;  %s10355_s24 = smov (%p43_p10, %s10353_s24), 0 }
  0x94   : > { %p6439_p4 = por %p10076_p1, %p57_p11  ;;  %s4689_s23 = sshll.u32 %s301_s12, 9 }
  0x95   : > { %s45_s14 = ssub.s32 %s6183_s30, %s10355_s24  ;;  %s5293_s21 = sshll.u32 %s6179_s29, 6 }
  0x96   : > { %s47_s19 = sor.u32 %s46_s1, %s45_s14  ;;  %s4692_s15 = sshll.u32 %s6183_s30, 7 }
  0x97   : > { %p48_p8 = scmp.eq.s32.totalorder %s47_s19, 0  ;;  %s312_s20 = sadd.s32 %s5293_s21, %s4692_s15 }
  0x98   : > { %s305_s10 = scalar_lea.vmem [#allocation2], %s4689_s23  ;;  %s4693_s3 = sshll.u32 %s312_s20, 7 }
  0x99   : > { %s315_s17 = sshll.u32 %s305_s10, 4  ;;  %s6459_s6 = scalar_lea.hbm %s9973_s0, %s4693_s3  ;;  %s6454_s17 = int_to_ptr.vmem [resolvable:$true] %s315_s17 }
  0x9a   : > { %s6452_s2 = scalar_select %p48_p8, %s6167_s26, %s50_s18  }
  0x9b   : > { %p6465_p0 = pnand %p5591_p6, %p6433_p2  ;;  %s6469_s18 = scalar_lea.sflag [#allocation3], %s301_s12 }
  0x9c   : > { %s6075_s23 = scalar_lea.hbm %s6459_s6, 8192  ;;  %s6080_s16 = scalar_lea.hbm %s9973_s0, 32768 }
  0x9d   : > { %p6076_p3 = scmp.ne.s32.totalorder %s6459_s6, %s6075_s23  ;;  %p6077_p5 = pneg %p6465_p0 }
  0x9e   : > { %p6081_p12 = scmp.lt.u32.totalorder %s6459_s6, %s9973_s0  ;;  %p6082_p11 = scmp.lt.u32.totalorder %s6080_s16, %s6075_s23 }
  0x9f   : > { %p6078_p7 = pnand %p6077_p5, %p6076_p3  ;;  %p6084_p2 = scmp.lt.u32.totalorder %s6075_s23, %s6459_s6 }
  0xa0   : > { %p6083_p13 = por %p6082_p11, %p6081_p12 }
  0xa1   : > { %p6079_p9 = pneg %p6078_p7 }
  0xa2   : > { %p6085_p10 = por %p6084_p2, %p6083_p13 }
  0xa4   : > { %p6086_p1 = pnand %p6085_p10, %p6079_p9 }
  0xa6   : > { %6089 = shalt.err (!%p6086_p1)
}
  0xa7   : > { %s6090_s12 = scalar_lea.vmem %s6454_s17, 8192  ;;  %s6195_s19 = smov [#allocation2]  }
  0xa8   : > { %p6091_p6 = scmp.ne.s32.totalorder %s6454_s17, %s6090_s12  ;;  %s6095_s21 = sshll.u32 %s6195_s19, 4  ;;  %s6096_s21 = int_to_ptr.vmem [resolvable:$false] %s6095_s21 }
  0xa9   : > { %s6097_s15 = scalar_lea.vmem %s6096_s21, 16384  ;;  %p6098_p7 = scmp.lt.s32.totalorder %s6454_s17, %s6096_s21 }
  0xaa   : > { %p6093_p8 = pnand %p6091_p6, %p6077_p5  ;;  %p6099_p12 = scmp.lt.s32.totalorder %s6097_s15, %s6090_s12 }
  0xac   : > { %p6094_p3 = pneg %p6093_p8  ;;  %p6100_p11 = por %p6099_p12, %p6098_p7 }
  0xae   : > { %p6101_p13 = pnand %p6100_p11, %p6094_p3 }
  0xb0   : > { %6104 = shalt.err (!%p6101_p13)
}
  0xb1   : > { %s6196_s20 = smov 256   ;;  %s6197_s10 = smov 16  }
  0xb2   : > { %5576 = dma.hbm_to_vmem [thread:$0]  (!%p6465_p0), %s6459_s6, 8192, %s6454_s17, %s6469_s18, %s6196_s20, %s6196_s20, %s6197_s10  }
  0xb3   : > { %p10079_p5 = scmp.ne.s32.totalorder %s10067_s13, 0 }
  0xb5   : > { %327 = sbr.rel (%p10079_p5) target bundleno = 1312 (0x520), region = 40 }
  0xbc   : > { %s6500_s23 = sand.u32 1, %s6163_s25   ;;  %p10080_p9 = scmp.ne.s32.totalorder %s10064_s11, 0 }
  0xbd   : > { %s6503_s3 = sshll.u32 %s6500_s23, 9  ;;  %s330_s4 = scalar_lea.sflag [#allocation3], %s6500_s23 }
  0xbe   : > { %s6507_s16 = scalar_lea.vmem [#allocation2], %s6503_s3 }
  0xbf   : > { %6138 = dma.done.wait (%p10080_p9), %s330_s4, 8192  }
  0xc0   : > { %6140 = vsyncadd (%p10080_p9), %s330_s4, 4294959104  ;;  %p10081_p0 = scmp.eq.s32.totalorder %s6301_s9, 0 }
  0xc2   : > { %6142 = dma.done.wait (%p10081_p0), [#allocation6], 64   ;;  %p10082_p2 = pmov %p10081_p0 }
  0xc3   : > { %p10083_p10 = pmov %p10081_p0 }
  0xc4   : > { %6144 = vsyncadd (%p10082_p2), [#allocation6], 4294967232 }
  0xc5   : > { %6146 = dma.done.wait (%p10083_p10), [#allocation9], 12384   ;;  %p10084_p1 = pmov %p10081_p0 }
  0xc6   : > { %v6522_v0 = vld [vmem:[%s6507_s16] sm:$0xff]  ;;  %v6525_v1 = vld [vmem:[%s6507_s16 + $0x8] sm:$0xff]  ;;  %v6536_v5 = vld [vmem:[%s6507_s16 + $0x10] sm:$0xff]  ;;  %s8032_s6 = scalar_lea.vmem [#allocation11], %s6503_s3  ;;  %s6198_s11 = smov 64  }
  0xc7   : > { %6148 = vsyncadd (%p10084_p1), [#allocation9], 4294954912  ;;  %v6528_v2 = vld [vmem:[%s6507_s16 + $0x100] sm:$0xff]  ;;  %v460_v3 = vadd.f32 %v6525_v1, %v6522_v0  ;;  %v6533_v4 = vld [vmem:[%s6507_s16 + $0x108] sm:$0xff]  ;;  %s8422_s13 = scalar_lea.vmem [#allocation14], %s6503_s3  ;;  %s8452_s17 = scalar_lea.vmem [#allocation12], %s6503_s3 }
  0xc8   : > { %v6539_v6 = vld [vmem:[%s6507_s16 + $0x18] sm:$0xff]  ;;  %v508_v7 = vadd.f32 %v6533_v4, %v6528_v2  ;;  %v6544_v8 = vld [vmem:[%s6507_s16 + $0x110] sm:$0xff]  ;;  %v6554_v12 = vld [vmem:[%s6507_s16 + $0x20] sm:$0xff]  ;;  %s4342_s1 = sand.u32 1, %s6301_s9   ;;  %s4338_s18 = scalar_lea.sflag [#allocation4], %s6500_s23 }
  0xc9   : > { %v6547_v9 = vld [vmem:[%s6507_s16 + $0x118] sm:$0xff]  ;;  %461 = vadd.xlane.f32.xlu0 %v460_v3  ;;  %v463_v10 = vadd.f32 %v6539_v6, %v6536_v5  ;;  %v6557_v13 = vld [vmem:[%s6507_s16 + $0x28] sm:$0xff]  ;;  %v6560_v14 = vld [vmem:[%s6507_s16 + $0x30] sm:$0xff]  ;;  %s9878_s22 = scalar_lea.sflag [#allocation13], %s4342_s1 }
  0xca   : > { %509 = vadd.xlane.f32.xlu1 %v508_v7  ;;  %v511_v11 = vadd.f32 %v6547_v9, %v6544_v8  ;;  %v6563_v15 = vld [vmem:[%s6507_s16 + $0x38] sm:$0xff]  ;;  %v466_v16 = vadd.f32 %v6557_v13, %v6554_v12  ;;  %v6570_v18 = vld [vmem:[%s6507_s16 + $0x120] sm:$0xff]  ;;  %v6573_v19 = vld [vmem:[%s6507_s16 + $0x128] sm:$0xff] }
  0xcb   : > { %v469_v17 = vadd.f32 %v6563_v15, %v6560_v14  ;;  %v6576_v20 = vld [vmem:[%s6507_s16 + $0x130] sm:$0xff]  ;;  %v6579_v21 = vld [vmem:[%s6507_s16 + $0x138] sm:$0xff]  ;;  %v514_v22 = vadd.f32 %v6573_v19, %v6570_v18  ;;  %v6586_v24 = vld [vmem:[%s6507_s16 + $0x40] sm:$0xff] }
  0xcc   : > { %v517_v23 = vadd.f32 %v6579_v21, %v6576_v20  ;;  %v6589_v25 = vld [vmem:[%s6507_s16 + $0x48] sm:$0xff]  ;;  %v6592_v26 = vld [vmem:[%s6507_s16 + $0x50] sm:$0xff]  ;;  %v6595_v27 = vld [vmem:[%s6507_s16 + $0x58] sm:$0xff] }
  0xcd   : > { %464 = vadd.xlane.f32.xlu0 %v463_v10  ;;  %v472_v28 = vadd.f32 %v6589_v25, %v6586_v24  ;;  %v475_v29 = vadd.f32 %v6595_v27, %v6592_v26  ;;  %v6602_v30 = vld [vmem:[%s6507_s16 + $0x140] sm:$0xff]  ;;  %v6605_v31 = vld [vmem:[%s6507_s16 + $0x148] sm:$0xff]  ;;  %v6608_v32 = vld [vmem:[%s6507_s16 + $0x150] sm:$0xff] }
  0xce   : > { %512 = vadd.xlane.f32.xlu1 %v511_v11  ;;  %v6611_v33 = vld [vmem:[%s6507_s16 + $0x158] sm:$0xff]  ;;  %v520_v34 = vadd.f32 %v6605_v31, %v6602_v30  ;;  %v6618_v36 = vld [vmem:[%s6507_s16 + $0x60] sm:$0xff]  ;;  %v6621_v37 = vld [vmem:[%s6507_s16 + $0x68] sm:$0xff] }
  0xcf   : > { %v523_v35 = vadd.f32 %v6611_v33, %v6608_v32  ;;  %v6624_v38 = vld [vmem:[%s6507_s16 + $0x70] sm:$0xff]  ;;  %v6627_v39 = vld [vmem:[%s6507_s16 + $0x78] sm:$0xff]  ;;  %v6630_v40 = vld [vmem:[%s6507_s16 + $0x160] sm:$0xff]  ;;  %v478_v42 = vadd.f32 %v6621_v37, %v6618_v36 }
  0xd0   : > { %v6633_v41 = vld [vmem:[%s6507_s16 + $0x168] sm:$0xff]  ;;  %v6638_v43 = vld [vmem:[%s6507_s16 + $0x170] sm:$0xff]  ;;  %v6641_v44 = vld [vmem:[%s6507_s16 + $0x178] sm:$0xff]  ;;  %v481_v45 = vadd.f32 %v6627_v39, %v6624_v38 }
  0xd1   : > { %467 = vadd.xlane.f32.xlu0 %v466_v16  ;;  %v6646_v46 = vld [vmem:[%s6507_s16 + $0x80] sm:$0xff]  ;;  %v6649_v47 = vld [vmem:[%s6507_s16 + $0x88] sm:$0xff]  ;;  %v526_v48 = vadd.f32 %v6633_v41, %v6630_v40  ;;  %v6654_v49 = vld [vmem:[%s6507_s16 + $0x90] sm:$0xff]  ;;  %v529_v51 = vadd.f32 %v6641_v44, %v6638_v43 }
  0xd2   : > { %470 = vadd.xlane.f32.xlu1 %v469_v17  ;;  %v6657_v50 = vld [vmem:[%s6507_s16 + $0x98] sm:$0xff]  ;;  %v6662_v52 = vld [vmem:[%s6507_s16 + $0x180] sm:$0xff]  ;;  %v6665_v53 = vld [vmem:[%s6507_s16 + $0x188] sm:$0xff]  ;;  %v484_v54 = vadd.f32 %v6649_v47, %v6646_v46 }
  0xd3   : > { %v6670_v55 = vld [vmem:[%s6507_s16 + $0x190] sm:$0xff]  ;;  %v6673_v56 = vld [vmem:[%s6507_s16 + $0x198] sm:$0xff]  ;;  %v487_v57 = vadd.f32 %v6657_v50, %v6654_v49  ;;  %v6678_v58 = vld [vmem:[%s6507_s16 + $0xa0] sm:$0xff]  ;;  %v532_v60 = vadd.f32 %v6665_v53, %v6662_v52 }
  0xd4   : > { %v6681_v59 = vld [vmem:[%s6507_s16 + $0xa8] sm:$0xff]  ;;  %v6686_v61 = vld [vmem:[%s6507_s16 + $0xb0] sm:$0xff]  ;;  %v6689_v62 = vld [vmem:[%s6507_s16 + $0xb8] sm:$0xff]  ;;  %v535_v63 = vadd.f32 %v6673_v56, %v6670_v55 }
  0xd5   : > { %515 = vadd.xlane.f32.xlu0 %v514_v22  ;;  %v6694_v3 = vld [vmem:[%s6507_s16 + $0x1a0] sm:$0xff]  ;;  %v6697_v7 = vld [vmem:[%s6507_s16 + $0x1a8] sm:$0xff]  ;;  %v490_v10 = vadd.f32 %v6681_v59, %v6678_v58  ;;  %v6702_v11 = vld [vmem:[%s6507_s16 + $0x1b0] sm:$0xff]  ;;  %v493_v17 = vadd.f32 %v6689_v62, %v6686_v61 }
  0xd6   : > { %518 = vadd.xlane.f32.xlu1 %v517_v23  ;;  %v6705_v16 = vld [vmem:[%s6507_s16 + $0x1b8] sm:$0xff]  ;;  %v6710_v22 = vld [vmem:[%s6507_s16 + $0xc0] sm:$0xff]  ;;  %v6713_v23 = vld [vmem:[%s6507_s16 + $0xc8] sm:$0xff] }
  0xd7   : > { %10085 = vst [vmem:[#allocation29_spill] sm:$0xff] %v6713_v23 }
  0xd9   : > { %473 = vadd.xlane.f32.xlu0 %v472_v28  ;;  %v538_v28 = vadd.f32 %v6697_v7, %v6694_v3 }
  0xda   : > { %476 = vadd.xlane.f32.xlu1 %v475_v29  ;;  %v6718_v29 = vld [vmem:[%s6507_s16 + $0xd0] sm:$0xff] }
  0xdb   : > { %10086 = vst [vmem:[#allocation30_spill] sm:$0xff] %v6718_v29 }
  0xdd   : > { %521 = vadd.xlane.f32.xlu0 %v520_v34  ;;  %v6721_v34 = vld [vmem:[%s6507_s16 + $0xd8] sm:$0xff] }
  0xde   : > { %524 = vadd.xlane.f32.xlu1 %v523_v35  ;;  %10087 = vst [vmem:[#allocation31_spill] sm:$0xff] %v6721_v34  ;;  %v541_v35 = vadd.f32 %v6705_v16, %v6702_v11 }
  0xe1   : > { %479 = vadd.xlane.f32.xlu0 %v478_v42  ;;  %v6726_v42 = vld [vmem:[%s6507_s16 + $0x1c0] sm:$0xff] }
  0xe2   : > { %482 = vadd.xlane.f32.xlu1 %v481_v45  ;;  %v6729_v45 = vld [vmem:[%s6507_s16 + $0x1c8] sm:$0xff] }
  0xe3   : > { %10088 = vst [vmem:[#allocation32_spill] sm:$0xff] %v6729_v45 }
  0xe5   : > { %527 = vadd.xlane.f32.xlu0 %v526_v48  ;;  %v496_v48 = vadd.f32 %v6713_v23, %v6710_v22  ;;  %v6765_v23 = vld [vmem:[%s6507_s16 + $0x1e8] sm:$0xff] }
  0xe6   : > { %530 = vadd.xlane.f32.xlu1 %v529_v51  ;;  %v6734_v51 = vld [vmem:[%s6507_s16 + $0x1d0] sm:$0xff]  ;;  %10094 = vst [vmem:[#allocation38_spill] sm:$0xff] %v6765_v23 }
  0xe9   : > { %485 = vadd.xlane.f32.xlu0 %v484_v54  ;;  %v6737_v54 = vld [vmem:[%s6507_s16 + $0x1d8] sm:$0xff] }
  0xea   : > { %488 = vadd.xlane.f32.xlu1 %v487_v57  ;;  %10089 = vst [vmem:[#allocation33_spill] sm:$0xff] %v6737_v54  ;;  %v499_v57 = vadd.f32 %v6721_v34, %v6718_v29 }
  0xed   : > { %533 = vadd.xlane.f32.xlu0 %v532_v60  ;;  %v6742_v60 = vld [vmem:[%s6507_s16 + $0xe0] sm:$0xff] }
  0xee   : > { %536 = vadd.xlane.f32.xlu1 %v535_v63  ;;  %v6745_v63 = vld [vmem:[%s6507_s16 + $0xe8] sm:$0xff] }
  0xef   : > { %10090 = vst [vmem:[#allocation34_spill] sm:$0xff] %v6745_v63  ;;  %v502_v34 = vadd.f32 %v6745_v63, %v6742_v60  ;;  %v5696_v63 = vld [vmem:[#allocation8 + $0x30] ss:$24 sps:$4 sm:$0xff]  }
  0xf1   : > { %491 = vadd.xlane.f32.xlu0 %v490_v10  ;;  %v544_v10 = vadd.f32 %v6729_v45, %v6726_v42  ;;  %v6768_v45 = vld [vmem:[%s6507_s16 + $0x1f0] sm:$0xff] }
  0xf2   : > { %494 = vadd.xlane.f32.xlu1 %v493_v17  ;;  %v6750_v17 = vld [vmem:[%s6507_s16 + $0xf0] sm:$0xff]  ;;  %10095 = vst [vmem:[#allocation39_spill] sm:$0xff] %v6768_v45 }
  0xf3   : > { %10091 = vst [vmem:[#allocation35_spill] sm:$0xff] %v6750_v17 }
  0xf5   : > { %539 = vadd.xlane.f32.xlu0 %v538_v28  ;;  %v547_v28 = vadd.f32 %v6737_v54, %v6734_v51 }
  0xf6   : > { %542 = vadd.xlane.f32.xlu1 %v541_v35  ;;  %v6755_v35 = vld [vmem:[%s6507_s16 + $0xf8] sm:$0xff] }
  0xf7   : > { %10092 = vst [vmem:[#allocation36_spill] sm:$0xff] %v6755_v35  ;;  %v505_v29 = vadd.f32 %v6755_v35, %v6750_v17  ;;  %v5693_v35 = vld [vmem:[#allocation8] ss:$24 sps:$4 sm:$0xff]   ;;  %v5694_v17 = vld [vmem:[#allocation8 + $0x34] ss:$24 sps:$4 sm:$0xff]  }
  0xf9   : > { %497 = vadd.xlane.f32.xlu0 %v496_v48  ;;  %v6762_v48 = vld [vmem:[%s6507_s16 + $0x1e0] sm:$0xff] }
  0xfa   : > { %500 = vadd.xlane.f32.xlu1 %v499_v57  ;;  %10093 = vst [vmem:[#allocation37_spill] sm:$0xff] %v6762_v48  ;;  %v6771_v57 = vld [vmem:[%s6507_s16 + $0x1f8] sm:$0xff]  ;;  %v550_v54 = vadd.f32 %v6765_v23, %v6762_v48 }
  0xfb   : > { %10096 = vst [vmem:[#allocation40_spill] sm:$0xff] %v6771_v57  ;;  %v5699_v23 = vld [vmem:[#allocation8 + $0x60] ss:$24 sps:$4 sm:$0xff]  }
  0xfd   : > { %545 = vadd.xlane.f32.xlu0 %v544_v10  ;;  %v553_v10 = vadd.f32 %v6771_v57, %v6768_v45 }
  0xfe   : > { %548 = vadd.xlane.f32.xlu1 %v547_v28  ;;  %v5691_v28 = vld [vmem:[#allocation8 + $0x4] ss:$24 sps:$4 sm:$0xff]  }
  0xff   : > { %2020 = vmatprep.subr.bf16.mxu0 %v5691_v28  ;;  %5486 = vmatprep.subr.bf16.mxu1 %v5691_v28  ;;  %v5705_v28 = vld [vmem:[#allocation8 + $0xc0] ss:$24 sps:$4 sm:$0xff]  }
 0x100   : > { %2021 = vmatpush1.bf16.msra.mxu0 %v5693_v35  ;;  %5502 = vmatpush1.bf16.msra.mxu1 %v5693_v35  ;;  %v5706_v35 = vld [vmem:[#allocation8 + $0xf4] ss:$24 sps:$4 sm:$0xff]  }
 0x101   : > { %503 = vadd.xlane.f32.xlu0 %v502_v34  ;;  %2022 = vmatprep.subr.bf16.mxu0 %v5694_v17  ;;  %v5697_v34 = vld [vmem:[#allocation8 + $0x64] ss:$24 sps:$4 sm:$0xff]  }
 0x102   : > { %506 = vadd.xlane.f32.xlu1 %v505_v29  ;;  %5487 = vmatprep.subr.bf16.mxu1 %v5694_v17  ;;  %v5700_v29 = vld [vmem:[#allocation8 + $0x94] ss:$24 sps:$4 sm:$0xff]   ;;  %v5708_v17 = vld [vmem:[#allocation8 + $0xf0] ss:$24 sps:$4 sm:$0xff]  }
 0x104   : > { %2023 = vmatpush1.bf16.msra.mxu0 %v5696_v63  ;;  %5503 = vmatpush1.bf16.msra.mxu1 %v5696_v63 }
 0x105   : > { %551 = vadd.xlane.f32.xlu0 %v550_v54  ;;  %2024 = vmatprep.subr.bf16.mxu0 %v5697_v34  ;;  %v5702_v54 = vld [vmem:[#allocation8 + $0x90] ss:$24 sps:$4 sm:$0xff]  }
 0x106   : > { %554 = vadd.xlane.f32.xlu1 %v553_v10  ;;  %5488 = vmatprep.subr.bf16.mxu1 %v5697_v34  ;;  %v5703_v10 = vld [vmem:[#allocation8 + $0xc4] ss:$24 sps:$4 sm:$0xff]  }
 0x108   : > { %2025 = vmatpush1.bf16.msra.mxu0 %v5699_v23  ;;  %5504 = vmatpush1.bf16.msra.mxu1 %v5699_v23 }
 0x109   : > { %2026 = vmatprep.subr.bf16.mxu0 %v5700_v29  ;;  %5489 = vmatprep.subr.bf16.mxu1 %v5700_v29 }
 0x10c   : > { %2027 = vmatpush1.bf16.msra.mxu0 %v5702_v54  ;;  %5505 = vmatpush1.bf16.msra.mxu1 %v5702_v54 }
 0x10d   : > { %2028 = vmatprep.subr.bf16.mxu0 %v5703_v10  ;;  %5490 = vmatprep.subr.bf16.mxu1 %v5703_v10 }
 0x110   : > { %2029 = vmatpush1.bf16.msra.mxu0 %v5705_v28  ;;  %5506 = vmatpush1.bf16.msra.mxu1 %v5705_v28 }
 0x111   : > { %2030 = vmatprep.subr.bf16.mxu0 %v5706_v35  ;;  %5491 = vmatprep.subr.bf16.mxu1 %v5706_v35 }
 0x114   : > { %2031 = vmatpush1.bf16.msra.mxu0 %v5708_v17  ;;  %5507 = vmatpush1.bf16.msra.mxu1 %v5708_v17 }
 0x156   : > { %v462_v63 = vpop.xlane.xlu0 %461 }
 0x157   : > { %v557_v34 = vmul.f32 0.00390625, %v462_v63  ;;  %v510_v23 = vpop.xlane.xlu1 %509 }
 0x158   : > { %v573_v57 = vmul.f32 0.00390625, %v510_v23 }
 0x159   : > { %v6778_v29 = vsub.f32 %v6522_v0, %v557_v34  ;;  %v6781_v54 = vsub.f32 %v6525_v1, %v557_v34 }
 0x15a   : > { %v6784_v10 = vsub.f32 %v6528_v2, %v573_v57  ;;  %v6787_v28 = vsub.f32 %v6533_v4, %v573_v57  ;;  %v465_v45 = vpop.xlane.xlu0 %464 }
 0x15b   : > { %10097 = vst [vmem:[#allocation41_spill] sm:$0xff] %v6778_v29  ;;  %10098 = vst [vmem:[#allocation42_spill] sm:$0xff] %v6781_v54  ;;  %v558_v35 = vmul.f32 0.00390625, %v465_v45  ;;  %v513_v48 = vpop.xlane.xlu1 %512  ;;  %v653_v17 = vmul.f32 %v6778_v29, %v6778_v29  ;;  %v654_v0 = vmul.f32 %v6781_v54, %v6781_v54 }
 0x15c   : > { %10099 = vst [vmem:[#allocation43_spill] sm:$0xff] %v6784_v10  ;;  %10100 = vst [vmem:[#allocation44_spill] sm:$0xff] %v6787_v28  ;;  %v574_v63 = vmul.f32 0.00390625, %v513_v48  ;;  %v685_v2 = vmul.f32 %v6784_v10, %v6784_v10  ;;  %v686_v4 = vmul.f32 %v6787_v28, %v6787_v28 }
 0x15d   : > { %v6794_v23 = vsub.f32 %v6536_v5, %v558_v35  ;;  %v6797_v1 = vsub.f32 %v6539_v6, %v558_v35  ;;  %v717_v34 = vadd.f32 %v654_v0, %v653_v17 }
 0x15e   : > { %v6804_v45 = vsub.f32 %v6544_v8, %v574_v63  ;;  %v6807_v48 = vsub.f32 %v6547_v9, %v574_v63  ;;  %v468_v57 = vpop.xlane.xlu0 %467  ;;  %v765_v6 = vadd.f32 %v686_v4, %v685_v2 }
 0x15f   : > { %v559_v54 = vmul.f32 0.00390625, %v468_v57  ;;  %v471_v5 = vpop.xlane.xlu1 %470  ;;  %718 = vadd.xlane.f32.xlu0 %v717_v34  ;;  %v655_v35 = vmul.f32 %v6794_v23, %v6794_v23  ;;  %v656_v8 = vmul.f32 %v6797_v1, %v6797_v1 }
 0x160   : > { %v560_v29 = vmul.f32 0.00390625, %v471_v5  ;;  %v687_v9 = vmul.f32 %v6804_v45, %v6804_v45 }
 0x161   : > { %v6812_v10 = vsub.f32 %v6554_v12, %v559_v54  ;;  %v6815_v28 = vsub.f32 %v6557_v13, %v559_v54  ;;  %v688_v12 = vmul.f32 %v6807_v48, %v6807_v48  ;;  %v720_v4 = vadd.f32 %v656_v8, %v655_v35 }
 0x162   : > { %v6822_v17 = vsub.f32 %v6560_v14, %v560_v29  ;;  %v6825_v63 = vsub.f32 %v6563_v15, %v560_v29  ;;  %v516_v0 = vpop.xlane.xlu0 %515 }
 0x163   : > { %v575_v2 = vmul.f32 0.00390625, %v516_v0  ;;  %v519_v13 = vpop.xlane.xlu1 %518  ;;  %766 = vadd.xlane.f32.xlu0 %v765_v6  ;;  %721 = vadd.xlane.f32.xlu1 %v720_v4  ;;  %v768_v34 = vadd.f32 %v688_v12, %v687_v9  ;;  %v657_v14 = vmul.f32 %v6812_v10, %v6812_v10  ;;  %v658_v15 = vmul.f32 %v6815_v28, %v6815_v28 }
 0x164   : > { %10101 = vst [vmem:[#allocation45_spill] sm:$0xff] %v6825_v63  ;;  %v576_v54 = vmul.f32 0.00390625, %v519_v13  ;;  %v659_v6 = vmul.f32 %v6822_v17, %v6822_v17 }
 0x165   : > { %v6830_v57 = vsub.f32 %v6570_v18, %v575_v2  ;;  %v6837_v29 = vsub.f32 %v6573_v19, %v575_v2  ;;  %v660_v18 = vmul.f32 %v6825_v63, %v6825_v63  ;;  %v723_v0 = vadd.f32 %v658_v15, %v657_v14 }
 0x166   : > { %v6840_v5 = vsub.f32 %v6576_v20, %v576_v54  ;;  %v474_v35 = vpop.xlane.xlu0 %473  ;;  %v6847_v8 = vsub.f32 %v6579_v21, %v576_v54 }
 0x167   : > { %v561_v9 = vmul.f32 0.00390625, %v474_v35  ;;  %v477_v12 = vpop.xlane.xlu1 %476  ;;  %769 = vadd.xlane.f32.xlu1 %v768_v34  ;;  %724 = vadd.xlane.f32.xlu0 %v723_v0  ;;  %v726_v20 = vadd.f32 %v660_v18, %v659_v6  ;;  %v689_v2 = vmul.f32 %v6830_v57, %v6830_v57  ;;  %v690_v54 = vmul.f32 %v6837_v29, %v6837_v29 }
 0x168   : > { %v562_v4 = vmul.f32 0.00390625, %v477_v12  ;;  %v692_v35 = vmul.f32 %v6847_v8, %v6847_v8 }
 0x169   : > { %v6850_v19 = vsub.f32 %v6586_v24, %v561_v9  ;;  %v6855_v13 = vsub.f32 %v6589_v25, %v561_v9  ;;  %v691_v24 = vmul.f32 %v6840_v5, %v6840_v5  ;;  %v771_v25 = vadd.f32 %v690_v54, %v689_v2  ;;  %v5709_v54 = vld [vmem:[#allocation8 + $0x124] ss:$24 sps:$4 sm:$0xff]  }
 0x16a   : > { %v6858_v63 = vsub.f32 %v6592_v26, %v562_v4  ;;  %v522_v21 = vpop.xlane.xlu0 %521  ;;  %v6865_v34 = vsub.f32 %v6595_v27, %v562_v4  ;;  %2032 = vmatprep.subr.bf16.mxu0 %v5709_v54  ;;  %5492 = vmatprep.subr.bf16.mxu1 %v5709_v54 }
 0x16b   : > { %v577_v14 = vmul.f32 0.00390625, %v522_v21  ;;  %v525_v15 = vpop.xlane.xlu1 %524  ;;  %727 = vadd.xlane.f32.xlu1 %v726_v20  ;;  %v774_v18 = vadd.f32 %v692_v35, %v691_v24  ;;  %v661_v9 = vmul.f32 %v6850_v19, %v6850_v19  ;;  %772 = vadd.xlane.f32.xlu0 %v771_v25  ;;  %v662_v4 = vmul.f32 %v6855_v13, %v6855_v13 }
 0x16c   : > { %10102 = vst [vmem:[#allocation46_spill] sm:$0xff] %v6858_v63  ;;  %v578_v6 = vmul.f32 0.00390625, %v525_v15  ;;  %v1167_v24 = vlaneseq  ;;  %v5711_v15 = vld [vmem:[#allocation8 + $0x120] ss:$24 sps:$4 sm:$0xff]  }
 0x16d   : > { %v6870_v26 = vsub.f32 %v6602_v30, %v577_v14  ;;  %v6875_v0 = vsub.f32 %v6605_v31, %v577_v14  ;;  %v663_v30 = vmul.f32 %v6858_v63, %v6858_v63  ;;  %v664_v31 = vmul.f32 %v6865_v34, %v6865_v34  ;;  %2033 = vmatpush1.bf16.msra.mxu0 %v5711_v15 }
 0x16e   : > { %v6878_v27 = vsub.f32 %v6608_v32, %v578_v6  ;;  %v480_v12 = vpop.xlane.xlu0 %479  ;;  %v6885_v20 = vsub.f32 %v6611_v33, %v578_v6  ;;  %v729_v14 = vadd.f32 %v662_v4, %v661_v9  ;;  %5508 = vmatpush1.bf16.msra.mxu1 %v5711_v15 }
 0x16f   : > { %v563_v2 = vmul.f32 0.00390625, %v480_v12  ;;  %v483_v21 = vpop.xlane.xlu1 %482  ;;  %775 = vadd.xlane.f32.xlu1 %v774_v18  ;;  %v732_v25 = vadd.f32 %v664_v31, %v663_v30  ;;  %v693_v63 = vmul.f32 %v6870_v26, %v6870_v26  ;;  %v694_v9 = vmul.f32 %v6875_v0, %v6875_v0 }
 0x170   : > { %10103 = vst [vmem:[#allocation47_spill] sm:$0xff] %v6878_v27  ;;  %v564_v32 = vmul.f32 0.00390625, %v483_v21  ;;  %730 = vadd.xlane.f32.xlu0 %v729_v14  ;;  %v5714_v14 = vld [vmem:[#allocation8 + $0x150] ss:$24 sps:$4 sm:$0xff]  }
 0x171   : > { %v6890_v35 = vsub.f32 %v6618_v36, %v563_v2  ;;  %v6895_v33 = vsub.f32 %v6621_v37, %v563_v2  ;;  %v695_v36 = vmul.f32 %v6878_v27, %v6878_v27  ;;  %v696_v37 = vmul.f32 %v6885_v20, %v6885_v20  ;;  %v5712_v2 = vld [vmem:[#allocation8 + $0x154] ss:$24 sps:$4 sm:$0xff]  }
 0x172   : > { %v6898_v6 = vsub.f32 %v6624_v38, %v564_v32  ;;  %v528_v12 = vpop.xlane.xlu0 %527  ;;  %v6905_v18 = vsub.f32 %v6627_v39, %v564_v32  ;;  %v6909_v38 = vshrl.u32 %v1167_v24, 7  ;;  %v777_v21 = vadd.f32 %v694_v9, %v693_v63  ;;  %2034 = vmatprep.subr.bf16.mxu0 %v5712_v2  ;;  %5493 = vmatprep.subr.bf16.mxu1 %v5712_v2 }
 0x173   : > { %v579_v4 = vmul.f32 0.00390625, %v528_v12  ;;  %v531_v30 = vpop.xlane.xlu1 %530  ;;  %733 = vadd.xlane.f32.xlu1 %v732_v25  ;;  %v780_v39 = vadd.f32 %v696_v37, %v695_v36  ;;  %v665_v32 = vmul.f32 %v6890_v35, %v6890_v35  ;;  %v666_v24 = vmul.f32 %v6895_v33, %v6895_v33  ;;  %v5715_v36 = vld [vmem:[#allocation8 + $0x184] ss:$24 sps:$4 sm:$0xff]   ;;  %2035 = vmatpush1.bf16.msra.mxu0 %v5714_v14 }
 0x174   : > { %10104 = vst [vmem:[#allocation48_spill] sm:$0xff] %v6905_v18  ;;  %10105 = vst [vmem:[#allocation49_spill] sm:$0xff] %v6909_v38  ;;  %v580_v31 = vmul.f32 0.00390625, %v531_v30  ;;  %778 = vadd.xlane.f32.xlu0 %v777_v21  ;;  %5509 = vmatpush1.bf16.msra.mxu1 %v5714_v14  ;;  %v458_v21 = vld [vmem:[#allocation5] sm:$0x3] }
 0x175   : > { %v6912_v27 = vsub.f32 %v6630_v40, %v579_v4  ;;  %v6917_v12 = vsub.f32 %v6633_v41, %v579_v4  ;;  %v667_v40 = vmul.f32 %v6898_v6, %v6898_v6  ;;  %v668_v41 = vmul.f32 %v6905_v18, %v6905_v18  ;;  %2036 = vmatprep.subr.bf16.mxu0 %v5715_v36 }
 0x176   : > { %v6920_v54 = vsub.f32 %v6638_v43, %v580_v31  ;;  %v486_v63 = vpop.xlane.xlu0 %485  ;;  %v6927_v15 = vsub.f32 %v6641_v44, %v580_v31  ;;  %v6932_v43 = vsub.s32 0, %v6909_v38  ;;  %v6935_v4 = vsub.s32 1, %v6909_v38  ;;  %v5717_v44 = vld [vmem:[#allocation8 + $0x180] ss:$24 sps:$4 sm:$0xff]   ;;  %5494 = vmatprep.subr.bf16.mxu1 %v5715_v36 }
 0x177   : > { %v565_v25 = vmul.f32 0.00390625, %v486_v63  ;;  %v489_v9 = vpop.xlane.xlu1 %488  ;;  %v735_v30 = vadd.f32 %v666_v24, %v665_v32  ;;  %781 = vadd.xlane.f32.xlu1 %v780_v39  ;;  %v738_v63 = vadd.f32 %v668_v41, %v667_v40  ;;  %v697_v2 = vmul.f32 %v6912_v27, %v6912_v27  ;;  %2037 = vmatpush1.bf16.msra.mxu0 %v5717_v44 }
 0x178   : > { %10106 = vst [vmem:[#allocation50_spill] sm:$0xff] %v6927_v15  ;;  %10107 = vst [vmem:[#allocation51_spill] sm:$0xff] %v6932_v43  ;;  %v566_v37 = vmul.f32 0.00390625, %v489_v9  ;;  %v698_v14 = vmul.f32 %v6917_v12, %v6917_v12  ;;  %v6961_v9 = vrot.slane %v458_v21, %v6935_v4  ;;  %5510 = vmatpush1.bf16.msra.mxu1 %v5717_v44 }
 0x179   : > { %10108 = vst [vmem:[#allocation52_spill] sm:$0xff] %v6935_v4  ;;  %v6938_v31 = vsub.f32 %v6646_v46, %v565_v25  ;;  %v6943_v18 = vsub.f32 %v6649_v47, %v565_v25  ;;  %736 = vadd.xlane.f32.xlu0 %v735_v30  ;;  %v699_v46 = vmul.f32 %v6920_v54, %v6920_v54  ;;  %v5718_v25 = vld [vmem:[#allocation8 + $0x1b4] ss:$24 sps:$4 sm:$0xff]  }
 0x17a   : > { %v6946_v38 = vsub.f32 %v6654_v49, %v566_v37  ;;  %v534_v32 = vpop.xlane.xlu0 %533  ;;  %v6953_v39 = vsub.f32 %v6657_v50, %v566_v37  ;;  %v700_v47 = vmul.f32 %v6927_v15, %v6927_v15  ;;  %v6958_v49 = vrot.slane %v458_v21, %v6932_v43  ;;  %v5720_v50 = vld [vmem:[#allocation8 + $0x1b0] ss:$24 sps:$4 sm:$0xff]   ;;  %2038 = vmatprep.subr.bf16.mxu0 %v5718_v25 }
 0x17b   : > { %v581_v24 = vmul.f32 0.00390625, %v534_v32  ;;  %v537_v40 = vpop.xlane.xlu1 %536  ;;  %v783_v41 = vadd.f32 %v698_v14, %v697_v2  ;;  %739 = vadd.xlane.f32.xlu1 %v738_v63  ;;  %v669_v36 = vmul.f32 %v6938_v31, %v6938_v31  ;;  %v670_v2 = vmul.f32 %v6943_v18, %v6943_v18  ;;  %5495 = vmatprep.subr.bf16.mxu1 %v5718_v25 }
 0x17c   : > { %10109 = vst [vmem:[#allocation53_spill] sm:$0xff] %v6946_v38  ;;  %10110 = vst [vmem:[#allocation54_spill] sm:$0xff] %v6953_v39  ;;  %v582_v30 = vmul.f32 0.00390625, %v537_v40  ;;  %v786_v15 = vadd.f32 %v700_v47, %v699_v46  ;;  %v671_v44 = vmul.f32 %v6946_v38, %v6946_v38  ;;  %2039 = vmatpush1.bf16.msra.mxu0 %v5720_v50  ;;  %5511 = vmatpush1.bf16.msra.mxu1 %v5720_v50 }
 0x17d   : > { %v637_v37 = vsub.f32 %v6662_v52, %v581_v24  ;;  %v638_v32 = vsub.f32 %v6665_v53, %v581_v24  ;;  %784 = vadd.xlane.f32.xlu0 %v783_v41  ;;  %v741_v40 = vadd.f32 %v670_v2, %v669_v36  ;;  %v5723_v41 = vld [vmem:[#allocation8 + $0x1e0] ss:$24 sps:$4 sm:$0xff]  }
 0x17e   : > { %v639_v43 = vsub.f32 %v6670_v55, %v582_v30  ;;  %v640_v21 = vsub.f32 %v6673_v56, %v582_v30  ;;  %v492_v4 = vpop.xlane.xlu0 %491  ;;  %v672_v55 = vmul.f32 %v6953_v39, %v6953_v39  ;;  %v5721_v56 = vld [vmem:[#allocation8 + $0x1e4] ss:$24 sps:$4 sm:$0xff]  }
 0x17f   : > { %v6974_v52 = vmul.f32 %v6958_v49, %v637_v37  ;;  %v6977_v53 = vmul.f32 %v6961_v9, %v638_v32  ;;  %v567_v63 = vmul.f32 0.00390625, %v492_v4  ;;  %v495_v14 = vpop.xlane.xlu1 %494  ;;  %787 = vadd.xlane.f32.xlu1 %v786_v15  ;;  %v702_v38 = vmul.f32 %v638_v32, %v638_v32  ;;  %2040 = vmatprep.subr.bf16.mxu0 %v5721_v56  ;;  %v5724_v15 = vld [vmem:[#allocation8 + $0x214] ss:$24 sps:$4 sm:$0xff]   ;;  %v5726_v32 = vld [vmem:[#allocation8 + $0x210] ss:$24 sps:$4 sm:$0xff]  }
 0x180   : > { %v6982_v46 = vmul.f32 %v6958_v49, %v639_v43  ;;  %v6985_v24 = vmul.f32 %v6961_v9, %v640_v21  ;;  %v568_v47 = vmul.f32 0.00390625, %v495_v14  ;;  %5496 = vmatprep.subr.bf16.mxu1 %v5721_v56  ;;  %2041 = vmatpush1.bf16.msra.mxu0 %v5723_v41 }
 0x181   : > { %10111 = vst [vmem:[#allocation55_spill] sm:$0xff] %v6974_v52  ;;  %10112 = vst [vmem:[#allocation56_spill] sm:$0xff] %v6977_v53  ;;  %v609_v4 = vsub.f32 %v6678_v58, %v567_v63  ;;  %v610_v30 = vsub.f32 %v6681_v59, %v567_v63  ;;  %v744_v52 = vadd.f32 %v672_v55, %v671_v44  ;;  %742 = vadd.xlane.f32.xlu0 %v741_v40 }
 0x182   : > { %10113 = vst [vmem:[#allocation57_spill] sm:$0xff] %v6982_v46  ;;  %10114 = vst [vmem:[#allocation58_spill] sm:$0xff] %v6985_v24  ;;  %v701_v53 = vmul.f32 %v637_v37, %v637_v37  ;;  %v611_v25 = vsub.f32 %v6686_v61, %v568_v47  ;;  %v612_v46 = vsub.f32 %v6689_v62, %v568_v47  ;;  %v540_v39 = vpop.xlane.xlu0 %539  ;;  %5512 = vmatpush1.bf16.msra.mxu1 %v5723_v41 }
 0x183   : > { %v703_v24 = vmul.f32 %v639_v43, %v639_v43  ;;  %v6992_v36 = vmul.f32 %v6958_v49, %v609_v4  ;;  %v6995_v50 = vmul.f32 %v6961_v9, %v610_v30  ;;  %v583_v58 = vmul.f32 0.00390625, %v540_v39  ;;  %v543_v2 = vpop.xlane.xlu1 %542  ;;  %745 = vadd.xlane.f32.xlu1 %v744_v52  ;;  %2042 = vmatprep.subr.bf16.mxu0 %v5724_v15  ;;  %v5727_v52 = vld [vmem:[#allocation8 + $0x244] ss:$24 sps:$4 sm:$0xff]  }
 0x184   : > { %v704_v59 = vmul.f32 %v640_v21, %v640_v21  ;;  %v6998_v37 = vmul.f32 %v6958_v49, %v611_v25  ;;  %v7001_v61 = vmul.f32 %v6961_v9, %v612_v46  ;;  %v789_v62 = vadd.f32 %v702_v38, %v701_v53  ;;  %5497 = vmatprep.subr.bf16.mxu1 %v5724_v15  ;;  %v10124_v15 = vld [vmem:[#allocation30_spill] sm:$0xff] }
 0x185   : > { %10115 = vst [vmem:[#allocation59_spill] sm:$0xff] %v6992_v36  ;;  %10116 = vst [vmem:[#allocation60_spill] sm:$0xff] %v6995_v50  ;;  %v584_v43 = vmul.f32 0.00390625, %v543_v2  ;;  %v641_v44 = vsub.f32 %v6694_v3, %v583_v58  ;;  %v642_v39 = vsub.f32 %v6697_v7, %v583_v58  ;;  %v673_v63 = vmul.f32 %v609_v4, %v609_v4  ;;  %v10123_v58 = vld [vmem:[#allocation29_spill] sm:$0xff] }
 0x186   : > { %10117 = vst [vmem:[#allocation61_spill] sm:$0xff] %v6998_v37  ;;  %10118 = vst [vmem:[#allocation62_spill] sm:$0xff] %v7001_v61  ;;  %v792_v21 = vadd.f32 %v704_v59, %v703_v24  ;;  %790 = vadd.xlane.f32.xlu0 %v789_v62  ;;  %v498_v56 = vpop.xlane.xlu0 %497  ;;  %v674_v40 = vmul.f32 %v610_v30, %v610_v30  ;;  %v675_v47 = vmul.f32 %v611_v25, %v611_v25  ;;  %v5729_v30 = vld [vmem:[#allocation8 + $0x240] ss:$24 sps:$4 sm:$0xff]  }
 0x187   : > { %v643_v14 = vsub.f32 %v6702_v11, %v584_v43  ;;  %v644_v55 = vsub.f32 %v6705_v16, %v584_v43  ;;  %v7008_v38 = vmul.f32 %v6958_v49, %v641_v44  ;;  %v7011_v53 = vmul.f32 %v6961_v9, %v642_v39  ;;  %v501_v41 = vpop.xlane.xlu1 %500  ;;  %2043 = vmatpush1.bf16.msra.mxu0 %v5726_v32  ;;  %v10125_v43 = vld [vmem:[#allocation31_spill] sm:$0xff] }
 0x188   : > { %v569_v3 = vmul.f32 0.00390625, %v498_v56  ;;  %v676_v7 = vmul.f32 %v612_v46, %v612_v46  ;;  %v747_v16 = vadd.f32 %v674_v40, %v673_v63  ;;  %v570_v4 = vmul.f32 0.00390625, %v501_v41  ;;  %5513 = vmatpush1.bf16.msra.mxu1 %v5726_v32  ;;  %793 = vadd.xlane.f32.xlu1 %v792_v21  ;;  %v5732_v41 = vld [vmem:[#allocation8 + $0x270] ss:$24 sps:$4 sm:$0xff]  }
 0x189   : > { %10119 = vst [vmem:[#allocation63_spill] sm:$0xff] %v7008_v38  ;;  %10120 = vst [vmem:[#allocation64_spill] sm:$0xff] %v7011_v53  ;;  %v7014_v24 = vmul.f32 %v6958_v49, %v643_v14  ;;  %v7017_v11 = vmul.f32 %v6961_v9, %v644_v55  ;;  %v705_v59 = vmul.f32 %v641_v44, %v641_v44  ;;  %2044 = vmatprep.subr.bf16.mxu0 %v5727_v52  ;;  %v5730_v44 = vld [vmem:[#allocation8 + $0x274] ss:$24 sps:$4 sm:$0xff]  }
 0x18a   : > { %v613_v25 = vsub.f32 %v6710_v22, %v569_v3  ;;  %v614_v2 = vsub.f32 %v10123_v58, %v569_v3  ;;  %v750_v46 = vadd.f32 %v676_v7, %v675_v47  ;;  %748 = vadd.xlane.f32.xlu0 %v747_v16  ;;  %v615_v62 = vsub.f32 %v10124_v15, %v570_v4  ;;  %v10130_v16 = vld [vmem:[#allocation32_spill] sm:$0xff]  ;;  %v10131_v58 = vld [vmem:[#allocation33_spill] sm:$0xff]  ;;  %v10180_v53 = vld [vmem:[#allocation51_spill] sm:$0xff] }
 0x18b   : > { %10121 = vst [vmem:[#allocation65_spill] sm:$0xff] %v7014_v24  ;;  %10122 = vst [vmem:[#allocation66_spill] sm:$0xff] %v7017_v11  ;;  %v616_v56 = vsub.f32 %v10125_v43, %v570_v4  ;;  %v546_v24 = vpop.xlane.xlu0 %545  ;;  %v706_v38 = vmul.f32 %v642_v39, %v642_v39  ;;  %v707_v11 = vmul.f32 %v643_v14, %v643_v14  ;;  %v549_v40 = vpop.xlane.xlu1 %548  ;;  %5498 = vmatprep.subr.bf16.mxu1 %v5727_v52 }
 0x18c   : > { %v7024_v63 = vmul.f32 %v6958_v49, %v613_v25  ;;  %v7027_v32 = vmul.f32 %v6961_v9, %v614_v2  ;;  %v585_v22 = vmul.f32 0.00390625, %v546_v24  ;;  %v708_v3 = vmul.f32 %v644_v55, %v644_v55  ;;  %2045 = vmatpush1.bf16.msra.mxu0 %v5729_v30  ;;  %5514 = vmatpush1.bf16.msra.mxu1 %v5729_v30 }
 0x18d   : > { %v7030_v21 = vmul.f32 %v6958_v49, %v615_v62  ;;  %v7033_v47 = vmul.f32 %v6961_v9, %v616_v56  ;;  %v795_v39 = vadd.f32 %v706_v38, %v705_v59  ;;  %v586_v14 = vmul.f32 0.00390625, %v549_v40  ;;  %751 = vadd.xlane.f32.xlu1 %v750_v46  ;;  %2046 = vmatprep.subr.bf16.mxu0 %v5730_v44 }
 0x18e   : > { %10126 = vst [vmem:[#allocation29_spill] sm:$0xff] %v7024_v63  ;;  %10127 = vst [vmem:[#allocation30_spill] sm:$0xff] %v7027_v32  ;;  %v645_v7 = vsub.f32 %v6726_v42, %v585_v22  ;;  %v646_v24 = vsub.f32 %v10130_v16, %v585_v22  ;;  %v798_v55 = vadd.f32 %v708_v3, %v707_v11  ;;  %5499 = vmatprep.subr.bf16.mxu1 %v5730_v44  ;;  %v5733_v11 = vld [vmem:[#allocation8 + $0x2a4] ss:$24 sps:$4 sm:$0xff]   ;;  %v10136_v3 = vld [vmem:[#allocation34_spill] sm:$0xff] }
 0x18f   : > { %10128 = vst [vmem:[#allocation31_spill] sm:$0xff] %v7030_v21  ;;  %10129 = vst [vmem:[#allocation67_spill] sm:$0xff] %v7033_v47  ;;  %v677_v4 = vmul.f32 %v613_v25, %v613_v25  ;;  %796 = vadd.xlane.f32.xlu0 %v795_v39  ;;  %v647_v52 = vsub.f32 %v6734_v51, %v586_v14  ;;  %v648_v15 = vsub.f32 %v10131_v58, %v586_v14  ;;  %v504_v43 = vpop.xlane.xlu0 %503  ;;  %v507_v59 = vpop.xlane.xlu1 %506  ;;  %v10137_v44 = vld [vmem:[#allocation35_spill] sm:$0xff]  ;;  %v10138_v58 = vld [vmem:[#allocation36_spill] sm:$0xff] }
 0x190   : > { %v678_v21 = vmul.f32 %v614_v2, %v614_v2  ;;  %v679_v47 = vmul.f32 %v615_v62, %v615_v62  ;;  %v7040_v38 = vmul.f32 %v6958_v49, %v645_v7  ;;  %v7043_v30 = vmul.f32 %v6961_v9, %v646_v24  ;;  %2047 = vmatpush1.bf16.msra.mxu0 %v5732_v41  ;;  %v5735_v62 = vld [vmem:[#allocation8 + $0x2a0] ss:$24 sps:$4 sm:$0xff]  }
 0x191   : > { %v571_v42 = vmul.f32 0.00390625, %v504_v43  ;;  %v680_v22 = vmul.f32 %v616_v56, %v616_v56  ;;  %v7046_v25 = vmul.f32 %v6958_v49, %v647_v52  ;;  %v7049_v51 = vmul.f32 %v6961_v9, %v648_v15  ;;  %5515 = vmatpush1.bf16.msra.mxu1 %v5732_v41  ;;  %799 = vadd.xlane.f32.xlu1 %v798_v55  ;;  %v10179_v32 = vld [vmem:[#allocation52_spill] sm:$0xff] }
 0x192   : > { %10132 = vst [vmem:[#allocation32_spill] sm:$0xff] %v7040_v38  ;;  %10133 = vst [vmem:[#allocation33_spill] sm:$0xff] %v7043_v30  ;;  %v753_v2 = vadd.f32 %v678_v21, %v677_v4  ;;  %v572_v46 = vmul.f32 0.00390625, %v507_v59  ;;  %v709_v14 = vmul.f32 %v645_v7, %v645_v7  ;;  %v710_v38 = vmul.f32 %v646_v24, %v646_v24  ;;  %v5738_v59 = vld [vmem:[#allocation8 + $0x2d0] ss:$24 sps:$4 sm:$0xff]  }
 0x193   : > { %10134 = vst [vmem:[#allocation68_spill] sm:$0xff] %v7046_v25  ;;  %10135 = vst [vmem:[#allocation69_spill] sm:$0xff] %v7049_v51  ;;  %v617_v40 = vsub.f32 %v6742_v60, %v571_v42  ;;  %v618_v39 = vsub.f32 %v10136_v3, %v571_v42  ;;  %v756_v56 = vadd.f32 %v680_v22, %v679_v47  ;;  %v552_v25 = vpop.xlane.xlu0 %551  ;;  %v555_v4 = vpop.xlane.xlu1 %554  ;;  %2048 = vmatprep.subr.bf16.mxu0 %v5733_v11  ;;  %v5736_v47 = vld [vmem:[#allocation8 + $0x2d4] ss:$24 sps:$4 sm:$0xff]  }
 0x194   : > { %754 = vadd.xlane.f32.xlu0 %v753_v2  ;;  %v619_v16 = vsub.f32 %v10137_v44, %v572_v46  ;;  %v620_v43 = vsub.f32 %v10138_v58, %v572_v46  ;;  %v711_v51 = vmul.f32 %v647_v52, %v647_v52  ;;  %v587_v60 = vmul.f32 0.00390625, %v552_v25  ;;  %5500 = vmatprep.subr.bf16.mxu1 %v5733_v11  ;;  %v10143_v22 = vld [vmem:[#allocation37_spill] sm:$0xff]  ;;  %v10144_v46 = vld [vmem:[#allocation38_spill] sm:$0xff]  ;;  %v10145_v11 = vld [vmem:[#allocation39_spill] sm:$0xff] }
 0x195   : > { %v7056_v21 = vmul.f32 %v6958_v49, %v617_v40  ;;  %v7059_v41 = vmul.f32 %v6961_v9, %v618_v39  ;;  %v712_v42 = vmul.f32 %v648_v15, %v648_v15  ;;  %v801_v24 = vadd.f32 %v710_v38, %v709_v14  ;;  %2049 = vmatpush1.bf16.msra.mxu0 %v5735_v62  ;;  %v10146_v58 = vld [vmem:[#allocation40_spill] sm:$0xff] }
 0x196   : > { %v7062_v7 = vmul.f32 %v6958_v49, %v619_v16  ;;  %v7065_v55 = vmul.f32 %v6961_v9, %v620_v43  ;;  %v588_v52 = vmul.f32 0.00390625, %v555_v4  ;;  %5516 = vmatpush1.bf16.msra.mxu1 %v5735_v62  ;;  %v649_v2 = vsub.f32 %v10143_v22, %v587_v60  ;;  %757 = vadd.xlane.f32.xlu1 %v756_v56  ;;  %v5744_v22 = vld [vmem:[#allocation8 + $0xc] ss:$24 sps:$4 sm:$0xff]  }
 0x197   : > { %10139 = vst [vmem:[#allocation34_spill] sm:$0xff] %v7056_v21  ;;  %10140 = vst [vmem:[#allocation35_spill] sm:$0xff] %v7059_v41  ;;  %v650_v25 = vsub.f32 %v10144_v46, %v587_v60  ;;  %v804_v15 = vadd.f32 %v712_v42, %v711_v51  ;;  %v681_v3 = vmul.f32 %v617_v40, %v617_v40  ;;  %2050 = vmatprep.subr.bf16.mxu0 %v5736_v47 }
 0x198   : > { %10141 = vst [vmem:[#allocation36_spill] sm:$0xff] %v7062_v7  ;;  %10142 = vst [vmem:[#allocation70_spill] sm:$0xff] %v7065_v55  ;;  %802 = vadd.xlane.f32.xlu0 %v801_v24  ;;  %v651_v44 = vsub.f32 %v10145_v11, %v588_v52  ;;  %v652_v7 = vsub.f32 %v10146_v58, %v588_v52  ;;  %v682_v21 = vmul.f32 %v618_v39, %v618_v39  ;;  %v5741_v52 = vld [vmem:[#allocation8 + $0x14] ss:$24 sps:$4 sm:$0xff]  }
 0x199   : > { %v683_v41 = vmul.f32 %v619_v16, %v619_v16  ;;  %v7072_v38 = vmul.f32 %v6958_v49, %v649_v2  ;;  %v7075_v62 = vmul.f32 %v6961_v9, %v650_v25  ;;  %v684_v14 = vmul.f32 %v620_v43, %v620_v43  ;;  %2051 = vmatpush1.bf16.msra.mxu0 %v5738_v59 }
 0x19a   : > { %v713_v4 = vmul.f32 %v649_v2, %v649_v2  ;;  %v7078_v56 = vmul.f32 %v6958_v49, %v651_v44  ;;  %v7081_v51 = vmul.f32 %v6961_v9, %v652_v7  ;;  %v759_v40 = vadd.f32 %v682_v21, %v681_v3  ;;  %805 = vadd.xlane.f32.xlu1 %v804_v15  ;;  %v10151_v3 = vld [vmem:[#allocation41_spill] sm:$0xff] }
 0x19b   : > { %10147 = vst [vmem:[#allocation37_spill] sm:$0xff] %v7072_v38  ;;  %10148 = vst [vmem:[#allocation38_spill] sm:$0xff] %v7075_v62  ;;  %v714_v60 = vmul.f32 %v650_v25, %v650_v25  ;;  %v762_v39 = vadd.f32 %v684_v14, %v683_v41  ;;  %v715_v16 = vmul.f32 %v651_v44, %v651_v44  ;;  %5501 = vmatprep.subr.bf16.mxu1 %v5736_v47  ;;  %v10153_v44 = vld [vmem:[#allocation43_spill] sm:$0xff]  ;;  %v10154_v14 = vld [vmem:[#allocation44_spill] sm:$0xff] }
 0x19c   : > { %10149 = vst [vmem:[#allocation39_spill] sm:$0xff] %v7078_v56  ;;  %10150 = vst [vmem:[#allocation40_spill] sm:$0xff] %v7081_v51  ;;  %v716_v42 = vmul.f32 %v652_v7, %v652_v7  ;;  %760 = vadd.xlane.f32.xlu0 %v759_v40  ;;  %5517 = vmatpush1.bf16.msra.mxu1 %v5738_v59  ;;  %v7085_v47 = vmul.f32 %v6958_v49, %v10151_v3  ;;  %v10152_v59 = vld [vmem:[#allocation42_spill] sm:$0xff]  ;;  %v459_v38 = vld [vmem:[#allocation7] sm:$0x3] }
 0x19d   : > { %v807_v24 = vadd.f32 %v714_v60, %v713_v4  ;;  %2406 = vmatprep.subr.bf16.mxu0 %v5741_v52  ;;  %2213 = vmatprep.subr.bf16.mxu1 %v5744_v22  ;;  %v7089_v11 = vmul.f32 %v6961_v9, %v10152_v59  ;;  %v7093_v58 = vmul.f32 %v6958_v49, %v10153_v44 }
 0x19e   : > { %763 = vadd.xlane.f32.xlu1 %v762_v39  ;;  %v810_v43 = vadd.f32 %v716_v42, %v715_v16  ;;  %v7097_v4 = vmul.f32 %v6961_v9, %v10154_v14  ;;  %v7101_v60 = vmul.f32 %v6958_v49, %v6794_v23  ;;  %v7105_v39 = vmul.f32 %v6961_v9, %v6797_v1 }
 0x19f   : > { %v7109_v16 = vmul.f32 %v6958_v49, %v6804_v45  ;;  %v7119_v52 = vmul.f32 %v6958_v49, %v6812_v10  ;;  %v7123_v23 = vmul.f32 %v6961_v9, %v6815_v28  ;;  %v7127_v45 = vmul.f32 %v6958_v49, %v6822_v17 }
 0x1a0   : > { %808 = vadd.xlane.f32.xlu0 %v807_v24  ;;  %v7137_v10 = vmul.f32 %v6958_v49, %v6830_v57  ;;  %v7141_v28 = vmul.f32 %v6961_v9, %v6837_v29  ;;  %v7147_v17 = vmul.f32 %v6958_v49, %v6840_v5  ;;  %v7151_v59 = vmul.f32 %v6961_v9, %v6847_v8 }
 0x1a1   : > { %v7156_v29 = vmul.f32 %v6958_v49, %v6850_v19  ;;  %v7233_v62 = vmul.f32 %v6958_v49, %v6938_v31 }
 0x1a2   : > { %811 = vadd.xlane.f32.xlu1 %v810_v43  ;;  %v7115_v43 = vmul.f32 %v6961_v9, %v6807_v48 }
 0x1a3   : > { %10173 = vst [vmem:[#allocation75_spill] sm:$0xff] %v7233_v62 }
 0x1ec   : > { %v719_v2 = vpop.xlane.xlu0 %718 }
 0x1ed   : > { %v814_v21 = vmul.f32 0.003921569, %v719_v2  ;;  %v10155_v2 = vld [vmem:[#allocation45_spill] sm:$0xff] }
 0x1ef   : > { %5835 = vrsqrt.f32 %v814_v21  ;;  %vm848_vm0 = vcmp.eq.f32.partialorder %v814_v21, inf  ;;  %vm850_vm1 = vcmp.eq.f32.partialorder %v814_v21, 0.0 }
 0x1f0   : > { %v767_v46 = vpop.xlane.xlu0 %766  ;;  %v722_v25 = vpop.xlane.xlu1 %721 }
 0x1f1   : > { %v815_v41 = vmul.f32 0.003921569, %v722_v25  ;;  %v7111_v42 = vmul.f32 0.003921569, %v767_v46  ;;  %v7131_v46 = vmul.f32 %v6961_v9, %v10155_v2 }
 0x1f3   : > { %5837 = vrsqrt.f32 %v815_v41  ;;  %vm855_vm2 = vcmp.eq.f32.partialorder %v815_v41, inf  ;;  %v858_v56 = vand.u32 2147483648, %v815_v41  ;;  %vm857_vm3 = vcmp.eq.f32.partialorder %v815_v41, 0.0 }
 0x1f4   : > { %v770_v7 = vpop.xlane.xlu1 %769  ;;  %v725_v15 = vpop.xlane.xlu0 %724  ;;  %5839 = vrsqrt.f32 %v7111_v42  ;;  %vm960_vm4 = vcmp.eq.f32.partialorder %v7111_v42, inf  ;;  %vm962_vm5 = vcmp.eq.f32.partialorder %v7111_v42, 0.0 }
 0x1f5   : > { %v7133_v48 = vmul.f32 0.003921569, %v770_v7  ;;  %v7143_v3 = vmul.f32 0.003921569, %v725_v15  ;;  %v851_v7 = vand.u32 2147483648, %v814_v21  ;;  %v7160_v15 = vmul.f32 %v6961_v9, %v6855_v13 }
 0x1f6   : > { %v7174_v13 = vmul.f32 %v6961_v9, %v6865_v34  ;;  %v10160_v34 = vld [vmem:[#allocation47_spill] sm:$0xff] }
 0x1f7   : > { %5841 = vrsqrt.f32 %v7133_v48  ;;  %vm967_vm6 = vcmp.eq.f32.partialorder %v7133_v48, inf  ;;  %vm862_vm7 = vcmp.eq.f32.partialorder %v7143_v3, inf  ;;  %vm969_vm9 = vcmp.eq.f32.partialorder %v7133_v48, 0.0 }
 0x1f8   : > { %v728_v24 = vpop.xlane.xlu1 %727  ;;  %v773_v22 = vpop.xlane.xlu0 %772  ;;  %5843 = vrsqrt.f32 %v7143_v3 }
 0x1f9   : > { %v5836_v40 = vpop.eup %5835  ;;  %v7162_v5 = vmul.f32 0.003921569, %v728_v24  ;;  %v7170_v19 = vmul.f32 0.003921569, %v773_v22  ;;  %v7185_v22 = vmul.f32 %v6961_v9, %v6875_v0 }
 0x1fa   : > { %v847_v1 = vmul.f32 %v5836_v40, %v814_v21  ;;  %v10156_v40 = vld [vmem:[#allocation46_spill] sm:$0xff] }
 0x1fb   : > { %v7166_v8 = vmul.f32 %v6958_v49, %v10156_v40  ;;  %5845 = vrsqrt.f32 %v7162_v5  ;;  %10159 = vst [vmem:[#allocation43_spill] sm:$0xff] %v7185_v22  ;;  %vm869_vm8 = vcmp.eq.f32.partialorder %v7162_v5, inf  ;;  %vm974_vm10 = vcmp.eq.f32.partialorder %v7170_v19, inf }
 0x1fc   : > { %v849_v25 = vsel %vm848_vm0, %v814_v21, %v847_v1  ;;  %v776_v57 = vpop.xlane.xlu1 %775  ;;  %5847 = vrsqrt.f32 %v7170_v19  ;;  %vm864_vm0 = vcmp.eq.f32.partialorder %v7143_v3, 0.0 }
 0x1fd   : > { %v5838_v44 = vpop.eup %5837  ;;  %v731_v14 = vpop.xlane.xlu0 %730  ;;  %10157 = vst [vmem:[#allocation41_spill] sm:$0xff] %v7166_v8  ;;  %v852_v2 = vsel %vm850_vm1, %v851_v7, %v849_v25  ;;  %v7176_v24 = vmul.f32 0.003921569, %v776_v57 }
 0x1fe   : > { %v854_v1 = vmul.f32 %v5838_v44, %v815_v41  ;;  %v7180_v44 = vmul.f32 %v6958_v49, %v6870_v26  ;;  %v1070_v51 = vadd.f32 1e-06, %v852_v2  ;;  %v7197_v26 = vmul.f32 %v6958_v49, %v6890_v35 }
 0x1ff   : > { %v7204_v0 = vmul.f32 0.003921569, %v731_v14  ;;  %v7208_v2 = vmul.f32 %v6958_v49, %v6898_v6  ;;  %v7216_v35 = vmul.f32 %v6958_v49, %v6912_v27  ;;  %5849 = vrsqrt.f32 %v7176_v24  ;;  %v10171_v6 = vld [vmem:[#allocation50_spill] sm:$0xff]  ;;  %v5840_v27 = vpop.eup %5839 }
 0x200   : > { %v856_v21 = vsel %vm855_vm2, %v815_v41, %v854_v1  ;;  %v734_v40 = vpop.xlane.xlu1 %733  ;;  %10158 = vst [vmem:[#allocation42_spill] sm:$0xff] %v7180_v44  ;;  %v7189_v1 = vmul.f32 %v6958_v49, %v10160_v34  ;;  %v7193_v41 = vmul.f32 %v6961_v9, %v6885_v20  ;;  %10163 = vst [vmem:[#allocation46_spill] sm:$0xff] %v7197_v26  ;;  %5851 = vrcp.f32 %v1070_v51  ;;  %v5745_v44 = vld [vmem:[#allocation8 + $0x40] ss:$24 sps:$4 sm:$0xff]  }
 0x201   : > { %v779_v25 = vpop.xlane.xlu0 %778  ;;  %v859_v7 = vsel %vm857_vm3, %v858_v56, %v856_v21  ;;  %v7201_v56 = vmul.f32 %v6961_v9, %v6895_v33  ;;  %10165 = vst [vmem:[#allocation71_spill] sm:$0xff] %v7208_v2  ;;  %v10166_v21 = vld [vmem:[#allocation48_spill] sm:$0xff]  ;;  %10168 = vst [vmem:[#allocation72_spill] sm:$0xff] %v7216_v35  ;;  %v7225_v14 = vmul.f32 %v6958_v49, %v6920_v54  ;;  %v7239_v55 = vmul.f32 0.003921569, %v734_v40  ;;  %v10175_v54 = vld [vmem:[#allocation53_spill] sm:$0xff]  ;;  %v5842_v31 = vpop.eup %5841 }
 0x202   : > { %10161 = vst [vmem:[#allocation44_spill] sm:$0xff] %v7189_v1  ;;  %10162 = vst [vmem:[#allocation45_spill] sm:$0xff] %v7193_v41  ;;  %v1071_v57 = vadd.f32 1e-06, %v859_v7  ;;  %v7212_v20 = vmul.f32 %v6961_v9, %v10166_v21  ;;  %v7221_v7 = vmul.f32 %v6961_v9, %v6917_v12  ;;  %v7229_v34 = vmul.f32 %v6961_v9, %v10171_v6  ;;  %v10177_v6 = vld [vmem:[#allocation54_spill] sm:$0xff] }
 0x203   : > { %10164 = vst [vmem:[#allocation47_spill] sm:$0xff] %v7201_v56  ;;  %10170 = vst [vmem:[#allocation74_spill] sm:$0xff] %v7225_v14  ;;  %v7237_v12 = vmul.f32 %v6961_v9, %v6943_v18  ;;  %v7243_v30 = vmul.f32 %v6958_v49, %v10175_v54  ;;  %v7247_v63 = vmul.f32 %v6961_v9, %v10177_v6  ;;  %v7250_v51 = vmul.f32 0.003921569, %v779_v25  ;;  %v5844_v54 = vpop.eup %5843 }
 0x204   : > { %10167 = vst [vmem:[#allocation48_spill] sm:$0xff] %v7212_v20  ;;  %v782_v33 = vpop.xlane.xlu1 %781  ;;  %10169 = vst [vmem:[#allocation73_spill] sm:$0xff] %v7221_v7  ;;  %5853 = vrcp.f32 %v1071_v57  ;;  %v7256_v57 = vrot.slane %v459_v38, %v10179_v32  ;;  %v7259_v49 = vrot.slane %v459_v38, %v10180_v53  ;;  %v959_v9 = vmul.f32 %v5840_v27, %v7111_v42 }
 0x205   : > { %10172 = vst [vmem:[#allocation50_spill] sm:$0xff] %v7229_v34  ;;  %10174 = vst [vmem:[#allocation76_spill] sm:$0xff] %v7237_v12  ;;  %5855 = vrsqrt.f32 %v7204_v0  ;;  %v7253_v18 = vmul.f32 0.003921569, %v782_v33  ;;  %v963_v25 = vand.u32 2147483648, %v7111_v42  ;;  %v5846_v38 = vpop.eup %5845  ;;  %v966_v53 = vmul.f32 %v5842_v31, %v7133_v48 }
 0x206   : > { %v737_v21 = vpop.xlane.xlu0 %736  ;;  %10176 = vst [vmem:[#allocation53_spill] sm:$0xff] %v7243_v30  ;;  %10178 = vst [vmem:[#allocation54_spill] sm:$0xff] %v7247_v63  ;;  %5857 = vrsqrt.f32 %v7239_v55  ;;  %v861_v37 = vmul.f32 %v5844_v54, %v7143_v3  ;;  %v5848_v61 = vpop.eup %5847  ;;  %v961_v31 = vsel %vm960_vm4, %v7111_v42, %v959_v9  ;;  %vm981_vm11 = vcmp.eq.f32.partialorder %v7176_v24, inf }
 0x207   : > { %5859 = vrsqrt.f32 %v7250_v51  ;;  %v7272_v27 = vmul.f32 0.003921569, %v737_v21  ;;  %v868_v33 = vmul.f32 %v5846_v38, %v7162_v5  ;;  %vm876_vm12 = vcmp.eq.f32.partialorder %v7204_v0, inf }
 0x208   : > { %v740_v40 = vpop.xlane.xlu1 %739  ;;  %5861 = vrsqrt.f32 %v7253_v18  ;;  %v968_v9 = vsel %vm967_vm6, %v7133_v48, %v966_v53  ;;  %v7301_v38 = vsel %vm862_vm7, %v7143_v3, %v861_v37  ;;  %vm883_vm13 = vcmp.eq.f32.partialorder %v7239_v55, inf }
 0x209   : > { %v7284_v21 = vmul.f32 0.003921569, %v740_v40  ;;  %v5850_v54 = vpop.eup %5849  ;;  %5863 = vrsqrt.f32 %v7272_v27  ;;  %v964_v37 = vsel %vm962_vm5, %v963_v25, %v961_v31  ;;  %vm988_vm14 = vcmp.eq.f32.partialorder %v7250_v51, inf }
 0x20a   : > { %v785_v6 = vpop.xlane.xlu0 %784  ;;  %v5852_v62 = vpop.eup %5851  ;;  %vm995_vm15 = vcmp.eq.f32.partialorder %v7253_v18, inf  ;;  %vm890_vm1 = vcmp.eq.f32.partialorder %v7272_v27, inf  ;;  %v10181_v7 = vand.u32 2147483648, %v7133_v48  ;;  %vm871_vm3 = vcmp.eq.f32.partialorder %v7162_v5, 0.0 }
 0x20b   : > { %v7289_v63 = vmul.f32 0.003921569, %v785_v6  ;;  %v973_v6 = vmul.f32 %v5848_v61, %v7170_v19  ;;  %5865 = vrsqrt.f32 %v7284_v21  ;;  %v7317_v61 = vsel %vm869_vm8, %v7162_v5, %v868_v33 }
 0x20c   : > { %v788_v32 = vpop.xlane.xlu1 %787  ;;  %v1242_v25 = vmul.f32 %v5852_v62, %v7089_v11  ;;  %vm897_vm2 = vcmp.eq.f32.partialorder %v7284_v21, inf  ;;  %vm976_vm5 = vcmp.eq.f32.partialorder %v7170_v19, 0.0  ;;  %vm983_vm7 = vcmp.eq.f32.partialorder %v7176_v24, 0.0 }
 0x20d   : > { %v7296_v40 = vmul.f32 0.003921569, %v788_v32  ;;  %5867 = vrsqrt.f32 %v7289_v63  ;;  %v7332_v31 = vsel %vm974_vm10, %v7170_v19, %v973_v6  ;;  %v1241_v6 = vmul.f32 %v5852_v62, %v7085_v47 }
 0x20e   : > { %v743_v50 = vpop.xlane.xlu0 %742  ;;  %v5854_v12 = vpop.eup %5853  ;;  %v1317_v62 = vadd.f32 %v7256_v57, %v1242_v25  ;;  %v1086_v47 = vadd.f32 1e-06, %v964_v37  ;;  %vm1002_vm4 = vcmp.eq.f32.partialorder %v7289_v63, inf }
 0x20f   : > { %v7305_v14 = vmul.f32 0.003921569, %v743_v50  ;;  %v5856_v53 = vpop.eup %5855  ;;  %v1244_v36 = vmul.f32 %v5854_v12, %v7105_v39  ;;  %5869 = vrsqrt.f32 %v7296_v40  ;;  %v1243_v26 = vmul.f32 %v5854_v12, %v7101_v60 }
 0x210   : > { %v746_v34 = vpop.xlane.xlu1 %745  ;;  %v5858_v33 = vpop.eup %5857  ;;  %v1316_v25 = vadd.f32 %v7259_v49, %v1241_v6  ;;  %vm1009_vm6 = vcmp.eq.f32.partialorder %v7296_v40, inf }
 0x211   : > { %v7310_v32 = vmul.f32 0.003921569, %v746_v34  ;;  %v980_v34 = vmul.f32 %v5850_v54, %v7176_v24  ;;  %5871 = vrsqrt.f32 %v7305_v14  ;;  %v5860_v30 = vpop.eup %5859  ;;  %v1319_v20 = vadd.f32 %v7256_v57, %v1244_v36 }
 0x212   : > { %v5862_v39 = vpop.eup %5861  ;;  %v882_v36 = vmul.f32 %v5858_v33, %v7239_v55  ;;  %v1318_v33 = vadd.f32 %v7259_v49, %v1243_v26  ;;  %vm904_vm8 = vcmp.eq.f32.partialorder %v7305_v14, inf }
 0x213   : > { %v791_v35 = vpop.xlane.xlu0 %790  ;;  %5873 = vrsqrt.f32 %v7310_v32  ;;  %v5864_v12 = vpop.eup %5863  ;;  %v994_v37 = vmul.f32 %v5862_v39, %v7253_v18 }
 0x214   : > { %v7321_v50 = vmul.f32 0.003921569, %v791_v35  ;;  %v875_v35 = vmul.f32 %v5856_v53, %v7204_v0  ;;  %v971_v53 = vsel %vm969_vm9, %v10181_v7, %v968_v9  ;;  %v987_v9 = vmul.f32 %v5860_v30, %v7250_v51  ;;  %v5739_v30 = vld [vmem:[#allocation8 + $0x10] ss:$24 sps:$4 sm:$0xff]  }
 0x215   : > { %v794_v54 = vpop.xlane.xlu1 %793  ;;  %v5866_v60 = vpop.eup %5865  ;;  %v1087_v39 = vadd.f32 1e-06, %v971_v53  ;;  %v7386_v6 = vsel %vm883_vm13, %v7239_v55, %v882_v36  ;;  %v889_v26 = vmul.f32 %v5864_v12, %v7272_v27  ;;  %vm911_vm9 = vcmp.eq.f32.partialorder %v7310_v32, inf }
 0x216   : > { %v7340_v11 = vmul.f32 0.003921569, %v794_v54  ;;  %5875 = vrsqrt.f32 %v7321_v50  ;;  %v7355_v54 = vsel %vm981_vm11, %v7176_v24, %v980_v34  ;;  %v7363_v48 = vsel %vm876_vm12, %v7204_v0, %v875_v35 }
 0x217   : > { %v749_v42 = vpop.xlane.xlu0 %748  ;;  %v7372_v34 = vpack.c.bf16 %v1319_v20, %v1317_v62  ;;  %v5868_v20 = vpop.eup %5867  ;;  %v7389_v62 = vpack.c.bf16 %v1318_v33, %v1316_v25  ;;  %v7395_v53 = vsel %vm988_vm14, %v7250_v51, %v987_v9  ;;  %v7404_v25 = vsel %vm995_vm15, %v7253_v18, %v994_v37 }
 0x218   : > { %v7348_v2 = vmul.f32 0.003921569, %v749_v42  ;;  %5877 = vrsqrt.f32 %v7340_v11  ;;  %v896_v33 = vmul.f32 %v5866_v60, %v7284_v21  ;;  %v7417_v60 = vsel %vm890_vm1, %v7272_v27, %v889_v26 }
 0x219   : > { %10182 = vst [vmem:[#allocation77_spill] sm:$0xff] %v7372_v34  ;;  %2052 = vmatprep.mubr.bf16.mxu0 %v7372_v34  ;;  %10183 = vst [vmem:[#allocation78_spill] sm:$0xff] %v7389_v62  ;;  %v5870_v34 = vpop.eup %5869  ;;  %vm1016_vm10 = vcmp.eq.f32.partialorder %v7321_v50, inf  ;;  %v10185_v26 = vand.u32 2147483648, %v7162_v5  ;;  %vm1023_vm11 = vcmp.eq.f32.partialorder %v7340_v11, inf  ;;  %vm878_vm12 = vcmp.eq.f32.partialorder %v7204_v0, 0.0 }
 0x21a   : > { %v752_v7 = vpop.xlane.xlu1 %751  ;;  %5879 = vrsqrt.f32 %v7348_v2  ;;  %2053 = vmatmul.mubr.bf16.vlgmr.msra.gmra.mrb[0].mxu0 %v7389_v62  ;;  %v7438_v62 = vsel %vm897_vm2, %v7284_v21, %v896_v33  ;;  %vm918_vm13 = vcmp.eq.f32.partialorder %v7348_v2, inf  ;;  %vm885_vm14 = vcmp.eq.f32.partialorder %v7239_v55, 0.0 }
 0x21b   : > { %v7377_v35 = vmul.f32 0.003921569, %v752_v7  ;;  %5881 = vrcp.f32 %v1086_v47  ;;  %v5747_v7 = vld [vmem:[#allocation8 + $0x44] ss:$24 sps:$4 sm:$0xff]   ;;  %v5872_v12 = vpop.eup %5871  ;;  %v1001_v47 = vmul.f32 %v5868_v20, %v7289_v63  ;;  %2407 = vmatpush1.bf16.msra.mxu0 %v5739_v30  ;;  %v10184_v20 = vand.u32 2147483648, %v7143_v3 }
 0x21c   : > { %v797_v42 = vpop.xlane.xlu0 %796  ;;  %2408 = vmatprep.subr.bf16.mxu0 %v5747_v7  ;;  %v903_v3 = vmul.f32 %v5872_v12, %v7305_v14  ;;  %vm990_vm2 = vcmp.eq.f32.partialorder %v7250_v51, 0.0 }
 0x21d   : > { %5883 = vrsqrt.f32 %v7377_v35  ;;  %v7399_v36 = vmul.f32 0.003921569, %v797_v42  ;;  %v5874_v9 = vpop.eup %5873  ;;  %v866_v30 = vsel %vm864_vm0, %v10184_v20, %v7301_v38  ;;  %v7448_v5 = vsel %vm1002_vm4, %v7289_v63, %v1001_v47  ;;  %v5751_v20 = vld [vmem:[#allocation8 + $0x70] ss:$24 sps:$4 sm:$0xff]  }
 0x21e   : > { %v800_v56 = vpop.xlane.xlu1 %799  ;;  %5885 = vrcp.f32 %v1087_v39  ;;  %v5753_v39 = vld [vmem:[#allocation8 + $0x74] ss:$24 sps:$4 sm:$0xff]   ;;  %10186 = vst [vmem:[#allocation79_spill] sm:$0xff] %v7448_v5  ;;  %v1072_v12 = vadd.f32 1e-06, %v866_v30  ;;  %v10187_v47 = vand.u32 2147483648, %v7170_v19  ;;  %v7472_v19 = vsel %vm904_vm8, %v7305_v14, %v903_v3 }
 0x21f   : > { %v7412_v22 = vmul.f32 0.003921569, %v800_v56  ;;  %v1008_v56 = vmul.f32 %v5870_v34, %v7296_v40  ;;  %5887 = vrsqrt.f32 %v7399_v36  ;;  %2409 = vmatpush1.bf16.msra.mxu0 %v5745_v44  ;;  %vm925_vm15 = vcmp.eq.f32.partialorder %v7377_v35, inf }
 0x220   : > { %v5876_v37 = vpop.eup %5875  ;;  %2410 = vmatprep.subr.bf16.mxu0 %v5753_v39  ;;  %vm1030_vm0 = vcmp.eq.f32.partialorder %v7399_v36, inf  ;;  %vm997_vm4 = vcmp.eq.f32.partialorder %v7253_v18, 0.0  ;;  %vm899_vm8 = vcmp.eq.f32.partialorder %v7284_v21, 0.0 }
 0x221   : > { %v755_v1 = vpop.xlane.xlu0 %754  ;;  %5889 = vrsqrt.f32 %v7412_v22  ;;  %v1015_v33 = vmul.f32 %v5876_v37, %v7321_v50  ;;  %v5759_v37 = vld [vmem:[#allocation8 + $0xa4] ss:$24 sps:$4 sm:$0xff]   ;;  %v7465_v44 = vsel %vm1009_vm6, %v7296_v40, %v1008_v56  ;;  %vm1037_vm1 = vcmp.eq.f32.partialorder %v7412_v22, inf }
 0x222   : > { %v7420_v41 = vmul.f32 0.003921569, %v755_v1  ;;  %v873_v1 = vsel %vm871_vm3, %v10185_v26, %v7317_v61  ;;  %v5878_v34 = vpop.eup %5877  ;;  %v910_v61 = vmul.f32 %v5874_v9, %v7310_v32  ;;  %v978_v9 = vsel %vm976_vm5, %v10187_v47, %v7332_v31  ;;  %10188 = vst [vmem:[#allocation80_spill] sm:$0xff] %v7465_v44  ;;  %v5757_v44 = vld [vmem:[#allocation8 + $0xa0] ss:$24 sps:$4 sm:$0xff]  }
 0x223   : > { %v758_v7 = vpop.xlane.xlu1 %757  ;;  %v1073_v42 = vadd.f32 1e-06, %v873_v1  ;;  %2411 = vmatpush1.bf16.msra.mxu0 %v5751_v20  ;;  %v10189_v47 = vand.u32 2147483648, %v7176_v24  ;;  %v1088_v30 = vadd.f32 1e-06, %v978_v9 }
 0x224   : > { %v5880_v38 = vpop.eup %5879  ;;  %5891 = vrsqrt.f32 %v7420_v41  ;;  %v7454_v8 = vmul.f32 0.003921569, %v758_v7  ;;  %v7487_v3 = vsel %vm911_vm9, %v7310_v32, %v910_v61  ;;  %2412 = vmatprep.subr.bf16.mxu0 %v5759_v37  ;;  %v5765_v24 = vld [vmem:[#allocation8 + $0xd4] ss:$24 sps:$4 sm:$0xff]   ;;  %v5763_v31 = vld [vmem:[#allocation8 + $0xd0] ss:$24 sps:$4 sm:$0xff]  }
 0x225   : > { %v803_v26 = vpop.xlane.xlu0 %802  ;;  %v5882_v5 = vpop.eup %5881  ;;  %5893 = vrcp.f32 %v1072_v12  ;;  %v985_v12 = vsel %vm983_vm7, %v10189_v47, %v7355_v54  ;;  %v917_v20 = vmul.f32 %v5880_v38, %v7348_v2  ;;  %vm932_vm3 = vcmp.eq.f32.partialorder %v7420_v41, inf }
 0x226   : > { %5895 = vrcp.f32 %v1073_v42  ;;  %v7475_v1 = vmul.f32 0.003921569, %v803_v26  ;;  %v1274_v7 = vmul.f32 %v5882_v5, %v7097_v4  ;;  %v1273_v56 = vmul.f32 %v5882_v5, %v7093_v58 }
 0x227   : > { %v5884_v39 = vpop.eup %5883  ;;  %v7492_v4 = vsel %vm1016_vm10, %v7321_v50, %v1015_v33  ;;  %5897 = vrsqrt.f32 %v7454_v8  ;;  %v806_v42 = vpop.xlane.xlu1 %805  ;;  %v1022_v5 = vmul.f32 %v5878_v34, %v7340_v11  ;;  %v1089_v47 = vadd.f32 1e-06, %v985_v12  ;;  %2413 = vmatpush1.bf16.msra.mxu0 %v5757_v44  ;;  %v5771_v12 = vld [vmem:[#allocation8 + $0x104] ss:$24 sps:$4 sm:$0xff]  }
 0x228   : > { %10190 = vst [vmem:[#allocation81_spill] sm:$0xff] %v7492_v4  ;;  %v5886_v54 = vpop.eup %5885  ;;  %v924_v61 = vmul.f32 %v5884_v39, %v7377_v35  ;;  %5899 = vrsqrt.f32 %v7475_v1  ;;  %v1349_v34 = vadd.f32 %v7256_v57, %v1274_v7  ;;  %v1348_v38 = vadd.f32 %v7259_v49, %v1273_v56  ;;  %2414 = vmatprep.subr.bf16.mxu0 %v5765_v24 }
 0x229   : > { %v761_v26 = vpop.xlane.xlu0 %760  ;;  %v1276_v9 = vmul.f32 %v5886_v54, %v7115_v43  ;;  %v1275_v37 = vmul.f32 %v5886_v54, %v7109_v16  ;;  %v5888_v58 = vpop.eup %5887  ;;  %5901 = vrcp.f32 %v1088_v30  ;;  %v7507_v39 = vmul.f32 0.003921569, %v806_v42  ;;  %v5742_v54 = vld [vmem:[#allocation8 + $0x8] ss:$24 sps:$4 sm:$0xff]  }
 0x22a   : > { %5903 = vrcp.f32 %v1089_v47  ;;  %v7511_v16 = vmul.f32 0.003921569, %v761_v26  ;;  %v7517_v30 = vsel %vm1023_vm11, %v7340_v11, %v1022_v5  ;;  %v7525_v56 = vsel %vm918_vm13, %v7348_v2, %v917_v20  ;;  %v5750_v47 = vld [vmem:[#allocation8 + $0x3c] ss:$24 sps:$4 sm:$0xff]  }
 0x22b   : > { %v5890_v4 = vpop.eup %5889  ;;  %v1351_v33 = vadd.f32 %v7256_v57, %v1276_v9  ;;  %v1350_v43 = vadd.f32 %v7259_v49, %v1275_v37  ;;  %5905 = vrsqrt.f32 %v7507_v39  ;;  %v10191_v5 = vand.u32 2147483648, %v7204_v0  ;;  %2415 = vmatpush1.bf16.msra.mxu0 %v5763_v31  ;;  %v764_v0 = vpop.xlane.xlu1 %763 }
 0x22c   : > { %v7540_v37 = vsel %vm925_vm15, %v7377_v35, %v924_v61  ;;  %v1029_v20 = vmul.f32 %v5888_v58, %v7399_v36  ;;  %vm939_vm5 = vcmp.eq.f32.partialorder %v7454_v8, inf  ;;  %5907 = vrsqrt.f32 %v7511_v16  ;;  %2416 = vmatprep.subr.bf16.mxu0 %v5771_v12  ;;  %v5748_v12 = vld [vmem:[#allocation8 + $0x38] ss:$24 sps:$4 sm:$0xff]  }
 0x22d   : > { %v7527_v42 = vpack.c.bf16 %v1351_v33, %v1349_v34  ;;  %v7529_v24 = vpack.c.bf16 %v1350_v43, %v1348_v38  ;;  %v880_v26 = vsel %vm878_vm12, %v10191_v5, %v7363_v48  ;;  %v1036_v33 = vmul.f32 %v5890_v4, %v7412_v22  ;;  %v5769_v48 = vld [vmem:[#allocation8 + $0x100] ss:$24 sps:$4 sm:$0xff]   ;;  %v5777_v5 = vld [vmem:[#allocation8 + $0x134] ss:$24 sps:$4 sm:$0xff]   ;;  %v809_v44 = vpop.xlane.xlu0 %808 }
 0x22e   : > { %v5892_v7 = vpop.eup %5891  ;;  %v10192_v4 = vand.u32 2147483648, %v7239_v55  ;;  %vm1044_vm6 = vcmp.eq.f32.partialorder %v7475_v1, inf  ;;  %vm892_vm7 = vcmp.eq.f32.partialorder %v7272_v27, 0.0  ;;  %vm1004_vm9 = vcmp.eq.f32.partialorder %v7289_v63, 0.0 }
 0x22f   : > { %v5894_v9 = vpop.eup %5893  ;;  %2132 = vmatprep.mubr.bf16.mxu1 %v7527_v42  ;;  %v931_v55 = vmul.f32 %v5892_v7, %v7420_v41  ;;  %2417 = vmatpush1.bf16.msra.mxu0 %v5769_v48  ;;  %v7573_v7 = vsel %vm1030_vm0, %v7399_v36, %v1029_v20  ;;  %vm1051_vm10 = vcmp.eq.f32.partialorder %v7507_v39, inf  ;;  %v812_v20 = vpop.xlane.xlu1 %811  ;;  %vm1011_vm11 = vcmp.eq.f32.partialorder %v7296_v40, 0.0 }
 0x230   : > { %v5896_v38 = vpop.eup %5895  ;;  %v1246_v43 = vmul.f32 %v5894_v9, %v7123_v23  ;;  %v1245_v61 = vmul.f32 %v5894_v9, %v7119_v52  ;;  %v887_v58 = vsel %vm885_vm14, %v10192_v4, %v7386_v6  ;;  %2133 = vmatmul.mubr.bf16.vlgmr.msra.gmra.mrb[0].mxu1 %v7529_v24  ;;  %v1074_v23 = vadd.f32 1e-06, %v880_v26  ;;  %2418 = vmatprep.subr.bf16.mxu0 %v5777_v5  ;;  %v5754_v5 = vld [vmem:[#allocation8 + $0x68] ss:$24 sps:$4 sm:$0xff]  }
 0x231   : > { %v1248_v31 = vmul.f32 %v5896_v38, %v7131_v46  ;;  %v1247_v34 = vmul.f32 %v5896_v38, %v7127_v45  ;;  %v1075_v52 = vadd.f32 1e-06, %v887_v58  ;;  %v5898_v9 = vpop.eup %5897  ;;  %2214 = vmatpush1.bf16.msra.mxu1 %v5742_v54  ;;  %v1047_v4 = vand.u32 2147483648, %v7475_v1  ;;  %v5756_v58 = vld [vmem:[#allocation8 + $0x6c] ss:$24 sps:$4 sm:$0xff]  }
 0x232   : > { %v1321_v6 = vadd.f32 %v7256_v57, %v1246_v43  ;;  %v7564_v46 = vmul.f32 0.003921569, %v764_v0  ;;  %v1320_v26 = vadd.f32 %v7259_v49, %v1245_v61  ;;  %2215 = vmatprep.subr.bf16.mxu1 %v5750_v47  ;;  %5909 = vrcp.f32 %v1074_v23  ;;  %v5900_v54 = vpop.eup %5899 }
 0x233   : > { %v1323_v45 = vadd.f32 %v7256_v57, %v1248_v31  ;;  %v1322_v38 = vadd.f32 %v7259_v49, %v1247_v34  ;;  %v7578_v0 = vsel %vm1037_vm1, %v7412_v22, %v1036_v33  ;;  %5911 = vrcp.f32 %v1075_v52  ;;  %v5902_v47 = vpop.eup %5901  ;;  %v5775_v31 = vld [vmem:[#allocation8 + $0x130] ss:$24 sps:$4 sm:$0xff]  }
 0x234   : > { %v938_v43 = vmul.f32 %v5898_v9, %v7454_v8  ;;  %v5904_v23 = vpop.eup %5903  ;;  %v1278_v33 = vmul.f32 %v5902_v47, %v7141_v28  ;;  %v1277_v52 = vmul.f32 %v5902_v47, %v7137_v10  ;;  %5913 = vrsqrt.f32 %v7564_v46  ;;  %2419 = vmatpush1.bf16.msra.mxu0 %v5775_v31 }
 0x235   : > { %v7581_v34 = vpack.c.bf16 %v1323_v45, %v1321_v6  ;;  %v7583_v48 = vpack.c.bf16 %v1322_v38, %v1320_v26  ;;  %2216 = vmatpush1.bf16.msra.mxu1 %v5748_v12  ;;  %v7591_v6 = vmul.f32 0.003921569, %v809_v44  ;;  %v5783_v45 = vld [vmem:[#allocation8 + $0x164] ss:$24 sps:$4 sm:$0xff]   ;;  %v5906_v26 = vpop.eup %5905  ;;  %vm906_vm12 = vcmp.eq.f32.partialorder %v7305_v14, 0.0 }
 0x236   : > { %v7597_v9 = vsel %vm932_vm3, %v7420_v41, %v931_v55  ;;  %v1280_v28 = vmul.f32 %v5904_v23, %v7151_v59  ;;  %v1279_v10 = vmul.f32 %v5904_v23, %v7147_v17  ;;  %2217 = vmatprep.subr.bf16.mxu1 %v5756_v58  ;;  %vm946_vm13 = vcmp.eq.f32.partialorder %v7511_v16, inf  ;;  %v5762_v44 = vld [vmem:[#allocation8 + $0x9c] ss:$24 sps:$4 sm:$0xff]   ;;  %v5908_v61 = vpop.eup %5907  ;;  %2420 = vmatprep.subr.bf16.mxu0 %v5783_v45  ;;  %v5768_v45 = vld [vmem:[#allocation8 + $0xcc] ss:$24 sps:$4 sm:$0xff]  }
 0x237   : > { %2062 = vmatprep.mubr.bf16.mxu0 %v7581_v34  ;;  %vm913_vm14 = vcmp.eq.f32.partialorder %v7310_v32, 0.0  ;;  %v1043_v12 = vmul.f32 %v5900_v54, %v7475_v1  ;;  %v1050_v38 = vmul.f32 %v5906_v26, %v7507_v39  ;;  %v10193_v55 = vand.u32 2147483648, %v7250_v51  ;;  %v5781_v26 = vld [vmem:[#allocation8 + $0x160] ss:$24 sps:$4 sm:$0xff]  }
 0x238   : > { %2063 = vmatmul.mubr.bf16.gmra.mrb[4].mxu0 %v7583_v48  ;;  %v7612_v47 = vmul.f32 0.003921569, %v812_v20  ;;  %vm1018_vm15 = vcmp.eq.f32.partialorder %v7321_v50, 0.0  ;;  %v1353_v17 = vadd.f32 %v7256_v57, %v1278_v33  ;;  %v1355_v58 = vadd.f32 %v7256_v57, %v1280_v28  ;;  %v5789_v33 = vld [vmem:[#allocation8 + $0x194] ss:$24 sps:$4 sm:$0xff]  }
 0x239   : > { %v992_v59 = vsel %vm990_vm2, %v10193_v55, %v7395_v53  ;;  %v1352_v23 = vadd.f32 %v7259_v49, %v1277_v52  ;;  %v1354_v54 = vadd.f32 %v7259_v49, %v1279_v10  ;;  %vm1025_vm0 = vcmp.eq.f32.partialorder %v7340_v11, 0.0  ;;  %2218 = vmatpush1.bf16.msra.mxu1 %v5754_v5  ;;  %v5760_v5 = vld [vmem:[#allocation8 + $0x98] ss:$24 sps:$4 sm:$0xff]   ;;  %2421 = vmatpush1.bf16.msra.mxu0 %v5781_v26 }
 0x23a   : > { %v7623_v51 = vsel %vm939_vm5, %v7454_v8, %v938_v43  ;;  %v949_v53 = vand.u32 2147483648, %v7511_v16  ;;  %5915 = vrsqrt.f32 %v7591_v6  ;;  %v10194_v20 = vand.u32 2147483648, %v7253_v18  ;;  %2219 = vmatprep.subr.bf16.mxu1 %v5762_v44  ;;  %2422 = vmatprep.subr.bf16.mxu0 %v5789_v33 }
 0x23b   : > { %vm920_vm1 = vcmp.eq.f32.partialorder %v7348_v2, 0.0  ;;  %vm927_vm2 = vcmp.eq.f32.partialorder %v7377_v35, 0.0  ;;  %v7634_v52 = vpack.c.bf16 %v1355_v58, %v1353_v17  ;;  %v7636_v43 = vpack.c.bf16 %v1354_v54, %v1352_v23  ;;  %v5787_v23 = vld [vmem:[#allocation8 + $0x190] ss:$24 sps:$4 sm:$0xff]  }
 0x23c   : > { %v999_v31 = vsel %vm997_vm4, %v10194_v20, %v7404_v25  ;;  %v1090_v28 = vadd.f32 1e-06, %v992_v59  ;;  %v7641_v55 = vsel %vm1044_vm6, %v7475_v1, %v1043_v12  ;;  %v7646_v18 = vsel %vm1051_vm10, %v7507_v39, %v1050_v38  ;;  %v5910_v44 = vpop.eup %5909 }
 0x23d   : > { %v1091_v10 = vadd.f32 1e-06, %v999_v31  ;;  %vm953_vm3 = vcmp.eq.f32.partialorder %v7564_v46, inf  ;;  %v956_v25 = vand.u32 2147483648, %v7564_v46  ;;  %5917 = vrsqrt.f32 %v7612_v47  ;;  %2142 = vmatprep.mubr.bf16.mxu1 %v7634_v52  ;;  %v5912_v54 = vpop.eup %5911  ;;  %2220 = vmatpush1.bf16.msra.mxu1 %v5760_v5  ;;  %v5766_v31 = vld [vmem:[#allocation8 + $0xc8] ss:$24 sps:$4 sm:$0xff]  }
 0x23e   : > { %v945_v59 = vmul.f32 %v5908_v61, %v7511_v16  ;;  %5919 = vrcp.f32 %v1090_v28  ;;  %v10195_v12 = vand.u32 2147483648, %v7272_v27  ;;  %v10196_v17 = vand.u32 2147483648, %v7284_v21  ;;  %2143 = vmatmul.mubr.bf16.gmra.mrb[4].mxu1 %v7636_v43  ;;  %2221 = vmatprep.subr.bf16.mxu1 %v5768_v45 }
 0x23f   : > { %vm1032_vm4 = vcmp.eq.f32.partialorder %v7399_v36, 0.0  ;;  %v1250_v61 = vmul.f32 %v5910_v44, %v7160_v15  ;;  %v1249_v20 = vmul.f32 %v5910_v44, %v7156_v29  ;;  %5921 = vrcp.f32 %v1091_v10  ;;  %v5914_v29 = vpop.eup %5913  ;;  %2423 = vmatpush1.bf16.msra.mxu0 %v5787_v23 }
 0x240   : > { %v894_v38 = vsel %vm892_vm7, %v10195_v12, %v7417_v60  ;;  %v901_v58 = vsel %vm899_vm8, %v10196_v17, %v7438_v62  ;;  %v5795_v60 = vld [vmem:[#allocation8 + $0x1c4] ss:$24 sps:$4 sm:$0xff]   ;;  %vm1039_vm5 = vcmp.eq.f32.partialorder %v7412_v22, 0.0  ;;  %v1252_v21 = vmul.f32 %v5912_v54, %v7174_v13 }
 0x241   : > { %v1076_v27 = vadd.f32 1e-06, %v894_v38  ;;  %v10197_v62 = vld [vmem:[#allocation41_spill] sm:$0xff]  ;;  %v1077_v28 = vadd.f32 1e-06, %v901_v58  ;;  %v10198_v12 = vld [vmem:[#allocation79_spill] sm:$0xff]  ;;  %v1325_v10 = vadd.f32 %v7256_v57, %v1250_v61  ;;  %v1324_v33 = vadd.f32 %v7259_v49, %v1249_v20  ;;  %2424 = vmatprep.subr.bf16.mxu0 %v5795_v60  ;;  %2222 = vmatpush1.bf16.msra.mxu1 %v5766_v31 }
 0x242   : > { %v1251_v26 = vmul.f32 %v5912_v54, %v10197_v62  ;;  %v10199_v17 = vand.u32 2147483648, %v7289_v63  ;;  %v1061_v44 = vand.u32 2147483648, %v7591_v6  ;;  %v5774_v13 = vld [vmem:[#allocation8 + $0xfc] ss:$24 sps:$4 sm:$0xff]   ;;  %v1327_v5 = vadd.f32 %v7256_v57, %v1252_v21  ;;  %v5793_v61 = vld [vmem:[#allocation8 + $0x1c0] ss:$24 sps:$4 sm:$0xff]  }
 0x243   : > { %5923 = vrcp.f32 %v1076_v27  ;;  %v10200_v58 = vld [vmem:[#allocation80_spill] sm:$0xff]  ;;  %v10201_v54 = vand.u32 2147483648, %v7296_v40  ;;  %v7688_v20 = vsel %vm946_vm13, %v7511_v16, %v945_v59  ;;  %v10202_v21 = vand.u32 2147483648, %v7305_v14  ;;  %2223 = vmatprep.subr.bf16.mxu1 %v5774_v13  ;;  %2425 = vmatpush1.bf16.msra.mxu0 %v5793_v61 }
 0x244   : > { %v1006_v15 = vsel %vm1004_vm9, %v10199_v17, %v10198_v12  ;;  %v1326_v38 = vadd.f32 %v7259_v49, %v1251_v26  ;;  %5925 = vrcp.f32 %v1077_v28  ;;  %v5801_v26 = vld [vmem:[#allocation8 + $0x1f4] ss:$24 sps:$4 sm:$0xff]   ;;  %v7695_v28 = vpack.c.bf16 %v1327_v5, %v1325_v10  ;;  %v5772_v12 = vld [vmem:[#allocation8 + $0xf8] ss:$24 sps:$4 sm:$0xff]  }
 0x245   : > { %v1013_v63 = vsel %vm1011_vm11, %v10201_v54, %v10200_v58  ;;  %v1092_v45 = vadd.f32 1e-06, %v1006_v15  ;;  %v908_v62 = vsel %vm906_vm12, %v10202_v21, %v7472_v19  ;;  %v952_v23 = vmul.f32 %v5914_v29, %v7564_v46  ;;  %v5916_v15 = vpop.eup %5915  ;;  %v5780_v14 = vld [vmem:[#allocation8 + $0x12c] ss:$24 sps:$4 sm:$0xff]   ;;  %v5799_v5 = vld [vmem:[#allocation8 + $0x1f0] ss:$24 sps:$4 sm:$0xff]   ;;  %2426 = vmatprep.subr.bf16.mxu0 %v5801_v26  ;;  %2224 = vmatpush1.bf16.msra.mxu1 %v5772_v12 }
 0x246   : > { %v1093_v27 = vadd.f32 1e-06, %v1013_v63  ;;  %v7697_v40 = vpack.c.bf16 %v1326_v38, %v1324_v33  ;;  %v10203_v59 = vand.u32 2147483648, %v7310_v32  ;;  %vm934_vm6 = vcmp.eq.f32.partialorder %v7420_v41, 0.0  ;;  %v10204_v10 = vld [vmem:[#allocation81_spill] sm:$0xff]  ;;  %2072 = vmatprep.mubr.bf16.mxu0 %v7695_v28  ;;  %2225 = vmatprep.subr.bf16.mxu1 %v5780_v14 }
 0x247   : > { %5927 = vrcp.f32 %v1092_v45  ;;  %v1078_v19 = vadd.f32 1e-06, %v908_v62  ;;  %v10205_v33 = vand.u32 2147483648, %v7321_v50  ;;  %v1068_v29 = vand.u32 2147483648, %v7612_v47  ;;  %v5918_v38 = vpop.eup %5917  ;;  %v10209_v62 = vld [vmem:[#allocation43_spill] sm:$0xff]  ;;  %2427 = vmatpush1.bf16.msra.mxu0 %v5799_v5 }
 0x248   : > { %v915_v17 = vsel %vm913_vm14, %v10203_v59, %v7487_v3  ;;  %5929 = vrcp.f32 %v1093_v27  ;;  %v10206_v32 = vand.u32 2147483648, %v7340_v11  ;;  %2073 = vmatmul.mubr.bf16.gmra.mrb[8].mxu0 %v7697_v40  ;;  %v10207_v58 = vand.u32 2147483648, %v7348_v2  ;;  %v5920_v61 = vpop.eup %5919  ;;  %v5778_v2 = vld [vmem:[#allocation8 + $0x128] ss:$24 sps:$4 sm:$0xff]   ;;  %v5786_v26 = vld [vmem:[#allocation8 + $0x15c] ss:$24 sps:$4 sm:$0xff]  }
 0x249   : > { %v1079_v60 = vadd.f32 1e-06, %v915_v17  ;;  %v1020_v31 = vsel %vm1018_vm15, %v10205_v33, %v10204_v10  ;;  %5931 = vrcp.f32 %v1078_v19  ;;  %v10208_v63 = vand.u32 2147483648, %v7377_v35  ;;  %v5922_v21 = vpop.eup %5921  ;;  %v10210_v35 = vld [vmem:[#allocation42_spill] sm:$0xff]  ;;  %v10211_v19 = vld [vmem:[#allocation45_spill] sm:$0xff]  ;;  %2226 = vmatpush1.bf16.msra.mxu1 %v5778_v2 }
 0x24a   : > { %v1027_v3 = vsel %vm1025_vm0, %v10206_v32, %v7517_v30  ;;  %v1094_v13 = vadd.f32 1e-06, %v1020_v31  ;;  %v922_v54 = vsel %vm920_vm1, %v10207_v58, %v7525_v56  ;;  %v5807_v30 = vld [vmem:[#allocation8 + $0x224] ss:$24 sps:$4 sm:$0xff]   ;;  %v7732_v45 = vsel %vm953_vm3, %v7564_v46, %v952_v23  ;;  %v5813_v5 = vld [vmem:[#allocation8 + $0x254] ss:$24 sps:$4 sm:$0xff]   ;;  %2227 = vmatprep.subr.bf16.mxu1 %v5786_v26 }
 0x24b   : > { %v1095_v50 = vadd.f32 1e-06, %v1027_v3  ;;  %v929_v11 = vsel %vm927_vm2, %v10208_v63, %v7540_v37  ;;  %v7735_v27 = vmul.f32 %v5916_v15, %v7591_v6  ;;  %5933 = vrcp.f32 %v1079_v60  ;;  %v10212_v23 = vld [vmem:[#allocation44_spill] sm:$0xff]  ;;  %2428 = vmatprep.subr.bf16.mxu0 %v5807_v30  ;;  %v10216_v63 = vld [vmem:[#allocation46_spill] sm:$0xff] }
 0x24c   : > { %v1080_v56 = vadd.f32 1e-06, %v922_v54  ;;  %v1282_v59 = vmul.f32 %v5920_v61, %v10209_v62  ;;  %v1281_v37 = vmul.f32 %v5920_v61, %v10210_v35  ;;  %5935 = vrcp.f32 %v1094_v13  ;;  %v5805_v60 = vld [vmem:[#allocation8 + $0x220] ss:$24 sps:$4 sm:$0xff]   ;;  %v5792_v2 = vld [vmem:[#allocation8 + $0x18c] ss:$24 sps:$4 sm:$0xff]  }
 0x24d   : > { %v1081_v17 = vadd.f32 1e-06, %v929_v11  ;;  %v1284_v10 = vmul.f32 %v5922_v21, %v10211_v19  ;;  %v1283_v33 = vmul.f32 %v5922_v21, %v10212_v23  ;;  %5937 = vrcp.f32 %v1095_v50  ;;  %v5924_v31 = vpop.eup %5923  ;;  %v5784_v61 = vld [vmem:[#allocation8 + $0x158] ss:$24 sps:$4 sm:$0xff]   ;;  %2429 = vmatpush1.bf16.msra.mxu0 %v5805_v60 }
 0x24e   : > { %v10213_v12 = vand.u32 2147483648, %v7399_v36  ;;  %v1357_v32 = vadd.f32 %v7256_v57, %v1282_v59  ;;  %v1356_v14 = vadd.f32 %v7259_v49, %v1281_v37  ;;  %5939 = vrcp.f32 %v1080_v56  ;;  %v5926_v50 = vpop.eup %5925  ;;  %v10217_v56 = vld [vmem:[#allocation48_spill] sm:$0xff]  ;;  %v10218_v62 = vld [vmem:[#allocation71_spill] sm:$0xff]  ;;  %2430 = vmatprep.subr.bf16.mxu0 %v5813_v5  ;;  %2228 = vmatpush1.bf16.msra.mxu1 %v5784_v61  ;;  %v10222_v5 = vld [vmem:[#allocation50_spill] sm:$0xff] }
 0x24f   : > { %v10214_v3 = vand.u32 2147483648, %v7412_v22  ;;  %v1359_v58 = vadd.f32 %v7256_v57, %v1284_v10  ;;  %v1358_v36 = vadd.f32 %v7259_v49, %v1283_v33  ;;  %v1253_v11 = vmul.f32 %v5924_v31, %v10216_v63  ;;  %v10224_v63 = vld [vmem:[#allocation76_spill] sm:$0xff]  ;;  %v10225_v61 = vld [vmem:[#allocation75_spill] sm:$0xff]  ;;  %2229 = vmatprep.subr.bf16.mxu1 %v5792_v2 }
 0x250   : > { %v1034_v15 = vsel %vm1032_vm4, %v10213_v12, %v7573_v7  ;;  %v10215_v7 = vld [vmem:[#allocation47_spill] sm:$0xff]  ;;  %v1256_v21 = vmul.f32 %v5926_v50, %v10217_v56  ;;  %v1255_v59 = vmul.f32 %v5926_v50, %v10218_v62  ;;  %5941 = vrcp.f32 %v1081_v17 }
 0x251   : > { %v1041_v13 = vsel %vm1039_vm5, %v10214_v3, %v7578_v0  ;;  %v1254_v54 = vmul.f32 %v5924_v31, %v10215_v7  ;;  %v1096_v22 = vadd.f32 1e-06, %v1034_v15  ;;  %vm941_vm7 = vcmp.eq.f32.partialorder %v7454_v8, 0.0  ;;  %v5928_v19 = vpop.eup %5927  ;;  %v10220_v15 = vld [vmem:[#allocation72_spill] sm:$0xff] }
 0x252   : > { %v7760_v0 = vpack.c.bf16 %v1359_v58, %v1357_v32  ;;  %v7762_v30 = vpack.c.bf16 %v1358_v36, %v1356_v14  ;;  %v7765_v35 = vmul.f32 %v5918_v38, %v7612_v47  ;;  %v1331_v10 = vadd.f32 %v7256_v57, %v1256_v21  ;;  %v5930_v33 = vpop.eup %5929  ;;  %v10219_v38 = vld [vmem:[#allocation73_spill] sm:$0xff]  ;;  %v10223_v58 = vld [vmem:[#allocation74_spill] sm:$0xff] }
 0x253   : > { %v1329_v37 = vadd.f32 %v7256_v57, %v1254_v54  ;;  %v1328_v26 = vadd.f32 %v7259_v49, %v1253_v11  ;;  %v1330_v17 = vadd.f32 %v7259_v49, %v1255_v59  ;;  %v7771_v23 = vadd.f32 1e-06, %v1041_v13  ;;  %v5932_v14 = vpop.eup %5931  ;;  %v5790_v7 = vld [vmem:[#allocation8 + $0x188] ss:$24 sps:$4 sm:$0xff]   ;;  %v5798_v21 = vld [vmem:[#allocation8 + $0x1bc] ss:$24 sps:$4 sm:$0xff]  }
 0x254   : > { %vm1058_vm8 = vcmp.eq.f32.partialorder %v7591_v6, inf  ;;  %2152 = vmatprep.mubr.bf16.mxu1 %v7760_v0  ;;  %vm1065_vm9 = vcmp.eq.f32.partialorder %v7612_v47, inf  ;;  %v1286_v12 = vmul.f32 %v5928_v19, %v10219_v38  ;;  %v1285_v60 = vmul.f32 %v5928_v19, %v10220_v15  ;;  %v10228_v38 = vld [vmem:[#allocation56_spill] sm:$0xff]  ;;  %v10229_v15 = vld [vmem:[#allocation55_spill] sm:$0xff]  ;;  %2230 = vmatpush1.bf16.msra.mxu1 %v5790_v7 }
 0x255   : > { %5943 = vrcp.f32 %v1096_v22  ;;  %v10221_v31 = vand.u32 2147483648, %v7420_v41  ;;  %vm1046_vm10 = vcmp.eq.f32.partialorder %v7475_v1, 0.0  ;;  %2153 = vmatmul.mubr.bf16.gmra.mrb[8].mxu1 %v7762_v30  ;;  %v7787_v3 = vpack.c.bf16 %v1331_v10, %v1329_v37  ;;  %v5934_v54 = vpop.eup %5933  ;;  %v10226_v37 = vld [vmem:[#allocation54_spill] sm:$0xff]  ;;  %v10227_v10 = vld [vmem:[#allocation53_spill] sm:$0xff]  ;;  %2231 = vmatprep.subr.bf16.mxu1 %v5798_v21  ;;  %v10233_v7 = vld [vmem:[#allocation59_spill] sm:$0xff] }
 0x256   : > { %v7789_v13 = vpack.c.bf16 %v1330_v17, %v1328_v26  ;;  %v1288_v50 = vmul.f32 %v5930_v33, %v10222_v5  ;;  %v1287_v36 = vmul.f32 %v5930_v33, %v10223_v58  ;;  %vm1053_vm11 = vcmp.eq.f32.partialorder %v7507_v39, 0.0  ;;  %v5936_v62 = vpop.eup %5935  ;;  %v10235_v21 = vld [vmem:[#allocation61_spill] sm:$0xff] }
 0x257   : > { %v7783_v32 = vsel %vm934_vm6, %v10221_v31, %v7597_v9  ;;  %v1361_v41 = vadd.f32 %v7256_v57, %v1286_v12  ;;  %v1360_v9 = vadd.f32 %v7259_v49, %v1285_v60  ;;  %v1258_v11 = vmul.f32 %v5932_v14, %v10224_v63  ;;  %2082 = vmatprep.mubr.bf16.mxu0 %v7787_v3  ;;  %v5938_v17 = vpop.eup %5937  ;;  %v5811_v31 = vld [vmem:[#allocation8 + $0x250] ss:$24 sps:$4 sm:$0xff]  }
 0x258   : > { %v1257_v56 = vmul.f32 %v5932_v14, %v10225_v61  ;;  %vm948_vm12 = vcmp.eq.f32.partialorder %v7511_v16, 0.0  ;;  %v1363_v59 = vadd.f32 %v7256_v57, %v1288_v50  ;;  %v1362_v22 = vadd.f32 %v7259_v49, %v1287_v36  ;;  %2083 = vmatmul.mubr.bf16.gmra.mrb[12].mxu0 %v7789_v13  ;;  %v5940_v14 = vpop.eup %5939  ;;  %v10231_v61 = vld [vmem:[#allocation57_spill] sm:$0xff] }
 0x259   : > { %v1260_v19 = vmul.f32 %v5934_v54, %v10226_v37  ;;  %v1259_v26 = vmul.f32 %v5934_v54, %v10227_v10  ;;  %vm955_vm13 = vcmp.eq.f32.partialorder %v7564_v46, 0.0  ;;  %vm1060_vm14 = vcmp.eq.f32.partialorder %v7591_v6, 0.0  ;;  %v10230_v54 = vld [vmem:[#allocation58_spill] sm:$0xff]  ;;  %2431 = vmatpush1.bf16.msra.mxu0 %v5811_v31 }
 0x25a   : > { %v1333_v2 = vadd.f32 %v7256_v57, %v1258_v11  ;;  %v1332_v33 = vadd.f32 %v7259_v49, %v1257_v56  ;;  %v1290_v12 = vmul.f32 %v5936_v62, %v10228_v38  ;;  %v1289_v60 = vmul.f32 %v5936_v62, %v10229_v15  ;;  %v5796_v62 = vld [vmem:[#allocation8 + $0x1b8] ss:$24 sps:$4 sm:$0xff]   ;;  %v5942_v10 = vpop.eup %5941  ;;  %v5819_v38 = vld [vmem:[#allocation8 + $0x284] ss:$24 sps:$4 sm:$0xff]  }
 0x25b   : > { %v7811_v5 = vpack.c.bf16 %v1363_v59, %v1361_v41  ;;  %v7813_v50 = vpack.c.bf16 %v1362_v22, %v1360_v9  ;;  %v1335_v58 = vadd.f32 %v7256_v57, %v1260_v19  ;;  %v1334_v36 = vadd.f32 %v7259_v49, %v1259_v26  ;;  %v10232_v59 = vld [vmem:[#allocation60_spill] sm:$0xff]  ;;  %v10234_v15 = vld [vmem:[#allocation62_spill] sm:$0xff]  ;;  %2232 = vmatpush1.bf16.msra.mxu1 %v5796_v62 }
 0x25c   : > { %v1292_v63 = vmul.f32 %v5938_v17, %v10230_v54  ;;  %v1365_v11 = vadd.f32 %v7256_v57, %v1290_v12  ;;  %v1291_v56 = vmul.f32 %v5938_v17, %v10231_v61  ;;  %v1364_v37 = vadd.f32 %v7259_v49, %v1289_v60  ;;  %v5804_v26 = vld [vmem:[#allocation8 + $0x1ec] ss:$24 sps:$4 sm:$0xff]   ;;  %2432 = vmatprep.subr.bf16.mxu0 %v5819_v38 }
 0x25d   : > { %2162 = vmatprep.mubr.bf16.mxu1 %v7811_v5  ;;  %v7822_v41 = vpack.c.bf16 %v1335_v58, %v1333_v2  ;;  %v7824_v9 = vpack.c.bf16 %v1334_v36, %v1332_v33  ;;  %v1262_v22 = vmul.f32 %v5940_v14, %v10232_v59  ;;  %v1261_v19 = vmul.f32 %v5940_v14, %v10233_v7  ;;  %v5817_v36 = vld [vmem:[#allocation8 + $0x280] ss:$24 sps:$4 sm:$0xff]  }
 0x25e   : > { %v1367_v12 = vadd.f32 %v7256_v57, %v1292_v63  ;;  %v1366_v17 = vadd.f32 %v7259_v49, %v1291_v56  ;;  %v1264_v60 = vmul.f32 %v5942_v10, %v10234_v15  ;;  %v1263_v54 = vmul.f32 %v5942_v10, %v10235_v21  ;;  %2163 = vmatmul.mubr.bf16.gmra.mrb[12].mxu1 %v7813_v50  ;;  %v5802_v59 = vld [vmem:[#allocation8 + $0x1e8] ss:$24 sps:$4 sm:$0xff]  }
 0x25f   : > { %2092 = vmatprep.mubr.bf16.mxu0 %v7822_v41  ;;  %v1337_v2 = vadd.f32 %v7256_v57, %v1262_v22  ;;  %v1336_v33 = vadd.f32 %v7259_v49, %v1261_v19  ;;  %5945 = vrcp.f32 %v7771_v23  ;;  %v10236_v14 = vand.u32 2147483648, %v7454_v8  ;;  %v5944_v63 = vpop.eup %5943  ;;  %v5810_v22 = vld [vmem:[#allocation8 + $0x21c] ss:$24 sps:$4 sm:$0xff]   ;;  %2233 = vmatprep.subr.bf16.mxu1 %v5804_v26  ;;  %v5823_v26 = vld [vmem:[#allocation8 + $0x2b0] ss:$24 sps:$4 sm:$0xff]  }
 0x260   : > { %v7842_v61 = vpack.c.bf16 %v1367_v12, %v1365_v11  ;;  %v7844_v31 = vpack.c.bf16 %v1366_v17, %v1364_v37  ;;  %v1339_v56 = vadd.f32 %v7256_v57, %v1264_v60  ;;  %v1338_v10 = vadd.f32 %v7259_v49, %v1263_v54  ;;  %v5825_v37 = vld [vmem:[#allocation8 + $0x2b4] ss:$24 sps:$4 sm:$0xff]   ;;  %2093 = vmatmul.mubr.bf16.gmra.mrb[16].mxu0 %v7824_v9 }
 0x261   : > { %v943_v58 = vsel %vm941_vm7, %v10236_v14, %v7623_v51  ;;  %v1059_v23 = vsel %vm1058_vm8, %v7591_v6, %v7735_v27  ;;  %v1066_v8 = vsel %vm1065_vm9, %v7612_v47, %v7765_v35  ;;  %v1082_v51 = vadd.f32 1e-06, %v7783_v32  ;;  %v5808_v32 = vld [vmem:[#allocation8 + $0x218] ss:$24 sps:$4 sm:$0xff]   ;;  %2433 = vmatpush1.bf16.msra.mxu0 %v5817_v36  ;;  %2234 = vmatpush1.bf16.msra.mxu1 %v5802_v59  ;;  %v5814_v6 = vld [vmem:[#allocation8 + $0x248] ss:$24 sps:$4 sm:$0xff]  }
 0x262   : > { %v1083_v11 = vadd.f32 1e-06, %v943_v58  ;;  %vm1067_vm15 = vcmp.eq.f32.partialorder %v7612_v47, 0.0  ;;  %2172 = vmatprep.mubr.bf16.mxu1 %v7842_v61  ;;  %v7860_v62 = vpack.c.bf16 %v1339_v56, %v1337_v2  ;;  %v7862_v27 = vpack.c.bf16 %v1338_v10, %v1336_v33  ;;  %2235 = vmatprep.subr.bf16.mxu1 %v5810_v22  ;;  %v10239_v60 = vld [vmem:[#allocation63_spill] sm:$0xff]  ;;  %v10241_v2 = vld [vmem:[#allocation65_spill] sm:$0xff] }
 0x263   : > { %v1048_v35 = vsel %vm1046_vm10, %v1047_v4, %v7641_v55  ;;  %5947 = vrcp.f32 %v1082_v51  ;;  %v10237_v7 = vand.u32 2147483648, %v7507_v39  ;;  %v950_v1 = vsel %vm948_vm12, %v949_v53, %v7688_v20  ;;  %v5831_v4 = vld [vmem:[#allocation8 + $0x2e4] ss:$24 sps:$4 sm:$0xff]   ;;  %2434 = vmatprep.subr.bf16.mxu0 %v5825_v37  ;;  %v5820_v56 = vld [vmem:[#allocation8 + $0x278] ss:$24 sps:$4 sm:$0xff]  }
 0x264   : > { %2102 = vmatprep.mubr.bf16.mxu0 %v7860_v62  ;;  %5949 = vrcp.f32 %v1083_v11  ;;  %v1098_v38 = vadd.f32 1e-06, %v1048_v35  ;;  %v5816_v55 = vld [vmem:[#allocation8 + $0x24c] ss:$24 sps:$4 sm:$0xff]   ;;  %v957_v39 = vsel %vm955_vm13, %v956_v25, %v7732_v45  ;;  %v1062_v17 = vsel %vm1060_vm14, %v1061_v44, %v1059_v23  ;;  %v5829_v25 = vld [vmem:[#allocation8 + $0x2e0] ss:$24 sps:$4 sm:$0xff]  }
 0x265   : > { %v1055_v19 = vsel %vm1053_vm11, %v10237_v7, %v7646_v18  ;;  %v1084_v18 = vadd.f32 1e-06, %v950_v1  ;;  %v1069_v16 = vsel %vm1067_vm15, %v1068_v29, %v1066_v8  ;;  %v1085_v53 = vadd.f32 1e-06, %v957_v39  ;;  %2435 = vmatpush1.bf16.msra.mxu0 %v5823_v26  ;;  %v10238_v45 = vld [vmem:[#allocation64_spill] sm:$0xff]  ;;  %2236 = vmatpush1.bf16.msra.mxu1 %v5808_v32  ;;  %v10240_v29 = vld [vmem:[#allocation66_spill] sm:$0xff] }
 0x266   : > { %v1099_v12 = vadd.f32 1e-06, %v1055_v19  ;;  %5951 = vrcp.f32 %v1098_v38  ;;  %v1100_v20 = vadd.f32 1e-06, %v1062_v17  ;;  %2173 = vmatmul.mubr.bf16.gmra.mrb[16].mxu1 %v7844_v31  ;;  %v1101_v46 = vadd.f32 1e-06, %v1069_v16  ;;  %2436 = vmatprep.subr.bf16.mxu0 %v5831_v4 }
 0x267   : > { %v1294_v15 = vmul.f32 %v5944_v63, %v10238_v45  ;;  %v1293_v21 = vmul.f32 %v5944_v63, %v10239_v60  ;;  %2237 = vmatprep.subr.bf16.mxu1 %v5816_v55  ;;  %v5822_v47 = vld [vmem:[#allocation8 + $0x27c] ss:$24 sps:$4 sm:$0xff]   ;;  %v10243_v11 = vld [vmem:[#allocation29_spill] sm:$0xff]  ;;  %vm2727_vm0 = vcmask 519168  }
 0x268   : > { %5953 = vrcp.f32 %v1099_v12  ;;  %2103 = vmatmul.mubr.bf16.gmra.mrb[20].mxu0 %v7862_v27  ;;  %v10242_v8 = vld [vmem:[#allocation30_spill] sm:$0xff]  ;;  %v10244_v32 = vld [vmem:[#allocation67_spill] sm:$0xff]  ;;  %v5826_v4 = vld [vmem:[#allocation8 + $0x2a8] ss:$24 sps:$4 sm:$0xff]  }
 0x269   : > { %5955 = vrcp.f32 %v1084_v18  ;;  %v5946_v44 = vpop.eup %5945  ;;  %2437 = vmatpush1.bf16.msra.mxu0 %v5829_v25  ;;  %v1369_v14 = vadd.f32 %v7256_v57, %v1294_v15  ;;  %v1368_v36 = vadd.f32 %v7259_v49, %v1293_v21  ;;  %2238 = vmatpush1.bf16.msra.mxu1 %v5814_v6  ;;  %v5828_v35 = vld [vmem:[#allocation8 + $0x2ac] ss:$24 sps:$4 sm:$0xff]   ;;  %v10245_v19 = vld [vmem:[#allocation31_spill] sm:$0xff] }
 0x26a   : > { %5957 = vrcp.f32 %v1085_v53  ;;  %v1296_v54 = vmul.f32 %v5946_v44, %v10240_v29  ;;  %v1295_v33 = vmul.f32 %v5946_v44, %v10241_v2  ;;  %2239 = vmatprep.subr.bf16.mxu1 %v5822_v47  ;;  %v10246_v17 = vld [vmem:[#allocation33_spill] sm:$0xff]  ;;  %v10247_v53 = vld [vmem:[#allocation32_spill] sm:$0xff] }
 0x26b   : > { %5959 = vrcp.f32 %v1100_v20  ;;  %v10248_v25 = vld [vmem:[#allocation69_spill] sm:$0xff]  ;;  %v10249_v15 = vld [vmem:[#allocation68_spill] sm:$0xff] }
 0x26c   : > { %5961 = vrcp.f32 %v1101_v46  ;;  %v1371_v58 = vadd.f32 %v7256_v57, %v1296_v54  ;;  %v1370_v63 = vadd.f32 %v7259_v49, %v1295_v33  ;;  %v5834_v54 = vld [vmem:[#allocation8 + $0x2dc] ss:$24 sps:$4 sm:$0xff]  }
 0x26d   : > { %v5948_v10 = vpop.eup %5947  ;;  %2240 = vmatpush1.bf16.msra.mxu1 %v5820_v56 }
 0x26e   : > { %v5950_v59 = vpop.eup %5949  ;;  %v7903_v22 = vpack.c.bf16 %v1371_v58, %v1369_v14  ;;  %v7905_v23 = vpack.c.bf16 %v1370_v63, %v1368_v36  ;;  %v1266_v51 = vmul.f32 %v5948_v10, %v10242_v8  ;;  %v1265_v37 = vmul.f32 %v5948_v10, %v10243_v11  ;;  %2241 = vmatprep.subr.bf16.mxu1 %v5828_v35  ;;  %v10250_v58 = vld [vmem:[#allocation35_spill] sm:$0xff]  ;;  %v10251_v63 = vld [vmem:[#allocation70_spill] sm:$0xff]  ;;  %v10253_v11 = vld [vmem:[#allocation36_spill] sm:$0xff] }
 0x26f   : > { %v1268_v7 = vmul.f32 %v5950_v59, %v10244_v32  ;;  %v1267_v26 = vmul.f32 %v5950_v59, %v10245_v19  ;;  %v5832_v10 = vld [vmem:[#allocation8 + $0x2d8] ss:$24 sps:$4 sm:$0xff]  }
 0x270   : > { %v5952_v38 = vpop.eup %5951  ;;  %2182 = vmatprep.mubr.bf16.mxu1 %v7903_v22  ;;  %v1341_v12 = vadd.f32 %v7256_v57, %v1266_v51  ;;  %v1340_v1 = vadd.f32 %v7259_v49, %v1265_v37  ;;  %v10252_v8 = vld [vmem:[#allocation34_spill] sm:$0xff] }
 0x271   : > { %2183 = vmatmul.mubr.bf16.gmra.mrb[20].mxu1 %v7905_v23  ;;  %v1343_v39 = vadd.f32 %v7256_v57, %v1268_v7  ;;  %v1342_v18 = vadd.f32 %v7259_v49, %v1267_v26  ;;  %v1298_v16 = vmul.f32 %v5952_v38, %v10246_v17  ;;  %v1297_v20 = vmul.f32 %v5952_v38, %v10247_v53  ;;  %v10254_v35 = vld [vmem:[#allocation38_spill] sm:$0xff]  ;;  %v10255_v7 = vld [vmem:[#allocation37_spill] sm:$0xff] }
 0x272   : > { %v5954_v55 = vpop.eup %5953  ;;  %2242 = vmatpush1.bf16.msra.mxu1 %v5826_v4 }
 0x273   : > { %v5956_v46 = vpop.eup %5955  ;;  %v1300_v45 = vmul.f32 %v5954_v55, %v10248_v25  ;;  %v1299_v60 = vmul.f32 %v5954_v55, %v10249_v15  ;;  %v7921_v6 = vpack.c.bf16 %v1343_v39, %v1341_v12  ;;  %v7923_v44 = vpack.c.bf16 %v1342_v18, %v1340_v1  ;;  %v10256_v39 = vld [vmem:[#allocation40_spill] sm:$0xff]  ;;  %2243 = vmatprep.subr.bf16.mxu1 %v5834_v54 }
 0x274   : > { %v5958_v21 = vpop.eup %5957  ;;  %v1373_v47 = vadd.f32 %v7256_v57, %v1298_v16  ;;  %v1372_v29 = vadd.f32 %v7259_v49, %v1297_v20  ;;  %v1270_v36 = vmul.f32 %v5956_v46, %v10250_v58  ;;  %v1269_v51 = vmul.f32 %v5956_v46, %v10252_v8  ;;  %v10257_v16 = vld [vmem:[#allocation39_spill] sm:$0xff] }
 0x275   : > { %v5960_v2 = vpop.eup %5959  ;;  %v1375_v33 = vadd.f32 %v7256_v57, %v1300_v45  ;;  %v1374_v14 = vadd.f32 %v7259_v49, %v1299_v60  ;;  %v1272_v56 = vmul.f32 %v5958_v21, %v10251_v63  ;;  %2112 = vmatprep.mubr.bf16.mxu0 %v7921_v6  ;;  %v1271_v37 = vmul.f32 %v5958_v21, %v10253_v11 }
 0x276   : > { %v5962_v59 = vpop.eup %5961  ;;  %v1302_v32 = vmul.f32 %v5960_v2, %v10254_v35  ;;  %v1301_v19 = vmul.f32 %v5960_v2, %v10255_v7  ;;  %2113 = vmatmul.mubr.bf16.gmra.mrb[24].mxu0 %v7923_v44  ;;  %v1345_v12 = vadd.f32 %v7256_v57, %v1270_v36  ;;  %v1344_v4 = vadd.f32 %v7259_v49, %v1269_v51 }
 0x277   : > { %v7937_v26 = vpack.c.bf16 %v1375_v33, %v1373_v47  ;;  %v7939_v38 = vpack.c.bf16 %v1374_v14, %v1372_v29  ;;  %v1347_v1 = vadd.f32 %v7256_v57, %v1272_v56  ;;  %v1346_v55 = vadd.f32 %v7259_v49, %v1271_v37  ;;  %2244 = vmatpush1.bf16.msra.mxu1 %v5832_v10  ;;  %v10258_v47 = vld [vmem:[#allocation77_spill] sm:$0xff]  ;;  %v10259_v29 = vld [vmem:[#allocation78_spill] sm:$0xff] }
 0x278   : > { %v1304_v18 = vmul.f32 %v5962_v59, %v10256_v39  ;;  %v1303_v53 = vmul.f32 %v5962_v59, %v10257_v16  ;;  %v1377_v46 = vadd.f32 %v7256_v57, %v1302_v32  ;;  %v1376_v45 = vadd.f32 %v7259_v49, %v1301_v19 }
 0x279   : > { %2192 = vmatprep.mubr.bf16.mxu1 %v7937_v26  ;;  %v1395_v17 = vpack.c.bf16 %v1347_v1, %v1345_v12  ;;  %v1394_v20 = vpack.c.bf16 %v1346_v55, %v1344_v4 }
 0x27a   : > { %2193 = vmatmul.mubr.bf16.gmra.mrb[24].mxu1 %v7939_v38  ;;  %v1379_v25 = vadd.f32 %v7256_v57, %v1304_v18  ;;  %v1378_v15 = vadd.f32 %v7259_v49, %v1303_v53  ;;  %v8013_v57 = vld [vmem:[#allocation10] sm:$0x3f]  ;;  %v10260_v49 = vld [vmem:[#allocation51_spill] sm:$0xff] }
 0x27b   : > { %2122 = vmatprep.mubr.bf16.mxu0 %v1395_v17 }
 0x27c   : > { %v7953_v60 = vpack.c.bf16 %v1379_v25, %v1377_v46  ;;  %v7955_v21 = vpack.c.bf16 %v1378_v15, %v1376_v45 }
 0x27e   : > { %2202 = vmatprep.mubr.bf16.mxu1 %v7953_v60  ;;  %2123 = vmatmul.mubr.bf16.gmra.mrb[28].mxu0 %v1394_v20 }
 0x27f   : > { %2438 = vmatprep.mubr.bf16.mxu0 %v10258_v47 }
 0x282   : > { %2203 = vmatmul.mubr.bf16.gmra.mrb[28].mxu1 %v7955_v21 }
 0x283   : > { %2245 = vmatprep.mubr.bf16.mxu1 %v10258_v47 }
 0x286   : > { %2439 = vmatmul.mubr.bf16.vlgmr.msra.gmra.mrb[32].mxu0 %v10259_v29 }
 0x287   : > { %2448 = vmatprep.mubr.bf16.mxu0 %v7581_v34 }
 0x28a   : > { %2246 = vmatmul.mubr.bf16.vlgmr.msra.gmra.mrb[32].mxu1 %v10259_v29 }
 0x28b   : > { %2255 = vmatprep.mubr.bf16.mxu1 %v7581_v34 }
 0x28e   : > { %2449 = vmatmul.mubr.bf16.gmra.mrb[36].mxu0 %v7583_v48 }
 0x28f   : > { %2458 = vmatprep.mubr.bf16.mxu0 %v7695_v28 }
 0x292   : > { %2256 = vmatmul.mubr.bf16.gmra.mrb[36].mxu1 %v7583_v48 }
 0x293   : > { %2265 = vmatprep.mubr.bf16.mxu1 %v7695_v28 }
 0x296   : > { %2459 = vmatmul.mubr.bf16.gmra.mrb[40].mxu0 %v7697_v40 }
 0x297   : > { %2468 = vmatprep.mubr.bf16.mxu0 %v7787_v3 }
 0x29a   : > { %2266 = vmatmul.mubr.bf16.gmra.mrb[40].mxu1 %v7697_v40 }
 0x29b   : > { %2275 = vmatprep.mubr.bf16.mxu1 %v7787_v3 }
 0x29e   : > { %2469 = vmatmul.mubr.bf16.gmra.mrb[44].mxu0 %v7789_v13 }
 0x29f   : > { %2478 = vmatprep.mubr.bf16.mxu0 %v7822_v41 }
 0x2a2   : > { %2276 = vmatmul.mubr.bf16.gmra.mrb[44].mxu1 %v7789_v13 }
 0x2a3   : > { %2285 = vmatprep.mubr.bf16.mxu1 %v7822_v41 }
 0x2a6   : > { %2479 = vmatmul.mubr.bf16.gmra.mrb[48].mxu0 %v7824_v9 }
 0x2a7   : > { %2488 = vmatprep.mubr.bf16.mxu0 %v7860_v62 }
 0x2aa   : > { %2286 = vmatmul.mubr.bf16.gmra.mrb[48].mxu1 %v7824_v9 }
 0x2ab   : > { %2295 = vmatprep.mubr.bf16.mxu1 %v7860_v62 }
 0x2ae   : > { %2489 = vmatmul.mubr.bf16.gmra.mrb[52].mxu0 %v7862_v27 }
 0x2af   : > { %2498 = vmatprep.mubr.bf16.mxu0 %v7921_v6 }
 0x2b2   : > { %2296 = vmatmul.mubr.bf16.gmra.mrb[52].mxu1 %v7862_v27 }
 0x2b3   : > { %2305 = vmatprep.mubr.bf16.mxu1 %v7921_v6 }
 0x2b6   : > { %2499 = vmatmul.mubr.bf16.gmra.mrb[56].mxu0 %v7923_v44 }
 0x2b7   : > { %2508 = vmatprep.mubr.bf16.mxu0 %v1395_v17 }
 0x2ba   : > { %2306 = vmatmul.mubr.bf16.gmra.mrb[56].mxu1 %v7923_v44 }
 0x2bb   : > { %2315 = vmatprep.mubr.bf16.mxu1 %v1395_v17 }
 0x2be   : > { %2509 = vmatmul.mubr.bf16.gmra.mrb[60].mxu0 %v1394_v20 }
 0x2bf   : > { %2518 = vmatprep.mubr.bf16.mxu0 %v7527_v42 }
 0x2c2   : > { %2316 = vmatmul.mubr.bf16.gmra.mrb[60].mxu1 %v1394_v20 }
 0x2c3   : > { %2325 = vmatprep.mubr.bf16.mxu1 %v7527_v42  ;;  %v8017_v42 = vrot.slane %v8013_v57, %v10260_v49 }
 0x2c6   : > { %2519 = vmatmul.mubr.bf16.gmra.mrb[64].mxu0 %v7529_v24 }
 0x2c7   : > { %2528 = vmatprep.mubr.bf16.mxu0 %v7634_v52 }
 0x2ca   : > { %2326 = vmatmul.mubr.bf16.gmra.mrb[64].mxu1 %v7529_v24  ;;  %v10261_v24 = vld [vmem:[#allocation52_spill] sm:$0xff] }
 0x2cb   : > { %2335 = vmatprep.mubr.bf16.mxu1 %v7634_v52  ;;  %v8022_v34 = vrot.slane %v8013_v57, %v10261_v24 }
 0x2ce   : > { %2529 = vmatmul.mubr.bf16.gmra.mrb[68].mxu0 %v7636_v43 }
 0x2cf   : > { %2538 = vmatprep.mubr.bf16.mxu0 %v7760_v0 }
 0x2d2   : > { %2336 = vmatmul.mubr.bf16.gmra.mrb[68].mxu1 %v7636_v43 }
 0x2d3   : > { %2345 = vmatprep.mubr.bf16.mxu1 %v7760_v0 }
 0x2d6   : > { %2539 = vmatmul.mubr.bf16.gmra.mrb[72].mxu0 %v7762_v30 }
 0x2d7   : > { %2548 = vmatprep.mubr.bf16.mxu0 %v7811_v5 }
 0x2da   : > { %2346 = vmatmul.mubr.bf16.gmra.mrb[72].mxu1 %v7762_v30 }
 0x2db   : > { %2355 = vmatprep.mubr.bf16.mxu1 %v7811_v5 }
 0x2de   : > { %2549 = vmatmul.mubr.bf16.gmra.mrb[76].mxu0 %v7813_v50 }
 0x2df   : > { %2558 = vmatprep.mubr.bf16.mxu0 %v7842_v61 }
 0x2e2   : > { %2356 = vmatmul.mubr.bf16.gmra.mrb[76].mxu1 %v7813_v50 }
 0x2e3   : > { %2365 = vmatprep.mubr.bf16.mxu1 %v7842_v61 }
 0x2e6   : > { %2559 = vmatmul.mubr.bf16.gmra.mrb[80].mxu0 %v7844_v31 }
 0x2e7   : > { %2568 = vmatprep.mubr.bf16.mxu0 %v7903_v22 }
 0x2ea   : > { %2366 = vmatmul.mubr.bf16.gmra.mrb[80].mxu1 %v7844_v31 }
 0x2eb   : > { %2375 = vmatprep.mubr.bf16.mxu1 %v7903_v22 }
 0x2ed   : > { %v2054_v48 = vpop.f32.mrb[0].mxu0 }
 0x2ee   : > { %2569 = vmatmul.mubr.bf16.gmra.mrb[84].mxu0 %v7905_v23  ;;  %v2055_v52 = vadd.f32 %v2054_v48, %v8017_v42  ;;  %v2056_v43 = vpop.f32.mrb[1].mxu0 }
 0x2ef   : > { %2578 = vmatprep.mubr.bf16.mxu0 %v7937_v26  ;;  %v2057_v28 = vadd.f32 %v2056_v43, %v8022_v34  ;;  %v2058_v40 = vpop.f32.mrb[2].mxu0 }
 0x2f0   : > { %v5294_v0 = vpack.c.bf16 %v2055_v52, %v2055_v52  ;;  %v2059_v30 = vadd.f32 %v2058_v40, %v8017_v42  ;;  %v2060_v3 = vpop.f32.mrb[3].mxu0 }
 0x2f1   : > { %v5390_v13 = vpack.c.bf16 %v2057_v28, %v2057_v28  ;;  %v2061_v5 = vadd.f32 %v2060_v3, %v8022_v34 }
 0x2f2   : > { %2376 = vmatmul.mubr.bf16.gmra.mrb[84].mxu1 %v7905_v23  ;;  %2728 = vst.msk [vmem:[%s8032_s6] sm:$0xf] %vm2727_vm0, %v5294_v0  ;;  %v5295_v50 = vpack.c.bf16 %v2059_v30, %v2059_v30  ;;  %3080 = vrot.lane.b32.xlu0 %v5294_v0, %s6198_s11 }
 0x2f3   : > { %2385 = vmatprep.mubr.bf16.mxu1 %v7937_v26  ;;  %5023 = vst.msk [vmem:[%s8032_s6 + $0x100] sm:$0xf] %vm2727_vm0, %v5390_v13  ;;  %v5391_v41 = vpack.c.bf16 %v2061_v5, %v2061_v5 }
 0x2f4   : > { %2729 = vst.msk [vmem:[%s8032_s6 + $0x4] sm:$0xf] %vm2727_vm0, %v5295_v50  ;;  %3082 = vrot.lane.b32.xlu1 %v5295_v50, %s6198_s11 }
 0x2f5   : > { %5024 = vst.msk [vmem:[%s8032_s6 + $0x104] sm:$0xf] %vm2727_vm0, %v5391_v41 }
 0x2f6   : > { %2579 = vmatmul.mubr.bf16.gmra.mrb[88].mxu0 %v7939_v38 }
 0x2f7   : > { %2588 = vmatprep.mubr.bf16.mxu0 %v7953_v60 }
 0x2fa   : > { %2386 = vmatmul.mubr.bf16.gmra.mrb[88].mxu1 %v7939_v38 }
 0x2fb   : > { %2395 = vmatprep.mubr.bf16.mxu1 %v7953_v60 }
 0x2fe   : > { %2589 = vmatmul.mubr.bf16.gmra.mrb[92].mxu0 %v7955_v21 }
 0x302   : > { %2396 = vmatmul.mubr.bf16.gmra.mrb[92].mxu1 %v7955_v21 }
 0x303   : > { %v2134_v9 = vpop.f32.mrb[0].mxu1 }
 0x304   : > { %v2135_v61 = vadd.f32 %v2134_v9, %v8017_v42  ;;  %v2136_v31 = vpop.f32.mrb[1].mxu1 }
 0x305   : > { %v2137_v62 = vadd.f32 %v2136_v31, %v8022_v34  ;;  %v2138_v27 = vpop.f32.mrb[2].mxu1 }
 0x306   : > { %v5310_v22 = vpack.c.bf16 %v2135_v61, %v2135_v61  ;;  %v2139_v23 = vadd.f32 %v2138_v27, %v8017_v42  ;;  %v2140_v6 = vpop.f32.mrb[3].mxu1 }
 0x307   : > { %v5406_v44 = vpack.c.bf16 %v2137_v62, %v2137_v62  ;;  %v2141_v54 = vadd.f32 %v2140_v6, %v8022_v34 }
 0x308   : > { %2744 = vst.msk [vmem:[%s8032_s6 + $0x40] sm:$0xf] %vm2727_vm0, %v5310_v22  ;;  %v5311_v2 = vpack.c.bf16 %v2139_v23, %v2139_v23  ;;  %3112 = vrot.lane.b32.xlu0 %v5310_v22, %s6198_s11 }
 0x309   : > { %5039 = vst.msk [vmem:[%s8032_s6 + $0x140] sm:$0xf] %vm2727_vm0, %v5406_v44  ;;  %v5407_v33 = vpack.c.bf16 %v2141_v54, %v2141_v54 }
 0x30a   : > { %2745 = vst.msk [vmem:[%s8032_s6 + $0x44] sm:$0xf] %vm2727_vm0, %v5311_v2  ;;  %3114 = vrot.lane.b32.xlu1 %v5311_v2, %s6198_s11 }
 0x30b   : > { %v2064_v14 = vpop.f32.mrb[4].mxu0  ;;  %5040 = vst.msk [vmem:[%s8032_s6 + $0x144] sm:$0xf] %vm2727_vm0, %v5407_v33 }
 0x30c   : > { %v2065_v58 = vadd.f32 %v2064_v14, %v8017_v42  ;;  %v2066_v36 = vpop.f32.mrb[5].mxu0  ;;  %3950 = vrot.lane.b32.xlu0 %v5390_v13, %s6198_s11 }
 0x30d   : > { %v2067_v63 = vadd.f32 %v2066_v36, %v8022_v34  ;;  %v2068_v56 = vpop.f32.mrb[6].mxu0 }
 0x30e   : > { %v5296_v10 = vpack.c.bf16 %v2065_v58, %v2065_v58  ;;  %v2069_v59 = vadd.f32 %v2068_v56, %v8017_v42  ;;  %v2070_v8 = vpop.f32.mrb[7].mxu0  ;;  %3952 = vrot.lane.b32.xlu1 %v5391_v41, %s6198_s11 }
 0x30f   : > { %v5392_v51 = vpack.c.bf16 %v2067_v63, %v2067_v63  ;;  %v2071_v11 = vadd.f32 %v2070_v8, %v8022_v34 }
 0x310   : > { %2730 = vst.msk [vmem:[%s8032_s6 + $0x8] sm:$0xf] %vm2727_vm0, %v5296_v10  ;;  %v5297_v37 = vpack.c.bf16 %v2069_v59, %v2069_v59  ;;  %3982 = vrot.lane.b32.xlu0 %v5406_v44, %s6198_s11 }
 0x311   : > { %5025 = vst.msk [vmem:[%s8032_s6 + $0x108] sm:$0xf] %vm2727_vm0, %v5392_v51  ;;  %v5393_v35 = vpack.c.bf16 %v2071_v11, %v2071_v11  ;;  %v2144_v32 = vpop.f32.mrb[4].mxu1 }
 0x312   : > { %2731 = vst.msk [vmem:[%s8032_s6 + $0xc] sm:$0xf] %vm2727_vm0, %v5297_v37  ;;  %v2145_v7 = vadd.f32 %v2144_v32, %v8017_v42  ;;  %v2146_v19 = vpop.f32.mrb[5].mxu1  ;;  %3984 = vrot.lane.b32.xlu1 %v5407_v33, %s6198_s11 }
 0x313   : > { %5026 = vst.msk [vmem:[%s8032_s6 + $0x10c] sm:$0xf] %vm2727_vm0, %v5393_v35  ;;  %v2147_v26 = vadd.f32 %v2146_v19, %v8022_v34  ;;  %v2148_v38 = vpop.f32.mrb[6].mxu1 }
 0x314   : > { %v5312_v12 = vpack.c.bf16 %v2145_v7, %v2145_v7  ;;  %v2149_v1 = vadd.f32 %v2148_v38, %v8017_v42  ;;  %v2150_v4 = vpop.f32.mrb[7].mxu1 }
 0x315   : > { %v5408_v55 = vpack.c.bf16 %v2147_v26, %v2147_v26  ;;  %v2151_v39 = vadd.f32 %v2150_v4, %v8022_v34 }
 0x316   : > { %2746 = vst.msk [vmem:[%s8032_s6 + $0x48] sm:$0xf] %vm2727_vm0, %v5312_v12  ;;  %v5313_v18 = vpack.c.bf16 %v2149_v1, %v2149_v1  ;;  %3116 = vrot.lane.b32.xlu0 %v5312_v12, %s6198_s11  ;;  %3084 = vrot.lane.b32.xlu1 %v5296_v10, %s6198_s11 }
 0x317   : > { %5041 = vst.msk [vmem:[%s8032_s6 + $0x148] sm:$0xf] %vm2727_vm0, %v5408_v55  ;;  %v5409_v17 = vpack.c.bf16 %v2151_v39, %v2151_v39 }
 0x318   : > { %2747 = vst.msk [vmem:[%s8032_s6 + $0x4c] sm:$0xf] %vm2727_vm0, %v5313_v18 }
 0x319   : > { %5042 = vst.msk [vmem:[%s8032_s6 + $0x14c] sm:$0xf] %vm2727_vm0, %v5409_v17 }
 0x31a   : > { %3954 = vrot.lane.b32.xlu0 %v5392_v51, %s6198_s11  ;;  %3086 = vrot.lane.b32.xlu1 %v5297_v37, %s6198_s11 }
 0x31b   : > { %v2074_v16 = vpop.f32.mrb[8].mxu0 }
 0x31c   : > { %v2075_v53 = vadd.f32 %v2074_v16, %v8017_v42  ;;  %v2076_v20 = vpop.f32.mrb[9].mxu0 }
 0x31d   : > { %v2077_v46 = vadd.f32 %v2076_v20, %v8022_v34  ;;  %v2078_v25 = vpop.f32.mrb[10].mxu0 }
 0x31e   : > { %v5298_v45 = vpack.c.bf16 %v2075_v53, %v2075_v53  ;;  %v2079_v15 = vadd.f32 %v2078_v25, %v8017_v42  ;;  %v2080_v60 = vpop.f32.mrb[11].mxu0  ;;  %3986 = vrot.lane.b32.xlu0 %v5408_v55, %s6198_s11  ;;  %3118 = vrot.lane.b32.xlu1 %v5313_v18, %s6198_s11 }
 0x31f   : > { %v5394_v21 = vpack.c.bf16 %v2077_v46, %v2077_v46  ;;  %v2081_v47 = vadd.f32 %v2080_v60, %v8022_v34 }
 0x320   : > { %2732 = vst.msk [vmem:[%s8032_s6 + $0x10] sm:$0xf] %vm2727_vm0, %v5298_v45  ;;  %v5299_v29 = vpack.c.bf16 %v2079_v15, %v2079_v15 }
 0x321   : > { %5027 = vst.msk [vmem:[%s8032_s6 + $0x110] sm:$0xf] %vm2727_vm0, %v5394_v21  ;;  %v8101_v49 = vpack.c.bf16 %v2081_v47, %v2081_v47 }
 0x322   : > { %2733 = vst.msk [vmem:[%s8032_s6 + $0x14] sm:$0xf] %vm2727_vm0, %v5299_v29  ;;  %3088 = vrot.lane.b32.xlu0 %v5298_v45, %s6198_s11  ;;  %3956 = vrot.lane.b32.xlu1 %v5393_v35, %s6198_s11 }
 0x323   : > { %5028 = vst.msk [vmem:[%s8032_s6 + $0x114] sm:$0xf] %vm2727_vm0, %v8101_v49 }
 0x326   : > { %3988 = vrot.lane.b32.xlu1 %v5409_v17, %s6198_s11 }
 0x328   : > { %v2154_v24 = vpop.f32.mrb[8].mxu1 }
 0x329   : > { %v2155_v48 = vadd.f32 %v2154_v24, %v8017_v42  ;;  %v2156_v52 = vpop.f32.mrb[9].mxu1 }
 0x32a   : > { %v2157_v43 = vadd.f32 %v2156_v52, %v8022_v34  ;;  %v2158_v28 = vpop.f32.mrb[10].mxu1  ;;  %3090 = vrot.lane.b32.xlu1 %v5299_v29, %s6198_s11 }
 0x32b   : > { %v5314_v40 = vpack.c.bf16 %v2155_v48, %v2155_v48  ;;  %v2159_v0 = vadd.f32 %v2158_v28, %v8017_v42  ;;  %v2160_v30 = vpop.f32.mrb[11].mxu1  ;;  %v2084_v3 = vpop.f32.mrb[12].mxu0 }
 0x32c   : > { %v5410_v13 = vpack.c.bf16 %v2157_v43, %v2157_v43  ;;  %v2161_v5 = vadd.f32 %v2160_v30, %v8022_v34  ;;  %v2085_v50 = vadd.f32 %v2084_v3, %v8017_v42  ;;  %v2086_v41 = vpop.f32.mrb[13].mxu0 }
 0x32d   : > { %2748 = vst.msk [vmem:[%s8032_s6 + $0x50] sm:$0xf] %vm2727_vm0, %v5314_v40  ;;  %v5315_v9 = vpack.c.bf16 %v2159_v0, %v2159_v0  ;;  %v2087_v61 = vadd.f32 %v2086_v41, %v8022_v34  ;;  %v2088_v31 = vpop.f32.mrb[14].mxu0  ;;  %3120 = vrot.lane.b32.xlu0 %v5314_v40, %s6198_s11 }
 0x32e   : > { %5043 = vst.msk [vmem:[%s8032_s6 + $0x150] sm:$0xf] %vm2727_vm0, %v5410_v13  ;;  %v8123_v62 = vpack.c.bf16 %v2161_v5, %v2161_v5  ;;  %v5300_v27 = vpack.c.bf16 %v2085_v50, %v2085_v50  ;;  %v2089_v22 = vadd.f32 %v2088_v31, %v8017_v42  ;;  %v2090_v23 = vpop.f32.mrb[15].mxu0 }
 0x32f   : > { %2749 = vst.msk [vmem:[%s8032_s6 + $0x54] sm:$0xf] %vm2727_vm0, %v5315_v9  ;;  %v8128_v6 = vpack.c.bf16 %v2087_v61, %v2087_v61  ;;  %v2091_v44 = vadd.f32 %v2090_v23, %v8022_v34  ;;  %3122 = vrot.lane.b32.xlu1 %v5315_v9, %s6198_s11 }
 0x330   : > { %5044 = vst.msk [vmem:[%s8032_s6 + $0x154] sm:$0xf] %vm2727_vm0, %v8123_v62  ;;  %2734 = vst.msk [vmem:[%s8032_s6 + $0x18] sm:$0xf] %vm2727_vm0, %v5300_v27  ;;  %v8136_v54 = vpack.c.bf16 %v2089_v22, %v2089_v22 }
 0x331   : > { %v2164_v2 = vpop.f32.mrb[12].mxu1  ;;  %5029 = vst.msk [vmem:[%s8032_s6 + $0x118] sm:$0xf] %vm2727_vm0, %v8128_v6  ;;  %v8142_v33 = vpack.c.bf16 %v2091_v44, %v2091_v44  ;;  %3958 = vrot.lane.b32.xlu0 %v5394_v21, %s6198_s11 }
 0x332   : > { %v2165_v14 = vadd.f32 %v2164_v2, %v8017_v42  ;;  %v2166_v58 = vpop.f32.mrb[13].mxu1  ;;  %2735 = vst.msk [vmem:[%s8032_s6 + $0x1c] sm:$0xf] %vm2727_vm0, %v8136_v54 }
 0x333   : > { %v2167_v36 = vadd.f32 %v2166_v58, %v8022_v34  ;;  %v2168_v63 = vpop.f32.mrb[14].mxu1  ;;  %5030 = vst.msk [vmem:[%s8032_s6 + $0x11c] sm:$0xf] %vm2727_vm0, %v8142_v33  ;;  %v2094_v8 = vpop.f32.mrb[16].mxu0  ;;  %3960 = vrot.lane.b32.xlu1 %v8101_v49, %s6198_s11 }
 0x334   : > { %v5316_v56 = vpack.c.bf16 %v2165_v14, %v2165_v14  ;;  %v2169_v10 = vadd.f32 %v2168_v63, %v8017_v42  ;;  %v2170_v59 = vpop.f32.mrb[15].mxu1  ;;  %v2095_v37 = vadd.f32 %v2094_v8, %v8017_v42  ;;  %v2096_v35 = vpop.f32.mrb[17].mxu0 }
 0x335   : > { %v8154_v51 = vpack.c.bf16 %v2167_v36, %v2167_v36  ;;  %v2171_v11 = vadd.f32 %v2170_v59, %v8022_v34  ;;  %v2097_v7 = vadd.f32 %v2096_v35, %v8022_v34  ;;  %v2098_v19 = vpop.f32.mrb[18].mxu0  ;;  %3990 = vrot.lane.b32.xlu0 %v5410_v13, %s6198_s11 }
 0x336   : > { %2750 = vst.msk [vmem:[%s8032_s6 + $0x58] sm:$0xf] %vm2727_vm0, %v5316_v56  ;;  %v5317_v32 = vpack.c.bf16 %v2169_v10, %v2169_v10  ;;  %v8168_v38 = vpack.c.bf16 %v2095_v37, %v2095_v37  ;;  %v2099_v12 = vadd.f32 %v2098_v19, %v8017_v42  ;;  %v2100_v1 = vpop.f32.mrb[19].mxu0 }
 0x337   : > { %5045 = vst.msk [vmem:[%s8032_s6 + $0x158] sm:$0xf] %vm2727_vm0, %v8154_v51  ;;  %v8166_v26 = vpack.c.bf16 %v2171_v11, %v2171_v11  ;;  %v8173_v4 = vpack.c.bf16 %v2097_v7, %v2097_v7  ;;  %v2101_v55 = vadd.f32 %v2100_v1, %v8022_v34  ;;  %3992 = vrot.lane.b32.xlu1 %v8123_v62, %s6198_s11 }
 0x338   : > { %2751 = vst.msk [vmem:[%s8032_s6 + $0x5c] sm:$0xf] %vm2727_vm0, %v5317_v32  ;;  %2736 = vst.msk [vmem:[%s8032_s6 + $0x20] sm:$0xf] %vm2727_vm0, %v8168_v38  ;;  %v8182_v39 = vpack.c.bf16 %v2099_v12, %v2099_v12 }
 0x339   : > { %5046 = vst.msk [vmem:[%s8032_s6 + $0x15c] sm:$0xf] %vm2727_vm0, %v8166_v26  ;;  %v2174_v18 = vpop.f32.mrb[16].mxu1  ;;  %5031 = vst.msk [vmem:[%s8032_s6 + $0x120] sm:$0xf] %vm2727_vm0, %v8173_v4  ;;  %v8189_v17 = vpack.c.bf16 %v2101_v55, %v2101_v55  ;;  %3092 = vrot.lane.b32.xlu0 %v5300_v27, %s6198_s11 }
 0x33a   : > { %v2175_v16 = vadd.f32 %v2174_v18, %v8017_v42  ;;  %v2176_v53 = vpop.f32.mrb[17].mxu1  ;;  %2737 = vst.msk [vmem:[%s8032_s6 + $0x24] sm:$0xf] %vm2727_vm0, %v8182_v39 }
 0x33b   : > { %v2177_v20 = vadd.f32 %v2176_v53, %v8022_v34  ;;  %v2178_v46 = vpop.f32.mrb[18].mxu1  ;;  %5032 = vst.msk [vmem:[%s8032_s6 + $0x124] sm:$0xf] %vm2727_vm0, %v8189_v17  ;;  %v2104_v60 = vpop.f32.mrb[20].mxu0  ;;  %3094 = vrot.lane.b32.xlu1 %v8136_v54, %s6198_s11 }
 0x33c   : > { %v8200_v25 = vpack.c.bf16 %v2175_v16, %v2175_v16  ;;  %v2179_v45 = vadd.f32 %v2178_v46, %v8017_v42  ;;  %v2180_v15 = vpop.f32.mrb[19].mxu1  ;;  %v2105_v29 = vadd.f32 %v2104_v60, %v8017_v42  ;;  %v2106_v49 = vpop.f32.mrb[21].mxu0 }
 0x33d   : > { %v8203_v21 = vpack.c.bf16 %v2177_v20, %v2177_v20  ;;  %v2181_v47 = vadd.f32 %v2180_v15, %v8022_v34  ;;  %v2107_v48 = vadd.f32 %v2106_v49, %v8022_v34  ;;  %v2108_v52 = vpop.f32.mrb[22].mxu0  ;;  %3124 = vrot.lane.b32.xlu0 %v5316_v56, %s6198_s11 }
 0x33e   : > { %2752 = vst.msk [vmem:[%s8032_s6 + $0x60] sm:$0xf] %vm2727_vm0, %v8200_v25  ;;  %v8212_v24 = vpack.c.bf16 %v2179_v45, %v2179_v45  ;;  %v8221_v28 = vpack.c.bf16 %v2105_v29, %v2105_v29  ;;  %v2109_v40 = vadd.f32 %v2108_v52, %v8017_v42  ;;  %v2110_v0 = vpop.f32.mrb[23].mxu0 }
 0x33f   : > { %5047 = vst.msk [vmem:[%s8032_s6 + $0x160] sm:$0xf] %vm2727_vm0, %v8203_v21  ;;  %v8219_v43 = vpack.c.bf16 %v2181_v47, %v2181_v47  ;;  %v8227_v30 = vpack.c.bf16 %v2107_v48, %v2107_v48  ;;  %v2111_v3 = vadd.f32 %v2110_v0, %v8022_v34  ;;  %3126 = vrot.lane.b32.xlu1 %v5317_v32, %s6198_s11 }
 0x340   : > { %2753 = vst.msk [vmem:[%s8032_s6 + $0x64] sm:$0xf] %vm2727_vm0, %v8212_v24  ;;  %2738 = vst.msk [vmem:[%s8032_s6 + $0x28] sm:$0xf] %vm2727_vm0, %v8221_v28  ;;  %v8236_v13 = vpack.c.bf16 %v2109_v40, %v2109_v40 }
 0x341   : > { %5048 = vst.msk [vmem:[%s8032_s6 + $0x164] sm:$0xf] %vm2727_vm0, %v8219_v43  ;;  %5033 = vst.msk [vmem:[%s8032_s6 + $0x128] sm:$0xf] %vm2727_vm0, %v8227_v30  ;;  %v8243_v5 = vpack.c.bf16 %v2111_v3, %v2111_v3  ;;  %3962 = vrot.lane.b32.xlu0 %v8128_v6, %s6198_s11 }
 0x342   : > { %2739 = vst.msk [vmem:[%s8032_s6 + $0x2c] sm:$0xf] %vm2727_vm0, %v8236_v13 }
 0x343   : > { %5034 = vst.msk [vmem:[%s8032_s6 + $0x12c] sm:$0xf] %vm2727_vm0, %v8243_v5  ;;  %3964 = vrot.lane.b32.xlu1 %v8142_v33, %s6198_s11 }
 0x344   : > { %v2184_v50 = vpop.f32.mrb[20].mxu1 }
 0x345   : > { %v2185_v41 = vadd.f32 %v2184_v50, %v8017_v42  ;;  %v2186_v9 = vpop.f32.mrb[21].mxu1  ;;  %3994 = vrot.lane.b32.xlu0 %v8154_v51, %s6198_s11 }
 0x346   : > { %v2187_v61 = vadd.f32 %v2186_v9, %v8022_v34  ;;  %v2188_v31 = vpop.f32.mrb[22].mxu1 }
 0x347   : > { %v8256_v62 = vpack.c.bf16 %v2185_v41, %v2185_v41  ;;  %v2189_v27 = vadd.f32 %v2188_v31, %v8017_v42  ;;  %v2190_v22 = vpop.f32.mrb[23].mxu1  ;;  %3996 = vrot.lane.b32.xlu1 %v8166_v26, %s6198_s11 }
 0x348   : > { %v8261_v23 = vpack.c.bf16 %v2187_v61, %v2187_v61  ;;  %v2191_v6 = vadd.f32 %v2190_v22, %v8022_v34 }
 0x349   : > { %2754 = vst.msk [vmem:[%s8032_s6 + $0x68] sm:$0xf] %vm2727_vm0, %v8256_v62  ;;  %v8267_v44 = vpack.c.bf16 %v2189_v27, %v2189_v27  ;;  %v2114_v54 = vpop.f32.mrb[24].mxu0  ;;  %3096 = vrot.lane.b32.xlu0 %v8168_v38, %s6198_s11 }
 0x34a   : > { %5049 = vst.msk [vmem:[%s8032_s6 + $0x168] sm:$0xf] %vm2727_vm0, %v8261_v23  ;;  %v8272_v2 = vpack.c.bf16 %v2191_v6, %v2191_v6  ;;  %v2115_v14 = vadd.f32 %v2114_v54, %v8017_v42  ;;  %v2116_v58 = vpop.f32.mrb[25].mxu0 }
 0x34b   : > { %2755 = vst.msk [vmem:[%s8032_s6 + $0x6c] sm:$0xf] %vm2727_vm0, %v8267_v44  ;;  %v2117_v36 = vadd.f32 %v2116_v58, %v8022_v34  ;;  %v2118_v63 = vpop.f32.mrb[26].mxu0  ;;  %3098 = vrot.lane.b32.xlu1 %v8182_v39, %s6198_s11 }
 0x34c   : > { %5050 = vst.msk [vmem:[%s8032_s6 + $0x16c] sm:$0xf] %vm2727_vm0, %v8272_v2  ;;  %v8286_v56 = vpack.c.bf16 %v2115_v14, %v2115_v14  ;;  %v2119_v10 = vadd.f32 %v2118_v63, %v8017_v42  ;;  %v2120_v59 = vpop.f32.mrb[27].mxu0 }
 0x34d   : > { %v2194_v8 = vpop.f32.mrb[24].mxu1  ;;  %v8289_v33 = vpack.c.bf16 %v2117_v36, %v2117_v36  ;;  %v2121_v51 = vadd.f32 %v2120_v59, %v8022_v34  ;;  %3128 = vrot.lane.b32.xlu0 %v8200_v25, %s6198_s11  ;;  %v10262_v25 = vld [vmem:[#allocation49_spill] sm:$0xff] }
 0x34e   : > { %v2195_v11 = vadd.f32 %v2194_v8, %v8017_v42  ;;  %v2196_v37 = vpop.f32.mrb[25].mxu1  ;;  %2740 = vst.msk [vmem:[%s8032_s6 + $0x30] sm:$0xf] %vm2727_vm0, %v8286_v56  ;;  %v8296_v35 = vpack.c.bf16 %v2119_v10, %v2119_v10  ;;  %v1528_v45 = vsub.s32 4, %v10262_v25  ;;  %v1532_v47 = vsub.s32 5, %v10262_v25 }
 0x34f   : > { %v2197_v32 = vadd.f32 %v2196_v37, %v8022_v34  ;;  %v2198_v7 = vpop.f32.mrb[26].mxu1  ;;  %5035 = vst.msk [vmem:[%s8032_s6 + $0x130] sm:$0xf] %vm2727_vm0, %v8289_v33  ;;  %v8304_v19 = vpack.c.bf16 %v2121_v51, %v2121_v51  ;;  %v1524_v31 = vsub.s32 3, %v10262_v25  ;;  %3130 = vrot.lane.b32.xlu1 %v8212_v24, %s6198_s11 }
 0x350   : > { %v8306_v38 = vpack.c.bf16 %v2195_v11, %v2195_v11  ;;  %v2199_v12 = vadd.f32 %v2198_v7, %v8017_v42  ;;  %v2200_v1 = vpop.f32.mrb[27].mxu1  ;;  %2741 = vst.msk [vmem:[%s8032_s6 + $0x34] sm:$0xf] %vm2727_vm0, %v8296_v35  ;;  %v8359_v61 = vrot.slane %v8013_v57, %v1528_v45  ;;  %v8373_v14 = vrot.slane %v8013_v57, %v1532_v47 }
 0x351   : > { %v8314_v55 = vpack.c.bf16 %v2197_v32, %v2197_v32  ;;  %v2201_v26 = vadd.f32 %v2200_v1, %v8022_v34  ;;  %5036 = vst.msk [vmem:[%s8032_s6 + $0x134] sm:$0xf] %vm2727_vm0, %v8304_v19  ;;  %v2124_v16 = vpop.f32.mrb[28].mxu0  ;;  %3966 = vrot.lane.b32.xlu0 %v8173_v4, %s6198_s11  ;;  %v1520_v4 = vsub.s32 2, %v10262_v25  ;;  %v8401_v59 = vrot.slane %v8013_v57, %v1524_v31 }
 0x352   : > { %2756 = vst.msk [vmem:[%s8032_s6 + $0x70] sm:$0xf] %vm2727_vm0, %v8306_v38  ;;  %v8323_v18 = vpack.c.bf16 %v2199_v12, %v2199_v12  ;;  %v2125_v20 = vadd.f32 %v2124_v16, %v8017_v42  ;;  %v2126_v46 = vpop.f32.mrb[29].mxu0 }
 0x353   : > { %5051 = vst.msk [vmem:[%s8032_s6 + $0x170] sm:$0xf] %vm2727_vm0, %v8314_v55  ;;  %v8328_v53 = vpack.c.bf16 %v2201_v26, %v2201_v26  ;;  %v2127_v15 = vadd.f32 %v2126_v46, %v8022_v34  ;;  %v2128_v60 = vpop.f32.mrb[30].mxu0  ;;  %v8392_v63 = vrot.slane %v8013_v57, %v1520_v4  ;;  %3968 = vrot.lane.b32.xlu1 %v8189_v17, %s6198_s11 }
 0x354   : > { %2757 = vst.msk [vmem:[%s8032_s6 + $0x74] sm:$0xf] %vm2727_vm0, %v8323_v18  ;;  %v8344_v29 = vpack.c.bf16 %v2125_v20, %v2125_v20  ;;  %v2129_v39 = vadd.f32 %v2128_v60, %v8017_v42  ;;  %v2130_v49 = vpop.f32.mrb[31].mxu0 }
 0x355   : > { %5052 = vst.msk [vmem:[%s8032_s6 + $0x174] sm:$0xf] %vm2727_vm0, %v8328_v53  ;;  %v2204_v48 = vpop.f32.mrb[28].mxu1  ;;  %v8347_v52 = vpack.c.bf16 %v2127_v15, %v2127_v15  ;;  %v2131_v40 = vadd.f32 %v2130_v49, %v8022_v34  ;;  %3998 = vrot.lane.b32.xlu0 %v8203_v21, %s6198_s11 }
 0x356   : > { %v2205_v0 = vadd.f32 %v2204_v48, %v8017_v42  ;;  %v2206_v3 = vpop.f32.mrb[29].mxu1  ;;  %2742 = vst.msk [vmem:[%s8032_s6 + $0x38] sm:$0xf] %vm2727_vm0, %v8344_v29  ;;  %v8355_v50 = vpack.c.bf16 %v2129_v39, %v2129_v39 }
 0x357   : > { %v2207_v41 = vadd.f32 %v2206_v3, %v8022_v34  ;;  %v2208_v9 = vpop.f32.mrb[30].mxu1  ;;  %5037 = vst.msk [vmem:[%s8032_s6 + $0x138] sm:$0xf] %vm2727_vm0, %v8347_v52  ;;  %v8367_v27 = vpack.c.bf16 %v2131_v40, %v2131_v40  ;;  %4000 = vrot.lane.b32.xlu1 %v8219_v43, %s6198_s11 }
 0x358   : > { %v8369_v22 = vpack.c.bf16 %v2205_v0, %v2205_v0  ;;  %v2209_v6 = vadd.f32 %v2208_v9, %v8017_v42  ;;  %v2210_v54 = vpop.f32.mrb[31].mxu1  ;;  %2743 = vst.msk [vmem:[%s8032_s6 + $0x3c] sm:$0xf] %vm2727_vm0, %v8355_v50 }
 0x359   : > { %v8380_v24 = vpack.c.bf16 %v2207_v41, %v2207_v41  ;;  %v2211_v58 = vadd.f32 %v2210_v54, %v8022_v34  ;;  %5038 = vst.msk [vmem:[%s8032_s6 + $0x13c] sm:$0xf] %vm2727_vm0, %v8367_v27  ;;  %v2440_v36 = vpop.f32.mrb[32].mxu0  ;;  %3100 = vrot.lane.b32.xlu0 %v8221_v28, %s6198_s11 }
 0x35a   : > { %2758 = vst.msk [vmem:[%s8032_s6 + $0x78] sm:$0xf] %vm2727_vm0, %v8369_v22  ;;  %v8389_v42 = vpack.c.bf16 %v2209_v6, %v2209_v6  ;;  %v2441_v34 = vadd.f32 %v2440_v36, %v8359_v61  ;;  %v2442_v10 = vpop.f32.mrb[33].mxu0 }
 0x35b   : > { %5053 = vst.msk [vmem:[%s8032_s6 + $0x178] sm:$0xf] %vm2727_vm0, %v8380_v24  ;;  %v8397_v21 = vpack.c.bf16 %v2211_v58, %v2211_v58  ;;  %v2443_v8 = vadd.f32 %v2442_v10, %v8373_v14  ;;  %v2444_v51 = vpop.f32.mrb[34].mxu0  ;;  %3102 = vrot.lane.b32.xlu1 %v8236_v13, %s6198_s11 }
 0x35c   : > { %2759 = vst.msk [vmem:[%s8032_s6 + $0x7c] sm:$0xf] %vm2727_vm0, %v8389_v42  ;;  %v8414_v11 = vpack.c.bf16 %v2441_v34, %v2441_v34  ;;  %v2445_v57 = vadd.f32 %v2444_v51, %v8359_v61  ;;  %v2446_v37 = vpop.f32.mrb[35].mxu0 }
 0x35d   : > { %5054 = vst.msk [vmem:[%s8032_s6 + $0x17c] sm:$0xf] %vm2727_vm0, %v8397_v21  ;;  %v2247_v32 = vpop.f32.mrb[32].mxu1  ;;  %v8417_v7 = vpack.c.bf16 %v2443_v8, %v2443_v8  ;;  %v2447_v17 = vadd.f32 %v2446_v37, %v8373_v14  ;;  %3132 = vrot.lane.b32.xlu0 %v8256_v62, %s6198_s11 }
 0x35e   : > { %v2248_v12 = vadd.f32 %v2247_v32, %v8392_v63  ;;  %v2249_v1 = vpop.f32.mrb[33].mxu1  ;;  %3048 = vst.msk [vmem:[%s8422_s13] sm:$0xf] %vm2727_vm0, %v8414_v11  ;;  %v8427_v28 = vpack.c.bf16 %v2445_v57, %v2445_v57 }
 0x35f   : > { %v2250_v26 = vadd.f32 %v2249_v1, %v8401_v59  ;;  %v2251_v16 = vpop.f32.mrb[34].mxu1  ;;  %5151 = vst.msk [vmem:[%s8422_s13 + $0x100] sm:$0xf] %vm2727_vm0, %v8417_v7  ;;  %v8435_v20 = vpack.c.bf16 %v2447_v17, %v2447_v17  ;;  %3134 = vrot.lane.b32.xlu1 %v8267_v44, %s6198_s11 }
 0x360   : > { %v8437_v46 = vpack.c.bf16 %v2248_v12, %v2248_v12  ;;  %v2252_v25 = vadd.f32 %v2251_v16, %v8392_v63  ;;  %v2253_v45 = vpop.f32.mrb[35].mxu1  ;;  %3049 = vst.msk [vmem:[%s8422_s13 + $0x4] sm:$0xf] %vm2727_vm0, %v8427_v28 }
 0x361   : > { %v8445_v15 = vpack.c.bf16 %v2250_v26, %v2250_v26  ;;  %v2254_v43 = vadd.f32 %v2253_v45, %v8401_v59  ;;  %5152 = vst.msk [vmem:[%s8422_s13 + $0x104] sm:$0xf] %vm2727_vm0, %v8435_v20  ;;  %v2450_v60 = vpop.f32.mrb[36].mxu0  ;;  %3970 = vrot.lane.b32.xlu0 %v8227_v30, %s6198_s11 }
 0x362   : > { %2888 = vst.msk [vmem:[%s8452_s17] sm:$0xf] %vm2727_vm0, %v8437_v46  ;;  %v8457_v62 = vpack.c.bf16 %v2252_v25, %v2252_v25  ;;  %v2451_v39 = vadd.f32 %v2450_v60, %v8359_v61  ;;  %v2452_v49 = vpop.f32.mrb[37].mxu0 }
 0x363   : > { %5087 = vst.msk [vmem:[%s8452_s17 + $0x100] sm:$0xf] %vm2727_vm0, %v8445_v15  ;;  %v8462_v47 = vpack.c.bf16 %v2254_v43, %v2254_v43  ;;  %v2453_v48 = vadd.f32 %v2452_v49, %v8373_v14  ;;  %v2454_v40 = vpop.f32.mrb[38].mxu0  ;;  %3972 = vrot.lane.b32.xlu1 %v8243_v5, %s6198_s11 }
 0x364   : > { %2889 = vst.msk [vmem:[%s8452_s17 + $0x4] sm:$0xf] %vm2727_vm0, %v8457_v62  ;;  %v8476_v0 = vpack.c.bf16 %v2451_v39, %v2451_v39  ;;  %v2455_v3 = vadd.f32 %v2454_v40, %v8359_v61  ;;  %v2456_v4 = vpop.f32.mrb[39].mxu0 }
 0x365   : > { %5088 = vst.msk [vmem:[%s8452_s17 + $0x104] sm:$0xf] %vm2727_vm0, %v8462_v47  ;;  %v2257_v41 = vpop.f32.mrb[36].mxu1  ;;  %v8479_v13 = vpack.c.bf16 %v2453_v48, %v2453_v48  ;;  %v2457_v9 = vadd.f32 %v2456_v4, %v8373_v14  ;;  %4002 = vrot.lane.b32.xlu0 %v8261_v23, %s6198_s11 }
 0x366   : > { %v2258_v31 = vadd.f32 %v2257_v41, %v8392_v63  ;;  %v2259_v6 = vpop.f32.mrb[37].mxu1  ;;  %3050 = vst.msk [vmem:[%s8422_s13 + $0x8] sm:$0xf] %vm2727_vm0, %v8476_v0  ;;  %v8486_v30 = vpack.c.bf16 %v2455_v3, %v2455_v3 }
 0x367   : > { %v2260_v54 = vadd.f32 %v2259_v6, %v8401_v59  ;;  %v2261_v58 = vpop.f32.mrb[38].mxu1  ;;  %5153 = vst.msk [vmem:[%s8422_s13 + $0x108] sm:$0xf] %vm2727_vm0, %v8479_v13  ;;  %v8494_v36 = vpack.c.bf16 %v2457_v9, %v2457_v9  ;;  %4004 = vrot.lane.b32.xlu1 %v8272_v2, %s6198_s11  ;;  %v3081_v9 = vpop.permute.xlu0 %3080 }
 0x368   : > { %v8496_v34 = vpack.c.bf16 %v2258_v31, %v2258_v31  ;;  %v2262_v10 = vadd.f32 %v2261_v58, %v8392_v63  ;;  %v2263_v8 = vpop.f32.mrb[39].mxu1  ;;  %3051 = vst.msk [vmem:[%s8422_s13 + $0xc] sm:$0xf] %vm2727_vm0, %v8486_v30  ;;  %4895 = vst.msk [vmem:[%s8032_s6 + $0x80] sm:$0xf] %vm2727_vm0, %v3081_v9 }
 0x369   : > { %v8504_v51 = vpack.c.bf16 %v2260_v54, %v2260_v54  ;;  %v2264_v44 = vadd.f32 %v2263_v8, %v8401_v59  ;;  %5154 = vst.msk [vmem:[%s8422_s13 + $0x10c] sm:$0xf] %vm2727_vm0, %v8494_v36  ;;  %v2460_v37 = vpop.f32.mrb[40].mxu0  ;;  %3104 = vrot.lane.b32.xlu0 %v8286_v56, %s6198_s11  ;;  %v3083_v54 = vpop.permute.xlu1 %3082 }
 0x36a   : > { %2890 = vst.msk [vmem:[%s8452_s17 + $0x8] sm:$0xf] %vm2727_vm0, %v8496_v34  ;;  %v8513_v57 = vpack.c.bf16 %v2262_v10, %v2262_v10  ;;  %v2461_v32 = vadd.f32 %v2460_v37, %v8359_v61  ;;  %v2462_v17 = vpop.f32.mrb[41].mxu0  ;;  %4896 = vst.msk [vmem:[%s8032_s6 + $0x84] sm:$0xf] %vm2727_vm0, %v3083_v54 }
 0x36b   : > { %5089 = vst.msk [vmem:[%s8452_s17 + $0x108] sm:$0xf] %vm2727_vm0, %v8504_v51  ;;  %v8518_v23 = vpack.c.bf16 %v2264_v44, %v2264_v44  ;;  %v2463_v12 = vadd.f32 %v2462_v17, %v8373_v14  ;;  %v2464_v1 = vpop.f32.mrb[42].mxu0  ;;  %3106 = vrot.lane.b32.xlu1 %v8296_v35, %s6198_s11 }
 0x36c   : > { %2891 = vst.msk [vmem:[%s8452_s17 + $0xc] sm:$0xf] %vm2727_vm0, %v8513_v57  ;;  %v8532_v26 = vpack.c.bf16 %v2461_v32, %v2461_v32  ;;  %v2465_v16 = vadd.f32 %v2464_v1, %v8359_v61  ;;  %v2466_v25 = vpop.f32.mrb[43].mxu0 }
 0x36d   : > { %5090 = vst.msk [vmem:[%s8452_s17 + $0x10c] sm:$0xf] %vm2727_vm0, %v8518_v23  ;;  %v2267_v45 = vpop.f32.mrb[40].mxu1  ;;  %v8535_v5 = vpack.c.bf16 %v2463_v12, %v2463_v12  ;;  %v2467_v43 = vadd.f32 %v2466_v25, %v8373_v14  ;;  %3136 = vrot.lane.b32.xlu0 %v8306_v38, %s6198_s11 }
 0x36e   : > { %v2268_v60 = vadd.f32 %v2267_v45, %v8392_v63  ;;  %v2269_v39 = vpop.f32.mrb[41].mxu1  ;;  %3052 = vst.msk [vmem:[%s8422_s13 + $0x10] sm:$0xf] %vm2727_vm0, %v8532_v26  ;;  %v8542_v56 = vpack.c.bf16 %v2465_v16, %v2465_v16 }
 0x36f   : > { %v2270_v49 = vadd.f32 %v2269_v39, %v8401_v59  ;;  %v2271_v48 = vpop.f32.mrb[42].mxu1  ;;  %5155 = vst.msk [vmem:[%s8422_s13 + $0x110] sm:$0xf] %vm2727_vm0, %v8535_v5  ;;  %v8550_v40 = vpack.c.bf16 %v2467_v43, %v2467_v43  ;;  %3138 = vrot.lane.b32.xlu1 %v8323_v18, %s6198_s11 }
 0x370   : > { %v8552_v3 = vpack.c.bf16 %v2268_v60, %v2268_v60  ;;  %v2272_v4 = vadd.f32 %v2271_v48, %v8392_v63  ;;  %v2273_v41 = vpop.f32.mrb[43].mxu1  ;;  %3053 = vst.msk [vmem:[%s8422_s13 + $0x14] sm:$0xf] %vm2727_vm0, %v8542_v56 }
 0x371   : > { %v8560_v2 = vpack.c.bf16 %v2270_v49, %v2270_v49  ;;  %v2274_v31 = vadd.f32 %v2273_v41, %v8401_v59  ;;  %5156 = vst.msk [vmem:[%s8422_s13 + $0x114] sm:$0xf] %vm2727_vm0, %v8550_v40  ;;  %v2470_v6 = vpop.f32.mrb[44].mxu0  ;;  %3974 = vrot.lane.b32.xlu0 %v8289_v33, %s6198_s11 }
 0x372   : > { %2892 = vst.msk [vmem:[%s8452_s17 + $0x10] sm:$0xf] %vm2727_vm0, %v8552_v3  ;;  %v8571_v38 = vpack.c.bf16 %v2272_v4, %v2272_v4  ;;  %v2471_v10 = vadd.f32 %v2470_v6, %v8359_v61  ;;  %v2472_v8 = vpop.f32.mrb[45].mxu0 }
 0x373   : > { %5091 = vst.msk [vmem:[%s8452_s17 + $0x110] sm:$0xf] %vm2727_vm0, %v8560_v2  ;;  %v8576_v58 = vpack.c.bf16 %v2274_v31, %v2274_v31  ;;  %v2473_v44 = vadd.f32 %v2472_v8, %v8373_v14  ;;  %v2474_v37 = vpop.f32.mrb[46].mxu0  ;;  %3976 = vrot.lane.b32.xlu1 %v8304_v19, %s6198_s11 }
 0x374   : > { %2893 = vst.msk [vmem:[%s8452_s17 + $0x14] sm:$0xf] %vm2727_vm0, %v8571_v38  ;;  %v8592_v32 = vpack.c.bf16 %v2471_v10, %v2471_v10  ;;  %v2475_v17 = vadd.f32 %v2474_v37, %v8359_v61  ;;  %v2476_v35 = vpop.f32.mrb[47].mxu0 }
 0x375   : > { %5092 = vst.msk [vmem:[%s8452_s17 + $0x114] sm:$0xf] %vm2727_vm0, %v8576_v58  ;;  %v2277_v12 = vpop.f32.mrb[44].mxu1  ;;  %v8595_v1 = vpack.c.bf16 %v2473_v44, %v2473_v44  ;;  %v2477_v16 = vadd.f32 %v2476_v35, %v8373_v14  ;;  %4006 = vrot.lane.b32.xlu0 %v8314_v55, %s6198_s11 }
 0x376   : > { %v2278_v25 = vadd.f32 %v2277_v12, %v8392_v63  ;;  %v2279_v45 = vpop.f32.mrb[45].mxu1  ;;  %3054 = vst.msk [vmem:[%s8422_s13 + $0x18] sm:$0xf] %vm2727_vm0, %v8592_v32  ;;  %v8602_v33 = vpack.c.bf16 %v2475_v17, %v2475_v17 }
 0x377   : > { %v2280_v43 = vadd.f32 %v2279_v45, %v8401_v59  ;;  %v2281_v60 = vpop.f32.mrb[46].mxu1  ;;  %5157 = vst.msk [vmem:[%s8422_s13 + $0x118] sm:$0xf] %vm2727_vm0, %v8595_v1  ;;  %v8610_v39 = vpack.c.bf16 %v2477_v16, %v2477_v16  ;;  %4008 = vrot.lane.b32.xlu1 %v8328_v53, %s6198_s11 }
 0x378   : > { %v8612_v49 = vpack.c.bf16 %v2278_v25, %v2278_v25  ;;  %v2282_v48 = vadd.f32 %v2281_v60, %v8392_v63  ;;  %v2283_v4 = vpop.f32.mrb[47].mxu1  ;;  %3055 = vst.msk [vmem:[%s8422_s13 + $0x1c] sm:$0xf] %vm2727_vm0, %v8602_v33 }
 0x379   : > { %v8620_v41 = vpack.c.bf16 %v2280_v43, %v2280_v43  ;;  %v2284_v18 = vadd.f32 %v2283_v4, %v8401_v59  ;;  %5158 = vst.msk [vmem:[%s8422_s13 + $0x11c] sm:$0xf] %vm2727_vm0, %v8610_v39  ;;  %v2480_v31 = vpop.f32.mrb[48].mxu0  ;;  %3108 = vrot.lane.b32.xlu0 %v8344_v29, %s6198_s11 }
 0x37a   : > { %2894 = vst.msk [vmem:[%s8452_s17 + $0x18] sm:$0xf] %vm2727_vm0, %v8612_v49  ;;  %v8629_v9 = vpack.c.bf16 %v2282_v48, %v2282_v48  ;;  %v2481_v6 = vadd.f32 %v2480_v31, %v8359_v61  ;;  %v2482_v54 = vpop.f32.mrb[49].mxu0 }
 0x37b   : > { %5093 = vst.msk [vmem:[%s8452_s17 + $0x118] sm:$0xf] %vm2727_vm0, %v8620_v41  ;;  %v8634_v55 = vpack.c.bf16 %v2284_v18, %v2284_v18  ;;  %v2483_v10 = vadd.f32 %v2482_v54, %v8373_v14  ;;  %v2484_v8 = vpop.f32.mrb[50].mxu0  ;;  %3110 = vrot.lane.b32.xlu1 %v8355_v50, %s6198_s11 }
 0x37c   : > { %2895 = vst.msk [vmem:[%s8452_s17 + $0x1c] sm:$0xf] %vm2727_vm0, %v8629_v9  ;;  %v8648_v44 = vpack.c.bf16 %v2481_v6, %v2481_v6  ;;  %v2485_v37 = vadd.f32 %v2484_v8, %v8359_v61  ;;  %v2486_v17 = vpop.f32.mrb[51].mxu0 }
 0x37d   : > { %5094 = vst.msk [vmem:[%s8452_s17 + $0x11c] sm:$0xf] %vm2727_vm0, %v8634_v55  ;;  %v2287_v35 = vpop.f32.mrb[48].mxu1  ;;  %v8651_v19 = vpack.c.bf16 %v2483_v10, %v2483_v10  ;;  %v2487_v12 = vadd.f32 %v2486_v17, %v8373_v14  ;;  %3140 = vrot.lane.b32.xlu0 %v8369_v22, %s6198_s11 }
 0x37e   : > { %v2288_v16 = vadd.f32 %v2287_v35, %v8392_v63  ;;  %v2289_v25 = vpop.f32.mrb[49].mxu1  ;;  %3056 = vst.msk [vmem:[%s8422_s13 + $0x20] sm:$0xf] %vm2727_vm0, %v8648_v44  ;;  %v8658_v29 = vpack.c.bf16 %v2485_v37, %v2485_v37  ;;  %v3113_v37 = vpop.permute.xlu0 %3112 }
 0x37f   : > { %v2290_v45 = vadd.f32 %v2289_v25, %v8401_v59  ;;  %v2291_v43 = vpop.f32.mrb[50].mxu1  ;;  %5159 = vst.msk [vmem:[%s8422_s13 + $0x120] sm:$0xf] %vm2727_vm0, %v8651_v19  ;;  %v8666_v60 = vpack.c.bf16 %v2487_v12, %v2487_v12  ;;  %4911 = vst.msk [vmem:[%s8032_s6 + $0xc0] sm:$0xf] %vm2727_vm0, %v3113_v37  ;;  %3142 = vrot.lane.b32.xlu1 %v8389_v42, %s6198_s11 }
 0x380   : > { %v8668_v48 = vpack.c.bf16 %v2288_v16, %v2288_v16  ;;  %v2292_v4 = vadd.f32 %v2291_v43, %v8392_v63  ;;  %v2293_v18 = vpop.f32.mrb[51].mxu1  ;;  %3057 = vst.msk [vmem:[%s8422_s13 + $0x24] sm:$0xf] %vm2727_vm0, %v8658_v29 }
 0x381   : > { %v8676_v31 = vpack.c.bf16 %v2290_v45, %v2290_v45  ;;  %v2294_v53 = vadd.f32 %v2293_v18, %v8401_v59  ;;  %5160 = vst.msk [vmem:[%s8422_s13 + $0x124] sm:$0xf] %vm2727_vm0, %v8666_v60  ;;  %v2490_v54 = vpop.f32.mrb[52].mxu0  ;;  %3978 = vrot.lane.b32.xlu0 %v8347_v52, %s6198_s11  ;;  %v3115_v18 = vpop.permute.xlu1 %3114 }
 0x382   : > { %2896 = vst.msk [vmem:[%s8452_s17 + $0x20] sm:$0xf] %vm2727_vm0, %v8668_v48  ;;  %v8685_v6 = vpack.c.bf16 %v2292_v4, %v2292_v4  ;;  %v2491_v10 = vadd.f32 %v2490_v54, %v8359_v61  ;;  %v2492_v8 = vpop.f32.mrb[53].mxu0  ;;  %4912 = vst.msk [vmem:[%s8032_s6 + $0xc4] sm:$0xf] %vm2727_vm0, %v3115_v18 }
 0x383   : > { %5095 = vst.msk [vmem:[%s8452_s17 + $0x120] sm:$0xf] %vm2727_vm0, %v8676_v31  ;;  %v8690_v22 = vpack.c.bf16 %v2294_v53, %v2294_v53  ;;  %v2493_v17 = vadd.f32 %v2492_v8, %v8373_v14  ;;  %v2494_v35 = vpop.f32.mrb[54].mxu0  ;;  %v3951_v8 = vpop.permute.xlu0 %3950  ;;  %3980 = vrot.lane.b32.xlu1 %v8367_v27, %s6198_s11 }
 0x384   : > { %2897 = vst.msk [vmem:[%s8452_s17 + $0x24] sm:$0xf] %vm2727_vm0, %v8685_v6  ;;  %v8706_v12 = vpack.c.bf16 %v2491_v10, %v2491_v10  ;;  %v2495_v50 = vadd.f32 %v2494_v35, %v8359_v61  ;;  %v2496_v16 = vpop.f32.mrb[55].mxu0  ;;  %5183 = vst.msk [vmem:[%s8032_s6 + $0x180] sm:$0xf] %vm2727_vm0, %v3951_v8 }
 0x385   : > { %5096 = vst.msk [vmem:[%s8452_s17 + $0x124] sm:$0xf] %vm2727_vm0, %v8690_v22  ;;  %v2297_v25 = vpop.f32.mrb[52].mxu1  ;;  %v8709_v45 = vpack.c.bf16 %v2493_v17, %v2493_v17  ;;  %v2497_v43 = vadd.f32 %v2496_v16, %v8373_v14  ;;  %4010 = vrot.lane.b32.xlu0 %v8380_v24, %s6198_s11 }
 0x386   : > { %v2298_v4 = vadd.f32 %v2297_v25, %v8392_v63  ;;  %v2299_v52 = vpop.f32.mrb[53].mxu1  ;;  %3058 = vst.msk [vmem:[%s8422_s13 + $0x28] sm:$0xf] %vm2727_vm0, %v8706_v12  ;;  %v8716_v53 = vpack.c.bf16 %v2495_v50, %v2495_v50 }
 0x387   : > { %v2300_v54 = vadd.f32 %v2299_v52, %v8401_v59  ;;  %v2301_v10 = vpop.f32.mrb[54].mxu1  ;;  %5161 = vst.msk [vmem:[%s8422_s13 + $0x128] sm:$0xf] %vm2727_vm0, %v8709_v45  ;;  %v8726_v37 = vpack.c.bf16 %v2497_v43, %v2497_v43  ;;  %v3953_v43 = vpop.permute.xlu1 %3952  ;;  %4012 = vrot.lane.b32.xlu1 %v8397_v21, %s6198_s11 }
 0x388   : > { %v8728_v17 = vpack.c.bf16 %v2298_v4, %v2298_v4  ;;  %v2302_v35 = vadd.f32 %v2301_v10, %v8392_v63  ;;  %v2303_v50 = vpop.f32.mrb[55].mxu1  ;;  %3059 = vst.msk [vmem:[%s8422_s13 + $0x2c] sm:$0xf] %vm2727_vm0, %v8716_v53  ;;  %5184 = vst.msk [vmem:[%s8032_s6 + $0x184] sm:$0xf] %vm2727_vm0, %v3953_v43 }
 0x389   : > { %10263 = vst [vmem:[#allocation41_spill] sm:$0xff] %v8726_v37  ;;  %v8738_v42 = vpack.c.bf16 %v2300_v54, %v2300_v54  ;;  %v2304_v16 = vadd.f32 %v2303_v50, %v8401_v59  ;;  %5162 = vst.msk [vmem:[%s8422_s13 + $0x12c] sm:$0xf] %vm2727_vm0, %v8726_v37  ;;  %v2500_v24 = vpop.f32.mrb[56].mxu0  ;;  %v3983_v54 = vpop.permute.xlu0 %3982  ;;  %3209 = vrot.lane.b32.xlu0 %v8437_v46, %s6198_s11 }
 0x38a   : > { %2898 = vst.msk [vmem:[%s8452_s17 + $0x28] sm:$0xf] %vm2727_vm0, %v8728_v17  ;;  %v8747_v25 = vpack.c.bf16 %v2302_v35, %v2302_v35  ;;  %v2501_v52 = vadd.f32 %v2500_v24, %v8359_v61  ;;  %v2502_v18 = vpop.f32.mrb[57].mxu0  ;;  %5199 = vst.msk [vmem:[%s8032_s6 + $0x1c0] sm:$0xf] %vm2727_vm0, %v3983_v54 }
 0x38b   : > { %5097 = vst.msk [vmem:[%s8452_s17 + $0x128] sm:$0xf] %vm2727_vm0, %v8738_v42  ;;  %v8752_v4 = vpack.c.bf16 %v2304_v16, %v2304_v16  ;;  %v2503_v10 = vadd.f32 %v2502_v18, %v8373_v14  ;;  %v2504_v8 = vpop.f32.mrb[58].mxu0  ;;  %v3985_v37 = vpop.permute.xlu1 %3984  ;;  %3211 = vrot.lane.b32.xlu1 %v8457_v62, %s6198_s11 }
 0x38c   : > { %2899 = vst.msk [vmem:[%s8452_s17 + $0x2c] sm:$0xf] %vm2727_vm0, %v8747_v25  ;;  %v8770_v35 = vpack.c.bf16 %v2501_v52, %v2501_v52  ;;  %v2505_v27 = vadd.f32 %v2504_v8, %v8359_v61  ;;  %v2506_v50 = vpop.f32.mrb[59].mxu0  ;;  %5200 = vst.msk [vmem:[%s8032_s6 + $0x1c4] sm:$0xf] %vm2727_vm0, %v3985_v37 }
 0x38d   : > { %5098 = vst.msk [vmem:[%s8452_s17 + $0x12c] sm:$0xf] %vm2727_vm0, %v8752_v4  ;;  %v2307_v16 = vpop.f32.mrb[56].mxu1  ;;  %v8773_v24 = vpack.c.bf16 %v2503_v10, %v2503_v10  ;;  %v2507_v43 = vadd.f32 %v2506_v50, %v8373_v14  ;;  %3338 = vrot.lane.b32.xlu0 %v8414_v11, %s6198_s11 }
 0x38e   : > { %v2308_v18 = vadd.f32 %v2307_v16, %v8392_v63  ;;  %v2309_v46 = vpop.f32.mrb[57].mxu1  ;;  %3060 = vst.msk [vmem:[%s8422_s13 + $0x30] sm:$0xf] %vm2727_vm0, %v8770_v35  ;;  %v8780_v54 = vpack.c.bf16 %v2505_v27, %v2505_v27 }
 0x38f   : > { %10264 = vst [vmem:[#allocation79_spill] sm:$0xff] %v8773_v24  ;;  %v2310_v52 = vadd.f32 %v2309_v46, %v8401_v59  ;;  %v2311_v8 = vpop.f32.mrb[58].mxu1  ;;  %5163 = vst.msk [vmem:[%s8422_s13 + $0x130] sm:$0xf] %vm2727_vm0, %v8773_v24  ;;  %v8790_v10 = vpack.c.bf16 %v2507_v43, %v2507_v43  ;;  %v3117_v46 = vpop.permute.xlu0 %3116  ;;  %3340 = vrot.lane.b32.xlu1 %v8427_v28, %s6198_s11 }
 0x390   : > { %10265 = vst [vmem:[#allocation80_spill] sm:$0xff] %v8780_v54  ;;  %v8792_v50 = vpack.c.bf16 %v2308_v18, %v2308_v18  ;;  %v2312_v27 = vadd.f32 %v2311_v8, %v8392_v63  ;;  %v2313_v16 = vpop.f32.mrb[59].mxu1  ;;  %3061 = vst.msk [vmem:[%s8422_s13 + $0x34] sm:$0xf] %vm2727_vm0, %v8780_v54  ;;  %v3085_v18 = vpop.permute.xlu1 %3084 }
 0x391   : > { %10266 = vst [vmem:[#allocation81_spill] sm:$0xff] %v8790_v10  ;;  %v8800_v21 = vpack.c.bf16 %v2310_v52, %v2310_v52  ;;  %v2314_v37 = vadd.f32 %v2313_v16, %v8401_v59  ;;  %4913 = vst.msk [vmem:[%s8032_s6 + $0xc8] sm:$0xf] %vm2727_vm0, %v3117_v46  ;;  %v2510_v11 = vpop.f32.mrb[60].mxu0  ;;  %4079 = vrot.lane.b32.xlu0 %v8445_v15, %s6198_s11 }
 0x392   : > { %5164 = vst.msk [vmem:[%s8422_s13 + $0x134] sm:$0xf] %vm2727_vm0, %v8790_v10  ;;  %2900 = vst.msk [vmem:[%s8452_s17 + $0x30] sm:$0xf] %vm2727_vm0, %v8792_v50  ;;  %v8811_v43 = vpack.c.bf16 %v2312_v27, %v2312_v27  ;;  %v2511_v8 = vadd.f32 %v2510_v11, %v8359_v61  ;;  %v2512_v16 = vpop.f32.mrb[61].mxu0 }
 0x393   : > { %10267 = vst [vmem:[#allocation43_spill] sm:$0xff] %v8800_v21  ;;  %5099 = vst.msk [vmem:[%s8452_s17 + $0x130] sm:$0xf] %vm2727_vm0, %v8800_v21  ;;  %v8816_v52 = vpack.c.bf16 %v2314_v37, %v2314_v37  ;;  %v2513_v27 = vadd.f32 %v2512_v16, %v8373_v14  ;;  %v2514_v46 = vpop.f32.mrb[62].mxu0  ;;  %v3955_v37 = vpop.permute.xlu0 %3954  ;;  %4081 = vrot.lane.b32.xlu1 %v8462_v47, %s6198_s11 }
 0x394   : > { %4897 = vst.msk [vmem:[%s8032_s6 + $0x88] sm:$0xf] %vm2727_vm0, %v3085_v18  ;;  %2901 = vst.msk [vmem:[%s8452_s17 + $0x34] sm:$0xf] %vm2727_vm0, %v8811_v43  ;;  %v8832_v11 = vpack.c.bf16 %v2511_v8, %v2511_v8  ;;  %v2515_v62 = vadd.f32 %v2514_v46, %v8359_v61  ;;  %v2516_v18 = vpop.f32.mrb[63].mxu0  ;;  %v3087_v21 = vpop.permute.xlu1 %3086 }
 0x395   : > { %5100 = vst.msk [vmem:[%s8452_s17 + $0x134] sm:$0xf] %vm2727_vm0, %v8816_v52  ;;  %v2317_v10 = vpop.f32.mrb[60].mxu1  ;;  %5185 = vst.msk [vmem:[%s8032_s6 + $0x188] sm:$0xf] %vm2727_vm0, %v3955_v37  ;;  %v8837_v24 = vpack.c.bf16 %v2513_v27, %v2513_v27  ;;  %v2517_v16 = vadd.f32 %v2516_v18, %v8373_v14  ;;  %4208 = vrot.lane.b32.xlu0 %v8417_v7, %s6198_s11 }
 0x396   : > { %v2318_v15 = vadd.f32 %v2317_v10, %v8392_v63  ;;  %v2319_v54 = vpop.f32.mrb[61].mxu1  ;;  %3062 = vst.msk [vmem:[%s8422_s13 + $0x38] sm:$0xf] %vm2727_vm0, %v8832_v11  ;;  %v8844_v8 = vpack.c.bf16 %v2515_v62, %v2515_v62  ;;  %4898 = vst.msk [vmem:[%s8032_s6 + $0x8c] sm:$0xf] %vm2727_vm0, %v3087_v21 }
 0x397   : > { %10268 = vst [vmem:[#allocation42_spill] sm:$0xff] %v8837_v24  ;;  %v2320_v46 = vadd.f32 %v2319_v54, %v8401_v59  ;;  %v2321_v37 = vpop.f32.mrb[62].mxu1  ;;  %5165 = vst.msk [vmem:[%s8422_s13 + $0x138] sm:$0xf] %vm2727_vm0, %v8837_v24  ;;  %v8854_v10 = vpack.c.bf16 %v2517_v16, %v2517_v16  ;;  %v3987_v54 = vpop.permute.xlu0 %3986  ;;  %4210 = vrot.lane.b32.xlu1 %v8435_v20, %s6198_s11 }
 0x398   : > { %10269 = vst [vmem:[#allocation45_spill] sm:$0xff] %v8844_v8  ;;  %v8856_v27 = vpack.c.bf16 %v2318_v15, %v2318_v15  ;;  %v2322_v62 = vadd.f32 %v2321_v37, %v8392_v63  ;;  %v2323_v18 = vpop.f32.mrb[63].mxu1  ;;  %3063 = vst.msk [vmem:[%s8422_s13 + $0x3c] sm:$0xf] %vm2727_vm0, %v8844_v8  ;;  %v3119_v15 = vpop.permute.xlu1 %3118 }
 0x399   : > { %10270 = vst [vmem:[#allocation44_spill] sm:$0xff] %v8854_v10  ;;  %v8864_v28 = vpack.c.bf16 %v2320_v46, %v2320_v46  ;;  %v2324_v21 = vadd.f32 %v2323_v18, %v8401_v59  ;;  %5201 = vst.msk [vmem:[%s8032_s6 + $0x1c8] sm:$0xf] %vm2727_vm0, %v3987_v54  ;;  %v2520_v7 = vpop.f32.mrb[64].mxu0  ;;  %3213 = vrot.lane.b32.xlu0 %v8496_v34, %s6198_s11 }
 0x39a   : > { %5166 = vst.msk [vmem:[%s8422_s13 + $0x13c] sm:$0xf] %vm2727_vm0, %v8854_v10  ;;  %2902 = vst.msk [vmem:[%s8452_s17 + $0x38] sm:$0xf] %vm2727_vm0, %v8856_v27  ;;  %v8875_v16 = vpack.c.bf16 %v2322_v62, %v2322_v62  ;;  %v2521_v37 = vadd.f32 %v2520_v7, %v8359_v61  ;;  %v2522_v18 = vpop.f32.mrb[65].mxu0 }
 0x39b   : > { %10271 = vst [vmem:[#allocation47_spill] sm:$0xff] %v8864_v28  ;;  %5101 = vst.msk [vmem:[%s8452_s17 + $0x138] sm:$0xf] %vm2727_vm0, %v8864_v28  ;;  %v8880_v46 = vpack.c.bf16 %v2324_v21, %v2324_v21  ;;  %v2523_v62 = vadd.f32 %v2522_v18, %v8373_v14  ;;  %v2524_v54 = vpop.f32.mrb[66].mxu0  ;;  %v3089_v21 = vpop.permute.xlu0 %3088  ;;  %3215 = vrot.lane.b32.xlu1 %v8513_v57, %s6198_s11 }
 0x39c   : > { %4914 = vst.msk [vmem:[%s8032_s6 + $0xcc] sm:$0xf] %vm2727_vm0, %v3119_v15  ;;  %2903 = vst.msk [vmem:[%s8452_s17 + $0x3c] sm:$0xf] %vm2727_vm0, %v8875_v16  ;;  %v8896_v7 = vpack.c.bf16 %v2521_v37, %v2521_v37  ;;  %v2525_v47 = vadd.f32 %v2524_v54, %v8359_v61  ;;  %v2526_v15 = vpop.f32.mrb[67].mxu0  ;;  %v3957_v28 = vpop.permute.xlu1 %3956 }
 0x39d   : > { %10272 = vst [vmem:[#allocation46_spill] sm:$0xff] %v8880_v46  ;;  %5102 = vst.msk [vmem:[%s8452_s17 + $0x13c] sm:$0xf] %vm2727_vm0, %v8880_v46  ;;  %v2327_v10 = vpop.f32.mrb[64].mxu1  ;;  %v8901_v24 = vpack.c.bf16 %v2523_v62, %v2523_v62  ;;  %v2527_v18 = vadd.f32 %v2526_v15, %v8373_v14  ;;  %3342 = vrot.lane.b32.xlu0 %v8476_v0, %s6198_s11 }
 0x39e   : > { %4899 = vst.msk [vmem:[%s8032_s6 + $0x90] sm:$0xf] %vm2727_vm0, %v3089_v21  ;;  %v2328_v34 = vadd.f32 %v2327_v10, %v8392_v63  ;;  %v2329_v8 = vpop.f32.mrb[65].mxu1  ;;  %3064 = vst.msk [vmem:[%s8422_s13 + $0x40] sm:$0xf] %vm2727_vm0, %v8896_v7  ;;  %v8908_v37 = vpack.c.bf16 %v2525_v47, %v2525_v47 }
 0x39f   : > { %10273 = vst [vmem:[#allocation48_spill] sm:$0xff] %v8901_v24  ;;  %v2330_v54 = vadd.f32 %v2329_v8, %v8401_v59  ;;  %v2331_v46 = vpop.f32.mrb[66].mxu1  ;;  %5186 = vst.msk [vmem:[%s8032_s6 + $0x18c] sm:$0xf] %vm2727_vm0, %v3957_v28  ;;  %v8918_v10 = vpack.c.bf16 %v2527_v18, %v2527_v18  ;;  %v3121_v0 = vpop.permute.xlu0 %3120  ;;  %3344 = vrot.lane.b32.xlu1 %v8486_v30, %s6198_s11 }
 0x3a0   : > { %5167 = vst.msk [vmem:[%s8422_s13 + $0x140] sm:$0xf] %vm2727_vm0, %v8901_v24  ;;  %v8920_v62 = vpack.c.bf16 %v2328_v34, %v2328_v34  ;;  %v2332_v21 = vadd.f32 %v2331_v46, %v8392_v63  ;;  %v2333_v47 = vpop.f32.mrb[67].mxu1  ;;  %3065 = vst.msk [vmem:[%s8422_s13 + $0x44] sm:$0xf] %vm2727_vm0, %v8908_v37 }
 0x3a1   : > { %10274 = vst [vmem:[#allocation71_spill] sm:$0xff] %v8918_v10  ;;  %v8928_v8 = vpack.c.bf16 %v2330_v54, %v2330_v54  ;;  %v2334_v20 = vadd.f32 %v2333_v47, %v8401_v59  ;;  %5168 = vst.msk [vmem:[%s8422_s13 + $0x144] sm:$0xf] %vm2727_vm0, %v8918_v10  ;;  %v2530_v46 = vpop.f32.mrb[68].mxu0  ;;  %v3989_v54 = vpop.permute.xlu1 %3988  ;;  %4083 = vrot.lane.b32.xlu0 %v8504_v51, %s6198_s11 }
 0x3a2   : > { %2904 = vst.msk [vmem:[%s8452_s17 + $0x40] sm:$0xf] %vm2727_vm0, %v8920_v62  ;;  %v8937_v28 = vpack.c.bf16 %v2332_v21, %v2332_v21  ;;  %v2531_v18 = vadd.f32 %v2530_v46, %v8359_v61  ;;  %v2532_v34 = vpop.f32.mrb[69].mxu0  ;;  %4915 = vst.msk [vmem:[%s8032_s6 + $0xd0] sm:$0xf] %vm2727_vm0, %v3121_v0 }
 0x3a3   : > { %5103 = vst.msk [vmem:[%s8452_s17 + $0x140] sm:$0xf] %vm2727_vm0, %v8928_v8  ;;  %v8942_v15 = vpack.c.bf16 %v2334_v20, %v2334_v20  ;;  %v2533_v21 = vadd.f32 %v2532_v34, %v8373_v14  ;;  %v2534_v47 = vpop.f32.mrb[70].mxu0  ;;  %5202 = vst.msk [vmem:[%s8032_s6 + $0x1cc] sm:$0xf] %vm2727_vm0, %v3989_v54  ;;  %v3959_v51 = vpop.permute.xlu0 %3958  ;;  %4085 = vrot.lane.b32.xlu1 %v8518_v23, %s6198_s11 }
 0x3a4   : > { %2905 = vst.msk [vmem:[%s8452_s17 + $0x44] sm:$0xf] %vm2727_vm0, %v8937_v28  ;;  %v8960_v20 = vpack.c.bf16 %v2531_v18, %v2531_v18  ;;  %v2535_v57 = vadd.f32 %v2534_v47, %v8359_v61  ;;  %v2536_v46 = vpop.f32.mrb[71].mxu0  ;;  %5187 = vst.msk [vmem:[%s8032_s6 + $0x190] sm:$0xf] %vm2727_vm0, %v3959_v51 }
 0x3a5   : > { %10275 = vst [vmem:[#allocation73_spill] sm:$0xff] %v8942_v15  ;;  %5104 = vst.msk [vmem:[%s8452_s17 + $0x144] sm:$0xf] %vm2727_vm0, %v8942_v15  ;;  %v2337_v0 = vpop.f32.mrb[68].mxu1  ;;  %v8963_v10 = vpack.c.bf16 %v2533_v21, %v2533_v21  ;;  %v2537_v34 = vadd.f32 %v2536_v46, %v8373_v14  ;;  %v3091_v21 = vpop.permute.xlu1 %3090  ;;  %4212 = vrot.lane.b32.xlu0 %v8479_v13, %s6198_s11 }
 0x3a6   : > { %v2338_v54 = vadd.f32 %v2337_v0, %v8392_v63  ;;  %v2339_v24 = vpop.f32.mrb[69].mxu1  ;;  %3066 = vst.msk [vmem:[%s8422_s13 + $0x48] sm:$0xf] %vm2727_vm0, %v8960_v20  ;;  %v8970_v18 = vpack.c.bf16 %v2535_v57, %v2535_v57  ;;  %4900 = vst.msk [vmem:[%s8032_s6 + $0x94] sm:$0xf] %vm2727_vm0, %v3091_v21 }
 0x3a7   : > { %10276 = vst [vmem:[#allocation72_spill] sm:$0xff] %v8963_v10  ;;  %v2340_v47 = vadd.f32 %v2339_v24, %v8401_v59  ;;  %v2341_v15 = vpop.f32.mrb[70].mxu1  ;;  %5169 = vst.msk [vmem:[%s8422_s13 + $0x148] sm:$0xf] %vm2727_vm0, %v8963_v10  ;;  %v8980_v46 = vpack.c.bf16 %v2537_v34, %v2537_v34  ;;  %v3991_v13 = vpop.permute.xlu0 %3990  ;;  %4214 = vrot.lane.b32.xlu1 %v8494_v36, %s6198_s11 }
 0x3a8   : > { %10277 = vst [vmem:[#allocation50_spill] sm:$0xff] %v8970_v18  ;;  %v8982_v0 = vpack.c.bf16 %v2338_v54, %v2338_v54  ;;  %v2342_v57 = vadd.f32 %v2341_v15, %v8392_v63  ;;  %v2343_v24 = vpop.f32.mrb[71].mxu1  ;;  %3067 = vst.msk [vmem:[%s8422_s13 + $0x4c] sm:$0xf] %vm2727_vm0, %v8970_v18 }
 0x3a9   : > { %10278 = vst [vmem:[#allocation74_spill] sm:$0xff] %v8980_v46  ;;  %v8992_v30 = vpack.c.bf16 %v2340_v47, %v2340_v47  ;;  %v2344_v34 = vadd.f32 %v2343_v24, %v8401_v59  ;;  %5170 = vst.msk [vmem:[%s8422_s13 + $0x14c] sm:$0xf] %vm2727_vm0, %v8980_v46  ;;  %v2540_v54 = vpop.f32.mrb[72].mxu0  ;;  %v3123_v24 = vpop.permute.xlu1 %3122  ;;  %3217 = vrot.lane.b32.xlu0 %v8552_v3, %s6198_s11 }
 0x3aa   : > { %2906 = vst.msk [vmem:[%s8452_s17 + $0x48] sm:$0xf] %vm2727_vm0, %v8982_v0  ;;  %v9001_v15 = vpack.c.bf16 %v2342_v57, %v2342_v57  ;;  %v2541_v47 = vadd.f32 %v2540_v54, %v8359_v61  ;;  %v2542_v21 = vpop.f32.mrb[73].mxu0  ;;  %5203 = vst.msk [vmem:[%s8032_s6 + $0x1d0] sm:$0xf] %vm2727_vm0, %v3991_v13 }
 0x3ab   : > { %5105 = vst.msk [vmem:[%s8452_s17 + $0x148] sm:$0xf] %vm2727_vm0, %v8992_v30  ;;  %v9006_v51 = vpack.c.bf16 %v2344_v34, %v2344_v34  ;;  %v2543_v57 = vadd.f32 %v2542_v21, %v8373_v14  ;;  %v2544_v46 = vpop.f32.mrb[74].mxu0  ;;  %4916 = vst.msk [vmem:[%s8032_s6 + $0xd4] sm:$0xf] %vm2727_vm0, %v3123_v24  ;;  %v3093_v3 = vpop.permute.xlu0 %3092  ;;  %3219 = vrot.lane.b32.xlu1 %v8571_v38, %s6198_s11 }
 0x3ac   : > { %2907 = vst.msk [vmem:[%s8452_s17 + $0x4c] sm:$0xf] %vm2727_vm0, %v9001_v15  ;;  %v9024_v34 = vpack.c.bf16 %v2541_v47, %v2541_v47  ;;  %v2545_v23 = vadd.f32 %v2544_v46, %v8359_v61  ;;  %v2546_v54 = vpop.f32.mrb[75].mxu0  ;;  %4901 = vst.msk [vmem:[%s8032_s6 + $0x98] sm:$0xf] %vm2727_vm0, %v3093_v3 }
 0x3ad   : > { %10279 = vst [vmem:[#allocation76_spill] sm:$0xff] %v9006_v51  ;;  %5106 = vst.msk [vmem:[%s8452_s17 + $0x14c] sm:$0xf] %vm2727_vm0, %v9006_v51  ;;  %v2347_v13 = vpop.f32.mrb[72].mxu1  ;;  %v9027_v10 = vpack.c.bf16 %v2543_v57, %v2543_v57  ;;  %v2547_v21 = vadd.f32 %v2546_v54, %v8373_v14  ;;  %v3961_v57 = vpop.permute.xlu1 %3960  ;;  %3346 = vrot.lane.b32.xlu0 %v8532_v26, %s6198_s11 }
 0x3ae   : > { %v2348_v24 = vadd.f32 %v2347_v13, %v8392_v63  ;;  %v2349_v18 = vpop.f32.mrb[73].mxu1  ;;  %3068 = vst.msk [vmem:[%s8422_s13 + $0x50] sm:$0xf] %vm2727_vm0, %v9024_v34  ;;  %v9034_v47 = vpack.c.bf16 %v2545_v23, %v2545_v23  ;;  %5188 = vst.msk [vmem:[%s8032_s6 + $0x194] sm:$0xf] %vm2727_vm0, %v3961_v57 }
 0x3af   : > { %10280 = vst [vmem:[#allocation75_spill] sm:$0xff] %v9027_v10  ;;  %v2350_v46 = vadd.f32 %v2349_v18, %v8401_v59  ;;  %v2351_v51 = vpop.f32.mrb[74].mxu1  ;;  %5171 = vst.msk [vmem:[%s8422_s13 + $0x150] sm:$0xf] %vm2727_vm0, %v9027_v10  ;;  %v9044_v54 = vpack.c.bf16 %v2547_v21, %v2547_v21  ;;  %v3125_v26 = vpop.permute.xlu0 %3124  ;;  %3348 = vrot.lane.b32.xlu1 %v8542_v56, %s6198_s11 }
 0x3b0   : > { %10281 = vst [vmem:[#allocation54_spill] sm:$0xff] %v9034_v47  ;;  %v9046_v13 = vpack.c.bf16 %v2348_v24, %v2348_v24  ;;  %v2352_v23 = vadd.f32 %v2351_v51, %v8392_v63  ;;  %v2353_v18 = vpop.f32.mrb[75].mxu1  ;;  %3069 = vst.msk [vmem:[%s8422_s13 + $0x54] sm:$0xf] %vm2727_vm0, %v9034_v47 }
 0x3b1   : > { %10282 = vst [vmem:[#allocation53_spill] sm:$0xff] %v9044_v54  ;;  %v9056_v36 = vpack.c.bf16 %v2350_v46, %v2350_v46  ;;  %v2354_v21 = vadd.f32 %v2353_v18, %v8401_v59  ;;  %5172 = vst.msk [vmem:[%s8422_s13 + $0x154] sm:$0xf] %vm2727_vm0, %v9044_v54  ;;  %v2550_v24 = vpop.f32.mrb[76].mxu0  ;;  %v3993_v18 = vpop.permute.xlu1 %3992  ;;  %4087 = vrot.lane.b32.xlu0 %v8560_v2, %s6198_s11 }
 0x3b2   : > { %2908 = vst.msk [vmem:[%s8452_s17 + $0x50] sm:$0xf] %vm2727_vm0, %v9046_v13  ;;  %v9065_v51 = vpack.c.bf16 %v2352_v23, %v2352_v23  ;;  %v2551_v46 = vadd.f32 %v2550_v24, %v8359_v61  ;;  %v2552_v57 = vpop.f32.mrb[77].mxu0  ;;  %4917 = vst.msk [vmem:[%s8032_s6 + $0xd8] sm:$0xf] %vm2727_vm0, %v3125_v26 }
 0x3b3   : > { %5107 = vst.msk [vmem:[%s8452_s17 + $0x150] sm:$0xf] %vm2727_vm0, %v9056_v36  ;;  %v9070_v3 = vpack.c.bf16 %v2354_v21, %v2354_v21  ;;  %v2553_v23 = vadd.f32 %v2552_v57, %v8373_v14  ;;  %v2554_v54 = vpop.f32.mrb[78].mxu0  ;;  %5204 = vst.msk [vmem:[%s8032_s6 + $0x1d4] sm:$0xf] %vm2727_vm0, %v3993_v18  ;;  %v3963_v2 = vpop.permute.xlu0 %3962  ;;  %4089 = vrot.lane.b32.xlu1 %v8576_v58, %s6198_s11 }
 0x3b4   : > { %2909 = vst.msk [vmem:[%s8452_s17 + $0x54] sm:$0xf] %vm2727_vm0, %v9065_v51  ;;  %v9088_v21 = vpack.c.bf16 %v2551_v46, %v2551_v46  ;;  %v2555_v38 = vadd.f32 %v2554_v54, %v8359_v61  ;;  %v2556_v24 = vpop.f32.mrb[79].mxu0  ;;  %5189 = vst.msk [vmem:[%s8032_s6 + $0x198] sm:$0xf] %vm2727_vm0, %v3963_v2 }
 0x3b5   : > { %10283 = vst [vmem:[#allocation56_spill] sm:$0xff] %v9070_v3  ;;  %5108 = vst.msk [vmem:[%s8452_s17 + $0x154] sm:$0xf] %vm2727_vm0, %v9070_v3  ;;  %v2357_v26 = vpop.f32.mrb[76].mxu1  ;;  %v9091_v10 = vpack.c.bf16 %v2553_v23, %v2553_v23  ;;  %v2557_v57 = vadd.f32 %v2556_v24, %v8373_v14  ;;  %v3095_v23 = vpop.permute.xlu1 %3094  ;;  %4216 = vrot.lane.b32.xlu0 %v8535_v5, %s6198_s11 }
 0x3b6   : > { %v2358_v18 = vadd.f32 %v2357_v26, %v8392_v63  ;;  %v2359_v47 = vpop.f32.mrb[77].mxu1  ;;  %3070 = vst.msk [vmem:[%s8422_s13 + $0x58] sm:$0xf] %vm2727_vm0, %v9088_v21  ;;  %v9098_v46 = vpack.c.bf16 %v2555_v38, %v2555_v38  ;;  %4902 = vst.msk [vmem:[%s8032_s6 + $0x9c] sm:$0xf] %vm2727_vm0, %v3095_v23 }
 0x3b7   : > { %10284 = vst [vmem:[#allocation55_spill] sm:$0xff] %v9091_v10  ;;  %v2360_v54 = vadd.f32 %v2359_v47, %v8401_v59  ;;  %v2361_v3 = vpop.f32.mrb[78].mxu1  ;;  %5173 = vst.msk [vmem:[%s8422_s13 + $0x158] sm:$0xf] %vm2727_vm0, %v9091_v10  ;;  %v9108_v24 = vpack.c.bf16 %v2557_v57, %v2557_v57  ;;  %v3995_v5 = vpop.permute.xlu0 %3994  ;;  %4218 = vrot.lane.b32.xlu1 %v8550_v40, %s6198_s11 }
 0x3b8   : > { %10285 = vst [vmem:[#allocation58_spill] sm:$0xff] %v9098_v46  ;;  %v9110_v26 = vpack.c.bf16 %v2358_v18, %v2358_v18  ;;  %v2362_v38 = vadd.f32 %v2361_v3, %v8392_v63  ;;  %v2363_v47 = vpop.f32.mrb[79].mxu1  ;;  %3071 = vst.msk [vmem:[%s8422_s13 + $0x5c] sm:$0xf] %vm2727_vm0, %v9098_v46 }
 0x3b9   : > { %10286 = vst [vmem:[#allocation57_spill] sm:$0xff] %v9108_v24  ;;  %v9120_v56 = vpack.c.bf16 %v2360_v54, %v2360_v54  ;;  %v2364_v57 = vadd.f32 %v2363_v47, %v8401_v59  ;;  %5174 = vst.msk [vmem:[%s8422_s13 + $0x15c] sm:$0xf] %vm2727_vm0, %v9108_v24  ;;  %v2560_v18 = vpop.f32.mrb[80].mxu0  ;;  %v3127_v47 = vpop.permute.xlu1 %3126  ;;  %3221 = vrot.lane.b32.xlu0 %v8612_v49, %s6198_s11 }
 0x3ba   : > { %2910 = vst.msk [vmem:[%s8452_s17 + $0x58] sm:$0xf] %vm2727_vm0, %v9110_v26  ;;  %v9129_v3 = vpack.c.bf16 %v2362_v38, %v2362_v38  ;;  %v2561_v54 = vadd.f32 %v2560_v18, %v8359_v61  ;;  %v2562_v23 = vpop.f32.mrb[81].mxu0  ;;  %5205 = vst.msk [vmem:[%s8032_s6 + $0x1d8] sm:$0xf] %vm2727_vm0, %v3995_v5 }
 0x3bb   : > { %5109 = vst.msk [vmem:[%s8452_s17 + $0x158] sm:$0xf] %vm2727_vm0, %v9120_v56  ;;  %v9134_v2 = vpack.c.bf16 %v2364_v57, %v2364_v57  ;;  %v2563_v38 = vadd.f32 %v2562_v23, %v8373_v14  ;;  %v2564_v24 = vpop.f32.mrb[82].mxu0  ;;  %4918 = vst.msk [vmem:[%s8032_s6 + $0xdc] sm:$0xf] %vm2727_vm0, %v3127_v47  ;;  %v3097_v49 = vpop.permute.xlu0 %3096  ;;  %3223 = vrot.lane.b32.xlu1 %v8629_v9, %s6198_s11 }
 0x3bc   : > { %2911 = vst.msk [vmem:[%s8452_s17 + $0x5c] sm:$0xf] %vm2727_vm0, %v9129_v3  ;;  %v9152_v57 = vpack.c.bf16 %v2561_v54, %v2561_v54  ;;  %v2565_v58 = vadd.f32 %v2564_v24, %v8359_v61  ;;  %v2566_v18 = vpop.f32.mrb[83].mxu0  ;;  %4903 = vst.msk [vmem:[%s8032_s6 + $0xa0] sm:$0xf] %vm2727_vm0, %v3097_v49 }
 0x3bd   : > { %10287 = vst [vmem:[#allocation60_spill] sm:$0xff] %v9134_v2  ;;  %5110 = vst.msk [vmem:[%s8452_s17 + $0x15c] sm:$0xf] %vm2727_vm0, %v9134_v2  ;;  %v2367_v5 = vpop.f32.mrb[80].mxu1  ;;  %v9155_v10 = vpack.c.bf16 %v2563_v38, %v2563_v38  ;;  %v2567_v23 = vadd.f32 %v2566_v18, %v8373_v14  ;;  %v3965_v38 = vpop.permute.xlu1 %3964  ;;  %3350 = vrot.lane.b32.xlu0 %v8592_v32, %s6198_s11 }
 0x3be   : > { %v2368_v47 = vadd.f32 %v2367_v5, %v8392_v63  ;;  %v2369_v46 = vpop.f32.mrb[81].mxu1  ;;  %3072 = vst.msk [vmem:[%s8422_s13 + $0x60] sm:$0xf] %vm2727_vm0, %v9152_v57  ;;  %v9162_v54 = vpack.c.bf16 %v2565_v58, %v2565_v58  ;;  %5190 = vst.msk [vmem:[%s8032_s6 + $0x19c] sm:$0xf] %vm2727_vm0, %v3965_v38 }
 0x3bf   : > { %10288 = vst [vmem:[#allocation59_spill] sm:$0xff] %v9155_v10  ;;  %v2370_v24 = vadd.f32 %v2369_v46, %v8401_v59  ;;  %v2371_v2 = vpop.f32.mrb[82].mxu1  ;;  %5175 = vst.msk [vmem:[%s8422_s13 + $0x160] sm:$0xf] %vm2727_vm0, %v9155_v10  ;;  %v9172_v18 = vpack.c.bf16 %v2567_v23, %v2567_v23  ;;  %v3129_v32 = vpop.permute.xlu0 %3128  ;;  %3352 = vrot.lane.b32.xlu1 %v8602_v33, %s6198_s11 }
 0x3c0   : > { %10289 = vst [vmem:[#allocation62_spill] sm:$0xff] %v9162_v54  ;;  %v9174_v5 = vpack.c.bf16 %v2368_v47, %v2368_v47  ;;  %v2372_v58 = vadd.f32 %v2371_v2, %v8392_v63  ;;  %v2373_v46 = vpop.f32.mrb[83].mxu1  ;;  %3073 = vst.msk [vmem:[%s8422_s13 + $0x64] sm:$0xf] %vm2727_vm0, %v9162_v54 }
 0x3c1   : > { %10290 = vst [vmem:[#allocation61_spill] sm:$0xff] %v9172_v18  ;;  %v9184_v40 = vpack.c.bf16 %v2370_v24, %v2370_v24  ;;  %v2374_v23 = vadd.f32 %v2373_v46, %v8401_v59  ;;  %5176 = vst.msk [vmem:[%s8422_s13 + $0x164] sm:$0xf] %vm2727_vm0, %v9172_v18  ;;  %v2570_v47 = vpop.f32.mrb[84].mxu0  ;;  %v3997_v46 = vpop.permute.xlu1 %3996  ;;  %4091 = vrot.lane.b32.xlu0 %v8620_v41, %s6198_s11 }
 0x3c2   : > { %2912 = vst.msk [vmem:[%s8452_s17 + $0x60] sm:$0xf] %vm2727_vm0, %v9174_v5  ;;  %v9193_v2 = vpack.c.bf16 %v2372_v58, %v2372_v58  ;;  %v2571_v24 = vadd.f32 %v2570_v47, %v8359_v61  ;;  %v2572_v38 = vpop.f32.mrb[85].mxu0  ;;  %4919 = vst.msk [vmem:[%s8032_s6 + $0xe0] sm:$0xf] %vm2727_vm0, %v3129_v32 }
 0x3c3   : > { %5111 = vst.msk [vmem:[%s8452_s17 + $0x160] sm:$0xf] %vm2727_vm0, %v9184_v40  ;;  %v9198_v49 = vpack.c.bf16 %v2374_v23, %v2374_v23  ;;  %v2573_v58 = vadd.f32 %v2572_v38, %v8373_v14  ;;  %v2574_v18 = vpop.f32.mrb[86].mxu0  ;;  %5206 = vst.msk [vmem:[%s8032_s6 + $0x1dc] sm:$0xf] %vm2727_vm0, %v3997_v46  ;;  %v3967_v41 = vpop.permute.xlu0 %3966  ;;  %4093 = vrot.lane.b32.xlu1 %v8634_v55, %s6198_s11 }
 0x3c4   : > { %2913 = vst.msk [vmem:[%s8452_s17 + $0x64] sm:$0xf] %vm2727_vm0, %v9193_v2  ;;  %v9216_v23 = vpack.c.bf16 %v2571_v24, %v2571_v24  ;;  %v2575_v9 = vadd.f32 %v2574_v18, %v8359_v61  ;;  %v2576_v47 = vpop.f32.mrb[87].mxu0  ;;  %5191 = vst.msk [vmem:[%s8032_s6 + $0x1a0] sm:$0xf] %vm2727_vm0, %v3967_v41 }
 0x3c5   : > { %10291 = vst [vmem:[#allocation64_spill] sm:$0xff] %v9198_v49  ;;  %5112 = vst.msk [vmem:[%s8452_s17 + $0x164] sm:$0xf] %vm2727_vm0, %v9198_v49  ;;  %v2377_v32 = vpop.f32.mrb[84].mxu1  ;;  %v9219_v10 = vpack.c.bf16 %v2573_v58, %v2573_v58  ;;  %v2577_v38 = vadd.f32 %v2576_v47, %v8373_v14  ;;  %v3099_v58 = vpop.permute.xlu1 %3098  ;;  %4220 = vrot.lane.b32.xlu0 %v8595_v1, %s6198_s11 }
 0x3c6   : > { %v2378_v46 = vadd.f32 %v2377_v32, %v8392_v63  ;;  %v2379_v54 = vpop.f32.mrb[85].mxu1  ;;  %3074 = vst.msk [vmem:[%s8422_s13 + $0x68] sm:$0xf] %vm2727_vm0, %v9216_v23  ;;  %v9226_v24 = vpack.c.bf16 %v2575_v9, %v2575_v9  ;;  %4904 = vst.msk [vmem:[%s8032_s6 + $0xa4] sm:$0xf] %vm2727_vm0, %v3099_v58 }
 0x3c7   : > { %10292 = vst [vmem:[#allocation63_spill] sm:$0xff] %v9219_v10  ;;  %v2380_v18 = vadd.f32 %v2379_v54, %v8401_v59  ;;  %v2381_v49 = vpop.f32.mrb[86].mxu1  ;;  %5177 = vst.msk [vmem:[%s8422_s13 + $0x168] sm:$0xf] %vm2727_vm0, %v9219_v10  ;;  %v9236_v47 = vpack.c.bf16 %v2577_v38, %v2577_v38  ;;  %v3999_v1 = vpop.permute.xlu0 %3998  ;;  %4222 = vrot.lane.b32.xlu1 %v8610_v39, %s6198_s11 }
 0x3c8   : > { %10293 = vst [vmem:[#allocation66_spill] sm:$0xff] %v9226_v24  ;;  %v9238_v32 = vpack.c.bf16 %v2378_v46, %v2378_v46  ;;  %v2382_v9 = vadd.f32 %v2381_v49, %v8392_v63  ;;  %v2383_v54 = vpop.f32.mrb[87].mxu1  ;;  %3075 = vst.msk [vmem:[%s8422_s13 + $0x6c] sm:$0xf] %vm2727_vm0, %v9226_v24 }
 0x3c9   : > { %10294 = vst [vmem:[#allocation65_spill] sm:$0xff] %v9236_v47  ;;  %v9248_v33 = vpack.c.bf16 %v2380_v18, %v2380_v18  ;;  %v2384_v38 = vadd.f32 %v2383_v54, %v8401_v59  ;;  %5178 = vst.msk [vmem:[%s8422_s13 + $0x16c] sm:$0xf] %vm2727_vm0, %v9236_v47  ;;  %v2580_v46 = vpop.f32.mrb[88].mxu0  ;;  %v3131_v54 = vpop.permute.xlu1 %3130  ;;  %3225 = vrot.lane.b32.xlu0 %v8668_v48, %s6198_s11 }
 0x3ca   : > { %2914 = vst.msk [vmem:[%s8452_s17 + $0x68] sm:$0xf] %vm2727_vm0, %v9238_v32  ;;  %v9257_v49 = vpack.c.bf16 %v2382_v9, %v2382_v9  ;;  %v2581_v18 = vadd.f32 %v2580_v46, %v8359_v61  ;;  %v2582_v58 = vpop.f32.mrb[89].mxu0  ;;  %5207 = vst.msk [vmem:[%s8032_s6 + $0x1e0] sm:$0xf] %vm2727_vm0, %v3999_v1 }
 0x3cb   : > { %5113 = vst.msk [vmem:[%s8452_s17 + $0x168] sm:$0xf] %vm2727_vm0, %v9248_v33  ;;  %v9262_v41 = vpack.c.bf16 %v2384_v38, %v2384_v38  ;;  %v2583_v9 = vadd.f32 %v2582_v58, %v8373_v14  ;;  %v2584_v47 = vpop.f32.mrb[90].mxu0  ;;  %4920 = vst.msk [vmem:[%s8032_s6 + $0xe4] sm:$0xf] %vm2727_vm0, %v3131_v54  ;;  %v3101_v48 = vpop.permute.xlu0 %3100  ;;  %3227 = vrot.lane.b32.xlu1 %v8685_v6, %s6198_s11 }
 0x3cc   : > { %2915 = vst.msk [vmem:[%s8452_s17 + $0x6c] sm:$0xf] %vm2727_vm0, %v9257_v49  ;;  %v9280_v38 = vpack.c.bf16 %v2581_v18, %v2581_v18  ;;  %v2585_v55 = vadd.f32 %v2584_v47, %v8359_v61  ;;  %v2586_v46 = vpop.f32.mrb[91].mxu0  ;;  %4905 = vst.msk [vmem:[%s8032_s6 + $0xa8] sm:$0xf] %vm2727_vm0, %v3101_v48 }
 0x3cd   : > { %10295 = vst [vmem:[#allocation30_spill] sm:$0xff] %v9262_v41  ;;  %5114 = vst.msk [vmem:[%s8452_s17 + $0x16c] sm:$0xf] %vm2727_vm0, %v9262_v41  ;;  %v2387_v1 = vpop.f32.mrb[88].mxu1  ;;  %v9283_v10 = vpack.c.bf16 %v2583_v9, %v2583_v9  ;;  %v2587_v58 = vadd.f32 %v2586_v46, %v8373_v14  ;;  %v3969_v9 = vpop.permute.xlu1 %3968  ;;  %3354 = vrot.lane.b32.xlu0 %v8648_v44, %s6198_s11 }
 0x3ce   : > { %v2388_v54 = vadd.f32 %v2387_v1, %v8392_v63  ;;  %v2389_v24 = vpop.f32.mrb[89].mxu1  ;;  %3076 = vst.msk [vmem:[%s8422_s13 + $0x70] sm:$0xf] %vm2727_vm0, %v9280_v38  ;;  %v9290_v18 = vpack.c.bf16 %v2585_v55, %v2585_v55  ;;  %5192 = vst.msk [vmem:[%s8032_s6 + $0x1a4] sm:$0xf] %vm2727_vm0, %v3969_v9 }
 0x3cf   : > { %10296 = vst [vmem:[#allocation29_spill] sm:$0xff] %v9283_v10  ;;  %v2390_v47 = vadd.f32 %v2389_v24, %v8401_v59  ;;  %v2391_v41 = vpop.f32.mrb[90].mxu1  ;;  %5179 = vst.msk [vmem:[%s8422_s13 + $0x170] sm:$0xf] %vm2727_vm0, %v9283_v10  ;;  %v9300_v46 = vpack.c.bf16 %v2587_v58, %v2587_v58  ;;  %v3133_v44 = vpop.permute.xlu0 %3132  ;;  %3356 = vrot.lane.b32.xlu1 %v8658_v29, %s6198_s11 }
 0x3d0   : > { %10297 = vst [vmem:[#allocation67_spill] sm:$0xff] %v9290_v18  ;;  %v9302_v1 = vpack.c.bf16 %v2388_v54, %v2388_v54  ;;  %v2392_v55 = vadd.f32 %v2391_v41, %v8392_v63  ;;  %v2393_v24 = vpop.f32.mrb[91].mxu1  ;;  %3077 = vst.msk [vmem:[%s8422_s13 + $0x74] sm:$0xf] %vm2727_vm0, %v9290_v18 }
 0x3d1   : > { %10298 = vst [vmem:[#allocation31_spill] sm:$0xff] %v9300_v46  ;;  %v9312_v39 = vpack.c.bf16 %v2390_v47, %v2390_v47  ;;  %v2394_v58 = vadd.f32 %v2393_v24, %v8401_v59  ;;  %5180 = vst.msk [vmem:[%s8422_s13 + $0x174] sm:$0xf] %vm2727_vm0, %v9300_v46  ;;  %v2590_v54 = vpop.f32.mrb[92].mxu0  ;;  %v4001_v24 = vpop.permute.xlu1 %4000  ;;  %4095 = vrot.lane.b32.xlu0 %v8676_v31, %s6198_s11 }
 0x3d2   : > { %2916 = vst.msk [vmem:[%s8452_s17 + $0x70] sm:$0xf] %vm2727_vm0, %v9302_v1  ;;  %v9321_v41 = vpack.c.bf16 %v2392_v55, %v2392_v55  ;;  %v2591_v47 = vadd.f32 %v2590_v54, %v8359_v61  ;;  %v2592_v9 = vpop.f32.mrb[93].mxu0  ;;  %4921 = vst.msk [vmem:[%s8032_s6 + $0xe8] sm:$0xf] %vm2727_vm0, %v3133_v44 }
 0x3d3   : > { %5115 = vst.msk [vmem:[%s8452_s17 + $0x170] sm:$0xf] %vm2727_vm0, %v9312_v39  ;;  %v9326_v48 = vpack.c.bf16 %v2394_v58, %v2394_v58  ;;  %v2593_v55 = vadd.f32 %v2592_v9, %v8373_v14  ;;  %v2594_v46 = vpop.f32.mrb[94].mxu0  ;;  %5208 = vst.msk [vmem:[%s8032_s6 + $0x1e4] sm:$0xf] %vm2727_vm0, %v4001_v24  ;;  %v3971_v31 = vpop.permute.xlu0 %3970  ;;  %4097 = vrot.lane.b32.xlu1 %v8690_v22, %s6198_s11 }
 0x3d4   : > { %2917 = vst.msk [vmem:[%s8452_s17 + $0x74] sm:$0xf] %vm2727_vm0, %v9321_v41  ;;  %v9344_v58 = vpack.c.bf16 %v2591_v47, %v2591_v47  ;;  %v2595_v6 = vadd.f32 %v2594_v46, %v8359_v61  ;;  %v2596_v54 = vpop.f32.mrb[95].mxu0  ;;  %5193 = vst.msk [vmem:[%s8032_s6 + $0x1a8] sm:$0xf] %vm2727_vm0, %v3971_v31 }
 0x3d5   : > { %5116 = vst.msk [vmem:[%s8452_s17 + $0x174] sm:$0xf] %vm2727_vm0, %v9326_v48  ;;  %v2397_v44 = vpop.f32.mrb[92].mxu1  ;;  %v9347_v10 = vpack.c.bf16 %v2593_v55, %v2593_v55  ;;  %v2597_v9 = vadd.f32 %v2596_v54, %v8373_v14  ;;  %v3103_v55 = vpop.permute.xlu1 %3102  ;;  %4224 = vrot.lane.b32.xlu0 %v8651_v19, %s6198_s11 }
 0x3d6   : > { %v2398_v24 = vadd.f32 %v2397_v44, %v8392_v63  ;;  %v2399_v18 = vpop.f32.mrb[93].mxu1  ;;  %3078 = vst.msk [vmem:[%s8422_s13 + $0x78] sm:$0xf] %vm2727_vm0, %v9344_v58  ;;  %v9354_v47 = vpack.c.bf16 %v2595_v6, %v2595_v6  ;;  %4906 = vst.msk [vmem:[%s8032_s6 + $0xac] sm:$0xf] %vm2727_vm0, %v3103_v55 }
 0x3d7   : > { %v2400_v61 = vadd.f32 %v2399_v18, %v8401_v59  ;;  %v2401_v46 = vpop.f32.mrb[94].mxu1  ;;  %5181 = vst.msk [vmem:[%s8422_s13 + $0x178] sm:$0xf] %vm2727_vm0, %v9347_v10  ;;  %v9364_v14 = vpack.c.bf16 %v2597_v9, %v2597_v9  ;;  %v4003_v9 = vpop.permute.xlu0 %4002  ;;  %4226 = vrot.lane.b32.xlu1 %v8666_v60, %s6198_s11 }
 0x3d8   : > { %v9366_v6 = vpack.c.bf16 %v2398_v24, %v2398_v24  ;;  %v2402_v54 = vadd.f32 %v2401_v46, %v8392_v63  ;;  %v2403_v18 = vpop.f32.mrb[95].mxu1  ;;  %3079 = vst.msk [vmem:[%s8422_s13 + $0x7c] sm:$0xf] %vm2727_vm0, %v9354_v47  ;;  %5209 = vst.msk [vmem:[%s8032_s6 + $0x1e8] sm:$0xf] %vm2727_vm0, %v4003_v9 }
 0x3d9   : > { %v9376_v29 = vpack.c.bf16 %v2400_v61, %v2400_v61  ;;  %v2404_v44 = vadd.f32 %v2403_v18, %v8401_v59  ;;  %5182 = vst.msk [vmem:[%s8422_s13 + $0x17c] sm:$0xf] %vm2727_vm0, %v9364_v14  ;;  %v3135_v24 = vpop.permute.xlu1 %3134  ;;  %3229 = vrot.lane.b32.xlu0 %v8728_v17, %s6198_s11  ;;  %v10302_v18 = vld [vmem:[#allocation79_spill] sm:$0xff] }
 0x3da   : > { %2918 = vst.msk [vmem:[%s8452_s17 + $0x78] sm:$0xf] %vm2727_vm0, %v9366_v6  ;;  %v9385_v63 = vpack.c.bf16 %v2402_v54, %v2402_v54  ;;  %4922 = vst.msk [vmem:[%s8032_s6 + $0xec] sm:$0xf] %vm2727_vm0, %v3135_v24 }
 0x3db   : > { %5117 = vst.msk [vmem:[%s8452_s17 + $0x178] sm:$0xf] %vm2727_vm0, %v9376_v29  ;;  %v9390_v19 = vpack.c.bf16 %v2404_v44, %v2404_v44  ;;  %v3105_v59 = vpop.permute.xlu0 %3104  ;;  %3231 = vrot.lane.b32.xlu1 %v8747_v25, %s6198_s11 }
 0x3dc   : > { %2919 = vst.msk [vmem:[%s8452_s17 + $0x7c] sm:$0xf] %vm2727_vm0, %v9385_v63  ;;  %4907 = vst.msk [vmem:[%s8032_s6 + $0xb0] sm:$0xf] %vm2727_vm0, %v3105_v59  ;;  %v10303_v59 = vld [vmem:[#allocation81_spill] sm:$0xff] }
 0x3dd   : > { %5118 = vst.msk [vmem:[%s8452_s17 + $0x17c] sm:$0xf] %vm2727_vm0, %v9390_v19  ;;  %v3973_v31 = vpop.permute.xlu1 %3972  ;;  %3358 = vrot.lane.b32.xlu0 %v8706_v12, %s6198_s11 }
 0x3de   : > { %5194 = vst.msk [vmem:[%s8032_s6 + $0x1ac] sm:$0xf] %vm2727_vm0, %v3973_v31 }
 0x3df   : > { %v3137_v22 = vpop.permute.xlu0 %3136  ;;  %3360 = vrot.lane.b32.xlu1 %v8716_v53, %s6198_s11 }
 0x3e0   : > { %4923 = vst.msk [vmem:[%s8032_s6 + $0xf0] sm:$0xf] %vm2727_vm0, %v3137_v22 }
 0x3e1   : > { %v4005_v17 = vpop.permute.xlu1 %4004  ;;  %4099 = vrot.lane.b32.xlu0 %v8738_v42, %s6198_s11 }
 0x3e2   : > { %5210 = vst.msk [vmem:[%s8032_s6 + $0x1ec] sm:$0xf] %vm2727_vm0, %v4005_v17 }
 0x3e3   : > { %v3975_v60 = vpop.permute.xlu0 %3974  ;;  %4101 = vrot.lane.b32.xlu1 %v8752_v4, %s6198_s11 }
 0x3e4   : > { %5195 = vst.msk [vmem:[%s8032_s6 + $0x1b0] sm:$0xf] %vm2727_vm0, %v3975_v60  ;;  %v10306_v60 = vld [vmem:[#allocation42_spill] sm:$0xff] }
 0x3e5   : > { %v3107_v61 = vpop.permute.xlu1 %3106  ;;  %4228 = vrot.lane.b32.xlu0 %v8709_v45, %s6198_s11  ;;  %v10299_v45 = vld [vmem:[#allocation41_spill] sm:$0xff] }
 0x3e6   : > { %4908 = vst.msk [vmem:[%s8032_s6 + $0xb4] sm:$0xf] %vm2727_vm0, %v3107_v61 }
 0x3e7   : > { %v4007_v12 = vpop.permute.xlu0 %4006  ;;  %4230 = vrot.lane.b32.xlu1 %v10299_v45, %s6198_s11 }
 0x3e8   : > { %5211 = vst.msk [vmem:[%s8032_s6 + $0x1f0] sm:$0xf] %vm2727_vm0, %v4007_v12  ;;  %v10307_v12 = vld [vmem:[#allocation46_spill] sm:$0xff] }
 0x3e9   : > { %v3139_v25 = vpop.permute.xlu1 %3138  ;;  %3233 = vrot.lane.b32.xlu0 %v8792_v50, %s6198_s11  ;;  %v10300_v50 = vld [vmem:[#allocation43_spill] sm:$0xff] }
 0x3ea   : > { %4924 = vst.msk [vmem:[%s8032_s6 + $0xf4] sm:$0xf] %vm2727_vm0, %v3139_v25 }
 0x3eb   : > { %v3109_v53 = vpop.permute.xlu0 %3108  ;;  %3235 = vrot.lane.b32.xlu1 %v8811_v43, %s6198_s11 }
 0x3ec   : > { %4909 = vst.msk [vmem:[%s8032_s6 + $0xb8] sm:$0xf] %vm2727_vm0, %v3109_v53 }
 0x3ed   : > { %v3977_v42 = vpop.permute.xlu1 %3976  ;;  %3362 = vrot.lane.b32.xlu0 %v8770_v35, %s6198_s11  ;;  %v10301_v35 = vld [vmem:[#allocation80_spill] sm:$0xff] }
 0x3ee   : > { %5196 = vst.msk [vmem:[%s8032_s6 + $0x1b4] sm:$0xf] %vm2727_vm0, %v3977_v42  ;;  %v10308_v42 = vld [vmem:[#allocation44_spill] sm:$0xff] }
 0x3ef   : > { %v3141_v4 = vpop.permute.xlu0 %3140  ;;  %3364 = vrot.lane.b32.xlu1 %v10301_v35, %s6198_s11 }
 0x3f0   : > { %4925 = vst.msk [vmem:[%s8032_s6 + $0xf8] sm:$0xf] %vm2727_vm0, %v3141_v4 }
 0x3f1   : > { %v4009_v46 = vpop.permute.xlu1 %4008  ;;  %4103 = vrot.lane.b32.xlu0 %v10300_v50, %s6198_s11 }
 0x3f2   : > { %5212 = vst.msk [vmem:[%s8032_s6 + $0x1f4] sm:$0xf] %vm2727_vm0, %v4009_v46 }
 0x3f3   : > { %v3979_v55 = vpop.permute.xlu0 %3978  ;;  %4105 = vrot.lane.b32.xlu1 %v8816_v52, %s6198_s11 }
 0x3f4   : > { %5197 = vst.msk [vmem:[%s8032_s6 + $0x1b8] sm:$0xf] %vm2727_vm0, %v3979_v55 }
 0x3f5   : > { %v3111_v54 = vpop.permute.xlu1 %3110  ;;  %4232 = vrot.lane.b32.xlu0 %v10302_v18, %s6198_s11 }
 0x3f6   : > { %4910 = vst.msk [vmem:[%s8032_s6 + $0xbc] sm:$0xf] %vm2727_vm0, %v3111_v54  ;;  %v10311_v54 = vld [vmem:[#allocation71_spill] sm:$0xff] }
 0x3f7   : > { %v4011_v43 = vpop.permute.xlu0 %4010  ;;  %4234 = vrot.lane.b32.xlu1 %v10303_v59, %s6198_s11 }
 0x3f8   : > { %5213 = vst.msk [vmem:[%s8032_s6 + $0x1f8] sm:$0xf] %vm2727_vm0, %v4011_v43 }
 0x3f9   : > { %v3143_v44 = vpop.permute.xlu1 %3142  ;;  %3237 = vrot.lane.b32.xlu0 %v8856_v27, %s6198_s11  ;;  %v10304_v27 = vld [vmem:[#allocation47_spill] sm:$0xff] }
 0x3fa   : > { %4926 = vst.msk [vmem:[%s8032_s6 + $0xfc] sm:$0xf] %vm2727_vm0, %v3143_v44  ;;  %v10313_v44 = vld [vmem:[#allocation72_spill] sm:$0xff] }
 0x3fb   : > { %v3210_v9 = vpop.permute.xlu0 %3209  ;;  %3239 = vrot.lane.b32.xlu1 %v8875_v16, %s6198_s11 }
 0x3fc   : > { %4927 = vst.msk [vmem:[%s8452_s17 + $0x80] sm:$0xf] %vm2727_vm0, %v3210_v9 }
 0x3fd   : > { %v3981_v24 = vpop.permute.xlu1 %3980  ;;  %3366 = vrot.lane.b32.xlu0 %v8832_v11, %s6198_s11  ;;  %v10305_v11 = vld [vmem:[#allocation45_spill] sm:$0xff] }
 0x3fe   : > { %5198 = vst.msk [vmem:[%s8032_s6 + $0x1bc] sm:$0xf] %vm2727_vm0, %v3981_v24 }
 0x3ff   : > { %v3339_v52 = vpop.permute.xlu0 %3338  ;;  %3368 = vrot.lane.b32.xlu1 %v10305_v11, %s6198_s11 }
 0x400   : > { %4959 = vst.msk [vmem:[%s8422_s13 + $0x80] sm:$0xf] %vm2727_vm0, %v3339_v52  ;;  %v10315_v52 = vld [vmem:[#allocation74_spill] sm:$0xff] }
 0x401   : > { %v4013_v31 = vpop.permute.xlu1 %4012  ;;  %4107 = vrot.lane.b32.xlu0 %v10304_v27, %s6198_s11 }
 0x402   : > { %5214 = vst.msk [vmem:[%s8032_s6 + $0x1fc] sm:$0xf] %vm2727_vm0, %v4013_v31 }
 0x403   : > { %v4080_v22 = vpop.permute.xlu0 %4079  ;;  %4109 = vrot.lane.b32.xlu1 %v10307_v12, %s6198_s11 }
 0x404   : > { %5215 = vst.msk [vmem:[%s8452_s17 + $0x180] sm:$0xf] %vm2727_vm0, %v4080_v22 }
 0x405   : > { %v3212_v17 = vpop.permute.xlu1 %3211  ;;  %4236 = vrot.lane.b32.xlu0 %v10306_v60, %s6198_s11 }
 0x406   : > { %4928 = vst.msk [vmem:[%s8452_s17 + $0x84] sm:$0xf] %vm2727_vm0, %v3212_v17  ;;  %v10317_v17 = vld [vmem:[#allocation75_spill] sm:$0xff] }
 0x407   : > { %v4209_v16 = vpop.permute.xlu0 %4208  ;;  %4238 = vrot.lane.b32.xlu1 %v10308_v42, %s6198_s11  ;;  %v10321_v42 = vld [vmem:[#allocation55_spill] sm:$0xff] }
 0x408   : > { %5247 = vst.msk [vmem:[%s8422_s13 + $0x180] sm:$0xf] %vm2727_vm0, %v4209_v16 }
 0x409   : > { %v3341_v61 = vpop.permute.xlu1 %3340  ;;  %3241 = vrot.lane.b32.xlu0 %v8920_v62, %s6198_s11 }
 0x40a   : > { %4960 = vst.msk [vmem:[%s8422_s13 + $0x84] sm:$0xf] %vm2727_vm0, %v3341_v61  ;;  %v10319_v61 = vld [vmem:[#allocation53_spill] sm:$0xff] }
 0x40b   : > { %v3214_v25 = vpop.permute.xlu0 %3213  ;;  %3243 = vrot.lane.b32.xlu1 %v8937_v28, %s6198_s11 }
 0x40c   : > { %4929 = vst.msk [vmem:[%s8452_s17 + $0x88] sm:$0xf] %vm2727_vm0, %v3214_v25 }
 0x40d   : > { %v4082_v53 = vpop.permute.xlu1 %4081  ;;  %3370 = vrot.lane.b32.xlu0 %v8896_v7, %s6198_s11  ;;  %v10309_v7 = vld [vmem:[#allocation48_spill] sm:$0xff] }
 0x40e   : > { %5216 = vst.msk [vmem:[%s8452_s17 + $0x184] sm:$0xf] %vm2727_vm0, %v4082_v53 }
 0x40f   : > { %v3343_v45 = vpop.permute.xlu0 %3342  ;;  %3372 = vrot.lane.b32.xlu1 %v8908_v37, %s6198_s11 }
 0x410   : > { %4961 = vst.msk [vmem:[%s8422_s13 + $0x88] sm:$0xf] %vm2727_vm0, %v3343_v45 }
 0x411   : > { %v4211_v4 = vpop.permute.xlu1 %4210  ;;  %4111 = vrot.lane.b32.xlu0 %v8928_v8, %s6198_s11  ;;  %v10310_v8 = vld [vmem:[#allocation73_spill] sm:$0xff] }
 0x412   : > { %5248 = vst.msk [vmem:[%s8422_s13 + $0x184] sm:$0xf] %vm2727_vm0, %v4211_v4 }
 0x413   : > { %v4084_v62 = vpop.permute.xlu0 %4083  ;;  %4113 = vrot.lane.b32.xlu1 %v10310_v8, %s6198_s11  ;;  %v10325_v8 = vld [vmem:[#allocation59_spill] sm:$0xff] }
 0x414   : > { %5217 = vst.msk [vmem:[%s8452_s17 + $0x188] sm:$0xf] %vm2727_vm0, %v4084_v62 }
 0x415   : > { %v3216_v46 = vpop.permute.xlu1 %3215  ;;  %4240 = vrot.lane.b32.xlu0 %v10309_v7, %s6198_s11 }
 0x416   : > { %4930 = vst.msk [vmem:[%s8452_s17 + $0x8c] sm:$0xf] %vm2727_vm0, %v3216_v46  ;;  %v10323_v46 = vld [vmem:[#allocation57_spill] sm:$0xff] }
 0x417   : > { %v4213_v28 = vpop.permute.xlu0 %4212  ;;  %4242 = vrot.lane.b32.xlu1 %v10311_v54, %s6198_s11 }
 0x418   : > { %5249 = vst.msk [vmem:[%s8422_s13 + $0x188] sm:$0xf] %vm2727_vm0, %v4213_v28 }
 0x419   : > { %v3345_v50 = vpop.permute.xlu1 %3344  ;;  %3245 = vrot.lane.b32.xlu0 %v8982_v0, %s6198_s11 }
 0x41a   : > { %4962 = vst.msk [vmem:[%s8422_s13 + $0x8c] sm:$0xf] %vm2727_vm0, %v3345_v50 }
 0x41b   : > { %v3218_v37 = vpop.permute.xlu0 %3217  ;;  %3247 = vrot.lane.b32.xlu1 %v9001_v15, %s6198_s11 }
 0x41c   : > { %4931 = vst.msk [vmem:[%s8452_s17 + $0x90] sm:$0xf] %vm2727_vm0, %v3218_v37 }
 0x41d   : > { %v4086_v55 = vpop.permute.xlu1 %4085  ;;  %3374 = vrot.lane.b32.xlu0 %v8960_v20, %s6198_s11  ;;  %v10312_v20 = vld [vmem:[#allocation50_spill] sm:$0xff] }
 0x41e   : > { %5218 = vst.msk [vmem:[%s8452_s17 + $0x18c] sm:$0xf] %vm2727_vm0, %v4086_v55 }
 0x41f   : > { %v3347_v35 = vpop.permute.xlu0 %3346  ;;  %3376 = vrot.lane.b32.xlu1 %v10312_v20, %s6198_s11  ;;  %v10329_v20 = vld [vmem:[#allocation63_spill] sm:$0xff] }
 0x420   : > { %4963 = vst.msk [vmem:[%s8422_s13 + $0x90] sm:$0xf] %vm2727_vm0, %v3347_v35  ;;  %v10327_v35 = vld [vmem:[#allocation61_spill] sm:$0xff] }
 0x421   : > { %v4215_v18 = vpop.permute.xlu1 %4214  ;;  %4115 = vrot.lane.b32.xlu0 %v8992_v30, %s6198_s11  ;;  %v10314_v30 = vld [vmem:[#allocation76_spill] sm:$0xff] }
 0x422   : > { %5250 = vst.msk [vmem:[%s8422_s13 + $0x18c] sm:$0xf] %vm2727_vm0, %v4215_v18 }
 0x423   : > { %v4088_v0 = vpop.permute.xlu0 %4087  ;;  %4117 = vrot.lane.b32.xlu1 %v10314_v30, %s6198_s11  ;;  %v10331_v30 = vld [vmem:[#allocation65_spill] sm:$0xff] }
 0x424   : > { %5219 = vst.msk [vmem:[%s8452_s17 + $0x190] sm:$0xf] %vm2727_vm0, %v4088_v0 }
 0x425   : > { %v3220_v43 = vpop.permute.xlu1 %3219  ;;  %4244 = vrot.lane.b32.xlu0 %v10313_v44, %s6198_s11 }
 0x426   : > { %4932 = vst.msk [vmem:[%s8452_s17 + $0x94] sm:$0xf] %vm2727_vm0, %v3220_v43 }
 0x427   : > { %v4217_v15 = vpop.permute.xlu0 %4216  ;;  %4246 = vrot.lane.b32.xlu1 %v10315_v52, %s6198_s11 }
 0x428   : > { %5251 = vst.msk [vmem:[%s8422_s13 + $0x190] sm:$0xf] %vm2727_vm0, %v4217_v15 }
 0x429   : > { %v3349_v9 = vpop.permute.xlu1 %3348  ;;  %3249 = vrot.lane.b32.xlu0 %v9046_v13, %s6198_s11 }
 0x42a   : > { %4964 = vst.msk [vmem:[%s8422_s13 + $0x94] sm:$0xf] %vm2727_vm0, %v3349_v9 }
 0x42b   : > { %v3222_v24 = vpop.permute.xlu0 %3221  ;;  %3251 = vrot.lane.b32.xlu1 %v9065_v51, %s6198_s11 }
 0x42c   : > { %4933 = vst.msk [vmem:[%s8452_s17 + $0x98] sm:$0xf] %vm2727_vm0, %v3222_v24 }
 0x42d   : > { %v4090_v59 = vpop.permute.xlu1 %4089  ;;  %3378 = vrot.lane.b32.xlu0 %v9024_v34, %s6198_s11  ;;  %v10316_v34 = vld [vmem:[#allocation54_spill] sm:$0xff] }
 0x42e   : > { %5220 = vst.msk [vmem:[%s8452_s17 + $0x194] sm:$0xf] %vm2727_vm0, %v4090_v59 }
 0x42f   : > { %v3351_v31 = vpop.permute.xlu0 %3350  ;;  %3380 = vrot.lane.b32.xlu1 %v10316_v34, %s6198_s11 }
 0x430   : > { %4965 = vst.msk [vmem:[%s8422_s13 + $0x98] sm:$0xf] %vm2727_vm0, %v3351_v31  ;;  %v10333_v31 = vld [vmem:[#allocation29_spill] sm:$0xff] }
 0x431   : > { %v4219_v27 = vpop.permute.xlu1 %4218  ;;  %4119 = vrot.lane.b32.xlu0 %v9056_v36, %s6198_s11  ;;  %v10318_v36 = vld [vmem:[#allocation56_spill] sm:$0xff] }
 0x432   : > { %5252 = vst.msk [vmem:[%s8422_s13 + $0x194] sm:$0xf] %vm2727_vm0, %v4219_v27 }
 0x433   : > { %v4092_v13 = vpop.permute.xlu0 %4091  ;;  %4121 = vrot.lane.b32.xlu1 %v10318_v36, %s6198_s11 }
 0x434   : > { %5221 = vst.msk [vmem:[%s8452_s17 + $0x198] sm:$0xf] %vm2727_vm0, %v4092_v13 }
 0x435   : > { %v3224_v22 = vpop.permute.xlu1 %3223  ;;  %4248 = vrot.lane.b32.xlu0 %v10317_v17, %s6198_s11 }
 0x436   : > { %4934 = vst.msk [vmem:[%s8452_s17 + $0x9c] sm:$0xf] %vm2727_vm0, %v3224_v22  ;;  %v10334_v22 = vld [vmem:[#allocation31_spill] sm:$0xff] }
 0x437   : > { %v4221_v51 = vpop.permute.xlu0 %4220  ;;  %4250 = vrot.lane.b32.xlu1 %v10319_v61, %s6198_s11 }
 0x438   : > { %5253 = vst.msk [vmem:[%s8422_s13 + $0x198] sm:$0xf] %vm2727_vm0, %v4221_v51 }
 0x439   : > { %v3353_v11 = vpop.permute.xlu1 %3352  ;;  %3253 = vrot.lane.b32.xlu0 %v9110_v26, %s6198_s11 }
 0x43a   : > { %4966 = vst.msk [vmem:[%s8422_s13 + $0x9c] sm:$0xf] %vm2727_vm0, %v3353_v11 }
 0x43b   : > { %v3226_v60 = vpop.permute.xlu0 %3225  ;;  %3255 = vrot.lane.b32.xlu1 %v9129_v3, %s6198_s11 }
 0x43c   : > { %4935 = vst.msk [vmem:[%s8452_s17 + $0xa0] sm:$0xf] %vm2727_vm0, %v3226_v60 }
 0x43d   : > { %v4094_v16 = vpop.permute.xlu1 %4093  ;;  %3382 = vrot.lane.b32.xlu0 %v9088_v21, %s6198_s11  ;;  %v10320_v21 = vld [vmem:[#allocation58_spill] sm:$0xff] }
 0x43e   : > { %5222 = vst.msk [vmem:[%s8452_s17 + $0x19c] sm:$0xf] %vm2727_vm0, %v4094_v16 }
 0x43f   : > { %v3355_v12 = vpop.permute.xlu0 %3354  ;;  %3384 = vrot.lane.b32.xlu1 %v10320_v21, %s6198_s11 }
 0x440   : > { %4967 = vst.msk [vmem:[%s8422_s13 + $0xa0] sm:$0xf] %vm2727_vm0, %v3355_v12 }
 0x441   : > { %v4223_v25 = vpop.permute.xlu1 %4222  ;;  %4123 = vrot.lane.b32.xlu0 %v9120_v56, %s6198_s11  ;;  %v10322_v56 = vld [vmem:[#allocation60_spill] sm:$0xff] }
 0x442   : > { %5254 = vst.msk [vmem:[%s8422_s13 + $0x19c] sm:$0xf] %vm2727_vm0, %v4223_v25 }
 0x443   : > { %v4096_v26 = vpop.permute.xlu0 %4095  ;;  %4125 = vrot.lane.b32.xlu1 %v10322_v56, %s6198_s11 }
 0x444   : > { %5223 = vst.msk [vmem:[%s8452_s17 + $0x1a0] sm:$0xf] %vm2727_vm0, %v4096_v26 }
 0x445   : > { %v3228_v53 = vpop.permute.xlu1 %3227  ;;  %4252 = vrot.lane.b32.xlu0 %v10321_v42, %s6198_s11 }
 0x446   : > { %4936 = vst.msk [vmem:[%s8452_s17 + $0xa4] sm:$0xf] %vm2727_vm0, %v3228_v53 }
 0x447   : > { %v4225_v3 = vpop.permute.xlu0 %4224  ;;  %4254 = vrot.lane.b32.xlu1 %v10323_v46, %s6198_s11 }
 0x448   : > { %5255 = vst.msk [vmem:[%s8422_s13 + $0x1a0] sm:$0xf] %vm2727_vm0, %v4225_v3 }
 0x449   : > { %v3357_v45 = vpop.permute.xlu1 %3356  ;;  %3257 = vrot.lane.b32.xlu0 %v9174_v5, %s6198_s11 }
 0x44a   : > { %4968 = vst.msk [vmem:[%s8422_s13 + $0xa4] sm:$0xf] %vm2727_vm0, %v3357_v45 }
 0x44b   : > { %v3230_v4 = vpop.permute.xlu0 %3229  ;;  %3259 = vrot.lane.b32.xlu1 %v9193_v2, %s6198_s11 }
 0x44c   : > { %4937 = vst.msk [vmem:[%s8452_s17 + $0xa8] sm:$0xf] %vm2727_vm0, %v3230_v4 }
 0x44d   : > { %v4098_v62 = vpop.permute.xlu1 %4097  ;;  %3386 = vrot.lane.b32.xlu0 %v9152_v57, %s6198_s11  ;;  %v10324_v57 = vld [vmem:[#allocation62_spill] sm:$0xff] }
 0x44e   : > { %5224 = vst.msk [vmem:[%s8452_s17 + $0x1a4] sm:$0xf] %vm2727_vm0, %v4098_v62 }
 0x44f   : > { %v3359_v7 = vpop.permute.xlu0 %3358  ;;  %3388 = vrot.lane.b32.xlu1 %v10324_v57, %s6198_s11 }
 0x450   : > { %4969 = vst.msk [vmem:[%s8422_s13 + $0xa8] sm:$0xf] %vm2727_vm0, %v3359_v7 }
 0x451   : > { %v4227_v28 = vpop.permute.xlu1 %4226  ;;  %4127 = vrot.lane.b32.xlu0 %v9184_v40, %s6198_s11  ;;  %v10326_v40 = vld [vmem:[#allocation64_spill] sm:$0xff] }
 0x452   : > { %5256 = vst.msk [vmem:[%s8422_s13 + $0x1a4] sm:$0xf] %vm2727_vm0, %v4227_v28 }
 0x453   : > { %v4100_v5 = vpop.permute.xlu0 %4099  ;;  %4129 = vrot.lane.b32.xlu1 %v10326_v40, %s6198_s11 }
 0x454   : > { %5225 = vst.msk [vmem:[%s8452_s17 + $0x1a8] sm:$0xf] %vm2727_vm0, %v4100_v5 }
 0x455   : > { %v3232_v50 = vpop.permute.xlu1 %3231  ;;  %4256 = vrot.lane.b32.xlu0 %v10325_v8, %s6198_s11 }
 0x456   : > { %4938 = vst.msk [vmem:[%s8452_s17 + $0xac] sm:$0xf] %vm2727_vm0, %v3232_v50 }
 0x457   : > { %v4229_v2 = vpop.permute.xlu0 %4228  ;;  %4258 = vrot.lane.b32.xlu1 %v10327_v35, %s6198_s11 }
 0x458   : > { %5257 = vst.msk [vmem:[%s8422_s13 + $0x1a8] sm:$0xf] %vm2727_vm0, %v4229_v2 }
 0x459   : > { %v3361_v37 = vpop.permute.xlu1 %3360  ;;  %3261 = vrot.lane.b32.xlu0 %v9238_v32, %s6198_s11 }
 0x45a   : > { %4970 = vst.msk [vmem:[%s8422_s13 + $0xac] sm:$0xf] %vm2727_vm0, %v3361_v37 }
 0x45b   : > { %v3234_v55 = vpop.permute.xlu0 %3233  ;;  %3263 = vrot.lane.b32.xlu1 %v9257_v49, %s6198_s11 }
 0x45c   : > { %4939 = vst.msk [vmem:[%s8452_s17 + $0xb0] sm:$0xf] %vm2727_vm0, %v3234_v55 }
 0x45d   : > { %v4102_v54 = vpop.permute.xlu1 %4101  ;;  %3390 = vrot.lane.b32.xlu0 %v9216_v23, %s6198_s11  ;;  %v10328_v23 = vld [vmem:[#allocation66_spill] sm:$0xff] }
 0x45e   : > { %5226 = vst.msk [vmem:[%s8452_s17 + $0x1ac] sm:$0xf] %vm2727_vm0, %v4102_v54 }
 0x45f   : > { %v3363_v18 = vpop.permute.xlu0 %3362  ;;  %3392 = vrot.lane.b32.xlu1 %v10328_v23, %s6198_s11 }
 0x460   : > { %4971 = vst.msk [vmem:[%s8422_s13 + $0xb0] sm:$0xf] %vm2727_vm0, %v3363_v18 }
 0x461   : > { %v4231_v0 = vpop.permute.xlu1 %4230  ;;  %4131 = vrot.lane.b32.xlu0 %v9248_v33, %s6198_s11  ;;  %v10330_v33 = vld [vmem:[#allocation30_spill] sm:$0xff] }
 0x462   : > { %5258 = vst.msk [vmem:[%s8422_s13 + $0x1ac] sm:$0xf] %vm2727_vm0, %v4231_v0 }
 0x463   : > { %v4104_v32 = vpop.permute.xlu0 %4103  ;;  %4133 = vrot.lane.b32.xlu1 %v10330_v33, %s6198_s11 }
 0x464   : > { %5227 = vst.msk [vmem:[%s8452_s17 + $0x1b0] sm:$0xf] %vm2727_vm0, %v4104_v32 }
 0x465   : > { %v3236_v43 = vpop.permute.xlu1 %3235  ;;  %4260 = vrot.lane.b32.xlu0 %v10329_v20, %s6198_s11 }
 0x466   : > { %4940 = vst.msk [vmem:[%s8452_s17 + $0xb4] sm:$0xf] %vm2727_vm0, %v3236_v43 }
 0x467   : > { %v4233_v49 = vpop.permute.xlu0 %4232  ;;  %4262 = vrot.lane.b32.xlu1 %v10331_v30, %s6198_s11 }
 0x468   : > { %5259 = vst.msk [vmem:[%s8422_s13 + $0x1b0] sm:$0xf] %vm2727_vm0, %v4233_v49 }
 0x469   : > { %v3365_v44 = vpop.permute.xlu1 %3364  ;;  %3265 = vrot.lane.b32.xlu0 %v9302_v1, %s6198_s11 }
 0x46a   : > { %4972 = vst.msk [vmem:[%s8422_s13 + $0xb4] sm:$0xf] %vm2727_vm0, %v3365_v44 }
 0x46b   : > { %v3238_v15 = vpop.permute.xlu0 %3237  ;;  %3267 = vrot.lane.b32.xlu1 %v9321_v41, %s6198_s11 }
 0x46c   : > { %4941 = vst.msk [vmem:[%s8452_s17 + $0xb8] sm:$0xf] %vm2727_vm0, %v3238_v15 }
 0x46d   : > { %v4106_v9 = vpop.permute.xlu1 %4105  ;;  %3394 = vrot.lane.b32.xlu0 %v9280_v38, %s6198_s11  ;;  %v10332_v38 = vld [vmem:[#allocation67_spill] sm:$0xff] }
 0x46e   : > { %5228 = vst.msk [vmem:[%s8452_s17 + $0x1b4] sm:$0xf] %vm2727_vm0, %v4106_v9 }
 0x46f   : > { %v3367_v24 = vpop.permute.xlu0 %3366  ;;  %3396 = vrot.lane.b32.xlu1 %v10332_v38, %s6198_s11 }
 0x470   : > { %4973 = vst.msk [vmem:[%s8422_s13 + $0xb8] sm:$0xf] %vm2727_vm0, %v3367_v24 }
 0x471   : > { %v4235_v59 = vpop.permute.xlu1 %4234  ;;  %4135 = vrot.lane.b32.xlu0 %v9312_v39, %s6198_s11 }
 0x472   : > { %5260 = vst.msk [vmem:[%s8422_s13 + $0x1b4] sm:$0xf] %vm2727_vm0, %v4235_v59 }
 0x473   : > { %v4108_v1 = vpop.permute.xlu0 %4107  ;;  %4137 = vrot.lane.b32.xlu1 %v9326_v48, %s6198_s11 }
 0x474   : > { %5229 = vst.msk [vmem:[%s8452_s17 + $0x1b8] sm:$0xf] %vm2727_vm0, %v4108_v1 }
 0x475   : > { %v3240_v52 = vpop.permute.xlu1 %3239  ;;  %4264 = vrot.lane.b32.xlu0 %v10333_v31, %s6198_s11 }
 0x476   : > { %4942 = vst.msk [vmem:[%s8452_s17 + $0xbc] sm:$0xf] %vm2727_vm0, %v3240_v52 }
 0x477   : > { %v4237_v41 = vpop.permute.xlu0 %4236  ;;  %4266 = vrot.lane.b32.xlu1 %v10334_v22, %s6198_s11 }
 0x478   : > { %5261 = vst.msk [vmem:[%s8422_s13 + $0x1b8] sm:$0xf] %vm2727_vm0, %v4237_v41 }
 0x479   : > { %v3369_v27 = vpop.permute.xlu1 %3368  ;;  %3269 = vrot.lane.b32.xlu0 %v9366_v6, %s6198_s11 }
 0x47a   : > { %4974 = vst.msk [vmem:[%s8422_s13 + $0xbc] sm:$0xf] %vm2727_vm0, %v3369_v27 }
 0x47b   : > { %v3242_v39 = vpop.permute.xlu0 %3241  ;;  %3271 = vrot.lane.b32.xlu1 %v9385_v63, %s6198_s11 }
 0x47c   : > { %4943 = vst.msk [vmem:[%s8452_s17 + $0xc0] sm:$0xf] %vm2727_vm0, %v3242_v39 }
 0x47d   : > { %v4110_v13 = vpop.permute.xlu1 %4109  ;;  %3398 = vrot.lane.b32.xlu0 %v9344_v58, %s6198_s11 }
 0x47e   : > { %5230 = vst.msk [vmem:[%s8452_s17 + $0x1bc] sm:$0xf] %vm2727_vm0, %v4110_v13 }
 0x47f   : > { %v3371_v48 = vpop.permute.xlu0 %3370  ;;  %3400 = vrot.lane.b32.xlu1 %v9354_v47, %s6198_s11 }
 0x480   : > { %4975 = vst.msk [vmem:[%s8422_s13 + $0xc0] sm:$0xf] %vm2727_vm0, %v3371_v48 }
 0x481   : > { %v4239_v34 = vpop.permute.xlu1 %4238  ;;  %4139 = vrot.lane.b32.xlu0 %v9376_v29, %s6198_s11 }
 0x482   : > { %5262 = vst.msk [vmem:[%s8422_s13 + $0x1bc] sm:$0xf] %vm2727_vm0, %v4239_v34 }
 0x483   : > { %v4112_v6 = vpop.permute.xlu0 %4111  ;;  %4141 = vrot.lane.b32.xlu1 %v9390_v19, %s6198_s11 }
 0x484   : > { %5231 = vst.msk [vmem:[%s8452_s17 + $0x1c0] sm:$0xf] %vm2727_vm0, %v4112_v6 }
 0x485   : > { %v3244_v58 = vpop.permute.xlu1 %3243  ;;  %4268 = vrot.lane.b32.xlu0 %v9347_v10, %s6198_s11 }
 0x486   : > { %4944 = vst.msk [vmem:[%s8452_s17 + $0xc4] sm:$0xf] %vm2727_vm0, %v3244_v58 }
 0x487   : > { %v4241_v63 = vpop.permute.xlu0 %4240  ;;  %4270 = vrot.lane.b32.xlu1 %v9364_v14, %s6198_s11 }
 0x488   : > { %5263 = vst.msk [vmem:[%s8422_s13 + $0x1c0] sm:$0xf] %vm2727_vm0, %v4241_v63 }
 0x489   : > { %v3373_v29 = vpop.permute.xlu1 %3372 }
 0x48a   : > { %4976 = vst.msk [vmem:[%s8422_s13 + $0xc4] sm:$0xf] %vm2727_vm0, %v3373_v29 }
 0x48b   : > { %v3246_v17 = vpop.permute.xlu0 %3245 }
 0x48c   : > { %4945 = vst.msk [vmem:[%s8452_s17 + $0xc8] sm:$0xf] %vm2727_vm0, %v3246_v17 }
 0x48d   : > { %v4114_v47 = vpop.permute.xlu1 %4113 }
 0x48e   : > { %5232 = vst.msk [vmem:[%s8452_s17 + $0x1c4] sm:$0xf] %vm2727_vm0, %v4114_v47 }
 0x48f   : > { %v3375_v10 = vpop.permute.xlu0 %3374 }
 0x490   : > { %4977 = vst.msk [vmem:[%s8422_s13 + $0xc8] sm:$0xf] %vm2727_vm0, %v3375_v10 }
 0x491   : > { %v4243_v19 = vpop.permute.xlu1 %4242 }
 0x492   : > { %5264 = vst.msk [vmem:[%s8422_s13 + $0x1c4] sm:$0xf] %vm2727_vm0, %v4243_v19 }
 0x493   : > { %v4116_v51 = vpop.permute.xlu0 %4115 }
 0x494   : > { %5233 = vst.msk [vmem:[%s8452_s17 + $0x1c8] sm:$0xf] %vm2727_vm0, %v4116_v51 }
 0x495   : > { %v3248_v11 = vpop.permute.xlu1 %3247 }
 0x496   : > { %4946 = vst.msk [vmem:[%s8452_s17 + $0xcc] sm:$0xf] %vm2727_vm0, %v3248_v11 }
 0x497   : > { %v4245_v14 = vpop.permute.xlu0 %4244 }
 0x498   : > { %5265 = vst.msk [vmem:[%s8422_s13 + $0x1c8] sm:$0xf] %vm2727_vm0, %v4245_v14 }
 0x499   : > { %v3377_v36 = vpop.permute.xlu1 %3376 }
 0x49a   : > { %4978 = vst.msk [vmem:[%s8422_s13 + $0xcc] sm:$0xf] %vm2727_vm0, %v3377_v36 }
 0x49b   : > { %v3250_v60 = vpop.permute.xlu0 %3249 }
 0x49c   : > { %4947 = vst.msk [vmem:[%s8452_s17 + $0xd0] sm:$0xf] %vm2727_vm0, %v3250_v60 }
 0x49d   : > { %v4118_v16 = vpop.permute.xlu1 %4117 }
 0x49e   : > { %5234 = vst.msk [vmem:[%s8452_s17 + $0x1cc] sm:$0xf] %vm2727_vm0, %v4118_v16 }
 0x49f   : > { %v3379_v61 = vpop.permute.xlu0 %3378 }
 0x4a0   : > { %4979 = vst.msk [vmem:[%s8422_s13 + $0xd0] sm:$0xf] %vm2727_vm0, %v3379_v61 }
 0x4a1   : > { %v4247_v12 = vpop.permute.xlu1 %4246 }
 0x4a2   : > { %5266 = vst.msk [vmem:[%s8422_s13 + $0x1cc] sm:$0xf] %vm2727_vm0, %v4247_v12 }
 0x4a3   : > { %v4120_v25 = vpop.permute.xlu0 %4119 }
 0x4a4   : > { %5235 = vst.msk [vmem:[%s8452_s17 + $0x1d0] sm:$0xf] %vm2727_vm0, %v4120_v25 }
 0x4a5   : > { %v3252_v26 = vpop.permute.xlu1 %3251 }
 0x4a6   : > { %4948 = vst.msk [vmem:[%s8452_s17 + $0xd4] sm:$0xf] %vm2727_vm0, %v3252_v26 }
 0x4a7   : > { %v4249_v53 = vpop.permute.xlu0 %4248 }
 0x4a8   : > { %5267 = vst.msk [vmem:[%s8422_s13 + $0x1d0] sm:$0xf] %vm2727_vm0, %v4249_v53 }
 0x4a9   : > { %v3381_v21 = vpop.permute.xlu1 %3380 }
 0x4aa   : > { %4980 = vst.msk [vmem:[%s8422_s13 + $0xd4] sm:$0xf] %vm2727_vm0, %v3381_v21 }
 0x4ab   : > { %v3254_v42 = vpop.permute.xlu0 %3253 }
 0x4ac   : > { %4949 = vst.msk [vmem:[%s8452_s17 + $0xd8] sm:$0xf] %vm2727_vm0, %v3254_v42 }
 0x4ad   : > { %v4122_v3 = vpop.permute.xlu1 %4121 }
 0x4ae   : > { %5236 = vst.msk [vmem:[%s8452_s17 + $0x1d4] sm:$0xf] %vm2727_vm0, %v4122_v3 }
 0x4af   : > { %v3383_v45 = vpop.permute.xlu0 %3382 }
 0x4b0   : > { %4981 = vst.msk [vmem:[%s8422_s13 + $0xd8] sm:$0xf] %vm2727_vm0, %v3383_v45 }
 0x4b1   : > { %v4251_v56 = vpop.permute.xlu1 %4250 }
 0x4b2   : > { %5268 = vst.msk [vmem:[%s8422_s13 + $0x1d4] sm:$0xf] %vm2727_vm0, %v4251_v56 }
 0x4b3   : > { %v4124_v4 = vpop.permute.xlu0 %4123 }
 0x4b4   : > { %5237 = vst.msk [vmem:[%s8452_s17 + $0x1d8] sm:$0xf] %vm2727_vm0, %v4124_v4 }
 0x4b5   : > { %v3256_v62 = vpop.permute.xlu1 %3255 }
 0x4b6   : > { %4950 = vst.msk [vmem:[%s8452_s17 + $0xdc] sm:$0xf] %vm2727_vm0, %v3256_v62 }
 0x4b7   : > { %v4253_v46 = vpop.permute.xlu0 %4252 }
 0x4b8   : > { %5269 = vst.msk [vmem:[%s8422_s13 + $0x1d8] sm:$0xf] %vm2727_vm0, %v4253_v46 }
 0x4b9   : > { %v3385_v7 = vpop.permute.xlu1 %3384 }
 0x4ba   : > { %4982 = vst.msk [vmem:[%s8422_s13 + $0xdc] sm:$0xf] %vm2727_vm0, %v3385_v7 }
 0x4bb   : > { %v3258_v28 = vpop.permute.xlu0 %3257 }
 0x4bc   : > { %4951 = vst.msk [vmem:[%s8452_s17 + $0xe0] sm:$0xf] %vm2727_vm0, %v3258_v28 }
 0x4bd   : > { %v4126_v5 = vpop.permute.xlu1 %4125 }
 0x4be   : > { %5238 = vst.msk [vmem:[%s8452_s17 + $0x1dc] sm:$0xf] %vm2727_vm0, %v4126_v5 }
 0x4bf   : > { %v3387_v50 = vpop.permute.xlu0 %3386 }
 0x4c0   : > { %4983 = vst.msk [vmem:[%s8422_s13 + $0xe0] sm:$0xf] %vm2727_vm0, %v3387_v50 }
 0x4c1   : > { %v4255_v57 = vpop.permute.xlu1 %4254 }
 0x4c2   : > { %5270 = vst.msk [vmem:[%s8422_s13 + $0x1dc] sm:$0xf] %vm2727_vm0, %v4255_v57 }
 0x4c3   : > { %v4128_v8 = vpop.permute.xlu0 %4127 }
 0x4c4   : > { %5239 = vst.msk [vmem:[%s8452_s17 + $0x1e0] sm:$0xf] %vm2727_vm0, %v4128_v8 }
 0x4c5   : > { %v3260_v2 = vpop.permute.xlu1 %3259 }
 0x4c6   : > { %4952 = vst.msk [vmem:[%s8452_s17 + $0xe4] sm:$0xf] %vm2727_vm0, %v3260_v2 }
 0x4c7   : > { %v4257_v37 = vpop.permute.xlu0 %4256 }
 0x4c8   : > { %5271 = vst.msk [vmem:[%s8422_s13 + $0x1e0] sm:$0xf] %vm2727_vm0, %v4257_v37 }
 0x4c9   : > { %v3389_v40 = vpop.permute.xlu1 %3388 }
 0x4ca   : > { %4984 = vst.msk [vmem:[%s8422_s13 + $0xe4] sm:$0xf] %vm2727_vm0, %v3389_v40 }
 0x4cb   : > { %v3262_v55 = vpop.permute.xlu0 %3261 }
 0x4cc   : > { %4953 = vst.msk [vmem:[%s8452_s17 + $0xe8] sm:$0xf] %vm2727_vm0, %v3262_v55 }
 0x4cd   : > { %v4130_v54 = vpop.permute.xlu1 %4129 }
 0x4ce   : > { %5240 = vst.msk [vmem:[%s8452_s17 + $0x1e4] sm:$0xf] %vm2727_vm0, %v4130_v54 }
 0x4cf   : > { %v3391_v35 = vpop.permute.xlu0 %3390 }
 0x4d0   : > { %4985 = vst.msk [vmem:[%s8422_s13 + $0xe8] sm:$0xf] %vm2727_vm0, %v3391_v35 }
 0x4d1   : > { %v4259_v18 = vpop.permute.xlu1 %4258 }
 0x4d2   : > { %5272 = vst.msk [vmem:[%s8422_s13 + $0x1e4] sm:$0xf] %vm2727_vm0, %v4259_v18 }
 0x4d3   : > { %v4132_v0 = vpop.permute.xlu0 %4131 }
 0x4d4   : > { %5241 = vst.msk [vmem:[%s8452_s17 + $0x1e8] sm:$0xf] %vm2727_vm0, %v4132_v0 }
 0x4d5   : > { %v3264_v32 = vpop.permute.xlu1 %3263 }
 0x4d6   : > { %4954 = vst.msk [vmem:[%s8452_s17 + $0xec] sm:$0xf] %vm2727_vm0, %v3264_v32 }
 0x4d7   : > { %v4261_v43 = vpop.permute.xlu0 %4260 }
 0x4d8   : > { %5273 = vst.msk [vmem:[%s8422_s13 + $0x1e8] sm:$0xf] %vm2727_vm0, %v4261_v43 }
 0x4d9   : > { %v3393_v23 = vpop.permute.xlu1 %3392 }
 0x4da   : > { %4986 = vst.msk [vmem:[%s8422_s13 + $0xec] sm:$0xf] %vm2727_vm0, %v3393_v23 }
 0x4db   : > { %v3266_v20 = vpop.permute.xlu0 %3265 }
 0x4dc   : > { %4955 = vst.msk [vmem:[%s8452_s17 + $0xf0] sm:$0xf] %vm2727_vm0, %v3266_v20 }
 0x4dd   : > { %v4134_v49 = vpop.permute.xlu1 %4133 }
 0x4de   : > { %5242 = vst.msk [vmem:[%s8452_s17 + $0x1ec] sm:$0xf] %vm2727_vm0, %v4134_v49 }
 0x4df   : > { %v3395_v44 = vpop.permute.xlu0 %3394 }
 0x4e0   : > { %4987 = vst.msk [vmem:[%s8422_s13 + $0xf0] sm:$0xf] %vm2727_vm0, %v3395_v44 }
 0x4e1   : > { %v4263_v33 = vpop.permute.xlu1 %4262 }
 0x4e2   : > { %5274 = vst.msk [vmem:[%s8422_s13 + $0x1ec] sm:$0xf] %vm2727_vm0, %v4263_v33 }
 0x4e3   : > { %v4136_v15 = vpop.permute.xlu0 %4135 }
 0x4e4   : > { %5243 = vst.msk [vmem:[%s8452_s17 + $0x1f0] sm:$0xf] %vm2727_vm0, %v4136_v15 }
 0x4e5   : > { %v3268_v9 = vpop.permute.xlu1 %3267 }
 0x4e6   : > { %4956 = vst.msk [vmem:[%s8452_s17 + $0xf4] sm:$0xf] %vm2727_vm0, %v3268_v9 }
 0x4e7   : > { %v4265_v30 = vpop.permute.xlu0 %4264 }
 0x4e8   : > { %5275 = vst.msk [vmem:[%s8422_s13 + $0x1f0] sm:$0xf] %vm2727_vm0, %v4265_v30 }
 0x4e9   : > { %v3397_v24 = vpop.permute.xlu1 %3396 }
 0x4ea   : > { %4988 = vst.msk [vmem:[%s8422_s13 + $0xf4] sm:$0xf] %vm2727_vm0, %v3397_v24 }
 0x4eb   : > { %v3270_v59 = vpop.permute.xlu0 %3269 }
 0x4ec   : > { %4957 = vst.msk [vmem:[%s8452_s17 + $0xf8] sm:$0xf] %vm2727_vm0, %v3270_v59 }
 0x4ed   : > { %v4138_v1 = vpop.permute.xlu1 %4137 }
 0x4ee   : > { %5244 = vst.msk [vmem:[%s8452_s17 + $0x1f4] sm:$0xf] %vm2727_vm0, %v4138_v1 }
 0x4ef   : > { %v3399_v52 = vpop.permute.xlu0 %3398 }
 0x4f0   : > { %4989 = vst.msk [vmem:[%s8422_s13 + $0xf8] sm:$0xf] %vm2727_vm0, %v3399_v52 }
 0x4f1   : > { %v4267_v38 = vpop.permute.xlu1 %4266 }
 0x4f2   : > { %5276 = vst.msk [vmem:[%s8422_s13 + $0x1f4] sm:$0xf] %vm2727_vm0, %v4267_v38 }
 0x4f3   : > { %v4140_v31 = vpop.permute.xlu0 %4139 }
 0x4f4   : > { %5245 = vst.msk [vmem:[%s8452_s17 + $0x1f8] sm:$0xf] %vm2727_vm0, %v4140_v31 }
 0x4f5   : > { %v3272_v41 = vpop.permute.xlu1 %3271 }
 0x4f6   : > { %4958 = vst.msk [vmem:[%s8452_s17 + $0xfc] sm:$0xf] %vm2727_vm0, %v3272_v41 }
 0x4f7   : > { %v4269_v27 = vpop.permute.xlu0 %4268 }
 0x4f8   : > { %5277 = vst.msk [vmem:[%s8422_s13 + $0x1f8] sm:$0xf] %vm2727_vm0, %v4269_v27 }
 0x4f9   : > { %v3401_v39 = vpop.permute.xlu1 %3400 }
 0x4fa   : > { %4990 = vst.msk [vmem:[%s8422_s13 + $0xfc] sm:$0xf] %vm2727_vm0, %v3401_v39 }
 0x4fd   : > { %v4142_v13 = vpop.permute.xlu1 %4141 }
 0x4fe   : > { %5246 = vst.msk [vmem:[%s8452_s17 + $0x1fc] sm:$0xf] %vm2727_vm0, %v4142_v13 }
 0x501   : > { %v4271_v22 = vpop.permute.xlu1 %4270 }
 0x502   : > { %5278 = vst.msk [vmem:[%s8422_s13 + $0x1fc] sm:$0xf] %vm2727_vm0, %v4271_v22 }
 0x503   : > { %s5282_s14 = sshll.u32 %s6171_s27, 5  ;;  %s5283_s12 = sshll.u32 %s6175_s28, 8 }
 0x504   : > { %s4360_s19 = sadd.s32 %s5283_s12, %s5282_s14  ;;  %s4379_s21 = sshll.u32 %s8032_s6, 4  ;;  %s4380_s21 = int_to_ptr.vmem [resolvable:$true] %s4379_s21 }
 0x505   : > { %s9883_s15 = sshll.u32 %s4360_s19, 6  ;;  %s6199_s23 = smov 2048  }
 0x506   : > { %s4362_s10 = scalar_lea.hbm %s9978_s5, %s9883_s15  ;;  %5536 = sst [smem:[#allocation16]] (%p6439_p4), %s6199_s23 }
 0x507   : > { %s6200_s3 = smov 4096   ;;  %s6201_s27 = smov 32  }
 0x508   : > { %5537 = sst [smem:[#allocation16 + $0x1]] (%p6439_p4), %s6200_s3  ;;  %s6202_s28 = smov 64  }
 0x509   : > { %5538 = sst [smem:[#allocation16 + $0x2]] (%p6439_p4), %s6201_s27  ;;  %s6203_s4 = smov 4  }
 0x50a   : > { %5539 = sst [smem:[#allocation16 + $0x3]] (%p6439_p4), %s6202_s28  ;;  %s6204_s16 = smov [#allocation15]  }
 0x50b   : > { %5540 = sst [smem:[#allocation16 + $0x4]] (%p6439_p4), %s6202_s28  ;;  %s6205_s6 = smov 0  }
 0x50c   : > { %5541 = sst [smem:[#allocation16 + $0x5]] (%p6439_p4), %s6203_s4 }
 0x50d   : > { %5542 = dma.general (%p6439_p4), %s4380_s21, 8192, %s4362_s10, %s4338_s18, %s6204_s16, [#allocation16], %s6205_s6, 0  }
 0x50e   : > { %s10335_s14 = sld [smem:[#allocation86_spill]]  ;;  %s4426_s19 = sshll.u32 %s8452_s17, 4  ;;  %s4427_s19 = int_to_ptr.vmem [resolvable:$true] %s4426_s19 }
 0x50f   : > { %s6206_s9 = smov 2048   ;;  %s6207_s18 = smov 4096  }
 0x510   : > { %5543 = sst [smem:[#allocation18]] (%p6439_p4), %s6206_s9  ;;  %s6208_s21 = smov 32  }
 0x511   : > { %5544 = sst [smem:[#allocation18 + $0x1]] (%p6439_p4), %s6207_s18  ;;  %s6209_s20 = smov 64  }
 0x512   : > { %5545 = sst [smem:[#allocation18 + $0x2]] (%p6439_p4), %s6208_s21  ;;  %s6210_s10 = smov 4  }
 0x513   : > { %5546 = sst [smem:[#allocation18 + $0x3]] (%p6439_p4), %s6209_s20  ;;  %s6211_s23 = smov [#allocation17]  }
 0x514   : > { %s4409_s12 = scalar_lea.hbm %s10335_s14, %s9883_s15  ;;  %5547 = sst [smem:[#allocation18 + $0x4]] (%p6439_p4), %s6209_s20 }
 0x515   : > { %5548 = sst [smem:[#allocation18 + $0x5]] (%p6439_p4), %s6210_s10  ;;  %s6212_s17 = smov 0  }
 0x516   : > { %5549 = dma.general (%p6439_p4), %s4427_s19, 8192, %s4409_s12, %s9878_s22, %s6211_s23, [#allocation18], %s6212_s17, 0  }
 0x517   : > { %s10336_s28 = sld [smem:[#allocation87_spill]]  ;;  %s4473_s16 = sshll.u32 %s8422_s13, 4  ;;  %s4474_s16 = int_to_ptr.vmem [resolvable:$true] %s4473_s16 }
 0x518   : > { %s6213_s6 = smov 2048   ;;  %s6214_s11 = smov 4096  }
 0x519   : > { %5550 = sst [smem:[#allocation20]] (%p6439_p4), %s6213_s6  ;;  %s6215_s1 = smov 32  }
 0x51a   : > { %5551 = sst [smem:[#allocation20 + $0x1]] (%p6439_p4), %s6214_s11  ;;  %s6216_s14 = smov 64  }
 0x51b   : > { %5552 = sst [smem:[#allocation20 + $0x2]] (%p6439_p4), %s6215_s1  ;;  %s6217_s12 = smov 4  }
 0x51c   : > { %5553 = sst [smem:[#allocation20 + $0x3]] (%p6439_p4), %s6216_s14  ;;  %s6219_s13 = smov 0  }
 0x51d   : > { %s4456_s4 = scalar_lea.hbm %s10336_s28, %s9883_s15  ;;  %5554 = sst [smem:[#allocation20 + $0x4]] (%p6439_p4), %s6216_s14 }
 0x51e   : > { %5555 = sst [smem:[#allocation20 + $0x5]] (%p6439_p4), %s6217_s12  ;;  %s6218_s15 = smov [#allocation19]  }
 0x51f   : > { %5556 = dma.general (%p6439_p4), %s4474_s16, 8192, %s4456_s4, %s9878_s22, %s6218_s15, [#allocation20], %s6219_s13, 0  }
 0x520 PF: > { %s10337_s19 = sld [smem:[#allocation26_spill]]  ;;  %s10338_s9 = sld [smem:[#allocation27_spill]] }
 0x521   : > { %p5596_p6 = scmp.ge.s32.totalorder %s6187_s8, 2 }
 0x526   : > { %s4501_s18 = sand.u32 1, %s10337_s19   ;;  %p10339_p8 = scmp.ne.s32.totalorder %s10338_s9, 0 }
 0x527   : > { %s4502_s21 = scalar_lea.sflag [#allocation4], %s4501_s18 }
 0x528   : > { %p5578_p3 = pnand %p5596_p6, %p10339_p8 }
 0x52a   : > { %6150 = dma.done.wait (!%p5578_p3), %s4502_s21, 8192  }
 0x52b   : > { %6152 = vsyncadd (!%p5578_p3), %s4502_s21, 4294959104  ;;  %s10340_s20 = sadd.s32 4294967294, %s6187_s8  }
 0x52c   : > { %s4510_s10 = sand.u32 1, %s10340_s20  }
 0x52d   : > { %s4511_s23 = scalar_lea.sflag [#allocation13], %s4510_s10 }
 0x52e   : > { %6154 = dma.done.wait (!%p5578_p3), %s4511_s23, 16384  }
 0x52f   : > { %6156 = vsyncadd (!%p5578_p3), %s4511_s23, 4294950912  ;;  %s29_s8 = sadd.s32 1, %s6187_s8   ;;  %s10341_s7 = sld [smem:[#allocation28_spill]] }
 0x530   : > { %p26_p4 = scmp.ge.s32.totalorder %s29_s8, 6   ;;  %s10342_s22 = smov %s10355_s24 }
 0x531   : > { %s10343_s24 = smov %s6163_s25  ;;  %s10344_s25 = smov %s6167_s26 }
 0x532   : > { %s10345_s26 = smov %s6452_s2  ;;  %s10346_s27 = smov %s6179_s29 }
 0x533   : > { %s10347_s28 = smov %s6183_s30  ;;  %s10349_s30 = smov %s10342_s22 }
 0x534   :  { %28 = sbr.rel (!%p26_p4) target bundleno = 18 (0x12), region = 157 }
 0x535   : > { %s10348_s29 = smov %s10341_s7 }
 0x53b   :  { %4525 = vsyncpa [#allocation3], 1 }
 0x53c   :  { %4527 = vsyncpa [#allocation3 + $0x1], 1 }
 0x53d   :  { %4528 = vsyncpa [#allocation6], 1 }
 0x53e   :  { %4529 = vsyncpa [#allocation9], 1 }
 0x53f   :  { %4530 = vsyncpa [#allocation4], 1 }
 0x540   :  { %4532 = vsyncpa [#allocation4 + $0x1], 1 }
 0x541   :  { %4533 = vsyncpa [#allocation13], 1 }
 0x542   :  { %4535 = vsyncpa [#allocation13 + $0x1], 1 }

// kernel: tpu_custom_call.1
= control target key start
LH: loop header
LB: loop body
LE: loop exit
PB: predicated region body
PF: predicated region fallthrough
CT: control target
= control target key end

     0   :  { %s9973_s0 = inlined_call_operand.hbm [shape: f32[2,512,256], index: 0, kind: input, shape index: {}]   ;;  %s9974_s1 = inlined_call_operand.hbm [shape: f32[1,256], index: 1, kind: input, shape index: {}]   ;;  %s9975_s2 = inlined_call_operand.hbm [shape: f32[1,256], index: 2, kind: input, shape index: {}]   ;;  %s9976_s3 = inlined_call_operand.hbm [shape: bf16[256,768], index: 3, kind: input, shape index: {}]   ;;  %s9977_s4 = inlined_call_operand.hbm [shape: f32[1,768], index: 4, kind: input, shape index: {}]   ;;  %s9978_s5 = inlined_call_operand.hbm [shape: bf16[2,4,512,64], index: 5, kind: output, shape index: {0}]   ;;  %s9979_s6 = inlined_call_operand.hbm [shape: bf16[2,4,512,64], index: 6, kind: output, shape index: {1}]   ;;  %s9980_s7 = inlined_call_operand.hbm [shape: bf16[2,4,512,64], index: 7, kind: output, shape index: {2}]  }
   0x1   :  { %10057 = sst [smem:[#allocation82_spill]] %s9974_s1 }
   0x2   :  { %10058 = sst [smem:[#allocation83_spill]] %s9975_s2 }
   0x3   :  { %10059 = sst [smem:[#allocation84_spill]] %s9976_s3 }
   0x4   :  { %10060 = sst [smem:[#allocation85_spill]] %s9977_s4 }
   0x5   :  { %10061 = sst [smem:[#allocation86_spill]] %s9979_s6 }
   0x6   :  { %10062 = sst [smem:[#allocation87_spill]] %s9980_s7 }
   0x7   :  { %13 = vsyncpa [#allocation3], 0 }
   0x8   :  { %15 = vsyncpa [#allocation3 + $0x1], 0 }
   0x9   :  { %16 = vsyncpa [#allocation6], 0 }
   0xa   :  { %17 = vsyncpa [#allocation9], 0 }
   0xb   :  { %18 = vsyncpa [#allocation4], 0 }
   0xc   :  { %20 = vsyncpa [#allocation4 + $0x1], 0 }
   0xd   :  { %21 = vsyncpa [#allocation13], 0 }
   0xe   :  { %23 = vsyncpa [#allocation13 + $0x1], 0  ;;  %s6260_s24 = smov 0   ;;  %s6262_s25 = smov 0  }
   0xf   :  { %s6264_s26 = smov 0   ;;  %s6266_s27 = smov 0  }
  0x10   :  { %s6268_s28 = smov 0   ;;  %s6270_s29 = smov 0  }
  0x11   :  { %s6272_s30 = smov 0   ;;  %s6274_s8 = smov 0  }
  0x12 LB: > { %10063 = sst [smem:[#allocation26_spill]] %s6159_s24  ;;  %s6301_s9 = sadd.s32 4294967295, %s6187_s8   ;;  %s6187_s8 = sphi %s6274_s8, %s29_s8   ;;  %s6183_s30 = sphi %s6272_s30, %s10349_s30   ;;  %s6179_s29 = sphi %s6270_s29, %s10348_s29   ;;  %s6175_s28 = sphi %s6268_s28, %s10347_s28   ;;  %s6171_s27 = sphi %s6266_s27, %s10346_s27   ;;  %s6167_s26 = sphi %s6264_s26, %s10345_s26   ;;  %s6163_s25 = sphi %s6262_s25, %s10344_s25   ;;  %s6159_s24 = sphi %s6260_s24, %s10343_s24  }
  0x13   : > { %s9981_s10 = sadd.s32 4294967294, %s6187_s8   ;;  %p63_p0 = scmp.ne.s32.totalorder %s6163_s25, %s6159_s24 }
  0x14   : > { %p9983_p1 = scmp.eq.s32.totalorder %s6301_s9, 0  ;;  %p179_p3 = scmp.eq.s32.totalorder %s9981_s10, 3 }
  0x15   : > { %p4683_p5 = scmp.ge.s32.totalorder %s6187_s8, 1  ;;  %p242_p7 = scmp.lt.s32.totalorder %s6187_s8, 5 }
  0x16   : > { %p6312_p4 = por %p9983_p1, %p63_p0  ;;  %p6317_p6 = por %p179_p3, %p63_p0 }
  0x17   : > { %p6322_p8 = pnand %p4683_p5, %p242_p7  ;;  %s6189_s14 = smov [#allocation5]  }
  0x18   : > { %s10064_s11 = scalar_select %p6312_p4, 1, 0 }
  0x19   : > { %s10065_s12 = scalar_select %p6317_p6, 1, 0 }
  0x1a   : > { %s10067_s13 = scalar_select %p6322_p8, 1, 0 }
  0x1b   : > { %10066 = sst [smem:[#allocation27_spill]] %s10065_s12  ;;  %s255_s15 = sshll.u32 %s6189_s14, 4  ;;  %s256_s15 = int_to_ptr.vmem [resolvable:$true] %s255_s15 }
  0x1c   : > { %p5560_p9 = pneg %p6322_p8  ;;  %s6190_s16 = smov [#allocation8]  }
  0x1d   : > { %s276_s17 = sshll.u32 %s6190_s16, 4  ;;  %s6191_s19 = smov [#allocation7]   ;;  %s6334_s17 = int_to_ptr.vmem [resolvable:$true] %s276_s17 }
  0x1e   : > { %p6330_p10 = pnand %p5560_p9, %p9983_p1  ;;  %s6336_s20 = sshll.u32 %s6191_s19, 4  ;;  %s267_s20 = int_to_ptr.vmem [resolvable:$true] %s6336_s20 }
  0x1f   : > { %s10069_s1 = sld [smem:[#allocation82_spill]] }
  0x20   : > { %p6346_p12 = pneg %p6330_p10 }
  0x25   : > { %s5963_s23 = scalar_lea.hbm %s10069_s1, 32 }
  0x26   : > { %p5964_p11 = scmp.ne.s32.totalorder %s10069_s1, %s5963_s23  ;;  %p5970_p3 = scmp.lt.u32.totalorder %s5963_s23, %s10069_s1 }
  0x28   : > { %p5966_p13 = pnand %p6346_p12, %p5964_p11 }
  0x2a   : > { %p5967_p0 = pneg %p5966_p13 }
  0x2c   : > { %p5972_p5 = pnand %p5970_p3, %p5967_p0 }
  0x2e   : > { %5975 = shalt.err (!%p5972_p5)
}
  0x2f   : > { %s5976_s21 = scalar_lea.vmem %s256_s15, 32  ;;  %p5984_p2 = scmp.lt.s32.totalorder %s256_s15, %s256_s15 }
  0x30   : > { %p5977_p7 = scmp.ne.s32.totalorder %s256_s15, %s5976_s21  ;;  %p5985_p6 = scmp.lt.s32.totalorder %s5976_s21, %s5976_s21 }
  0x32   : > { %p5979_p9 = pnand %p5977_p7, %p6346_p12  ;;  %p5986_p4 = por %p5985_p6, %p5984_p2 }
  0x34   : > { %p5980_p1 = pneg %p5979_p9 }
  0x36   : > { %p5987_p8 = pnand %p5986_p4, %p5980_p1 }
  0x38   : > { %5990 = shalt.err (!%p5987_p8)
}
  0x39   : > { %5563 = dma.hbm_to_vmem [thread:$0]  (!%p6330_p10), %s10069_s1, 32, %s256_s15, [#allocation6]  }
  0x3a   : > { %s10071_s3 = sld [smem:[#allocation84_spill]] }
  0x40   : > { %s5991_s14 = scalar_lea.hbm %s10071_s3, 12288 }
  0x41   : > { %p5992_p11 = scmp.ne.s32.totalorder %s10071_s3, %s5991_s14  ;;  %p5998_p1 = scmp.lt.u32.totalorder %s5991_s14, %s10071_s3 }
  0x43   : > { %p5994_p13 = pnand %p5992_p11, %p6346_p12 }
  0x45   : > { %p5995_p2 = pneg %p5994_p13 }
  0x47   : > { %p6000_p4 = pnand %p5998_p1, %p5995_p2 }
  0x49   : > { %6003 = shalt.err (!%p6000_p4)
}
  0x4a   : > { %s6004_s15 = scalar_lea.vmem %s6334_s17, 12288  ;;  %p6012_p3 = scmp.lt.s32.totalorder %s6334_s17, %s6334_s17 }
  0x4b   : > { %p6005_p6 = scmp.ne.s32.totalorder %s6334_s17, %s6004_s15  ;;  %p6013_p5 = scmp.lt.s32.totalorder %s6004_s15, %s6004_s15 }
  0x4d   : > { %p6007_p8 = pnand %p6005_p6, %p6346_p12  ;;  %p6014_p7 = por %p6013_p5, %p6012_p3 }
  0x4f   : > { %p6008_p0 = pneg %p6007_p8 }
  0x51   : > { %p6015_p9 = pnand %p6014_p7, %p6008_p0 }
  0x53   : > { %6018 = shalt.err (!%p6015_p9)
}
  0x54   : > { %s6192_s24 = smov 384   ;;  %s6193_s7 = smov 24  }
  0x55   : > { %5569 = dma.hbm_to_vmem [thread:$0]  (!%p6330_p10), %s10071_s3, 12288, %s6334_s17, [#allocation9], %s6192_s24, %s6192_s24, %s6193_s7  }
  0x56   : > { %s10072_s2 = sld [smem:[#allocation83_spill]] }
  0x5c   : > { %s6019_s14 = scalar_lea.hbm %s10072_s2, 32 }
  0x5d   : > { %p6020_p11 = scmp.ne.s32.totalorder %s10072_s2, %s6019_s14  ;;  %p6026_p1 = scmp.lt.u32.totalorder %s6019_s14, %s10072_s2 }
  0x5f   : > { %p6022_p13 = pnand %p6020_p11, %p6346_p12 }
  0x61   : > { %p6023_p2 = pneg %p6022_p13 }
  0x63   : > { %p6028_p4 = pnand %p6026_p1, %p6023_p2 }
  0x65   : > { %6031 = shalt.err (!%p6028_p4)
}
  0x66   : > { %s6032_s10 = scalar_lea.vmem %s267_s20, 32  ;;  %p6040_p3 = scmp.lt.s32.totalorder %s267_s20, %s267_s20 }
  0x67   : > { %p6033_p6 = scmp.ne.s32.totalorder %s267_s20, %s6032_s10  ;;  %p6041_p5 = scmp.lt.s32.totalorder %s6032_s10, %s6032_s10 }
  0x69   : > { %p6035_p8 = pnand %p6033_p6, %p6346_p12  ;;  %p6042_p7 = por %p6041_p5, %p6040_p3 }
  0x6b   : > { %p6036_p0 = pneg %p6035_p8 }
  0x6d   : > { %p6043_p9 = pnand %p6042_p7, %p6036_p0 }
  0x6f   : > { %6046 = shalt.err (!%p6043_p9)
}
  0x70   : > { %5566 = dma.hbm_to_vmem [thread:$0]  (!%p6330_p10), %s10072_s2, 32, %s267_s20, [#allocation6]  }
  0x71   : > { %s6194_s1 = smov [#allocation10]   ;;  %s10073_s4 = sld [smem:[#allocation85_spill]] }
  0x72   : > { %s290_s7 = sshll.u32 %s6194_s1, 4  ;;  %s291_s7 = int_to_ptr.vmem [resolvable:$true] %s290_s7 }
  0x77   : > { %s6047_s23 = scalar_lea.hbm %s10073_s4, 96 }
  0x78   : > { %p6048_p11 = scmp.ne.s32.totalorder %s10073_s4, %s6047_s23  ;;  %p6054_p1 = scmp.lt.u32.totalorder %s6047_s23, %s10073_s4 }
  0x7a   : > { %p6050_p13 = pnand %p6048_p11, %p6346_p12 }
  0x7c   : > { %p6051_p2 = pneg %p6050_p13 }
  0x7e   : > { %p6056_p4 = pnand %p6054_p1, %p6051_p2 }
  0x80   : > { %6059 = shalt.err (!%p6056_p4)
}
  0x81   : > { %s6060_s20 = scalar_lea.vmem %s291_s7, 96  ;;  %p6068_p3 = scmp.lt.s32.totalorder %s291_s7, %s291_s7 }
  0x82   : > { %p6061_p6 = scmp.ne.s32.totalorder %s291_s7, %s6060_s20  ;;  %p6069_p5 = scmp.lt.s32.totalorder %s6060_s20, %s6060_s20 }
  0x84   : > { %p6063_p8 = pnand %p6061_p6, %p6346_p12  ;;  %p6070_p7 = por %p6069_p5, %p6068_p3 }
  0x86   : > { %p6064_p0 = pneg %p6063_p8 }
  0x88   : > { %p6071_p9 = pnand %p6070_p7, %p6064_p0 }
  0x8a   : > { %6074 = shalt.err (!%p6071_p9)
}
  0x8b   : > { %5572 = dma.hbm_to_vmem [thread:$0]  (!%p6330_p10), %s10073_s4, 96, %s291_s7, [#allocation9]  }
  0x8c   : > { %s38_s16 = sadd.s32 1, %s6179_s29  ;;  %s41_s24 = sadd.s32 1, %s6183_s30 }
  0x8d   : > { %p39_p12 = scmp.ge.s32.totalorder %s38_s16, 2  ;;  %s50_s18 = sadd.s32 1, %s6167_s26 }
  0x8e   : > { %p57_p11 = scmp.ne.s32.totalorder %s6167_s26, %s6163_s25  ;;  %p58_p13 = scmp.eq.s32.totalorder %s6187_s8, 0 }
  0x8f   : > { %s10351_s16 = smov (%p39_p12, %s38_s16), 0  ;;  %s10353_s24 = smov (!%p39_p12, %s41_s24), %s6183_s30 }
  0x90   : > { %10074 = sst [smem:[#allocation28_spill]] %s10351_s16  ;;  %s46_s1 = ssub.s32 %s6179_s29, %s10351_s16 }
  0x91   : > { %p6433_p2 = por %p58_p13, %p57_p11  ;;  %p43_p10 = scmp.ge.s32.totalorder %s10353_s24, 2 }
  0x92   : > { %p10076_p1 = scmp.eq.s32.totalorder %s6301_s9, 3  ;;  %p5591_p6 = scmp.lt.s32.totalorder %s6187_s8, 4 }
  0x93   : > { %s301_s12 = sand.u32 1, %s6167_s26   ;;  %s10355_s24 = smov (%p43_p10, %s10353_s24), 0 }
  0x94   : > { %p6439_p4 = por %p10076_p1, %p57_p11  ;;  %s4689_s23 = sshll.u32 %s301_s12, 9 }
  0x95   : > { %s45_s14 = ssub.s32 %s6183_s30, %s10355_s24  ;;  %s5293_s21 = sshll.u32 %s6179_s29, 6 }
  0x96   : > { %s47_s19 = sor.u32 %s46_s1, %s45_s14  ;;  %s4692_s15 = sshll.u32 %s6183_s30, 7 }
  0x97   : > { %p48_p8 = scmp.eq.s32.totalorder %s47_s19, 0  ;;  %s312_s20 = sadd.s32 %s5293_s21, %s4692_s15 }
  0x98   : > { %s305_s10 = scalar_lea.vmem [#allocation2], %s4689_s23  ;;  %s4693_s3 = sshll.u32 %s312_s20, 7 }
  0x99   : > { %s315_s17 = sshll.u32 %s305_s10, 4  ;;  %s6459_s6 = scalar_lea.hbm %s9973_s0, %s4693_s3  ;;  %s6454_s17 = int_to_ptr.vmem [resolvable:$true] %s315_s17 }
  0x9a   : > { %s6452_s2 = scalar_select %p48_p8, %s6167_s26, %s50_s18  }
  0x9b   : > { %p6465_p0 = pnand %p5591_p6, %p6433_p2  ;;  %s6469_s18 = scalar_lea.sflag [#allocation3], %s301_s12 }
  0x9c   : > { %s6075_s23 = scalar_lea.hbm %s6459_s6, 8192  ;;  %s6080_s16 = scalar_lea.hbm %s9973_s0, 32768 }
  0x9d   : > { %p6076_p3 = scmp.ne.s32.totalorder %s6459_s6, %s6075_s23  ;;  %p6077_p5 = pneg %p6465_p0 }
  0x9e   : > { %p6081_p12 = scmp.lt.u32.totalorder %s6459_s6, %s9973_s0  ;;  %p6082_p11 = scmp.lt.u32.totalorder %s6080_s16, %s6075_s23 }
  0x9f   : > { %p6078_p7 = pnand %p6077_p5, %p6076_p3  ;;  %p6084_p2 = scmp.lt.u32.totalorder %s6075_s23, %s6459_s6 }
  0xa0   : > { %p6083_p13 = por %p6082_p11, %p6081_p12 }
  0xa1   : > { %p6079_p9 = pneg %p6078_p7 }
  0xa2   : > { %p6085_p10 = por %p6084_p2, %p6083_p13 }
  0xa4   : > { %p6086_p1 = pnand %p6085_p10, %p6079_p9 }
  0xa6   : > { %6089 = shalt.err (!%p6086_p1)
}
  0xa7   : > { %s6090_s12 = scalar_lea.vmem %s6454_s17, 8192  ;;  %s6195_s19 = smov [#allocation2]  }
  0xa8   : > { %p6091_p6 = scmp.ne.s32.totalorder %s6454_s17, %s6090_s12  ;;  %s6095_s21 = sshll.u32 %s6195_s19, 4  ;;  %s6096_s21 = int_to_ptr.vmem [resolvable:$false] %s6095_s21 }
  0xa9   : > { %s6097_s15 = scalar_lea.vmem %s6096_s21, 16384  ;;  %p6098_p7 = scmp.lt.s32.totalorder %s6454_s17, %s6096_s21 }
  0xaa   : > { %p6093_p8 = pnand %p6091_p6, %p6077_p5  ;;  %p6099_p12 = scmp.lt.s32.totalorder %s6097_s15, %s6090_s12 }
  0xac   : > { %p6094_p3 = pneg %p6093_p8  ;;  %p6100_p11 = por %p6099_p12, %p6098_p7 }
  0xae   : > { %p6101_p13 = pnand %p6100_p11, %p6094_p3 }
  0xb0   : > { %6104 = shalt.err (!%p6101_p13)
}
  0xb1   : > { %s6196_s20 = smov 256   ;;  %s6197_s10 = smov 16  }
  0xb2   : > { %5576 = dma.hbm_to_vmem [thread:$0]  (!%p6465_p0), %s6459_s6, 8192, %s6454_s17, %s6469_s18, %s6196_s20, %s6196_s20, %s6197_s10  }
  0xb3   : > { %p10079_p5 = scmp.ne.s32.totalorder %s10067_s13, 0 }
  0xb5   : > { %327 = sbr.rel (%p10079_p5) target bundleno = 1312 (0x520), region = 40 }
  0xbc   : > { %s6500_s23 = sand.u32 1, %s6163_s25   ;;  %p10080_p9 = scmp.ne.s32.totalorder %s10064_s11, 0 }
  0xbd   : > { %s6503_s3 = sshll.u32 %s6500_s23, 9  ;;  %s330_s4 = scalar_lea.sflag [#allocation3], %s6500_s23 }
  0xbe   : > { %s6507_s16 = scalar_lea.vmem [#allocation2], %s6503_s3 }
  0xbf   : > { %6138 = dma.done.wait (%p10080_p9), %s330_s4, 8192  }
  0xc0   : > { %6140 = vsyncadd (%p10080_p9), %s330_s4, 4294959104  ;;  %p10081_p0 = scmp.eq.s32.totalorder %s6301_s9, 0 }
  0xc2   : > { %6142 = dma.done.wait (%p10081_p0), [#allocation6], 64   ;;  %p10082_p2 = pmov %p10081_p0 }
  0xc3   : > { %p10083_p10 = pmov %p10081_p0 }
  0xc4   : > { %6144 = vsyncadd (%p10082_p2), [#allocation6], 4294967232 }
  0xc5   : > { %6146 = dma.done.wait (%p10083_p10), [#allocation9], 12384   ;;  %p10084_p1 = pmov %p10081_p0 }
  0xc6   : > { %v6522_v0 = vld [vmem:[%s6507_s16] sm:$0xff]  ;;  %v6525_v1 = vld [vmem:[%s6507_s16 + $0x8] sm:$0xff]  ;;  %v6536_v5 = vld [vmem:[%s6507_s16 + $0x10] sm:$0xff]  ;;  %s8032_s6 = scalar_lea.vmem [#allocation11], %s6503_s3  ;;  %s6198_s11 = smov 64  }
  0xc7   : > { %6148 = vsyncadd (%p10084_p1), [#allocation9], 4294954912  ;;  %v6528_v2 = vld [vmem:[%s6507_s16 + $0x100] sm:$0xff]  ;;  %v460_v3 = vadd.f32 %v6525_v1, %v6522_v0  ;;  %v6533_v4 = vld [vmem:[%s6507_s16 + $0x108] sm:$0xff]  ;;  %s8422_s13 = scalar_lea.vmem [#allocation14], %s6503_s3  ;;  %s8452_s17 = scalar_lea.vmem [#allocation12], %s6503_s3 }
  0xc8   : > { %v6539_v6 = vld [vmem:[%s6507_s16 + $0x18] sm:$0xff]  ;;  %v508_v7 = vadd.f32 %v6533_v4, %v6528_v2  ;;  %v6544_v8 = vld [vmem:[%s6507_s16 + $0x110] sm:$0xff]  ;;  %v6554_v12 = vld [vmem:[%s6507_s16 + $0x20] sm:$0xff]  ;;  %s4342_s1 = sand.u32 1, %s6301_s9   ;;  %s4338_s18 = scalar_lea.sflag [#allocation4], %s6500_s23 }
  0xc9   : > { %v6547_v9 = vld [vmem:[%s6507_s16 + $0x118] sm:$0xff]  ;;  %461 = vadd.xlane.f32.xlu0 %v460_v3  ;;  %v463_v10 = vadd.f32 %v6539_v6, %v6536_v5  ;;  %v6557_v13 = vld [vmem:[%s6507_s16 + $0x28] sm:$0xff]  ;;  %v6560_v14 = vld [vmem:[%s6507_s16 + $0x30] sm:$0xff]  ;;  %s9878_s22 = scalar_lea.sflag [#allocation13], %s4342_s1 }
  0xca   : > { %509 = vadd.xlane.f32.xlu1 %v508_v7  ;;  %v511_v11 = vadd.f32 %v6547_v9, %v6544_v8  ;;  %v6563_v15 = vld [vmem:[%s6507_s16 + $0x38] sm:$0xff]  ;;  %v466_v16 = vadd.f32 %v6557_v13, %v6554_v12  ;;  %v6570_v18 = vld [vmem:[%s6507_s16 + $0x120] sm:$0xff]  ;;  %v6573_v19 = vld [vmem:[%s6507_s16 + $0x128] sm:$0xff] }
  0xcb   : > { %v469_v17 = vadd.f32 %v6563_v15, %v6560_v14  ;;  %v6576_v20 = vld [vmem:[%s6507_s16 + $0x130] sm:$0xff]  ;;  %v6579_v21 = vld [vmem:[%s6507_s16 + $0x138] sm:$0xff]  ;;  %v514_v22 = vadd.f32 %v6573_v19, %v6570_v18  ;;  %v6586_v24 = vld [vmem:[%s6507_s16 + $0x40] sm:$0xff] }
  0xcc   : > { %v517_v23 = vadd.f32 %v6579_v21, %v6576_v20  ;;  %v6589_v25 = vld [vmem:[%s6507_s16 + $0x48] sm:$0xff]  ;;  %v6592_v26 = vld [vmem:[%s6507_s16 + $0x50] sm:$0xff]  ;;  %v6595_v27 = vld [vmem:[%s6507_s16 + $0x58] sm:$0xff] }
  0xcd   : > { %464 = vadd.xlane.f32.xlu0 %v463_v10  ;;  %v472_v28 = vadd.f32 %v6589_v25, %v6586_v24  ;;  %v475_v29 = vadd.f32 %v6595_v27, %v6592_v26  ;;  %v6602_v30 = vld [vmem:[%s6507_s16 + $0x140] sm:$0xff]  ;;  %v6605_v31 = vld [vmem:[%s6507_s16 + $0x148] sm:$0xff]  ;;  %v6608_v32 = vld [vmem:[%s6507_s16 + $0x150] sm:$0xff] }
  0xce   : > { %512 = vadd.xlane.f32.xlu1 %v511_v11  ;;  %v6611_v33 = vld [vmem:[%s6507_s16 + $0x158] sm:$0xff]  ;;  %v520_v34 = vadd.f32 %v6605_v31, %v6602_v30  ;;  %v6618_v36 = vld [vmem:[%s6507_s16 + $0x60] sm:$0xff]  ;;  %v6621_v37 = vld [vmem:[%s6507_s16 + $0x68] sm:$0xff] }
  0xcf   : > { %v523_v35 = vadd.f32 %v6611_v33, %v6608_v32  ;;  %v6624_v38 = vld [vmem:[%s6507_s16 + $0x70] sm:$0xff]  ;;  %v6627_v39 = vld [vmem:[%s6507_s16 + $0x78] sm:$0xff]  ;;  %v6630_v40 = vld [vmem:[%s6507_s16 + $0x160] sm:$0xff]  ;;  %v478_v42 = vadd.f32 %v6621_v37, %v6618_v36 }
  0xd0   : > { %v6633_v41 = vld [vmem:[%s6507_s16 + $0x168] sm:$0xff]  ;;  %v6638_v43 = vld [vmem:[%s6507_s16 + $0x170] sm:$0xff]  ;;  %v6641_v44 = vld [vmem:[%s6507_s16 + $0x178] sm:$0xff]  ;;  %v481_v45 = vadd.f32 %v6627_v39, %v6624_v38 }
  0xd1   : > { %467 = vadd.xlane.f32.xlu0 %v466_v16  ;;  %v6646_v46 = vld [vmem:[%s6507_s16 + $0x80] sm:$0xff]  ;;  %v6649_v47 = vld [vmem:[%s6507_s16 + $0x88] sm:$0xff]  ;;  %v526_v48 = vadd.f32 %v6633_v41, %v6630_v40  ;;  %v6654_v49 = vld [vmem:[%s6507_s16 + $0x90] sm:$0xff]  ;;  %v529_v51 = vadd.f32 %v6641_v44, %v6638_v43 }
  0xd2   : > { %470 = vadd.xlane.f32.xlu1 %v469_v17  ;;  %v6657_v50 = vld [vmem:[%s6507_s16 + $0x98] sm:$0xff]  ;;  %v6662_v52 = vld [vmem:[%s6507_s16 + $0x180] sm:$0xff]  ;;  %v6665_v53 = vld [vmem:[%s6507_s16 + $0x188] sm:$0xff]  ;;  %v484_v54 = vadd.f32 %v6649_v47, %v6646_v46 }
  0xd3   : > { %v6670_v55 = vld [vmem:[%s6507_s16 + $0x190] sm:$0xff]  ;;  %v6673_v56 = vld [vmem:[%s6507_s16 + $0x198] sm:$0xff]  ;;  %v487_v57 = vadd.f32 %v6657_v50, %v6654_v49  ;;  %v6678_v58 = vld [vmem:[%s6507_s16 + $0xa0] sm:$0xff]  ;;  %v532_v60 = vadd.f32 %v6665_v53, %v6662_v52 }
  0xd4   : > { %v6681_v59 = vld [vmem:[%s6507_s16 + $0xa8] sm:$0xff]  ;;  %v6686_v61 = vld [vmem:[%s6507_s16 + $0xb0] sm:$0xff]  ;;  %v6689_v62 = vld [vmem:[%s6507_s16 + $0xb8] sm:$0xff]  ;;  %v535_v63 = vadd.f32 %v6673_v56, %v6670_v55 }
  0xd5   : > { %515 = vadd.xlane.f32.xlu0 %v514_v22  ;;  %v6694_v3 = vld [vmem:[%s6507_s16 + $0x1a0] sm:$0xff]  ;;  %v6697_v7 = vld [vmem:[%s6507_s16 + $0x1a8] sm:$0xff]  ;;  %v490_v10 = vadd.f32 %v6681_v59, %v6678_v58  ;;  %v6702_v11 = vld [vmem:[%s6507_s16 + $0x1b0] sm:$0xff]  ;;  %v493_v17 = vadd.f32 %v6689_v62, %v6686_v61 }
  0xd6   : > { %518 = vadd.xlane.f32.xlu1 %v517_v23  ;;  %v6705_v16 = vld [vmem:[%s6507_s16 + $0x1b8] sm:$0xff]  ;;  %v6710_v22 = vld [vmem:[%s6507_s16 + $0xc0] sm:$0xff]  ;;  %v6713_v23 = vld [vmem:[%s6507_s16 + $0xc8] sm:$0xff] }
  0xd7   : > { %10085 = vst [vmem:[#allocation29_spill] sm:$0xff] %v6713_v23 }
  0xd9   : > { %473 = vadd.xlane.f32.xlu0 %v472_v28  ;;  %v538_v28 = vadd.f32 %v6697_v7, %v6694_v3 }
  0xda   : > { %476 = vadd.xlane.f32.xlu1 %v475_v29  ;;  %v6718_v29 = vld [vmem:[%s6507_s16 + $0xd0] sm:$0xff] }
  0xdb   : > { %10086 = vst [vmem:[#allocation30_spill] sm:$0xff] %v6718_v29 }
  0xdd   : > { %521 = vadd.xlane.f32.xlu0 %v520_v34  ;;  %v6721_v34 = vld [vmem:[%s6507_s16 + $0xd8] sm:$0xff] }
  0xde   : > { %524 = vadd.xlane.f32.xlu1 %v523_v35  ;;  %10087 = vst [vmem:[#allocation31_spill] sm:$0xff] %v6721_v34  ;;  %v541_v35 = vadd.f32 %v6705_v16, %v6702_v11 }
  0xe1   : > { %479 = vadd.xlane.f32.xlu0 %v478_v42  ;;  %v6726_v42 = vld [vmem:[%s6507_s16 + $0x1c0] sm:$0xff] }
  0xe2   : > { %482 = vadd.xlane.f32.xlu1 %v481_v45  ;;  %v6729_v45 = vld [vmem:[%s6507_s16 + $0x1c8] sm:$0xff] }
  0xe3   : > { %10088 = vst [vmem:[#allocation32_spill] sm:$0xff] %v6729_v45 }
  0xe5   : > { %527 = vadd.xlane.f32.xlu0 %v526_v48  ;;  %v496_v48 = vadd.f32 %v6713_v23, %v6710_v22  ;;  %v6765_v23 = vld [vmem:[%s6507_s16 + $0x1e8] sm:$0xff] }
  0xe6   : > { %530 = vadd.xlane.f32.xlu1 %v529_v51  ;;  %v6734_v51 = vld [vmem:[%s6507_s16 + $0x1d0] sm:$0xff]  ;;  %10094 = vst [vmem:[#allocation38_spill] sm:$0xff] %v6765_v23 }
  0xe9   : > { %485 = vadd.xlane.f32.xlu0 %v484_v54  ;;  %v6737_v54 = vld [vmem:[%s6507_s16 + $0x1d8] sm:$0xff] }
  0xea   : > { %488 = vadd.xlane.f32.xlu1 %v487_v57  ;;  %10089 = vst [vmem:[#allocation33_spill] sm:$0xff] %v6737_v54  ;;  %v499_v57 = vadd.f32 %v6721_v34, %v6718_v29 }
  0xed   : > { %533 = vadd.xlane.f32.xlu0 %v532_v60  ;;  %v6742_v60 = vld [vmem:[%s6507_s16 + $0xe0] sm:$0xff] }
  0xee   : > { %536 = vadd.xlane.f32.xlu1 %v535_v63  ;;  %v6745_v63 = vld [vmem:[%s6507_s16 + $0xe8] sm:$0xff] }
  0xef   : > { %10090 = vst [vmem:[#allocation34_spill] sm:$0xff] %v6745_v63  ;;  %v502_v34 = vadd.f32 %v6745_v63, %v6742_v60  ;;  %v5696_v63 = vld [vmem:[#allocation8 + $0x30] ss:$24 sps:$4 sm:$0xff]  }
  0xf1   : > { %491 = vadd.xlane.f32.xlu0 %v490_v10  ;;  %v544_v10 = vadd.f32 %v6729_v45, %v6726_v42  ;;  %v6768_v45 = vld [vmem:[%s6507_s16 + $0x1f0] sm:$0xff] }
  0xf2   : > { %494 = vadd.xlane.f32.xlu1 %v493_v17  ;;  %v6750_v17 = vld [vmem:[%s6507_s16 + $0xf0] sm:$0xff]  ;;  %10095 = vst [vmem:[#allocation39_spill] sm:$0xff] %v6768_v45 }
  0xf3   : > { %10091 = vst [vmem:[#allocation35_spill] sm:$0xff] %v6750_v17 }
  0xf5   : > { %539 = vadd.xlane.f32.xlu0 %v538_v28  ;;  %v547_v28 = vadd.f32 %v6737_v54, %v6734_v51 }
  0xf6   : > { %542 = vadd.xlane.f32.xlu1 %v541_v35  ;;  %v6755_v35 = vld [vmem:[%s6507_s16 + $0xf8] sm:$0xff] }
  0xf7   : > { %10092 = vst [vmem:[#allocation36_spill] sm:$0xff] %v6755_v35  ;;  %v505_v29 = vadd.f32 %v6755_v35, %v6750_v17  ;;  %v5693_v35 = vld [vmem:[#allocation8] ss:$24 sps:$4 sm:$0xff]   ;;  %v5694_v17 = vld [vmem:[#allocation8 + $0x34] ss:$24 sps:$4 sm:$0xff]  }
  0xf9   : > { %497 = vadd.xlane.f32.xlu0 %v496_v48  ;;  %v6762_v48 = vld [vmem:[%s6507_s16 + $0x1e0] sm:$0xff] }
  0xfa   : > { %500 = vadd.xlane.f32.xlu1 %v499_v57  ;;  %10093 = vst [vmem:[#allocation37_spill] sm:$0xff] %v6762_v48  ;;  %v6771_v57 = vld [vmem:[%s6507_s16 + $0x1f8] sm:$0xff]  ;;  %v550_v54 = vadd.f32 %v6765_v23, %v6762_v48 }
  0xfb   : > { %10096 = vst [vmem:[#allocation40_spill] sm:$0xff] %v6771_v57  ;;  %v5699_v23 = vld [vmem:[#allocation8 + $0x60] ss:$24 sps:$4 sm:$0xff]  }
  0xfd   : > { %545 = vadd.xlane.f32.xlu0 %v544_v10  ;;  %v553_v10 = vadd.f32 %v6771_v57, %v6768_v45 }
  0xfe   : > { %548 = vadd.xlane.f32.xlu1 %v547_v28  ;;  %v5691_v28 = vld [vmem:[#allocation8 + $0x4] ss:$24 sps:$4 sm:$0xff]  }
  0xff   : > { %2020 = vmatprep.subr.bf16.mxu0 %v5691_v28  ;;  %5486 = vmatprep.subr.bf16.mxu1 %v5691_v28  ;;  %v5705_v28 = vld [vmem:[#allocation8 + $0xc0] ss:$24 sps:$4 sm:$0xff]  }
 0x100   : > { %2021 = vmatpush1.bf16.msra.mxu0 %v5693_v35  ;;  %5502 = vmatpush1.bf16.msra.mxu1 %v5693_v35  ;;  %v5706_v35 = vld [vmem:[#allocation8 + $0xf4] ss:$24 sps:$4 sm:$0xff]  }
 0x101   : > { %503 = vadd.xlane.f32.xlu0 %v502_v34  ;;  %2022 = vmatprep.subr.bf16.mxu0 %v5694_v17  ;;  %v5697_v34 = vld [vmem:[#allocation8 + $0x64] ss:$24 sps:$4 sm:$0xff]  }
 0x102   : > { %506 = vadd.xlane.f32.xlu1 %v505_v29  ;;  %5487 = vmatprep.subr.bf16.mxu1 %v5694_v17  ;;  %v5700_v29 = vld [vmem:[#allocation8 + $0x94] ss:$24 sps:$4 sm:$0xff]   ;;  %v5708_v17 = vld [vmem:[#allocation8 + $0xf0] ss:$24 sps:$4 sm:$0xff]  }
 0x104   : > { %2023 = vmatpush1.bf16.msra.mxu0 %v5696_v63  ;;  %5503 = vmatpush1.bf16.msra.mxu1 %v5696_v63 }
 0x105   : > { %551 = vadd.xlane.f32.xlu0 %v550_v54  ;;  %2024 = vmatprep.subr.bf16.mxu0 %v5697_v34  ;;  %v5702_v54 = vld [vmem:[#allocation8 + $0x90] ss:$24 sps:$4 sm:$0xff]  }
 0x106   : > { %554 = vadd.xlane.f32.xlu1 %v553_v10  ;;  %5488 = vmatprep.subr.bf16.mxu1 %v5697_v34  ;;  %v5703_v10 = vld [vmem:[#allocation8 + $0xc4] ss:$24 sps:$4 sm:$0xff]  }
 0x108   : > { %2025 = vmatpush1.bf16.msra.mxu0 %v5699_v23  ;;  %5504 = vmatpush1.bf16.msra.mxu1 %v5699_v23 }
 0x109   : > { %2026 = vmatprep.subr.bf16.mxu0 %v5700_v29  ;;  %5489 = vmatprep.subr.bf16.mxu1 %v5700_v29 }
 0x10c   : > { %2027 = vmatpush1.bf16.msra.mxu0 %v5702_v54  ;;  %5505 = vmatpush1.bf16.msra.mxu1 %v5702_v54 }
 0x10d   : > { %2028 = vmatprep.subr.bf16.mxu0 %v5703_v10  ;;  %5490 = vmatprep.subr.bf16.mxu1 %v5703_v10 }
 0x110   : > { %2029 = vmatpush1.bf16.msra.mxu0 %v5705_v28  ;;  %5506 = vmatpush1.bf16.msra.mxu1 %v5705_v28 }
 0x111   : > { %2030 = vmatprep.subr.bf16.mxu0 %v5706_v35  ;;  %5491 = vmatprep.subr.bf16.mxu1 %v5706_v35 }
 0x114   : > { %2031 = vmatpush1.bf16.msra.mxu0 %v5708_v17  ;;  %5507 = vmatpush1.bf16.msra.mxu1 %v5708_v17 }
 0x156   : > { %v462_v63 = vpop.xlane.xlu0 %461 }
 0x157   : > { %v557_v34 = vmul.f32 0.00390625, %v462_v63  ;;  %v510_v23 = vpop.xlane.xlu1 %509 }
 0x158   : > { %v573_v57 = vmul.f32 0.00390625, %v510_v23 }
 0x159   : > { %v6778_v29 = vsub.f32 %v6522_v0, %v557_v34  ;;  %v6781_v54 = vsub.f32 %v6525_v1, %v557_v34 }
 0x15a   : > { %v6784_v10 = vsub.f32 %v6528_v2, %v573_v57  ;;  %v6787_v28 = vsub.f32 %v6533_v4, %v573_v57  ;;  %v465_v45 = vpop.xlane.xlu0 %464 }
 0x15b   : > { %10097 = vst [vmem:[#allocation41_spill] sm:$0xff] %v6778_v29  ;;  %10098 = vst [vmem:[#allocation42_spill] sm:$0xff] %v6781_v54  ;;  %v558_v35 = vmul.f32 0.00390625, %v465_v45  ;;  %v513_v48 = vpop.xlane.xlu1 %512  ;;  %v653_v17 = vmul.f32 %v6778_v29, %v6778_v29  ;;  %v654_v0 = vmul.f32 %v6781_v54, %v6781_v54 }
 0x15c   : > { %10099 = vst [vmem:[#allocation43_spill] sm:$0xff] %v6784_v10  ;;  %10100 = vst [vmem:[#allocation44_spill] sm:$0xff] %v6787_v28  ;;  %v574_v63 = vmul.f32 0.00390625, %v513_v48  ;;  %v685_v2 = vmul.f32 %v6784_v10, %v6784_v10  ;;  %v686_v4 = vmul.f32 %v6787_v28, %v6787_v28 }
 0x15d   : > { %v6794_v23 = vsub.f32 %v6536_v5, %v558_v35  ;;  %v6797_v1 = vsub.f32 %v6539_v6, %v558_v35  ;;  %v717_v34 = vadd.f32 %v654_v0, %v653_v17 }
 0x15e   : > { %v6804_v45 = vsub.f32 %v6544_v8, %v574_v63  ;;  %v6807_v48 = vsub.f32 %v6547_v9, %v574_v63  ;;  %v468_v57 = vpop.xlane.xlu0 %467  ;;  %v765_v6 = vadd.f32 %v686_v4, %v685_v2 }
 0x15f   : > { %v559_v54 = vmul.f32 0.00390625, %v468_v57  ;;  %v471_v5 = vpop.xlane.xlu1 %470  ;;  %718 = vadd.xlane.f32.xlu0 %v717_v34  ;;  %v655_v35 = vmul.f32 %v6794_v23, %v6794_v23  ;;  %v656_v8 = vmul.f32 %v6797_v1, %v6797_v1 }
 0x160   : > { %v560_v29 = vmul.f32 0.00390625, %v471_v5  ;;  %v687_v9 = vmul.f32 %v6804_v45, %v6804_v45 }
 0x161   : > { %v6812_v10 = vsub.f32 %v6554_v12, %v559_v54  ;;  %v6815_v28 = vsub.f32 %v6557_v13, %v559_v54  ;;  %v688_v12 = vmul.f32 %v6807_v48, %v6807_v48  ;;  %v720_v4 = vadd.f32 %v656_v8, %v655_v35 }
 0x162   : > { %v6822_v17 = vsub.f32 %v6560_v14, %v560_v29  ;;  %v6825_v63 = vsub.f32 %v6563_v15, %v560_v29  ;;  %v516_v0 = vpop.xlane.xlu0 %515 }
 0x163   : > { %v575_v2 = vmul.f32 0.00390625, %v516_v0  ;;  %v519_v13 = vpop.xlane.xlu1 %518  ;;  %766 = vadd.xlane.f32.xlu0 %v765_v6  ;;  %721 = vadd.xlane.f32.xlu1 %v720_v4  ;;  %v768_v34 = vadd.f32 %v688_v12, %v687_v9  ;;  %v657_v14 = vmul.f32 %v6812_v10, %v6812_v10  ;;  %v658_v15 = vmul.f32 %v6815_v28, %v6815_v28 }
 0x164   : > { %10101 = vst [vmem:[#allocation45_spill] sm:$0xff] %v6825_v63  ;;  %v576_v54 = vmul.f32 0.00390625, %v519_v13  ;;  %v659_v6 = vmul.f32 %v6822_v17, %v6822_v17 }
 0x165   : > { %v6830_v57 = vsub.f32 %v6570_v18, %v575_v2  ;;  %v6837_v29 = vsub.f32 %v6573_v19, %v575_v2  ;;  %v660_v18 = vmul.f32 %v6825_v63, %v6825_v63  ;;  %v723_v0 = vadd.f32 %v658_v15, %v657_v14 }
 0x166   : > { %v6840_v5 = vsub.f32 %v6576_v20, %v576_v54  ;;  %v474_v35 = vpop.xlane.xlu0 %473  ;;  %v6847_v8 = vsub.f32 %v6579_v21, %v576_v54 }
 0x167   : > { %v561_v9 = vmul.f32 0.00390625, %v474_v35  ;;  %v477_v12 = vpop.xlane.xlu1 %476  ;;  %769 = vadd.xlane.f32.xlu1 %v768_v34  ;;  %724 = vadd.xlane.f32.xlu0 %v723_v0  ;;  %v726_v20 = vadd.f32 %v660_v18, %v659_v6  ;;  %v689_v2 = vmul.f32 %v6830_v57, %v6830_v57  ;;  %v690_v54 = vmul.f32 %v6837_v29, %v6837_v29 }
 0x168   : > { %v562_v4 = vmul.f32 0.00390625, %v477_v12  ;;  %v692_v35 = vmul.f32 %v6847_v8, %v6847_v8 }
 0x169   : > { %v6850_v19 = vsub.f32 %v6586_v24, %v561_v9  ;;  %v6855_v13 = vsub.f32 %v6589_v25, %v561_v9  ;;  %v691_v24 = vmul.f32 %v6840_v5, %v6840_v5  ;;  %v771_v25 = vadd.f32 %v690_v54, %v689_v2  ;;  %v5709_v54 = vld [vmem:[#allocation8 + $0x124] ss:$24 sps:$4 sm:$0xff]  }
 0x16a   : > { %v6858_v63 = vsub.f32 %v6592_v26, %v562_v4  ;;  %v522_v21 = vpop.xlane.xlu0 %521  ;;  %v6865_v34 = vsub.f32 %v6595_v27, %v562_v4  ;;  %2032 = vmatprep.subr.bf16.mxu0 %v5709_v54  ;;  %5492 = vmatprep.subr.bf16.mxu1 %v5709_v54 }
 0x16b   : > { %v577_v14 = vmul.f32 0.00390625, %v522_v21  ;;  %v525_v15 = vpop.xlane.xlu1 %524  ;;  %727 = vadd.xlane.f32.xlu1 %v726_v20  ;;  %v774_v18 = vadd.f32 %v692_v35, %v691_v24  ;;  %v661_v9 = vmul.f32 %v6850_v19, %v6850_v19  ;;  %772 = vadd.xlane.f32.xlu0 %v771_v25  ;;  %v662_v4 = vmul.f32 %v6855_v13, %v6855_v13 }
 0x16c   : > { %10102 = vst [vmem:[#allocation46_spill] sm:$0xff] %v6858_v63  ;;  %v578_v6 = vmul.f32 0.00390625, %v525_v15  ;;  %v1167_v24 = vlaneseq  ;;  %v5711_v15 = vld [vmem:[#allocation8 + $0x120] ss:$24 sps:$4 sm:$0xff]  }
 0x16d   : > { %v6870_v26 = vsub.f32 %v6602_v30, %v577_v14  ;;  %v6875_v0 = vsub.f32 %v6605_v31, %v577_v14  ;;  %v663_v30 = vmul.f32 %v6858_v63, %v6858_v63  ;;  %v664_v31 = vmul.f32 %v6865_v34, %v6865_v34  ;;  %2033 = vmatpush1.bf16.msra.mxu0 %v5711_v15 }
 0x16e   : > { %v6878_v27 = vsub.f32 %v6608_v32, %v578_v6  ;;  %v480_v12 = vpop.xlane.xlu0 %479  ;;  %v6885_v20 = vsub.f32 %v6611_v33, %v578_v6  ;;  %v729_v14 = vadd.f32 %v662_v4, %v661_v9  ;;  %5508 = vmatpush1.bf16.msra.mxu1 %v5711_v15 }
 0x16f   : > { %v563_v2 = vmul.f32 0.00390625, %v480_v12  ;;  %v483_v21 = vpop.xlane.xlu1 %482  ;;  %775 = vadd.xlane.f32.xlu1 %v774_v18  ;;  %v732_v25 = vadd.f32 %v664_v31, %v663_v30  ;;  %v693_v63 = vmul.f32 %v6870_v26, %v6870_v26  ;;  %v694_v9 = vmul.f32 %v6875_v0, %v6875_v0 }
 0x170   : > { %10103 = vst [vmem:[#allocation47_spill] sm:$0xff] %v6878_v27  ;;  %v564_v32 = vmul.f32 0.00390625, %v483_v21  ;;  %730 = vadd.xlane.f32.xlu0 %v729_v14  ;;  %v5714_v14 = vld [vmem:[#allocation8 + $0x150] ss:$24 sps:$4 sm:$0xff]  }
 0x171   : > { %v6890_v35 = vsub.f32 %v6618_v36, %v563_v2  ;;  %v6895_v33 = vsub.f32 %v6621_v37, %v563_v2  ;;  %v695_v36 = vmul.f32 %v6878_v27, %v6878_v27  ;;  %v696_v37 = vmul.f32 %v6885_v20, %v6885_v20  ;;  %v5712_v2 = vld [vmem:[#allocation8 + $0x154] ss:$24 sps:$4 sm:$0xff]  }
 0x172   : > { %v6898_v6 = vsub.f32 %v6624_v38, %v564_v32  ;;  %v528_v12 = vpop.xlane.xlu0 %527  ;;  %v6905_v18 = vsub.f32 %v6627_v39, %v564_v32  ;;  %v6909_v38 = vshrl.u32 %v1167_v24, 7  ;;  %v777_v21 = vadd.f32 %v694_v9, %v693_v63  ;;  %2034 = vmatprep.subr.bf16.mxu0 %v5712_v2  ;;  %5493 = vmatprep.subr.bf16.mxu1 %v5712_v2 }
 0x173   : > { %v579_v4 = vmul.f32 0.00390625, %v528_v12  ;;  %v531_v30 = vpop.xlane.xlu1 %530  ;;  %733 = vadd.xlane.f32.xlu1 %v732_v25  ;;  %v780_v39 = vadd.f32 %v696_v37, %v695_v36  ;;  %v665_v32 = vmul.f32 %v6890_v35, %v6890_v35  ;;  %v666_v24 = vmul.f32 %v6895_v33, %v6895_v33  ;;  %v5715_v36 = vld [vmem:[#allocation8 + $0x184] ss:$24 sps:$4 sm:$0xff]   ;;  %2035 = vmatpush1.bf16.msra.mxu0 %v5714_v14 }
 0x174   : > { %10104 = vst [vmem:[#allocation48_spill] sm:$0xff] %v6905_v18  ;;  %10105 = vst [vmem:[#allocation49_spill] sm:$0xff] %v6909_v38  ;;  %v580_v31 = vmul.f32 0.00390625, %v531_v30  ;;  %778 = vadd.xlane.f32.xlu0 %v777_v21  ;;  %5509 = vmatpush1.bf16.msra.mxu1 %v5714_v14  ;;  %v458_v21 = vld [vmem:[#allocation5] sm:$0x3] }
 0x175   : > { %v6912_v27 = vsub.f32 %v6630_v40, %v579_v4  ;;  %v6917_v12 = vsub.f32 %v6633_v41, %v579_v4  ;;  %v667_v40 = vmul.f32 %v6898_v6, %v6898_v6  ;;  %v668_v41 = vmul.f32 %v6905_v18, %v6905_v18  ;;  %2036 = vmatprep.subr.bf16.mxu0 %v5715_v36 }
 0x176   : > { %v6920_v54 = vsub.f32 %v6638_v43, %v580_v31  ;;  %v486_v63 = vpop.xlane.xlu0 %485  ;;  %v6927_v15 = vsub.f32 %v6641_v44, %v580_v31  ;;  %v6932_v43 = vsub.s32 0, %v6909_v38  ;;  %v6935_v4 = vsub.s32 1, %v6909_v38  ;;  %v5717_v44 = vld [vmem:[#allocation8 + $0x180] ss:$24 sps:$4 sm:$0xff]   ;;  %5494 = vmatprep.subr.bf16.mxu1 %v5715_v36 }
 0x177   : > { %v565_v25 = vmul.f32 0.00390625, %v486_v63  ;;  %v489_v9 = vpop.xlane.xlu1 %488  ;;  %v735_v30 = vadd.f32 %v666_v24, %v665_v32  ;;  %781 = vadd.xlane.f32.xlu1 %v780_v39  ;;  %v738_v63 = vadd.f32 %v668_v41, %v667_v40  ;;  %v697_v2 = vmul.f32 %v6912_v27, %v6912_v27  ;;  %2037 = vmatpush1.bf16.msra.mxu0 %v5717_v44 }
 0x178   : > { %10106 = vst [vmem:[#allocation50_spill] sm:$0xff] %v6927_v15  ;;  %10107 = vst [vmem:[#allocation51_spill] sm:$0xff] %v6932_v43  ;;  %v566_v37 = vmul.f32 0.00390625, %v489_v9  ;;  %v698_v14 = vmul.f32 %v6917_v12, %v6917_v12  ;;  %v6961_v9 = vrot.slane %v458_v21, %v6935_v4  ;;  %5510 = vmatpush1.bf16.msra.mxu1 %v5717_v44 }
 0x179   : > { %10108 = vst [vmem:[#allocation52_spill] sm:$0xff] %v6935_v4  ;;  %v6938_v31 = vsub.f32 %v6646_v46, %v565_v25  ;;  %v6943_v18 = vsub.f32 %v6649_v47, %v565_v25  ;;  %736 = vadd.xlane.f32.xlu0 %v735_v30  ;;  %v699_v46 = vmul.f32 %v6920_v54, %v6920_v54  ;;  %v5718_v25 = vld [vmem:[#allocation8 + $0x1b4] ss:$24 sps:$4 sm:$0xff]  }
 0x17a   : > { %v6946_v38 = vsub.f32 %v6654_v49, %v566_v37  ;;  %v534_v32 = vpop.xlane.xlu0 %533  ;;  %v6953_v39 = vsub.f32 %v6657_v50, %v566_v37  ;;  %v700_v47 = vmul.f32 %v6927_v15, %v6927_v15  ;;  %v6958_v49 = vrot.slane %v458_v21, %v6932_v43  ;;  %v5720_v50 = vld [vmem:[#allocation8 + $0x1b0] ss:$24 sps:$4 sm:$0xff]   ;;  %2038 = vmatprep.subr.bf16.mxu0 %v5718_v25 }
 0x17b   : > { %v581_v24 = vmul.f32 0.00390625, %v534_v32  ;;  %v537_v40 = vpop.xlane.xlu1 %536  ;;  %v783_v41 = vadd.f32 %v698_v14, %v697_v2  ;;  %739 = vadd.xlane.f32.xlu1 %v738_v63  ;;  %v669_v36 = vmul.f32 %v6938_v31, %v6938_v31  ;;  %v670_v2 = vmul.f32 %v6943_v18, %v6943_v18  ;;  %5495 = vmatprep.subr.bf16.mxu1 %v5718_v25 }
 0x17c   : > { %10109 = vst [vmem:[#allocation53_spill] sm:$0xff] %v6946_v38  ;;  %10110 = vst [vmem:[#allocation54_spill] sm:$0xff] %v6953_v39  ;;  %v582_v30 = vmul.f32 0.00390625, %v537_v40  ;;  %v786_v15 = vadd.f32 %v700_v47, %v699_v46  ;;  %v671_v44 = vmul.f32 %v6946_v38, %v6946_v38  ;;  %2039 = vmatpush1.bf16.msra.mxu0 %v5720_v50  ;;  %5511 = vmatpush1.bf16.msra.mxu1 %v5720_v50 }
 0x17d   : > { %v637_v37 = vsub.f32 %v6662_v52, %v581_v24  ;;  %v638_v32 = vsub.f32 %v6665_v53, %v581_v24  ;;  %784 = vadd.xlane.f32.xlu0 %v783_v41  ;;  %v741_v40 = vadd.f32 %v670_v2, %v669_v36  ;;  %v5723_v41 = vld [vmem:[#allocation8 + $0x1e0] ss:$24 sps:$4 sm:$0xff]  }
 0x17e   : > { %v639_v43 = vsub.f32 %v6670_v55, %v582_v30  ;;  %v640_v21 = vsub.f32 %v6673_v56, %v582_v30  ;;  %v492_v4 = vpop.xlane.xlu0 %491  ;;  %v672_v55 = vmul.f32 %v6953_v39, %v6953_v39  ;;  %v5721_v56 = vld [vmem:[#allocation8 + $0x1e4] ss:$24 sps:$4 sm:$0xff]  }
 0x17f   : > { %v6974_v52 = vmul.f32 %v6958_v49, %v637_v37  ;;  %v6977_v53 = vmul.f32 %v6961_v9, %v638_v32  ;;  %v567_v63 = vmul.f32 0.00390625, %v492_v4  ;;  %v495_v14 = vpop.xlane.xlu1 %494  ;;  %787 = vadd.xlane.f32.xlu1 %v786_v15  ;;  %v702_v38 = vmul.f32 %v638_v32, %v638_v32  ;;  %2040 = vmatprep.subr.bf16.mxu0 %v5721_v56  ;;  %v5724_v15 = vld [vmem:[#allocation8 + $0x214] ss:$24 sps:$4 sm:$0xff]   ;;  %v5726_v32 = vld [vmem:[#allocation8 + $0x210] ss:$24 sps:$4 sm:$0xff]  }
 0x180   : > { %v6982_v46 = vmul.f32 %v6958_v49, %v639_v43  ;;  %v6985_v24 = vmul.f32 %v6961_v9, %v640_v21  ;;  %v568_v47 = vmul.f32 0.00390625, %v495_v14  ;;  %5496 = vmatprep.subr.bf16.mxu1 %v5721_v56  ;;  %2041 = vmatpush1.bf16.msra.mxu0 %v5723_v41 }
 0x181   : > { %10111 = vst [vmem:[#allocation55_spill] sm:$0xff] %v6974_v52  ;;  %10112 = vst [vmem:[#allocation56_spill] sm:$0xff] %v6977_v53  ;;  %v609_v4 = vsub.f32 %v6678_v58, %v567_v63  ;;  %v610_v30 = vsub.f32 %v6681_v59, %v567_v63  ;;  %v744_v52 = vadd.f32 %v672_v55, %v671_v44  ;;  %742 = vadd.xlane.f32.xlu0 %v741_v40 }
 0x182   : > { %10113 = vst [vmem:[#allocation57_spill] sm:$0xff] %v6982_v46  ;;  %10114 = vst [vmem:[#allocation58_spill] sm:$0xff] %v6985_v24  ;;  %v701_v53 = vmul.f32 %v637_v37, %v637_v37  ;;  %v611_v25 = vsub.f32 %v6686_v61, %v568_v47  ;;  %v612_v46 = vsub.f32 %v6689_v62, %v568_v47  ;;  %v540_v39 = vpop.xlane.xlu0 %539  ;;  %5512 = vmatpush1.bf16.msra.mxu1 %v5723_v41 }
 0x183   : > { %v703_v24 = vmul.f32 %v639_v43, %v639_v43  ;;  %v6992_v36 = vmul.f32 %v6958_v49, %v609_v4  ;;  %v6995_v50 = vmul.f32 %v6961_v9, %v610_v30  ;;  %v583_v58 = vmul.f32 0.00390625, %v540_v39  ;;  %v543_v2 = vpop.xlane.xlu1 %542  ;;  %745 = vadd.xlane.f32.xlu1 %v744_v52  ;;  %2042 = vmatprep.subr.bf16.mxu0 %v5724_v15  ;;  %v5727_v52 = vld [vmem:[#allocation8 + $0x244] ss:$24 sps:$4 sm:$0xff]  }
 0x184   : > { %v704_v59 = vmul.f32 %v640_v21, %v640_v21  ;;  %v6998_v37 = vmul.f32 %v6958_v49, %v611_v25  ;;  %v7001_v61 = vmul.f32 %v6961_v9, %v612_v46  ;;  %v789_v62 = vadd.f32 %v702_v38, %v701_v53  ;;  %5497 = vmatprep.subr.bf16.mxu1 %v5724_v15  ;;  %v10124_v15 = vld [vmem:[#allocation30_spill] sm:$0xff] }
 0x185   : > { %10115 = vst [vmem:[#allocation59_spill] sm:$0xff] %v6992_v36  ;;  %10116 = vst [vmem:[#allocation60_spill] sm:$0xff] %v6995_v50  ;;  %v584_v43 = vmul.f32 0.00390625, %v543_v2  ;;  %v641_v44 = vsub.f32 %v6694_v3, %v583_v58  ;;  %v642_v39 = vsub.f32 %v6697_v7, %v583_v58  ;;  %v673_v63 = vmul.f32 %v609_v4, %v609_v4  ;;  %v10123_v58 = vld [vmem:[#allocation29_spill] sm:$0xff] }
 0x186   : > { %10117 = vst [vmem:[#allocation61_spill] sm:$0xff] %v6998_v37  ;;  %10118 = vst [vmem:[#allocation62_spill] sm:$0xff] %v7001_v61  ;;  %v792_v21 = vadd.f32 %v704_v59, %v703_v24  ;;  %790 = vadd.xlane.f32.xlu0 %v789_v62  ;;  %v498_v56 = vpop.xlane.xlu0 %497  ;;  %v674_v40 = vmul.f32 %v610_v30, %v610_v30  ;;  %v675_v47 = vmul.f32 %v611_v25, %v611_v25  ;;  %v5729_v30 = vld [vmem:[#allocation8 + $0x240] ss:$24 sps:$4 sm:$0xff]  }
 0x187   : > { %v643_v14 = vsub.f32 %v6702_v11, %v584_v43  ;;  %v644_v55 = vsub.f32 %v6705_v16, %v584_v43  ;;  %v7008_v38 = vmul.f32 %v6958_v49, %v641_v44  ;;  %v7011_v53 = vmul.f32 %v6961_v9, %v642_v39  ;;  %v501_v41 = vpop.xlane.xlu1 %500  ;;  %2043 = vmatpush1.bf16.msra.mxu0 %v5726_v32  ;;  %v10125_v43 = vld [vmem:[#allocation31_spill] sm:$0xff] }
 0x188   : > { %v569_v3 = vmul.f32 0.00390625, %v498_v56  ;;  %v676_v7 = vmul.f32 %v612_v46, %v612_v46  ;;  %v747_v16 = vadd.f32 %v674_v40, %v673_v63  ;;  %v570_v4 = vmul.f32 0.00390625, %v501_v41  ;;  %5513 = vmatpush1.bf16.msra.mxu1 %v5726_v32  ;;  %793 = vadd.xlane.f32.xlu1 %v792_v21  ;;  %v5732_v41 = vld [vmem:[#allocation8 + $0x270] ss:$24 sps:$4 sm:$0xff]  }
 0x189   : > { %10119 = vst [vmem:[#allocation63_spill] sm:$0xff] %v7008_v38  ;;  %10120 = vst [vmem:[#allocation64_spill] sm:$0xff] %v7011_v53  ;;  %v7014_v24 = vmul.f32 %v6958_v49, %v643_v14  ;;  %v7017_v11 = vmul.f32 %v6961_v9, %v644_v55  ;;  %v705_v59 = vmul.f32 %v641_v44, %v641_v44  ;;  %2044 = vmatprep.subr.bf16.mxu0 %v5727_v52  ;;  %v5730_v44 = vld [vmem:[#allocation8 + $0x274] ss:$24 sps:$4 sm:$0xff]  }
 0x18a   : > { %v613_v25 = vsub.f32 %v6710_v22, %v569_v3  ;;  %v614_v2 = vsub.f32 %v10123_v58, %v569_v3  ;;  %v750_v46 = vadd.f32 %v676_v7, %v675_v47  ;;  %748 = vadd.xlane.f32.xlu0 %v747_v16  ;;  %v615_v62 = vsub.f32 %v10124_v15, %v570_v4  ;;  %v10130_v16 = vld [vmem:[#allocation32_spill] sm:$0xff]  ;;  %v10131_v58 = vld [vmem:[#allocation33_spill] sm:$0xff]  ;;  %v10180_v53 = vld [vmem:[#allocation51_spill] sm:$0xff] }
 0x18b   : > { %10121 = vst [vmem:[#allocation65_spill] sm:$0xff] %v7014_v24  ;;  %10122 = vst [vmem:[#allocation66_spill] sm:$0xff] %v7017_v11  ;;  %v616_v56 = vsub.f32 %v10125_v43, %v570_v4  ;;  %v546_v24 = vpop.xlane.xlu0 %545  ;;  %v706_v38 = vmul.f32 %v642_v39, %v642_v39  ;;  %v707_v11 = vmul.f32 %v643_v14, %v643_v14  ;;  %v549_v40 = vpop.xlane.xlu1 %548  ;;  %5498 = vmatprep.subr.bf16.mxu1 %v5727_v52 }
 0x18c   : > { %v7024_v63 = vmul.f32 %v6958_v49, %v613_v25  ;;  %v7027_v32 = vmul.f32 %v6961_v9, %v614_v2  ;;  %v585_v22 = vmul.f32 0.00390625, %v546_v24  ;;  %v708_v3 = vmul.f32 %v644_v55, %v644_v55  ;;  %2045 = vmatpush1.bf16.msra.mxu0 %v5729_v30  ;;  %5514 = vmatpush1.bf16.msra.mxu1 %v5729_v30 }
 0x18d   : > { %v7030_v21 = vmul.f32 %v6958_v49, %v615_v62  ;;  %v7033_v47 = vmul.f32 %v6961_v9, %v616_v56  ;;  %v795_v39 = vadd.f32 %v706_v38, %v705_v59  ;;  %v586_v14 = vmul.f32 0.00390625, %v549_v40  ;;  %751 = vadd.xlane.f32.xlu1 %v750_v46  ;;  %2046 = vmatprep.subr.bf16.mxu0 %v5730_v44 }
 0x18e   : > { %10126 = vst [vmem:[#allocation29_spill] sm:$0xff] %v7024_v63  ;;  %10127 = vst [vmem:[#allocation30_spill] sm:$0xff] %v7027_v32  ;;  %v645_v7 = vsub.f32 %v6726_v42, %v585_v22  ;;  %v646_v24 = vsub.f32 %v10130_v16, %v585_v22  ;;  %v798_v55 = vadd.f32 %v708_v3, %v707_v11  ;;  %5499 = vmatprep.subr.bf16.mxu1 %v5730_v44  ;;  %v5733_v11 = vld [vmem:[#allocation8 + $0x2a4] ss:$24 sps:$4 sm:$0xff]   ;;  %v10136_v3 = vld [vmem:[#allocation34_spill] sm:$0xff] }
 0x18f   : > { %10128 = vst [vmem:[#allocation31_spill] sm:$0xff] %v7030_v21  ;;  %10129 = vst [vmem:[#allocation67_spill] sm:$0xff] %v7033_v47  ;;  %v677_v4 = vmul.f32 %v613_v25, %v613_v25  ;;  %796 = vadd.xlane.f32.xlu0 %v795_v39  ;;  %v647_v52 = vsub.f32 %v6734_v51, %v586_v14  ;;  %v648_v15 = vsub.f32 %v10131_v58, %v586_v14  ;;  %v504_v43 = vpop.xlane.xlu0 %503  ;;  %v507_v59 = vpop.xlane.xlu1 %506  ;;  %v10137_v44 = vld [vmem:[#allocation35_spill] sm:$0xff]  ;;  %v10138_v58 = vld [vmem:[#allocation36_spill] sm:$0xff] }
 0x190   : > { %v678_v21 = vmul.f32 %v614_v2, %v614_v2  ;;  %v679_v47 = vmul.f32 %v615_v62, %v615_v62  ;;  %v7040_v38 = vmul.f32 %v6958_v49, %v645_v7  ;;  %v7043_v30 = vmul.f32 %v6961_v9, %v646_v24  ;;  %2047 = vmatpush1.bf16.msra.mxu0 %v5732_v41  ;;  %v5735_v62 = vld [vmem:[#allocation8 + $0x2a0] ss:$24 sps:$4 sm:$0xff]  }
 0x191   : > { %v571_v42 = vmul.f32 0.00390625, %v504_v43  ;;  %v680_v22 = vmul.f32 %v616_v56, %v616_v56  ;;  %v7046_v25 = vmul.f32 %v6958_v49, %v647_v52  ;;  %v7049_v51 = vmul.f32 %v6961_v9, %v648_v15  ;;  %5515 = vmatpush1.bf16.msra.mxu1 %v5732_v41  ;;  %799 = vadd.xlane.f32.xlu1 %v798_v55  ;;  %v10179_v32 = vld [vmem:[#allocation52_spill] sm:$0xff] }
 0x192   : > { %10132 = vst [vmem:[#allocation32_spill] sm:$0xff] %v7040_v38  ;;  %10133 = vst [vmem:[#allocation33_spill] sm:$0xff] %v7043_v30  ;;  %v753_v2 = vadd.f32 %v678_v21, %v677_v4  ;;  %v572_v46 = vmul.f32 0.00390625, %v507_v59  ;;  %v709_v14 = vmul.f32 %v645_v7, %v645_v7  ;;  %v710_v38 = vmul.f32 %v646_v24, %v646_v24  ;;  %v5738_v59 = vld [vmem:[#allocation8 + $0x2d0] ss:$24 sps:$4 sm:$0xff]  }
 0x193   : > { %10134 = vst [vmem:[#allocation68_spill] sm:$0xff] %v7046_v25  ;;  %10135 = vst [vmem:[#allocation69_spill] sm:$0xff] %v7049_v51  ;;  %v617_v40 = vsub.f32 %v6742_v60, %v571_v42  ;;  %v618_v39 = vsub.f32 %v10136_v3, %v571_v42  ;;  %v756_v56 = vadd.f32 %v680_v22, %v679_v47  ;;  %v552_v25 = vpop.xlane.xlu0 %551  ;;  %v555_v4 = vpop.xlane.xlu1 %554  ;;  %2048 = vmatprep.subr.bf16.mxu0 %v5733_v11  ;;  %v5736_v47 = vld [vmem:[#allocation8 + $0x2d4] ss:$24 sps:$4 sm:$0xff]  }
 0x194   : > { %754 = vadd.xlane.f32.xlu0 %v753_v2  ;;  %v619_v16 = vsub.f32 %v10137_v44, %v572_v46  ;;  %v620_v43 = vsub.f32 %v10138_v58, %v572_v46  ;;  %v711_v51 = vmul.f32 %v647_v52, %v647_v52  ;;  %v587_v60 = vmul.f32 0.00390625, %v552_v25  ;;  %5500 = vmatprep.subr.bf16.mxu1 %v5733_v11  ;;  %v10143_v22 = vld [vmem:[#allocation37_spill] sm:$0xff]  ;;  %v10144_v46 = vld [vmem:[#allocation38_spill] sm:$0xff]  ;;  %v10145_v11 = vld [vmem:[#allocation39_spill] sm:$0xff] }
 0x195   : > { %v7056_v21 = vmul.f32 %v6958_v49, %v617_v40  ;;  %v7059_v41 = vmul.f32 %v6961_v9, %v618_v39  ;;  %v712_v42 = vmul.f32 %v648_v15, %v648_v15  ;;  %v801_v24 = vadd.f32 %v710_v38, %v709_v14  ;;  %2049 = vmatpush1.bf16.msra.mxu0 %v5735_v62  ;;  %v10146_v58 = vld [vmem:[#allocation40_spill] sm:$0xff] }
 0x196   : > { %v7062_v7 = vmul.f32 %v6958_v49, %v619_v16  ;;  %v7065_v55 = vmul.f32 %v6961_v9, %v620_v43  ;;  %v588_v52 = vmul.f32 0.00390625, %v555_v4  ;;  %5516 = vmatpush1.bf16.msra.mxu1 %v5735_v62  ;;  %v649_v2 = vsub.f32 %v10143_v22, %v587_v60  ;;  %757 = vadd.xlane.f32.xlu1 %v756_v56  ;;  %v5744_v22 = vld [vmem:[#allocation8 + $0xc] ss:$24 sps:$4 sm:$0xff]  }
 0x197   : > { %10139 = vst [vmem:[#allocation34_spill] sm:$0xff] %v7056_v21  ;;  %10140 = vst [vmem:[#allocation35_spill] sm:$0xff] %v7059_v41  ;;  %v650_v25 = vsub.f32 %v10144_v46, %v587_v60  ;;  %v804_v15 = vadd.f32 %v712_v42, %v711_v51  ;;  %v681_v3 = vmul.f32 %v617_v40, %v617_v40  ;;  %2050 = vmatprep.subr.bf16.mxu0 %v5736_v47 }
 0x198   : > { %10141 = vst [vmem:[#allocation36_spill] sm:$0xff] %v7062_v7  ;;  %10142 = vst [vmem:[#allocation70_spill] sm:$0xff] %v7065_v55  ;;  %802 = vadd.xlane.f32.xlu0 %v801_v24  ;;  %v651_v44 = vsub.f32 %v10145_v11, %v588_v52  ;;  %v652_v7 = vsub.f32 %v10146_v58, %v588_v52  ;;  %v682_v21 = vmul.f32 %v618_v39, %v618_v39  ;;  %v5741_v52 = vld [vmem:[#allocation8 + $0x14] ss:$24 sps:$4 sm:$0xff]  }
 0x199   : > { %v683_v41 = vmul.f32 %v619_v16, %v619_v16  ;;  %v7072_v38 = vmul.f32 %v6958_v49, %v649_v2  ;;  %v7075_v62 = vmul.f32 %v6961_v9, %v650_v25  ;;  %v684_v14 = vmul.f32 %v620_v43, %v620_v43  ;;  %2051 = vmatpush1.bf16.msra.mxu0 %v5738_v59 }
 0x19a   : > { %v713_v4 = vmul.f32 %v649_v2, %v649_v2  ;;  %v7078_v56 = vmul.f32 %v6958_v49, %v651_v44  ;;  %v7081_v51 = vmul.f32 %v6961_v9, %v652_v7  ;;  %v759_v40 = vadd.f32 %v682_v21, %v681_v3  ;;  %805 = vadd.xlane.f32.xlu1 %v804_v15  ;;  %v10151_v3 = vld [vmem:[#allocation41_spill] sm:$0xff] }
 0x19b   : > { %10147 = vst [vmem:[#allocation37_spill] sm:$0xff] %v7072_v38  ;;  %10148 = vst [vmem:[#allocation38_spill] sm:$0xff] %v7075_v62  ;;  %v714_v60 = vmul.f32 %v650_v25, %v650_v25  ;;  %v762_v39 = vadd.f32 %v684_v14, %v683_v41  ;;  %v715_v16 = vmul.f32 %v651_v44, %v651_v44  ;;  %5501 = vmatprep.subr.bf16.mxu1 %v5736_v47  ;;  %v10153_v44 = vld [vmem:[#allocation43_spill] sm:$0xff]  ;;  %v10154_v14 = vld [vmem:[#allocation44_spill] sm:$0xff] }
 0x19c   : > { %10149 = vst [vmem:[#allocation39_spill] sm:$0xff] %v7078_v56  ;;  %10150 = vst [vmem:[#allocation40_spill] sm:$0xff] %v7081_v51  ;;  %v716_v42 = vmul.f32 %v652_v7, %v652_v7  ;;  %760 = vadd.xlane.f32.xlu0 %v759_v40  ;;  %5517 = vmatpush1.bf16.msra.mxu1 %v5738_v59  ;;  %v7085_v47 = vmul.f32 %v6958_v49, %v10151_v3  ;;  %v10152_v59 = vld [vmem:[#allocation42_spill] sm:$0xff]  ;;  %v459_v38 = vld [vmem:[#allocation7] sm:$0x3] }
 0x19d   : > { %v807_v24 = vadd.f32 %v714_v60, %v713_v4  ;;  %2406 = vmatprep.subr.bf16.mxu0 %v5741_v52  ;;  %2213 = vmatprep.subr.bf16.mxu1 %v5744_v22  ;;  %v7089_v11 = vmul.f32 %v6961_v9, %v10152_v59  ;;  %v7093_v58 = vmul.f32 %v6958_v49, %v10153_v44 }
 0x19e   : > { %763 = vadd.xlane.f32.xlu1 %v762_v39  ;;  %v810_v43 = vadd.f32 %v716_v42, %v715_v16  ;;  %v7097_v4 = vmul.f32 %v6961_v9, %v10154_v14  ;;  %v7101_v60 = vmul.f32 %v6958_v49, %v6794_v23  ;;  %v7105_v39 = vmul.f32 %v6961_v9, %v6797_v1 }
 0x19f   : > { %v7109_v16 = vmul.f32 %v6958_v49, %v6804_v45  ;;  %v7119_v52 = vmul.f32 %v6958_v49, %v6812_v10  ;;  %v7123_v23 = vmul.f32 %v6961_v9, %v6815_v28  ;;  %v7127_v45 = vmul.f32 %v6958_v49, %v6822_v17 }
 0x1a0   : > { %808 = vadd.xlane.f32.xlu0 %v807_v24  ;;  %v7137_v10 = vmul.f32 %v6958_v49, %v6830_v57  ;;  %v7141_v28 = vmul.f32 %v6961_v9, %v6837_v29  ;;  %v7147_v17 = vmul.f32 %v6958_v49, %v6840_v5  ;;  %v7151_v59 = vmul.f32 %v6961_v9, %v6847_v8 }
 0x1a1   : > { %v7156_v29 = vmul.f32 %v6958_v49, %v6850_v19  ;;  %v7233_v62 = vmul.f32 %v6958_v49, %v6938_v31 }
 0x1a2   : > { %811 = vadd.xlane.f32.xlu1 %v810_v43  ;;  %v7115_v43 = vmul.f32 %v6961_v9, %v6807_v48 }
 0x1a3   : > { %10173 = vst [vmem:[#allocation75_spill] sm:$0xff] %v7233_v62 }
 0x1ec   : > { %v719_v2 = vpop.xlane.xlu0 %718 }
 0x1ed   : > { %v814_v21 = vmul.f32 0.003921569, %v719_v2  ;;  %v10155_v2 = vld [vmem:[#allocation45_spill] sm:$0xff] }
 0x1ef   : > { %5835 = vrsqrt.f32 %v814_v21  ;;  %vm848_vm0 = vcmp.eq.f32.partialorder %v814_v21, inf  ;;  %vm850_vm1 = vcmp.eq.f32.partialorder %v814_v21, 0.0 }
 0x1f0   : > { %v767_v46 = vpop.xlane.xlu0 %766  ;;  %v722_v25 = vpop.xlane.xlu1 %721 }
 0x1f1   : > { %v815_v41 = vmul.f32 0.003921569, %v722_v25  ;;  %v7111_v42 = vmul.f32 0.003921569, %v767_v46  ;;  %v7131_v46 = vmul.f32 %v6961_v9, %v10155_v2 }
 0x1f3   : > { %5837 = vrsqrt.f32 %v815_v41  ;;  %vm855_vm2 = vcmp.eq.f32.partialorder %v815_v41, inf  ;;  %v858_v56 = vand.u32 2147483648, %v815_v41  ;;  %vm857_vm3 = vcmp.eq.f32.partialorder %v815_v41, 0.0 }
 0x1f4   : > { %v770_v7 = vpop.xlane.xlu1 %769  ;;  %v725_v15 = vpop.xlane.xlu0 %724  ;;  %5839 = vrsqrt.f32 %v7111_v42  ;;  %vm960_vm4 = vcmp.eq.f32.partialorder %v7111_v42, inf  ;;  %vm962_vm5 = vcmp.eq.f32.partialorder %v7111_v42, 0.0 }
 0x1f5   : > { %v7133_v48 = vmul.f32 0.003921569, %v770_v7  ;;  %v7143_v3 = vmul.f32 0.003921569, %v725_v15  ;;  %v851_v7 = vand.u32 2147483648, %v814_v21  ;;  %v7160_v15 = vmul.f32 %v6961_v9, %v6855_v13 }
 0x1f6   : > { %v7174_v13 = vmul.f32 %v6961_v9, %v6865_v34  ;;  %v10160_v34 = vld [vmem:[#allocation47_spill] sm:$0xff] }
 0x1f7   : > { %5841 = vrsqrt.f32 %v7133_v48  ;;  %vm967_vm6 = vcmp.eq.f32.partialorder %v7133_v48, inf  ;;  %vm862_vm7 = vcmp.eq.f32.partialorder %v7143_v3, inf  ;;  %vm969_vm9 = vcmp.eq.f32.partialorder %v7133_v48, 0.0 }
 0x1f8   : > { %v728_v24 = vpop.xlane.xlu1 %727  ;;  %v773_v22 = vpop.xlane.xlu0 %772  ;;  %5843 = vrsqrt.f32 %v7143_v3 }
 0x1f9   : > { %v5836_v40 = vpop.eup %5835  ;;  %v7162_v5 = vmul.f32 0.003921569, %v728_v24  ;;  %v7170_v19 = vmul.f32 0.003921569, %v773_v22  ;;  %v7185_v22 = vmul.f32 %v6961_v9, %v6875_v0 }
 0x1fa   : > { %v847_v1 = vmul.f32 %v5836_v40, %v814_v21  ;;  %v10156_v40 = vld [vmem:[#allocation46_spill] sm:$0xff] }
 0x1fb   : > { %v7166_v8 = vmul.f32 %v6958_v49, %v10156_v40  ;;  %5845 = vrsqrt.f32 %v7162_v5  ;;  %10159 = vst [vmem:[#allocation43_spill] sm:$0xff] %v7185_v22  ;;  %vm869_vm8 = vcmp.eq.f32.partialorder %v7162_v5, inf  ;;  %vm974_vm10 = vcmp.eq.f32.partialorder %v7170_v19, inf }
 0x1fc   : > { %v849_v25 = vsel %vm848_vm0, %v814_v21, %v847_v1  ;;  %v776_v57 = vpop.xlane.xlu1 %775  ;;  %5847 = vrsqrt.f32 %v7170_v19  ;;  %vm864_vm0 = vcmp.eq.f32.partialorder %v7143_v3, 0.0 }
 0x1fd   : > { %v5838_v44 = vpop.eup %5837  ;;  %v731_v14 = vpop.xlane.xlu0 %730  ;;  %10157 = vst [vmem:[#allocation41_spill] sm:$0xff] %v7166_v8  ;;  %v852_v2 = vsel %vm850_vm1, %v851_v7, %v849_v25  ;;  %v7176_v24 = vmul.f32 0.003921569, %v776_v57 }
 0x1fe   : > { %v854_v1 = vmul.f32 %v5838_v44, %v815_v41  ;;  %v7180_v44 = vmul.f32 %v6958_v49, %v6870_v26  ;;  %v1070_v51 = vadd.f32 1e-06, %v852_v2  ;;  %v7197_v26 = vmul.f32 %v6958_v49, %v6890_v35 }
 0x1ff   : > { %v7204_v0 = vmul.f32 0.003921569, %v731_v14  ;;  %v7208_v2 = vmul.f32 %v6958_v49, %v6898_v6  ;;  %v7216_v35 = vmul.f32 %v6958_v49, %v6912_v27  ;;  %5849 = vrsqrt.f32 %v7176_v24  ;;  %v10171_v6 = vld [vmem:[#allocation50_spill] sm:$0xff]  ;;  %v5840_v27 = vpop.eup %5839 }
 0x200   : > { %v856_v21 = vsel %vm855_vm2, %v815_v41, %v854_v1  ;;  %v734_v40 = vpop.xlane.xlu1 %733  ;;  %10158 = vst [vmem:[#allocation42_spill] sm:$0xff] %v7180_v44  ;;  %v7189_v1 = vmul.f32 %v6958_v49, %v10160_v34  ;;  %v7193_v41 = vmul.f32 %v6961_v9, %v6885_v20  ;;  %10163 = vst [vmem:[#allocation46_spill] sm:$0xff] %v7197_v26  ;;  %5851 = vrcp.f32 %v1070_v51  ;;  %v5745_v44 = vld [vmem:[#allocation8 + $0x40] ss:$24 sps:$4 sm:$0xff]  }
 0x201   : > { %v779_v25 = vpop.xlane.xlu0 %778  ;;  %v859_v7 = vsel %vm857_vm3, %v858_v56, %v856_v21  ;;  %v7201_v56 = vmul.f32 %v6961_v9, %v6895_v33  ;;  %10165 = vst [vmem:[#allocation71_spill] sm:$0xff] %v7208_v2  ;;  %v10166_v21 = vld [vmem:[#allocation48_spill] sm:$0xff]  ;;  %10168 = vst [vmem:[#allocation72_spill] sm:$0xff] %v7216_v35  ;;  %v7225_v14 = vmul.f32 %v6958_v49, %v6920_v54  ;;  %v7239_v55 = vmul.f32 0.003921569, %v734_v40  ;;  %v10175_v54 = vld [vmem:[#allocation53_spill] sm:$0xff]  ;;  %v5842_v31 = vpop.eup %5841 }
 0x202   : > { %10161 = vst [vmem:[#allocation44_spill] sm:$0xff] %v7189_v1  ;;  %10162 = vst [vmem:[#allocation45_spill] sm:$0xff] %v7193_v41  ;;  %v1071_v57 = vadd.f32 1e-06, %v859_v7  ;;  %v7212_v20 = vmul.f32 %v6961_v9, %v10166_v21  ;;  %v7221_v7 = vmul.f32 %v6961_v9, %v6917_v12  ;;  %v7229_v34 = vmul.f32 %v6961_v9, %v10171_v6  ;;  %v10177_v6 = vld [vmem:[#allocation54_spill] sm:$0xff] }
 0x203   : > { %10164 = vst [vmem:[#allocation47_spill] sm:$0xff] %v7201_v56  ;;  %10170 = vst [vmem:[#allocation74_spill] sm:$0xff] %v7225_v14  ;;  %v7237_v12 = vmul.f32 %v6961_v9, %v6943_v18  ;;  %v7243_v30 = vmul.f32 %v6958_v49, %v10175_v54  ;;  %v7247_v63 = vmul.f32 %v6961_v9, %v10177_v6  ;;  %v7250_v51 = vmul.f32 0.003921569, %v779_v25  ;;  %v5844_v54 = vpop.eup %5843 }
 0x204   : > { %10167 = vst [vmem:[#allocation48_spill] sm:$0xff] %v7212_v20  ;;  %v782_v33 = vpop.xlane.xlu1 %781  ;;  %10169 = vst [vmem:[#allocation73_spill] sm:$0xff] %v7221_v7  ;;  %5853 = vrcp.f32 %v1071_v57  ;;  %v7256_v57 = vrot.slane %v459_v38, %v10179_v32  ;;  %v7259_v49 = vrot.slane %v459_v38, %v10180_v53  ;;  %v959_v9 = vmul.f32 %v5840_v27, %v7111_v42 }
 0x205   : > { %10172 = vst [vmem:[#allocation50_spill] sm:$0xff] %v7229_v34  ;;  %10174 = vst [vmem:[#allocation76_spill] sm:$0xff] %v7237_v12  ;;  %5855 = vrsqrt.f32 %v7204_v0  ;;  %v7253_v18 = vmul.f32 0.003921569, %v782_v33  ;;  %v963_v25 = vand.u32 2147483648, %v7111_v42  ;;  %v5846_v38 = vpop.eup %5845  ;;  %v966_v53 = vmul.f32 %v5842_v31, %v7133_v48 }
 0x206   : > { %v737_v21 = vpop.xlane.xlu0 %736  ;;  %10176 = vst [vmem:[#allocation53_spill] sm:$0xff] %v7243_v30  ;;  %10178 = vst [vmem:[#allocation54_spill] sm:$0xff] %v7247_v63  ;;  %5857 = vrsqrt.f32 %v7239_v55  ;;  %v861_v37 = vmul.f32 %v5844_v54, %v7143_v3  ;;  %v5848_v61 = vpop.eup %5847  ;;  %v961_v31 = vsel %vm960_vm4, %v7111_v42, %v959_v9  ;;  %vm981_vm11 = vcmp.eq.f32.partialorder %v7176_v24, inf }
 0x207   : > { %5859 = vrsqrt.f32 %v7250_v51  ;;  %v7272_v27 = vmul.f32 0.003921569, %v737_v21  ;;  %v868_v33 = vmul.f32 %v5846_v38, %v7162_v5  ;;  %vm876_vm12 = vcmp.eq.f32.partialorder %v7204_v0, inf }
 0x208   : > { %v740_v40 = vpop.xlane.xlu1 %739  ;;  %5861 = vrsqrt.f32 %v7253_v18  ;;  %v968_v9 = vsel %vm967_vm6, %v7133_v48, %v966_v53  ;;  %v7301_v38 = vsel %vm862_vm7, %v7143_v3, %v861_v37  ;;  %vm883_vm13 = vcmp.eq.f32.partialorder %v7239_v55, inf }
 0x209   : > { %v7284_v21 = vmul.f32 0.003921569, %v740_v40  ;;  %v5850_v54 = vpop.eup %5849  ;;  %5863 = vrsqrt.f32 %v7272_v27  ;;  %v964_v37 = vsel %vm962_vm5, %v963_v25, %v961_v31  ;;  %vm988_vm14 = vcmp.eq.f32.partialorder %v7250_v51, inf }
 0x20a   : > { %v785_v6 = vpop.xlane.xlu0 %784  ;;  %v5852_v62 = vpop.eup %5851  ;;  %vm995_vm15 = vcmp.eq.f32.partialorder %v7253_v18, inf  ;;  %vm890_vm1 = vcmp.eq.f32.partialorder %v7272_v27, inf  ;;  %v10181_v7 = vand.u32 2147483648, %v7133_v48  ;;  %vm871_vm3 = vcmp.eq.f32.partialorder %v7162_v5, 0.0 }
 0x20b   : > { %v7289_v63 = vmul.f32 0.003921569, %v785_v6  ;;  %v973_v6 = vmul.f32 %v5848_v61, %v7170_v19  ;;  %5865 = vrsqrt.f32 %v7284_v21  ;;  %v7317_v61 = vsel %vm869_vm8, %v7162_v5, %v868_v33 }
 0x20c   : > { %v788_v32 = vpop.xlane.xlu1 %787  ;;  %v1242_v25 = vmul.f32 %v5852_v62, %v7089_v11  ;;  %vm897_vm2 = vcmp.eq.f32.partialorder %v7284_v21, inf  ;;  %vm976_vm5 = vcmp.eq.f32.partialorder %v7170_v19, 0.0  ;;  %vm983_vm7 = vcmp.eq.f32.partialorder %v7176_v24, 0.0 }
 0x20d   : > { %v7296_v40 = vmul.f32 0.003921569, %v788_v32  ;;  %5867 = vrsqrt.f32 %v7289_v63  ;;  %v7332_v31 = vsel %vm974_vm10, %v7170_v19, %v973_v6  ;;  %v1241_v6 = vmul.f32 %v5852_v62, %v7085_v47 }
 0x20e   : > { %v743_v50 = vpop.xlane.xlu0 %742  ;;  %v5854_v12 = vpop.eup %5853  ;;  %v1317_v62 = vadd.f32 %v7256_v57, %v1242_v25  ;;  %v1086_v47 = vadd.f32 1e-06, %v964_v37  ;;  %vm1002_vm4 = vcmp.eq.f32.partialorder %v7289_v63, inf }
 0x20f   : > { %v7305_v14 = vmul.f32 0.003921569, %v743_v50  ;;  %v5856_v53 = vpop.eup %5855  ;;  %v1244_v36 = vmul.f32 %v5854_v12, %v7105_v39  ;;  %5869 = vrsqrt.f32 %v7296_v40  ;;  %v1243_v26 = vmul.f32 %v5854_v12, %v7101_v60 }
 0x210   : > { %v746_v34 = vpop.xlane.xlu1 %745  ;;  %v5858_v33 = vpop.eup %5857  ;;  %v1316_v25 = vadd.f32 %v7259_v49, %v1241_v6  ;;  %vm1009_vm6 = vcmp.eq.f32.partialorder %v7296_v40, inf }
 0x211   : > { %v7310_v32 = vmul.f32 0.003921569, %v746_v34  ;;  %v980_v34 = vmul.f32 %v5850_v54, %v7176_v24  ;;  %5871 = vrsqrt.f32 %v7305_v14  ;;  %v5860_v30 = vpop.eup %5859  ;;  %v1319_v20 = vadd.f32 %v7256_v57, %v1244_v36 }
 0x212   : > { %v5862_v39 = vpop.eup %5861  ;;  %v882_v36 = vmul.f32 %v5858_v33, %v7239_v55  ;;  %v1318_v33 = vadd.f32 %v7259_v49, %v1243_v26  ;;  %vm904_vm8 = vcmp.eq.f32.partialorder %v7305_v14, inf }
 0x213   : > { %v791_v35 = vpop.xlane.xlu0 %790  ;;  %5873 = vrsqrt.f32 %v7310_v32  ;;  %v5864_v12 = vpop.eup %5863  ;;  %v994_v37 = vmul.f32 %v5862_v39, %v7253_v18 }
 0x214   : > { %v7321_v50 = vmul.f32 0.003921569, %v791_v35  ;;  %v875_v35 = vmul.f32 %v5856_v53, %v7204_v0  ;;  %v971_v53 = vsel %vm969_vm9, %v10181_v7, %v968_v9  ;;  %v987_v9 = vmul.f32 %v5860_v30, %v7250_v51  ;;  %v5739_v30 = vld [vmem:[#allocation8 + $0x10] ss:$24 sps:$4 sm:$0xff]  }
 0x215   : > { %v794_v54 = vpop.xlane.xlu1 %793  ;;  %v5866_v60 = vpop.eup %5865  ;;  %v1087_v39 = vadd.f32 1e-06, %v971_v53  ;;  %v7386_v6 = vsel %vm883_vm13, %v7239_v55, %v882_v36  ;;  %v889_v26 = vmul.f32 %v5864_v12, %v7272_v27  ;;  %vm911_vm9 = vcmp.eq.f32.partialorder %v7310_v32, inf }
 0x216   : > { %v7340_v11 = vmul.f32 0.003921569, %v794_v54  ;;  %5875 = vrsqrt.f32 %v7321_v50  ;;  %v7355_v54 = vsel %vm981_vm11, %v7176_v24, %v980_v34  ;;  %v7363_v48 = vsel %vm876_vm12, %v7204_v0, %v875_v35 }
 0x217   : > { %v749_v42 = vpop.xlane.xlu0 %748  ;;  %v7372_v34 = vpack.c.bf16 %v1319_v20, %v1317_v62  ;;  %v5868_v20 = vpop.eup %5867  ;;  %v7389_v62 = vpack.c.bf16 %v1318_v33, %v1316_v25  ;;  %v7395_v53 = vsel %vm988_vm14, %v7250_v51, %v987_v9  ;;  %v7404_v25 = vsel %vm995_vm15, %v7253_v18, %v994_v37 }
 0x218   : > { %v7348_v2 = vmul.f32 0.003921569, %v749_v42  ;;  %5877 = vrsqrt.f32 %v7340_v11  ;;  %v896_v33 = vmul.f32 %v5866_v60, %v7284_v21  ;;  %v7417_v60 = vsel %vm890_vm1, %v7272_v27, %v889_v26 }
 0x219   : > { %10182 = vst [vmem:[#allocation77_spill] sm:$0xff] %v7372_v34  ;;  %2052 = vmatprep.mubr.bf16.mxu0 %v7372_v34  ;;  %10183 = vst [vmem:[#allocation78_spill] sm:$0xff] %v7389_v62  ;;  %v5870_v34 = vpop.eup %5869  ;;  %vm1016_vm10 = vcmp.eq.f32.partialorder %v7321_v50, inf  ;;  %v10185_v26 = vand.u32 2147483648, %v7162_v5  ;;  %vm1023_vm11 = vcmp.eq.f32.partialorder %v7340_v11, inf  ;;  %vm878_vm12 = vcmp.eq.f32.partialorder %v7204_v0, 0.0 }
 0x21a   : > { %v752_v7 = vpop.xlane.xlu1 %751  ;;  %5879 = vrsqrt.f32 %v7348_v2  ;;  %2053 = vmatmul.mubr.bf16.vlgmr.msra.gmra.mrb[0].mxu0 %v7389_v62  ;;  %v7438_v62 = vsel %vm897_vm2, %v7284_v21, %v896_v33  ;;  %vm918_vm13 = vcmp.eq.f32.partialorder %v7348_v2, inf  ;;  %vm885_vm14 = vcmp.eq.f32.partialorder %v7239_v55, 0.0 }
 0x21b   : > { %v7377_v35 = vmul.f32 0.003921569, %v752_v7  ;;  %5881 = vrcp.f32 %v1086_v47  ;;  %v5747_v7 = vld [vmem:[#allocation8 + $0x44] ss:$24 sps:$4 sm:$0xff]   ;;  %v5872_v12 = vpop.eup %5871  ;;  %v1001_v47 = vmul.f32 %v5868_v20, %v7289_v63  ;;  %2407 = vmatpush1.bf16.msra.mxu0 %v5739_v30  ;;  %v10184_v20 = vand.u32 2147483648, %v7143_v3 }
 0x21c   : > { %v797_v42 = vpop.xlane.xlu0 %796  ;;  %2408 = vmatprep.subr.bf16.mxu0 %v5747_v7  ;;  %v903_v3 = vmul.f32 %v5872_v12, %v7305_v14  ;;  %vm990_vm2 = vcmp.eq.f32.partialorder %v7250_v51, 0.0 }
 0x21d   : > { %5883 = vrsqrt.f32 %v7377_v35  ;;  %v7399_v36 = vmul.f32 0.003921569, %v797_v42  ;;  %v5874_v9 = vpop.eup %5873  ;;  %v866_v30 = vsel %vm864_vm0, %v10184_v20, %v7301_v38  ;;  %v7448_v5 = vsel %vm1002_vm4, %v7289_v63, %v1001_v47  ;;  %v5751_v20 = vld [vmem:[#allocation8 + $0x70] ss:$24 sps:$4 sm:$0xff]  }
 0x21e   : > { %v800_v56 = vpop.xlane.xlu1 %799  ;;  %5885 = vrcp.f32 %v1087_v39  ;;  %v5753_v39 = vld [vmem:[#allocation8 + $0x74] ss:$24 sps:$4 sm:$0xff]   ;;  %10186 = vst [vmem:[#allocation79_spill] sm:$0xff] %v7448_v5  ;;  %v1072_v12 = vadd.f32 1e-06, %v866_v30  ;;  %v10187_v47 = vand.u32 2147483648, %v7170_v19  ;;  %v7472_v19 = vsel %vm904_vm8, %v7305_v14, %v903_v3 }
 0x21f   : > { %v7412_v22 = vmul.f32 0.003921569, %v800_v56  ;;  %v1008_v56 = vmul.f32 %v5870_v34, %v7296_v40  ;;  %5887 = vrsqrt.f32 %v7399_v36  ;;  %2409 = vmatpush1.bf16.msra.mxu0 %v5745_v44  ;;  %vm925_vm15 = vcmp.eq.f32.partialorder %v7377_v35, inf }
 0x220   : > { %v5876_v37 = vpop.eup %5875  ;;  %2410 = vmatprep.subr.bf16.mxu0 %v5753_v39  ;;  %vm1030_vm0 = vcmp.eq.f32.partialorder %v7399_v36, inf  ;;  %vm997_vm4 = vcmp.eq.f32.partialorder %v7253_v18, 0.0  ;;  %vm899_vm8 = vcmp.eq.f32.partialorder %v7284_v21, 0.0 }
 0x221   : > { %v755_v1 = vpop.xlane.xlu0 %754  ;;  %5889 = vrsqrt.f32 %v7412_v22  ;;  %v1015_v33 = vmul.f32 %v5876_v37, %v7321_v50  ;;  %v5759_v37 = vld [vmem:[#allocation8 + $0xa4] ss:$24 sps:$4 sm:$0xff]   ;;  %v7465_v44 = vsel %vm1009_vm6, %v7296_v40, %v1008_v56  ;;  %vm1037_vm1 = vcmp.eq.f32.partialorder %v7412_v22, inf }
 0x222   : > { %v7420_v41 = vmul.f32 0.003921569, %v755_v1  ;;  %v873_v1 = vsel %vm871_vm3, %v10185_v26, %v7317_v61  ;;  %v5878_v34 = vpop.eup %5877  ;;  %v910_v61 = vmul.f32 %v5874_v9, %v7310_v32  ;;  %v978_v9 = vsel %vm976_vm5, %v10187_v47, %v7332_v31  ;;  %10188 = vst [vmem:[#allocation80_spill] sm:$0xff] %v7465_v44  ;;  %v5757_v44 = vld [vmem:[#allocation8 + $0xa0] ss:$24 sps:$4 sm:$0xff]  }
 0x223   : > { %v758_v7 = vpop.xlane.xlu1 %757  ;;  %v1073_v42 = vadd.f32 1e-06, %v873_v1  ;;  %2411 = vmatpush1.bf16.msra.mxu0 %v5751_v20  ;;  %v10189_v47 = vand.u32 2147483648, %v7176_v24  ;;  %v1088_v30 = vadd.f32 1e-06, %v978_v9 }
 0x224   : > { %v5880_v38 = vpop.eup %5879  ;;  %5891 = vrsqrt.f32 %v7420_v41  ;;  %v7454_v8 = vmul.f32 0.003921569, %v758_v7  ;;  %v7487_v3 = vsel %vm911_vm9, %v7310_v32, %v910_v61  ;;  %2412 = vmatprep.subr.bf16.mxu0 %v5759_v37  ;;  %v5765_v24 = vld [vmem:[#allocation8 + $0xd4] ss:$24 sps:$4 sm:$0xff]   ;;  %v5763_v31 = vld [vmem:[#allocation8 + $0xd0] ss:$24 sps:$4 sm:$0xff]  }
 0x225   : > { %v803_v26 = vpop.xlane.xlu0 %802  ;;  %v5882_v5 = vpop.eup %5881  ;;  %5893 = vrcp.f32 %v1072_v12  ;;  %v985_v12 = vsel %vm983_vm7, %v10189_v47, %v7355_v54  ;;  %v917_v20 = vmul.f32 %v5880_v38, %v7348_v2  ;;  %vm932_vm3 = vcmp.eq.f32.partialorder %v7420_v41, inf }
 0x226   : > { %5895 = vrcp.f32 %v1073_v42  ;;  %v7475_v1 = vmul.f32 0.003921569, %v803_v26  ;;  %v1274_v7 = vmul.f32 %v5882_v5, %v7097_v4  ;;  %v1273_v56 = vmul.f32 %v5882_v5, %v7093_v58 }
 0x227   : > { %v5884_v39 = vpop.eup %5883  ;;  %v7492_v4 = vsel %vm1016_vm10, %v7321_v50, %v1015_v33  ;;  %5897 = vrsqrt.f32 %v7454_v8  ;;  %v806_v42 = vpop.xlane.xlu1 %805  ;;  %v1022_v5 = vmul.f32 %v5878_v34, %v7340_v11  ;;  %v1089_v47 = vadd.f32 1e-06, %v985_v12  ;;  %2413 = vmatpush1.bf16.msra.mxu0 %v5757_v44  ;;  %v5771_v12 = vld [vmem:[#allocation8 + $0x104] ss:$24 sps:$4 sm:$0xff]  }
 0x228   : > { %10190 = vst [vmem:[#allocation81_spill] sm:$0xff] %v7492_v4  ;;  %v5886_v54 = vpop.eup %5885  ;;  %v924_v61 = vmul.f32 %v5884_v39, %v7377_v35  ;;  %5899 = vrsqrt.f32 %v7475_v1  ;;  %v1349_v34 = vadd.f32 %v7256_v57, %v1274_v7  ;;  %v1348_v38 = vadd.f32 %v7259_v49, %v1273_v56  ;;  %2414 = vmatprep.subr.bf16.mxu0 %v5765_v24 }
 0x229   : > { %v761_v26 = vpop.xlane.xlu0 %760  ;;  %v1276_v9 = vmul.f32 %v5886_v54, %v7115_v43  ;;  %v1275_v37 = vmul.f32 %v5886_v54, %v7109_v16  ;;  %v5888_v58 = vpop.eup %5887  ;;  %5901 = vrcp.f32 %v1088_v30  ;;  %v7507_v39 = vmul.f32 0.003921569, %v806_v42  ;;  %v5742_v54 = vld [vmem:[#allocation8 + $0x8] ss:$24 sps:$4 sm:$0xff]  }
 0x22a   : > { %5903 = vrcp.f32 %v1089_v47  ;;  %v7511_v16 = vmul.f32 0.003921569, %v761_v26  ;;  %v7517_v30 = vsel %vm1023_vm11, %v7340_v11, %v1022_v5  ;;  %v7525_v56 = vsel %vm918_vm13, %v7348_v2, %v917_v20  ;;  %v5750_v47 = vld [vmem:[#allocation8 + $0x3c] ss:$24 sps:$4 sm:$0xff]  }
 0x22b   : > { %v5890_v4 = vpop.eup %5889  ;;  %v1351_v33 = vadd.f32 %v7256_v57, %v1276_v9  ;;  %v1350_v43 = vadd.f32 %v7259_v49, %v1275_v37  ;;  %5905 = vrsqrt.f32 %v7507_v39  ;;  %v10191_v5 = vand.u32 2147483648, %v7204_v0  ;;  %2415 = vmatpush1.bf16.msra.mxu0 %v5763_v31  ;;  %v764_v0 = vpop.xlane.xlu1 %763 }
 0x22c   : > { %v7540_v37 = vsel %vm925_vm15, %v7377_v35, %v924_v61  ;;  %v1029_v20 = vmul.f32 %v5888_v58, %v7399_v36  ;;  %vm939_vm5 = vcmp.eq.f32.partialorder %v7454_v8, inf  ;;  %5907 = vrsqrt.f32 %v7511_v16  ;;  %2416 = vmatprep.subr.bf16.mxu0 %v5771_v12  ;;  %v5748_v12 = vld [vmem:[#allocation8 + $0x38] ss:$24 sps:$4 sm:$0xff]  }
 0x22d   : > { %v7527_v42 = vpack.c.bf16 %v1351_v33, %v1349_v34  ;;  %v7529_v24 = vpack.c.bf16 %v1350_v43, %v1348_v38  ;;  %v880_v26 = vsel %vm878_vm12, %v10191_v5, %v7363_v48  ;;  %v1036_v33 = vmul.f32 %v5890_v4, %v7412_v22  ;;  %v5769_v48 = vld [vmem:[#allocation8 + $0x100] ss:$24 sps:$4 sm:$0xff]   ;;  %v5777_v5 = vld [vmem:[#allocation8 + $0x134] ss:$24 sps:$4 sm:$0xff]   ;;  %v809_v44 = vpop.xlane.xlu0 %808 }
 0x22e   : > { %v5892_v7 = vpop.eup %5891  ;;  %v10192_v4 = vand.u32 2147483648, %v7239_v55  ;;  %vm1044_vm6 = vcmp.eq.f32.partialorder %v7475_v1, inf  ;;  %vm892_vm7 = vcmp.eq.f32.partialorder %v7272_v27, 0.0  ;;  %vm1004_vm9 = vcmp.eq.f32.partialorder %v7289_v63, 0.0 }
 0x22f   : > { %v5894_v9 = vpop.eup %5893  ;;  %2132 = vmatprep.mubr.bf16.mxu1 %v7527_v42  ;;  %v931_v55 = vmul.f32 %v5892_v7, %v7420_v41  ;;  %2417 = vmatpush1.bf16.msra.mxu0 %v5769_v48  ;;  %v7573_v7 = vsel %vm1030_vm0, %v7399_v36, %v1029_v20  ;;  %vm1051_vm10 = vcmp.eq.f32.partialorder %v7507_v39, inf  ;;  %v812_v20 = vpop.xlane.xlu1 %811  ;;  %vm1011_vm11 = vcmp.eq.f32.partialorder %v7296_v40, 0.0 }
 0x230   : > { %v5896_v38 = vpop.eup %5895  ;;  %v1246_v43 = vmul.f32 %v5894_v9, %v7123_v23  ;;  %v1245_v61 = vmul.f32 %v5894_v9, %v7119_v52  ;;  %v887_v58 = vsel %vm885_vm14, %v10192_v4, %v7386_v6  ;;  %2133 = vmatmul.mubr.bf16.vlgmr.msra.gmra.mrb[0].mxu1 %v7529_v24  ;;  %v1074_v23 = vadd.f32 1e-06, %v880_v26  ;;  %2418 = vmatprep.subr.bf16.mxu0 %v5777_v5  ;;  %v5754_v5 = vld [vmem:[#allocation8 + $0x68] ss:$24 sps:$4 sm:$0xff]  }
 0x231   : > { %v1248_v31 = vmul.f32 %v5896_v38, %v7131_v46  ;;  %v1247_v34 = vmul.f32 %v5896_v38, %v7127_v45  ;;  %v1075_v52 = vadd.f32 1e-06, %v887_v58  ;;  %v5898_v9 = vpop.eup %5897  ;;  %2214 = vmatpush1.bf16.msra.mxu1 %v5742_v54  ;;  %v1047_v4 = vand.u32 2147483648, %v7475_v1  ;;  %v5756_v58 = vld [vmem:[#allocation8 + $0x6c] ss:$24 sps:$4 sm:$0xff]  }
 0x232   : > { %v1321_v6 = vadd.f32 %v7256_v57, %v1246_v43  ;;  %v7564_v46 = vmul.f32 0.003921569, %v764_v0  ;;  %v1320_v26 = vadd.f32 %v7259_v49, %v1245_v61  ;;  %2215 = vmatprep.subr.bf16.mxu1 %v5750_v47  ;;  %5909 = vrcp.f32 %v1074_v23  ;;  %v5900_v54 = vpop.eup %5899 }
 0x233   : > { %v1323_v45 = vadd.f32 %v7256_v57, %v1248_v31  ;;  %v1322_v38 = vadd.f32 %v7259_v49, %v1247_v34  ;;  %v7578_v0 = vsel %vm1037_vm1, %v7412_v22, %v1036_v33  ;;  %5911 = vrcp.f32 %v1075_v52  ;;  %v5902_v47 = vpop.eup %5901  ;;  %v5775_v31 = vld [vmem:[#allocation8 + $0x130] ss:$24 sps:$4 sm:$0xff]  }
 0x234   : > { %v938_v43 = vmul.f32 %v5898_v9, %v7454_v8  ;;  %v5904_v23 = vpop.eup %5903  ;;  %v1278_v33 = vmul.f32 %v5902_v47, %v7141_v28  ;;  %v1277_v52 = vmul.f32 %v5902_v47, %v7137_v10  ;;  %5913 = vrsqrt.f32 %v7564_v46  ;;  %2419 = vmatpush1.bf16.msra.mxu0 %v5775_v31 }
 0x235   : > { %v7581_v34 = vpack.c.bf16 %v1323_v45, %v1321_v6  ;;  %v7583_v48 = vpack.c.bf16 %v1322_v38, %v1320_v26  ;;  %2216 = vmatpush1.bf16.msra.mxu1 %v5748_v12  ;;  %v7591_v6 = vmul.f32 0.003921569, %v809_v44  ;;  %v5783_v45 = vld [vmem:[#allocation8 + $0x164] ss:$24 sps:$4 sm:$0xff]   ;;  %v5906_v26 = vpop.eup %5905  ;;  %vm906_vm12 = vcmp.eq.f32.partialorder %v7305_v14, 0.0 }
 0x236   : > { %v7597_v9 = vsel %vm932_vm3, %v7420_v41, %v931_v55  ;;  %v1280_v28 = vmul.f32 %v5904_v23, %v7151_v59  ;;  %v1279_v10 = vmul.f32 %v5904_v23, %v7147_v17  ;;  %2217 = vmatprep.subr.bf16.mxu1 %v5756_v58  ;;  %vm946_vm13 = vcmp.eq.f32.partialorder %v7511_v16, inf  ;;  %v5762_v44 = vld [vmem:[#allocation8 + $0x9c] ss:$24 sps:$4 sm:$0xff]   ;;  %v5908_v61 = vpop.eup %5907  ;;  %2420 = vmatprep.subr.bf16.mxu0 %v5783_v45  ;;  %v5768_v45 = vld [vmem:[#allocation8 + $0xcc] ss:$24 sps:$4 sm:$0xff]  }
 0x237   : > { %2062 = vmatprep.mubr.bf16.mxu0 %v7581_v34  ;;  %vm913_vm14 = vcmp.eq.f32.partialorder %v7310_v32, 0.0  ;;  %v1043_v12 = vmul.f32 %v5900_v54, %v7475_v1  ;;  %v1050_v38 = vmul.f32 %v5906_v26, %v7507_v39  ;;  %v10193_v55 = vand.u32 2147483648, %v7250_v51  ;;  %v5781_v26 = vld [vmem:[#allocation8 + $0x160] ss:$24 sps:$4 sm:$0xff]  }
 0x238   : > { %2063 = vmatmul.mubr.bf16.gmra.mrb[4].mxu0 %v7583_v48  ;;  %v7612_v47 = vmul.f32 0.003921569, %v812_v20  ;;  %vm1018_vm15 = vcmp.eq.f32.partialorder %v7321_v50, 0.0  ;;  %v1353_v17 = vadd.f32 %v7256_v57, %v1278_v33  ;;  %v1355_v58 = vadd.f32 %v7256_v57, %v1280_v28  ;;  %v5789_v33 = vld [vmem:[#allocation8 + $0x194] ss:$24 sps:$4 sm:$0xff]  }
 0x239   : > { %v992_v59 = vsel %vm990_vm2, %v10193_v55, %v7395_v53  ;;  %v1352_v23 = vadd.f32 %v7259_v49, %v1277_v52  ;;  %v1354_v54 = vadd.f32 %v7259_v49, %v1279_v10  ;;  %vm1025_vm0 = vcmp.eq.f32.partialorder %v7340_v11, 0.0  ;;  %2218 = vmatpush1.bf16.msra.mxu1 %v5754_v5  ;;  %v5760_v5 = vld [vmem:[#allocation8 + $0x98] ss:$24 sps:$4 sm:$0xff]   ;;  %2421 = vmatpush1.bf16.msra.mxu0 %v5781_v26 }
 0x23a   : > { %v7623_v51 = vsel %vm939_vm5, %v7454_v8, %v938_v43  ;;  %v949_v53 = vand.u32 2147483648, %v7511_v16  ;;  %5915 = vrsqrt.f32 %v7591_v6  ;;  %v10194_v20 = vand.u32 2147483648, %v7253_v18  ;;  %2219 = vmatprep.subr.bf16.mxu1 %v5762_v44  ;;  %2422 = vmatprep.subr.bf16.mxu0 %v5789_v33 }
 0x23b   : > { %vm920_vm1 = vcmp.eq.f32.partialorder %v7348_v2, 0.0  ;;  %vm927_vm2 = vcmp.eq.f32.partialorder %v7377_v35, 0.0  ;;  %v7634_v52 = vpack.c.bf16 %v1355_v58, %v1353_v17  ;;  %v7636_v43 = vpack.c.bf16 %v1354_v54, %v1352_v23  ;;  %v5787_v23 = vld [vmem:[#allocation8 + $0x190] ss:$24 sps:$4 sm:$0xff]  }
 0x23c   : > { %v999_v31 = vsel %vm997_vm4, %v10194_v20, %v7404_v25  ;;  %v1090_v28 = vadd.f32 1e-06, %v992_v59  ;;  %v7641_v55 = vsel %vm1044_vm6, %v7475_v1, %v1043_v12  ;;  %v7646_v18 = vsel %vm1051_vm10, %v7507_v39, %v1050_v38  ;;  %v5910_v44 = vpop.eup %5909 }
 0x23d   : > { %v1091_v10 = vadd.f32 1e-06, %v999_v31  ;;  %vm953_vm3 = vcmp.eq.f32.partialorder %v7564_v46, inf  ;;  %v956_v25 = vand.u32 2147483648, %v7564_v46  ;;  %5917 = vrsqrt.f32 %v7612_v47  ;;  %2142 = vmatprep.mubr.bf16.mxu1 %v7634_v52  ;;  %v5912_v54 = vpop.eup %5911  ;;  %2220 = vmatpush1.bf16.msra.mxu1 %v5760_v5  ;;  %v5766_v31 = vld [vmem:[#allocation8 + $0xc8] ss:$24 sps:$4 sm:$0xff]  }
 0x23e   : > { %v945_v59 = vmul.f32 %v5908_v61, %v7511_v16  ;;  %5919 = vrcp.f32 %v1090_v28  ;;  %v10195_v12 = vand.u32 2147483648, %v7272_v27  ;;  %v10196_v17 = vand.u32 2147483648, %v7284_v21  ;;  %2143 = vmatmul.mubr.bf16.gmra.mrb[4].mxu1 %v7636_v43  ;;  %2221 = vmatprep.subr.bf16.mxu1 %v5768_v45 }
 0x23f   : > { %vm1032_vm4 = vcmp.eq.f32.partialorder %v7399_v36, 0.0  ;;  %v1250_v61 = vmul.f32 %v5910_v44, %v7160_v15  ;;  %v1249_v20 = vmul.f32 %v5910_v44, %v7156_v29  ;;  %5921 = vrcp.f32 %v1091_v10  ;;  %v5914_v29 = vpop.eup %5913  ;;  %2423 = vmatpush1.bf16.msra.mxu0 %v5787_v23 }
 0x240   : > { %v894_v38 = vsel %vm892_vm7, %v10195_v12, %v7417_v60  ;;  %v901_v58 = vsel %vm899_vm8, %v10196_v17, %v7438_v62  ;;  %v5795_v60 = vld [vmem:[#allocation8 + $0x1c4] ss:$24 sps:$4 sm:$0xff]   ;;  %vm1039_vm5 = vcmp.eq.f32.partialorder %v7412_v22, 0.0  ;;  %v1252_v21 = vmul.f32 %v5912_v54, %v7174_v13 }
 0x241   : > { %v1076_v27 = vadd.f32 1e-06, %v894_v38  ;;  %v10197_v62 = vld [vmem:[#allocation41_spill] sm:$0xff]  ;;  %v1077_v28 = vadd.f32 1e-06, %v901_v58  ;;  %v10198_v12 = vld [vmem:[#allocation79_spill] sm:$0xff]  ;;  %v1325_v10 = vadd.f32 %v7256_v57, %v1250_v61  ;;  %v1324_v33 = vadd.f32 %v7259_v49, %v1249_v20  ;;  %2424 = vmatprep.subr.bf16.mxu0 %v5795_v60  ;;  %2222 = vmatpush1.bf16.msra.mxu1 %v5766_v31 }
 0x242   : > { %v1251_v26 = vmul.f32 %v5912_v54, %v10197_v62  ;;  %v10199_v17 = vand.u32 2147483648, %v7289_v63  ;;  %v1061_v44 = vand.u32 2147483648, %v7591_v6  ;;  %v5774_v13 = vld [vmem:[#allocation8 + $0xfc] ss:$24 sps:$4 sm:$0xff]   ;;  %v1327_v5 = vadd.f32 %v7256_v57, %v1252_v21  ;;  %v5793_v61 = vld [vmem:[#allocation8 + $0x1c0] ss:$24 sps:$4 sm:$0xff]  }
 0x243   : > { %5923 = vrcp.f32 %v1076_v27  ;;  %v10200_v58 = vld [vmem:[#allocation80_spill] sm:$0xff]  ;;  %v10201_v54 = vand.u32 2147483648, %v7296_v40  ;;  %v7688_v20 = vsel %vm946_vm13, %v7511_v16, %v945_v59  ;;  %v10202_v21 = vand.u32 2147483648, %v7305_v14  ;;  %2223 = vmatprep.subr.bf16.mxu1 %v5774_v13  ;;  %2425 = vmatpush1.bf16.msra.mxu0 %v5793_v61 }
 0x244   : > { %v1006_v15 = vsel %vm1004_vm9, %v10199_v17, %v10198_v12  ;;  %v1326_v38 = vadd.f32 %v7259_v49, %v1251_v26  ;;  %5925 = vrcp.f32 %v1077_v28  ;;  %v5801_v26 = vld [vmem:[#allocation8 + $0x1f4] ss:$24 sps:$4 sm:$0xff]   ;;  %v7695_v28 = vpack.c.bf16 %v1327_v5, %v1325_v10  ;;  %v5772_v12 = vld [vmem:[#allocation8 + $0xf8] ss:$24 sps:$4 sm:$0xff]  }
 0x245   : > { %v1013_v63 = vsel %vm1011_vm11, %v10201_v54, %v10200_v58  ;;  %v1092_v45 = vadd.f32 1e-06, %v1006_v15  ;;  %v908_v62 = vsel %vm906_vm12, %v10202_v21, %v7472_v19  ;;  %v952_v23 = vmul.f32 %v5914_v29, %v7564_v46  ;;  %v5916_v15 = vpop.eup %5915  ;;  %v5780_v14 = vld [vmem:[#allocation8 + $0x12c] ss:$24 sps:$4 sm:$0xff]   ;;  %v5799_v5 = vld [vmem:[#allocation8 + $0x1f0] ss:$24 sps:$4 sm:$0xff]   ;;  %2426 = vmatprep.subr.bf16.mxu0 %v5801_v26  ;;  %2224 = vmatpush1.bf16.msra.mxu1 %v5772_v12 }
 0x246   : > { %v1093_v27 = vadd.f32 1e-06, %v1013_v63  ;;  %v7697_v40 = vpack.c.bf16 %v1326_v38, %v1324_v33  ;;  %v10203_v59 = vand.u32 2147483648, %v7310_v32  ;;  %vm934_vm6 = vcmp.eq.f32.partialorder %v7420_v41, 0.0  ;;  %v10204_v10 = vld [vmem:[#allocation81_spill] sm:$0xff]  ;;  %2072 = vmatprep.mubr.bf16.mxu0 %v7695_v28  ;;  %2225 = vmatprep.subr.bf16.mxu1 %v5780_v14 }
 0x247   : > { %5927 = vrcp.f32 %v1092_v45  ;;  %v1078_v19 = vadd.f32 1e-06, %v908_v62  ;;  %v10205_v33 = vand.u32 2147483648, %v7321_v50  ;;  %v1068_v29 = vand.u32 2147483648, %v7612_v47  ;;  %v5918_v38 = vpop.eup %5917  ;;  %v10209_v62 = vld [vmem:[#allocation43_spill] sm:$0xff]  ;;  %2427 = vmatpush1.bf16.msra.mxu0 %v5799_v5 }
 0x248   : > { %v915_v17 = vsel %vm913_vm14, %v10203_v59, %v7487_v3  ;;  %5929 = vrcp.f32 %v1093_v27  ;;  %v10206_v32 = vand.u32 2147483648, %v7340_v11  ;;  %2073 = vmatmul.mubr.bf16.gmra.mrb[8].mxu0 %v7697_v40  ;;  %v10207_v58 = vand.u32 2147483648, %v7348_v2  ;;  %v5920_v61 = vpop.eup %5919  ;;  %v5778_v2 = vld [vmem:[#allocation8 + $0x128] ss:$24 sps:$4 sm:$0xff]   ;;  %v5786_v26 = vld [vmem:[#allocation8 + $0x15c] ss:$24 sps:$4 sm:$0xff]  }
 0x249   : > { %v1079_v60 = vadd.f32 1e-06, %v915_v17  ;;  %v1020_v31 = vsel %vm1018_vm15, %v10205_v33, %v10204_v10  ;;  %5931 = vrcp.f32 %v1078_v19  ;;  %v10208_v63 = vand.u32 2147483648, %v7377_v35  ;;  %v5922_v21 = vpop.eup %5921  ;;  %v10210_v35 = vld [vmem:[#allocation42_spill] sm:$0xff]  ;;  %v10211_v19 = vld [vmem:[#allocation45_spill] sm:$0xff]  ;;  %2226 = vmatpush1.bf16.msra.mxu1 %v5778_v2 }
 0x24a   : > { %v1027_v3 = vsel %vm1025_vm0, %v10206_v32, %v7517_v30  ;;  %v1094_v13 = vadd.f32 1e-06, %v1020_v31  ;;  %v922_v54 = vsel %vm920_vm1, %v10207_v58, %v7525_v56  ;;  %v5807_v30 = vld [vmem:[#allocation8 + $0x224] ss:$24 sps:$4 sm:$0xff]   ;;  %v7732_v45 = vsel %vm953_vm3, %v7564_v46, %v952_v23  ;;  %v5813_v5 = vld [vmem:[#allocation8 + $0x254] ss:$24 sps:$4 sm:$0xff]   ;;  %2227 = vmatprep.subr.bf16.mxu1 %v5786_v26 }
 0x24b   : > { %v1095_v50 = vadd.f32 1e-06, %v1027_v3  ;;  %v929_v11 = vsel %vm927_vm2, %v10208_v63, %v7540_v37  ;;  %v7735_v27 = vmul.f32 %v5916_v15, %v7591_v6  ;;  %5933 = vrcp.f32 %v1079_v60  ;;  %v10212_v23 = vld [vmem:[#allocation44_spill] sm:$0xff]  ;;  %2428 = vmatprep.subr.bf16.mxu0 %v5807_v30  ;;  %v10216_v63 = vld [vmem:[#allocation46_spill] sm:$0xff] }
 0x24c   : > { %v1080_v56 = vadd.f32 1e-06, %v922_v54  ;;  %v1282_v59 = vmul.f32 %v5920_v61, %v10209_v62  ;;  %v1281_v37 = vmul.f32 %v5920_v61, %v10210_v35  ;;  %5935 = vrcp.f32 %v1094_v13  ;;  %v5805_v60 = vld [vmem:[#allocation8 + $0x220] ss:$24 sps:$4 sm:$0xff]   ;;  %v5792_v2 = vld [vmem:[#allocation8 + $0x18c] ss:$24 sps:$4 sm:$0xff]  }
 0x24d   : > { %v1081_v17 = vadd.f32 1e-06, %v929_v11  ;;  %v1284_v10 = vmul.f32 %v5922_v21, %v10211_v19  ;;  %v1283_v33 = vmul.f32 %v5922_v21, %v10212_v23  ;;  %5937 = vrcp.f32 %v1095_v50  ;;  %v5924_v31 = vpop.eup %5923  ;;  %v5784_v61 = vld [vmem:[#allocation8 + $0x158] ss:$24 sps:$4 sm:$0xff]   ;;  %2429 = vmatpush1.bf16.msra.mxu0 %v5805_v60 }
 0x24e   : > { %v10213_v12 = vand.u32 2147483648, %v7399_v36  ;;  %v1357_v32 = vadd.f32 %v7256_v57, %v1282_v59  ;;  %v1356_v14 = vadd.f32 %v7259_v49, %v1281_v37  ;;  %5939 = vrcp.f32 %v1080_v56  ;;  %v5926_v50 = vpop.eup %5925  ;;  %v10217_v56 = vld [vmem:[#allocation48_spill] sm:$0xff]  ;;  %v10218_v62 = vld [vmem:[#allocation71_spill] sm:$0xff]  ;;  %2430 = vmatprep.subr.bf16.mxu0 %v5813_v5  ;;  %2228 = vmatpush1.bf16.msra.mxu1 %v5784_v61  ;;  %v10222_v5 = vld [vmem:[#allocation50_spill] sm:$0xff] }
 0x24f   : > { %v10214_v3 = vand.u32 2147483648, %v7412_v22  ;;  %v1359_v58 = vadd.f32 %v7256_v57, %v1284_v10  ;;  %v1358_v36 = vadd.f32 %v7259_v49, %v1283_v33  ;;  %v1253_v11 = vmul.f32 %v5924_v31, %v10216_v63  ;;  %v10224_v63 = vld [vmem:[#allocation76_spill] sm:$0xff]  ;;  %v10225_v61 = vld [vmem:[#allocation75_spill] sm:$0xff]  ;;  %2229 = vmatprep.subr.bf16.mxu1 %v5792_v2 }
 0x250   : > { %v1034_v15 = vsel %vm1032_vm4, %v10213_v12, %v7573_v7  ;;  %v10215_v7 = vld [vmem:[#allocation47_spill] sm:$0xff]  ;;  %v1256_v21 = vmul.f32 %v5926_v50, %v10217_v56  ;;  %v1255_v59 = vmul.f32 %v5926_v50, %v10218_v62  ;;  %5941 = vrcp.f32 %v1081_v17 }
 0x251   : > { %v1041_v13 = vsel %vm1039_vm5, %v10214_v3, %v7578_v0  ;;  %v1254_v54 = vmul.f32 %v5924_v31, %v10215_v7  ;;  %v1096_v22 = vadd.f32 1e-06, %v1034_v15  ;;  %vm941_vm7 = vcmp.eq.f32.partialorder %v7454_v8, 0.0  ;;  %v5928_v19 = vpop.eup %5927  ;;  %v10220_v15 = vld [vmem:[#allocation72_spill] sm:$0xff] }
 0x252   : > { %v7760_v0 = vpack.c.bf16 %v1359_v58, %v1357_v32  ;;  %v7762_v30 = vpack.c.bf16 %v1358_v36, %v1356_v14  ;;  %v7765_v35 = vmul.f32 %v5918_v38, %v7612_v47  ;;  %v1331_v10 = vadd.f32 %v7256_v57, %v1256_v21  ;;  %v5930_v33 = vpop.eup %5929  ;;  %v10219_v38 = vld [vmem:[#allocation73_spill] sm:$0xff]  ;;  %v10223_v58 = vld [vmem:[#allocation74_spill] sm:$0xff] }
 0x253   : > { %v1329_v37 = vadd.f32 %v7256_v57, %v1254_v54  ;;  %v1328_v26 = vadd.f32 %v7259_v49, %v1253_v11  ;;  %v1330_v17 = vadd.f32 %v7259_v49, %v1255_v59  ;;  %v7771_v23 = vadd.f32 1e-06, %v1041_v13  ;;  %v5932_v14 = vpop.eup %5931  ;;  %v5790_v7 = vld [vmem:[#allocation8 + $0x188] ss:$24 sps:$4 sm:$0xff]   ;;  %v5798_v21 = vld [vmem:[#allocation8 + $0x1bc] ss:$24 sps:$4 sm:$0xff]  }
 0x254   : > { %vm1058_vm8 = vcmp.eq.f32.partialorder %v7591_v6, inf  ;;  %2152 = vmatprep.mubr.bf16.mxu1 %v7760_v0  ;;  %vm1065_vm9 = vcmp.eq.f32.partialorder %v7612_v47, inf  ;;  %v1286_v12 = vmul.f32 %v5928_v19, %v10219_v38  ;;  %v1285_v60 = vmul.f32 %v5928_v19, %v10220_v15  ;;  %v10228_v38 = vld [vmem:[#allocation56_spill] sm:$0xff]  ;;  %v10229_v15 = vld [vmem:[#allocation55_spill] sm:$0xff]  ;;  %2230 = vmatpush1.bf16.msra.mxu1 %v5790_v7 }
 0x255   : > { %5943 = vrcp.f32 %v1096_v22  ;;  %v10221_v31 = vand.u32 2147483648, %v7420_v41  ;;  %vm1046_vm10 = vcmp.eq.f32.partialorder %v7475_v1, 0.0  ;;  %2153 = vmatmul.mubr.bf16.gmra.mrb[8].mxu1 %v7762_v30  ;;  %v7787_v3 = vpack.c.bf16 %v1331_v10, %v1329_v37  ;;  %v5934_v54 = vpop.eup %5933  ;;  %v10226_v37 = vld [vmem:[#allocation54_spill] sm:$0xff]  ;;  %v10227_v10 = vld [vmem:[#allocation53_spill] sm:$0xff]  ;;  %2231 = vmatprep.subr.bf16.mxu1 %v5798_v21  ;;  %v10233_v7 = vld [vmem:[#allocation59_spill] sm:$0xff] }
 0x256   : > { %v7789_v13 = vpack.c.bf16 %v1330_v17, %v1328_v26  ;;  %v1288_v50 = vmul.f32 %v5930_v33, %v10222_v5  ;;  %v1287_v36 = vmul.f32 %v5930_v33, %v10223_v58  ;;  %vm1053_vm11 = vcmp.eq.f32.partialorder %v7507_v39, 0.0  ;;  %v5936_v62 = vpop.eup %5935  ;;  %v10235_v21 = vld [vmem:[#allocation61_spill] sm:$0xff] }
 0x257   : > { %v7783_v32 = vsel %vm934_vm6, %v10221_v31, %v7597_v9  ;;  %v1361_v41 = vadd.f32 %v7256_v57, %v1286_v12  ;;  %v1360_v9 = vadd.f32 %v7259_v49, %v1285_v60  ;;  %v1258_v11 = vmul.f32 %v5932_v14, %v10224_v63  ;;  %2082 = vmatprep.mubr.bf16.mxu0 %v7787_v3  ;;  %v5938_v17 = vpop.eup %5937  ;;  %v5811_v31 = vld [vmem:[#allocation8 + $0x250] ss:$24 sps:$4 sm:$0xff]  }
 0x258   : > { %v1257_v56 = vmul.f32 %v5932_v14, %v10225_v61  ;;  %vm948_vm12 = vcmp.eq.f32.partialorder %v7511_v16, 0.0  ;;  %v1363_v59 = vadd.f32 %v7256_v57, %v1288_v50  ;;  %v1362_v22 = vadd.f32 %v7259_v49, %v1287_v36  ;;  %2083 = vmatmul.mubr.bf16.gmra.mrb[12].mxu0 %v7789_v13  ;;  %v5940_v14 = vpop.eup %5939  ;;  %v10231_v61 = vld [vmem:[#allocation57_spill] sm:$0xff] }
 0x259   : > { %v1260_v19 = vmul.f32 %v5934_v54, %v10226_v37  ;;  %v1259_v26 = vmul.f32 %v5934_v54, %v10227_v10  ;;  %vm955_vm13 = vcmp.eq.f32.partialorder %v7564_v46, 0.0  ;;  %vm1060_vm14 = vcmp.eq.f32.partialorder %v7591_v6, 0.0  ;;  %v10230_v54 = vld [vmem:[#allocation58_spill] sm:$0xff]  ;;  %2431 = vmatpush1.bf16.msra.mxu0 %v5811_v31 }
 0x25a   : > { %v1333_v2 = vadd.f32 %v7256_v57, %v1258_v11  ;;  %v1332_v33 = vadd.f32 %v7259_v49, %v1257_v56  ;;  %v1290_v12 = vmul.f32 %v5936_v62, %v10228_v38  ;;  %v1289_v60 = vmul.f32 %v5936_v62, %v10229_v15  ;;  %v5796_v62 = vld [vmem:[#allocation8 + $0x1b8] ss:$24 sps:$4 sm:$0xff]   ;;  %v5942_v10 = vpop.eup %5941  ;;  %v5819_v38 = vld [vmem:[#allocation8 + $0x284] ss:$24 sps:$4 sm:$0xff]  }
 0x25b   : > { %v7811_v5 = vpack.c.bf16 %v1363_v59, %v1361_v41  ;;  %v7813_v50 = vpack.c.bf16 %v1362_v22, %v1360_v9  ;;  %v1335_v58 = vadd.f32 %v7256_v57, %v1260_v19  ;;  %v1334_v36 = vadd.f32 %v7259_v49, %v1259_v26  ;;  %v10232_v59 = vld [vmem:[#allocation60_spill] sm:$0xff]  ;;  %v10234_v15 = vld [vmem:[#allocation62_spill] sm:$0xff]  ;;  %2232 = vmatpush1.bf16.msra.mxu1 %v5796_v62 }
 0x25c   : > { %v1292_v63 = vmul.f32 %v5938_v17, %v10230_v54  ;;  %v1365_v11 = vadd.f32 %v7256_v57, %v1290_v12  ;;  %v1291_v56 = vmul.f32 %v5938_v17, %v10231_v61  ;;  %v1364_v37 = vadd.f32 %v7259_v49, %v1289_v60  ;;  %v5804_v26 = vld [vmem:[#allocation8 + $0x1ec] ss:$24 sps:$4 sm:$0xff]   ;;  %2432 = vmatprep.subr.bf16.mxu0 %v5819_v38 }
 0x25d   : > { %2162 = vmatprep.mubr.bf16.mxu1 %v7811_v5  ;;  %v7822_v41 = vpack.c.bf16 %v1335_v58, %v1333_v2  ;;  %v7824_v9 = vpack.c.bf16 %v1334_v36, %v1332_v33  ;;  %v1262_v22 = vmul.f32 %v5940_v14, %v10232_v59  ;;  %v1261_v19 = vmul.f32 %v5940_v14, %v10233_v7  ;;  %v5817_v36 = vld [vmem:[#allocation8 + $0x280] ss:$24 sps:$4 sm:$0xff]  }
 0x25e   : > { %v1367_v12 = vadd.f32 %v7256_v57, %v1292_v63  ;;  %v1366_v17 = vadd.f32 %v7259_v49, %v1291_v56  ;;  %v1264_v60 = vmul.f32 %v5942_v10, %v10234_v15  ;;  %v1263_v54 = vmul.f32 %v5942_v10, %v10235_v21  ;;  %2163 = vmatmul.mubr.bf16.gmra.mrb[12].mxu1 %v7813_v50  ;;  %v5802_v59 = vld [vmem:[#allocation8 + $0x1e8] ss:$24 sps:$4 sm:$0xff]  }
 0x25f   : > { %2092 = vmatprep.mubr.bf16.mxu0 %v7822_v41  ;;  %v1337_v2 = vadd.f32 %v7256_v57, %v1262_v22  ;;  %v1336_v33 = vadd.f32 %v7259_v49, %v1261_v19  ;;  %5945 = vrcp.f32 %v7771_v23  ;;  %v10236_v14 = vand.u32 2147483648, %v7454_v8  ;;  %v5944_v63 = vpop.eup %5943  ;;  %v5810_v22 = vld [vmem:[#allocation8 + $0x21c] ss:$24 sps:$4 sm:$0xff]   ;;  %2233 = vmatprep.subr.bf16.mxu1 %v5804_v26  ;;  %v5823_v26 = vld [vmem:[#allocation8 + $0x2b0] ss:$24 sps:$4 sm:$0xff]  }
 0x260   : > { %v7842_v61 = vpack.c.bf16 %v1367_v12, %v1365_v11  ;;  %v7844_v31 = vpack.c.bf16 %v1366_v17, %v1364_v37  ;;  %v1339_v56 = vadd.f32 %v7256_v57, %v1264_v60  ;;  %v1338_v10 = vadd.f32 %v7259_v49, %v1263_v54  ;;  %v5825_v37 = vld [vmem:[#allocation8 + $0x2b4] ss:$24 sps:$4 sm:$0xff]   ;;  %2093 = vmatmul.mubr.bf16.gmra.mrb[16].mxu0 %v7824_v9 }
 0x261   : > { %v943_v58 = vsel %vm941_vm7, %v10236_v14, %v7623_v51  ;;  %v1059_v23 = vsel %vm1058_vm8, %v7591_v6, %v7735_v27  ;;  %v1066_v8 = vsel %vm1065_vm9, %v7612_v47, %v7765_v35  ;;  %v1082_v51 = vadd.f32 1e-06, %v7783_v32  ;;  %v5808_v32 = vld [vmem:[#allocation8 + $0x218] ss:$24 sps:$4 sm:$0xff]   ;;  %2433 = vmatpush1.bf16.msra.mxu0 %v5817_v36  ;;  %2234 = vmatpush1.bf16.msra.mxu1 %v5802_v59  ;;  %v5814_v6 = vld [vmem:[#allocation8 + $0x248] ss:$24 sps:$4 sm:$0xff]  }
 0x262   : > { %v1083_v11 = vadd.f32 1e-06, %v943_v58  ;;  %vm1067_vm15 = vcmp.eq.f32.partialorder %v7612_v47, 0.0  ;;  %2172 = vmatprep.mubr.bf16.mxu1 %v7842_v61  ;;  %v7860_v62 = vpack.c.bf16 %v1339_v56, %v1337_v2  ;;  %v7862_v27 = vpack.c.bf16 %v1338_v10, %v1336_v33  ;;  %2235 = vmatprep.subr.bf16.mxu1 %v5810_v22  ;;  %v10239_v60 = vld [vmem:[#allocation63_spill] sm:$0xff]  ;;  %v10241_v2 = vld [vmem:[#allocation65_spill] sm:$0xff] }
 0x263   : > { %v1048_v35 = vsel %vm1046_vm10, %v1047_v4, %v7641_v55  ;;  %5947 = vrcp.f32 %v1082_v51  ;;  %v10237_v7 = vand.u32 2147483648, %v7507_v39  ;;  %v950_v1 = vsel %vm948_vm12, %v949_v53, %v7688_v20  ;;  %v5831_v4 = vld [vmem:[#allocation8 + $0x2e4] ss:$24 sps:$4 sm:$0xff]   ;;  %2434 = vmatprep.subr.bf16.mxu0 %v5825_v37  ;;  %v5820_v56 = vld [vmem:[#allocation8 + $0x278] ss:$24 sps:$4 sm:$0xff]  }
 0x264   : > { %2102 = vmatprep.mubr.bf16.mxu0 %v7860_v62  ;;  %5949 = vrcp.f32 %v1083_v11  ;;  %v1098_v38 = vadd.f32 1e-06, %v1048_v35  ;;  %v5816_v55 = vld [vmem:[#allocation8 + $0x24c] ss:$24 sps:$4 sm:$0xff]   ;;  %v957_v39 = vsel %vm955_vm13, %v956_v25, %v7732_v45  ;;  %v1062_v17 = vsel %vm1060_vm14, %v1061_v44, %v1059_v23  ;;  %v5829_v25 = vld [vmem:[#allocation8 + $0x2e0] ss:$24 sps:$4 sm:$0xff]  }
 0x265   : > { %v1055_v19 = vsel %vm1053_vm11, %v10237_v7, %v7646_v18  ;;  %v1084_v18 = vadd.f32 1e-06, %v950_v1  ;;  %v1069_v16 = vsel %vm1067_vm15, %v1068_v29, %v1066_v8  ;;  %v1085_v53 = vadd.f32 1e-06, %v957_v39  ;;  %2435 = vmatpush1.bf16.msra.mxu0 %v5823_v26  ;;  %v10238_v45 = vld [vmem:[#allocation64_spill] sm:$0xff]  ;;  %2236 = vmatpush1.bf16.msra.mxu1 %v5808_v32  ;;  %v10240_v29 = vld [vmem:[#allocation66_spill] sm:$0xff] }
 0x266   : > { %v1099_v12 = vadd.f32 1e-06, %v1055_v19  ;;  %5951 = vrcp.f32 %v1098_v38  ;;  %v1100_v20 = vadd.f32 1e-06, %v1062_v17  ;;  %2173 = vmatmul.mubr.bf16.gmra.mrb[16].mxu1 %v7844_v31  ;;  %v1101_v46 = vadd.f32 1e-06, %v1069_v16  ;;  %2436 = vmatprep.subr.bf16.mxu0 %v5831_v4 }
 0x267   : > { %v1294_v15 = vmul.f32 %v5944_v63, %v10238_v45  ;;  %v1293_v21 = vmul.f32 %v5944_v63, %v10239_v60  ;;  %2237 = vmatprep.subr.bf16.mxu1 %v5816_v55  ;;  %v5822_v47 = vld [vmem:[#allocation8 + $0x27c] ss:$24 sps:$4 sm:$0xff]   ;;  %v10243_v11 = vld [vmem:[#allocation29_spill] sm:$0xff]  ;;  %vm2727_vm0 = vcmask 519168  }
 0x268   : > { %5953 = vrcp.f32 %v1099_v12  ;;  %2103 = vmatmul.mubr.bf16.gmra.mrb[20].mxu0 %v7862_v27  ;;  %v10242_v8 = vld [vmem:[#allocation30_spill] sm:$0xff]  ;;  %v10244_v32 = vld [vmem:[#allocation67_spill] sm:$0xff]  ;;  %v5826_v4 = vld [vmem:[#allocation8 + $0x2a8] ss:$24 sps:$4 sm:$0xff]  }
 0x269   : > { %5955 = vrcp.f32 %v1084_v18  ;;  %v5946_v44 = vpop.eup %5945  ;;  %2437 = vmatpush1.bf16.msra.mxu0 %v5829_v25  ;;  %v1369_v14 = vadd.f32 %v7256_v57, %v1294_v15  ;;  %v1368_v36 = vadd.f32 %v7259_v49, %v1293_v21  ;;  %2238 = vmatpush1.bf16.msra.mxu1 %v5814_v6  ;;  %v5828_v35 = vld [vmem:[#allocation8 + $0x2ac] ss:$24 sps:$4 sm:$0xff]   ;;  %v10245_v19 = vld [vmem:[#allocation31_spill] sm:$0xff] }
 0x26a   : > { %5957 = vrcp.f32 %v1085_v53  ;;  %v1296_v54 = vmul.f32 %v5946_v44, %v10240_v29  ;;  %v1295_v33 = vmul.f32 %v5946_v44, %v10241_v2  ;;  %2239 = vmatprep.subr.bf16.mxu1 %v5822_v47  ;;  %v10246_v17 = vld [vmem:[#allocation33_spill] sm:$0xff]  ;;  %v10247_v53 = vld [vmem:[#allocation32_spill] sm:$0xff] }
 0x26b   : > { %5959 = vrcp.f32 %v1100_v20  ;;  %v10248_v25 = vld [vmem:[#allocation69_spill] sm:$0xff]  ;;  %v10249_v15 = vld [vmem:[#allocation68_spill] sm:$0xff] }
 0x26c   : > { %5961 = vrcp.f32 %v1101_v46  ;;  %v1371_v58 = vadd.f32 %v7256_v57, %v1296_v54  ;;  %v1370_v63 = vadd.f32 %v7259_v49, %v1295_v33  ;;  %v5834_v54 = vld [vmem:[#allocation8 + $0x2dc] ss:$24 sps:$4 sm:$0xff]  }
 0x26d   : > { %v5948_v10 = vpop.eup %5947  ;;  %2240 = vmatpush1.bf16.msra.mxu1 %v5820_v56 }
 0x26e   : > { %v5950_v59 = vpop.eup %5949  ;;  %v7903_v22 = vpack.c.bf16 %v1371_v58, %v1369_v14  ;;  %v7905_v23 = vpack.c.bf16 %v1370_v63, %v1368_v36  ;;  %v1266_v51 = vmul.f32 %v5948_v10, %v10242_v8  ;;  %v1265_v37 = vmul.f32 %v5948_v10, %v10243_v11  ;;  %2241 = vmatprep.subr.bf16.mxu1 %v5828_v35  ;;  %v10250_v58 = vld [vmem:[#allocation35_spill] sm:$0xff]  ;;  %v10251_v63 = vld [vmem:[#allocation70_spill] sm:$0xff]  ;;  %v10253_v11 = vld [vmem:[#allocation36_spill] sm:$0xff] }
 0x26f   : > { %v1268_v7 = vmul.f32 %v5950_v59, %v10244_v32  ;;  %v1267_v26 = vmul.f32 %v5950_v59, %v10245_v19  ;;  %v5832_v10 = vld [vmem:[#allocation8 + $0x2d8] ss:$24 sps:$4 sm:$0xff]  }
 0x270   : > { %v5952_v38 = vpop.eup %5951  ;;  %2182 = vmatprep.mubr.bf16.mxu1 %v7903_v22  ;;  %v1341_v12 = vadd.f32 %v7256_v57, %v1266_v51  ;;  %v1340_v1 = vadd.f32 %v7259_v49, %v1265_v37  ;;  %v10252_v8 = vld [vmem:[#allocation34_spill] sm:$0xff] }
 0x271   : > { %2183 = vmatmul.mubr.bf16.gmra.mrb[20].mxu1 %v7905_v23  ;;  %v1343_v39 = vadd.f32 %v7256_v57, %v1268_v7  ;;  %v1342_v18 = vadd.f32 %v7259_v49, %v1267_v26  ;;  %v1298_v16 = vmul.f32 %v5952_v38, %v10246_v17  ;;  %v1297_v20 = vmul.f32 %v5952_v38, %v10247_v53  ;;  %v10254_v35 = vld [vmem:[#allocation38_spill] sm:$0xff]  ;;  %v10255_v7 = vld [vmem:[#allocation37_spill] sm:$0xff] }
 0x272   : > { %v5954_v55 = vpop.eup %5953  ;;  %2242 = vmatpush1.bf16.msra.mxu1 %v5826_v4 }
 0x273   : > { %v5956_v46 = vpop.eup %5955  ;;  %v1300_v45 = vmul.f32 %v5954_v55, %v10248_v25  ;;  %v1299_v60 = vmul.f32 %v5954_v55, %v10249_v15  ;;  %v7921_v6 = vpack.c.bf16 %v1343_v39, %v1341_v12  ;;  %v7923_v44 = vpack.c.bf16 %v1342_v18, %v1340_v1  ;;  %v10256_v39 = vld [vmem:[#allocation40_spill] sm:$0xff]  ;;  %2243 = vmatprep.subr.bf16.mxu1 %v5834_v54 }
 0x274   : > { %v5958_v21 = vpop.eup %5957  ;;  %v1373_v47 = vadd.f32 %v7256_v57, %v1298_v16  ;;  %v1372_v29 = vadd.f32 %v7259_v49, %v1297_v20  ;;  %v1270_v36 = vmul.f32 %v5956_v46, %v10250_v58  ;;  %v1269_v51 = vmul.f32 %v5956_v46, %v10252_v8  ;;  %v10257_v16 = vld [vmem:[#allocation39_spill] sm:$0xff] }
 0x275   : > { %v5960_v2 = vpop.eup %5959  ;;  %v1375_v33 = vadd.f32 %v7256_v57, %v1300_v45  ;;  %v1374_v14 = vadd.f32 %v7259_v49, %v1299_v60  ;;  %v1272_v56 = vmul.f32 %v5958_v21, %v10251_v63  ;;  %2112 = vmatprep.mubr.bf16.mxu0 %v7921_v6  ;;  %v1271_v37 = vmul.f32 %v5958_v21, %v10253_v11 }
 0x276   : > { %v5962_v59 = vpop.eup %5961  ;;  %v1302_v32 = vmul.f32 %v5960_v2, %v10254_v35  ;;  %v1301_v19 = vmul.f32 %v5960_v2, %v10255_v7  ;;  %2113 = vmatmul.mubr.bf16.gmra.mrb[24].mxu0 %v7923_v44  ;;  %v1345_v12 = vadd.f32 %v7256_v57, %v1270_v36  ;;  %v1344_v4 = vadd.f32 %v7259_v49, %v1269_v51 }
 0x277   : > { %v7937_v26 = vpack.c.bf16 %v1375_v33, %v1373_v47  ;;  %v7939_v38 = vpack.c.bf16 %v1374_v14, %v1372_v29  ;;  %v1347_v1 = vadd.f32 %v7256_v57, %v1272_v56  ;;  %v1346_v55 = vadd.f32 %v7259_v49, %v1271_v37  ;;  %2244 = vmatpush1.bf16.msra.mxu1 %v5832_v10  ;;  %v10258_v47 = vld [vmem:[#allocation77_spill] sm:$0xff]  ;;  %v10259_v29 = vld [vmem:[#allocation78_spill] sm:$0xff] }
 0x278   : > { %v1304_v18 = vmul.f32 %v5962_v59, %v10256_v39  ;;  %v1303_v53 = vmul.f32 %v5962_v59, %v10257_v16  ;;  %v1377_v46 = vadd.f32 %v7256_v57, %v1302_v32  ;;  %v1376_v45 = vadd.f32 %v7259_v49, %v1301_v19 }
 0x279   : > { %2192 = vmatprep.mubr.bf16.mxu1 %v7937_v26  ;;  %v1395_v17 = vpack.c.bf16 %v1347_v1, %v1345_v12  ;;  %v1394_v20 = vpack.c.bf16 %v1346_v55, %v1344_v4 }
 0x27a   : > { %2193 = vmatmul.mubr.bf16.gmra.mrb[24].mxu1 %v7939_v38  ;;  %v1379_v25 = vadd.f32 %v7256_v57, %v1304_v18  ;;  %v1378_v15 = vadd.f32 %v7259_v49, %v1303_v53  ;;  %v8013_v57 = vld [vmem:[#allocation10] sm:$0x3f]  ;;  %v10260_v49 = vld [vmem:[#allocation51_spill] sm:$0xff] }
 0x27b   : > { %2122 = vmatprep.mubr.bf16.mxu0 %v1395_v17 }
 0x27c   : > { %v7953_v60 = vpack.c.bf16 %v1379_v25, %v1377_v46  ;;  %v7955_v21 = vpack.c.bf16 %v1378_v15, %v1376_v45 }
 0x27e   : > { %2202 = vmatprep.mubr.bf16.mxu1 %v7953_v60  ;;  %2123 = vmatmul.mubr.bf16.gmra.mrb[28].mxu0 %v1394_v20 }
 0x27f   : > { %2438 = vmatprep.mubr.bf16.mxu0 %v10258_v47 }
 0x282   : > { %2203 = vmatmul.mubr.bf16.gmra.mrb[28].mxu1 %v7955_v21 }
 0x283   : > { %2245 = vmatprep.mubr.bf16.mxu1 %v10258_v47 }
 0x286   : > { %2439 = vmatmul.mubr.bf16.vlgmr.msra.gmra.mrb[32].mxu0 %v10259_v29 }
 0x287   : > { %2448 = vmatprep.mubr.bf16.mxu0 %v7581_v34 }
 0x28a   : > { %2246 = vmatmul.mubr.bf16.vlgmr.msra.gmra.mrb[32].mxu1 %v10259_v29 }
 0x28b   : > { %2255 = vmatprep.mubr.bf16.mxu1 %v7581_v34 }
 0x28e   : > { %2449 = vmatmul.mubr.bf16.gmra.mrb[36].mxu0 %v7583_v48 }
 0x28f   : > { %2458 = vmatprep.mubr.bf16.mxu0 %v7695_v28 }
 0x292   : > { %2256 = vmatmul.mubr.bf16.gmra.mrb[36].mxu1 %v7583_v48 }
 0x293   : > { %2265 = vmatprep.mubr.bf16.mxu1 %v7695_v28 }
 0x296   : > { %2459 = vmatmul.mubr.bf16.gmra.mrb[40].mxu0 %v7697_v40 }
 0x297   : > { %2468 = vmatprep.mubr.bf16.mxu0 %v7787_v3 }
 0x29a   : > { %2266 = vmatmul.mubr.bf16.gmra.mrb[40].mxu1 %v7697_v40 }
 0x29b   : > { %2275 = vmatprep.mubr.bf16.mxu1 %v7787_v3 }
 0x29e   : > { %2469 = vmatmul.mubr.bf16.gmra.mrb[44].mxu0 %v7789_v13 }
 0x29f   : > { %2478 = vmatprep.mubr.bf16.mxu0 %v7822_v41 }
 0x2a2   : > { %2276 = vmatmul.mubr.bf16.gmra.mrb[44].mxu1 %v7789_v13 }
 0x2a3   : > { %2285 = vmatprep.mubr.bf16.mxu1 %v7822_v41 }
 0x2a6   : > { %2479 = vmatmul.mubr.bf16.gmra.mrb[48].mxu0 %v7824_v9 }
 0x2a7   : > { %2488 = vmatprep.mubr.bf16.mxu0 %v7860_v62 }
 0x2aa   : > { %2286 = vmatmul.mubr.bf16.gmra.mrb[48].mxu1 %v7824_v9 }
 0x2ab   : > { %2295 = vmatprep.mubr.bf16.mxu1 %v7860_v62 }
 0x2ae   : > { %2489 = vmatmul.mubr.bf16.gmra.mrb[52].mxu0 %v7862_v27 }
 0x2af   : > { %2498 = vmatprep.mubr.bf16.mxu0 %v7921_v6 }
 0x2b2   : > { %2296 = vmatmul.mubr.bf16.gmra.mrb[52].mxu1 %v7862_v27 }
 0x2b3   : > { %2305 = vmatprep.mubr.bf16.mxu1 %v7921_v6 }
 0x2b6   : > { %2499 = vmatmul.mubr.bf16.gmra.mrb[56].mxu0 %v7923_v44 }
 0x2b7   : > { %2508 = vmatprep.mubr.bf16.mxu0 %v1395_v17 }
 0x2ba   : > { %2306 = vmatmul.mubr.bf16.gmra.mrb[56].mxu1 %v7923_v44 }
 0x2bb   : > { %2315 = vmatprep.mubr.bf16.mxu1 %v1395_v17 }
 0x2be   : > { %2509 = vmatmul.mubr.bf16.gmra.mrb[60].mxu0 %v1394_v20 }
 0x2bf   : > { %2518 = vmatprep.mubr.bf16.mxu0 %v7527_v42 }
 0x2c2   : > { %2316 = vmatmul.mubr.bf16.gmra.mrb[60].mxu1 %v1394_v20 }
 0x2c3   : > { %2325 = vmatprep.mubr.bf16.mxu1 %v7527_v42  ;;  %v8017_v42 = vrot.slane %v8013_v57, %v10260_v49 }
 0x2c6   : > { %2519 = vmatmul.mubr.bf16.gmra.mrb[64].mxu0 %v7529_v24 }
 0x2c7   : > { %2528 = vmatprep.mubr.bf16.mxu0 %v7634_v52 }
 0x2ca   : > { %2326 = vmatmul.mubr.bf16.gmra.mrb[64].mxu1 %v7529_v24  ;;  %v10261_v24 = vld [vmem:[#allocation52_spill] sm:$0xff] }
 0x2cb   : > { %2335 = vmatprep.mubr.bf16.mxu1 %v7634_v52  ;;  %v8022_v34 = vrot.slane %v8013_v57, %v10261_v24 }
 0x2ce   : > { %2529 = vmatmul.mubr.bf16.gmra.mrb[68].mxu0 %v7636_v43 }
 0x2cf   : > { %2538 = vmatprep.mubr.bf16.mxu0 %v7760_v0 }
 0x2d2   : > { %2336 = vmatmul.mubr.bf16.gmra.mrb[68].mxu1 %v7636_v43 }
 0x2d3   : > { %2345 = vmatprep.mubr.bf16.mxu1 %v7760_v0 }
 0x2d6   : > { %2539 = vmatmul.mubr.bf16.gmra.mrb[72].mxu0 %v7762_v30 }
 0x2d7   : > { %2548 = vmatprep.mubr.bf16.mxu0 %v7811_v5 }
 0x2da   : > { %2346 = vmatmul.mubr.bf16.gmra.mrb[72].mxu1 %v7762_v30 }
 0x2db   : > { %2355 = vmatprep.mubr.bf16.mxu1 %v7811_v5 }
 0x2de   : > { %2549 = vmatmul.mubr.bf16.gmra.mrb[76].mxu0 %v7813_v50 }
 0x2df   : > { %2558 = vmatprep.mubr.bf16.mxu0 %v7842_v61 }
 0x2e2   : > { %2356 = vmatmul.mubr.bf16.gmra.mrb[76].mxu1 %v7813_v50 }
 0x2e3   : > { %2365 = vmatprep.mubr.bf16.mxu1 %v7842_v61 }
 0x2e6   : > { %2559 = vmatmul.mubr.bf16.gmra.mrb[80].mxu0 %v7844_v31 }
 0x2e7   : > { %2568 = vmatprep.mubr.bf16.mxu0 %v7903_v22 }
 0x2ea   : > { %2366 = vmatmul.mubr.bf16.gmra.mrb[80].mxu1 %v7844_v31 }
 0x2eb   : > { %2375 = vmatprep.mubr.bf16.mxu1 %v7903_v22 }
 0x2ed   : > { %v2054_v48 = vpop.f32.mrb[0].mxu0 }
 0x2ee   : > { %2569 = vmatmul.mubr.bf16.gmra.mrb[84].mxu0 %v7905_v23  ;;  %v2055_v52 = vadd.f32 %v2054_v48, %v8017_v42  ;;  %v2056_v43 = vpop.f32.mrb[1].mxu0 }
 0x2ef   : > { %2578 = vmatprep.mubr.bf16.mxu0 %v7937_v26  ;;  %v2057_v28 = vadd.f32 %v2056_v43, %v8022_v34  ;;  %v2058_v40 = vpop.f32.mrb[2].mxu0 }
 0x2f0   : > { %v5294_v0 = vpack.c.bf16 %v2055_v52, %v2055_v52  ;;  %v2059_v30 = vadd.f32 %v2058_v40, %v8017_v42  ;;  %v2060_v3 = vpop.f32.mrb[3].mxu0 }
 0x2f1   : > { %v5390_v13 = vpack.c.bf16 %v2057_v28, %v2057_v28  ;;  %v2061_v5 = vadd.f32 %v2060_v3, %v8022_v34 }
 0x2f2   : > { %2376 = vmatmul.mubr.bf16.gmra.mrb[84].mxu1 %v7905_v23  ;;  %2728 = vst.msk [vmem:[%s8032_s6] sm:$0xf] %vm2727_vm0, %v5294_v0  ;;  %v5295_v50 = vpack.c.bf16 %v2059_v30, %v2059_v30  ;;  %3080 = vrot.lane.b32.xlu0 %v5294_v0, %s6198_s11 }
 0x2f3   : > { %2385 = vmatprep.mubr.bf16.mxu1 %v7937_v26  ;;  %5023 = vst.msk [vmem:[%s8032_s6 + $0x100] sm:$0xf] %vm2727_vm0, %v5390_v13  ;;  %v5391_v41 = vpack.c.bf16 %v2061_v5, %v2061_v5 }
 0x2f4   : > { %2729 = vst.msk [vmem:[%s8032_s6 + $0x4] sm:$0xf] %vm2727_vm0, %v5295_v50  ;;  %3082 = vrot.lane.b32.xlu1 %v5295_v50, %s6198_s11 }
 0x2f5   : > { %5024 = vst.msk [vmem:[%s8032_s6 + $0x104] sm:$0xf] %vm2727_vm0, %v5391_v41 }
 0x2f6   : > { %2579 = vmatmul.mubr.bf16.gmra.mrb[88].mxu0 %v7939_v38 }
 0x2f7   : > { %2588 = vmatprep.mubr.bf16.mxu0 %v7953_v60 }
 0x2fa   : > { %2386 = vmatmul.mubr.bf16.gmra.mrb[88].mxu1 %v7939_v38 }
 0x2fb   : > { %2395 = vmatprep.mubr.bf16.mxu1 %v7953_v60 }
 0x2fe   : > { %2589 = vmatmul.mubr.bf16.gmra.mrb[92].mxu0 %v7955_v21 }
 0x302   : > { %2396 = vmatmul.mubr.bf16.gmra.mrb[92].mxu1 %v7955_v21 }
 0x303   : > { %v2134_v9 = vpop.f32.mrb[0].mxu1 }
 0x304   : > { %v2135_v61 = vadd.f32 %v2134_v9, %v8017_v42  ;;  %v2136_v31 = vpop.f32.mrb[1].mxu1 }
 0x305   : > { %v2137_v62 = vadd.f32 %v2136_v31, %v8022_v34  ;;  %v2138_v27 = vpop.f32.mrb[2].mxu1 }
 0x306   : > { %v5310_v22 = vpack.c.bf16 %v2135_v61, %v2135_v61  ;;  %v2139_v23 = vadd.f32 %v2138_v27, %v8017_v42  ;;  %v2140_v6 = vpop.f32.mrb[3].mxu1 }
 0x307   : > { %v5406_v44 = vpack.c.bf16 %v2137_v62, %v2137_v62  ;;  %v2141_v54 = vadd.f32 %v2140_v6, %v8022_v34 }
 0x308   : > { %2744 = vst.msk [vmem:[%s8032_s6 + $0x40] sm:$0xf] %vm2727_vm0, %v5310_v22  ;;  %v5311_v2 = vpack.c.bf16 %v2139_v23, %v2139_v23  ;;  %3112 = vrot.lane.b32.xlu0 %v5310_v22, %s6198_s11 }
 0x309   : > { %5039 = vst.msk [vmem:[%s8032_s6 + $0x140] sm:$0xf] %vm2727_vm0, %v5406_v44  ;;  %v5407_v33 = vpack.c.bf16 %v2141_v54, %v2141_v54 }
 0x30a   : > { %2745 = vst.msk [vmem:[%s8032_s6 + $0x44] sm:$0xf] %vm2727_vm0, %v5311_v2  ;;  %3114 = vrot.lane.b32.xlu1 %v5311_v2, %s6198_s11 }
 0x30b   : > { %v2064_v14 = vpop.f32.mrb[4].mxu0  ;;  %5040 = vst.msk [vmem:[%s8032_s6 + $0x144] sm:$0xf] %vm2727_vm0, %v5407_v33 }
 0x30c   : > { %v2065_v58 = vadd.f32 %v2064_v14, %v8017_v42  ;;  %v2066_v36 = vpop.f32.mrb[5].mxu0  ;;  %3950 = vrot.lane.b32.xlu0 %v5390_v13, %s6198_s11 }
 0x30d   : > { %v2067_v63 = vadd.f32 %v2066_v36, %v8022_v34  ;;  %v2068_v56 = vpop.f32.mrb[6].mxu0 }
 0x30e   : > { %v5296_v10 = vpack.c.bf16 %v2065_v58, %v2065_v58  ;;  %v2069_v59 = vadd.f32 %v2068_v56, %v8017_v42  ;;  %v2070_v8 = vpop.f32.mrb[7].mxu0  ;;  %3952 = vrot.lane.b32.xlu1 %v5391_v41, %s6198_s11 }
 0x30f   : > { %v5392_v51 = vpack.c.bf16 %v2067_v63, %v2067_v63  ;;  %v2071_v11 = vadd.f32 %v2070_v8, %v8022_v34 }
 0x310   : > { %2730 = vst.msk [vmem:[%s8032_s6 + $0x8] sm:$0xf] %vm2727_vm0, %v5296_v10  ;;  %v5297_v37 = vpack.c.bf16 %v2069_v59, %v2069_v59  ;;  %3982 = vrot.lane.b32.xlu0 %v5406_v44, %s6198_s11 }
 0x311   : > { %5025 = vst.msk [vmem:[%s8032_s6 + $0x108] sm:$0xf] %vm2727_vm0, %v5392_v51  ;;  %v5393_v35 = vpack.c.bf16 %v2071_v11, %v2071_v11  ;;  %v2144_v32 = vpop.f32.mrb[4].mxu1 }
 0x312   : > { %2731 = vst.msk [vmem:[%s8032_s6 + $0xc] sm:$0xf] %vm2727_vm0, %v5297_v37  ;;  %v2145_v7 = vadd.f32 %v2144_v32, %v8017_v42  ;;  %v2146_v19 = vpop.f32.mrb[5].mxu1  ;;  %3984 = vrot.lane.b32.xlu1 %v5407_v33, %s6198_s11 }
 0x313   : > { %5026 = vst.msk [vmem:[%s8032_s6 + $0x10c] sm:$0xf] %vm2727_vm0, %v5393_v35  ;;  %v2147_v26 = vadd.f32 %v2146_v19, %v8022_v34  ;;  %v2148_v38 = vpop.f32.mrb[6].mxu1 }
 0x314   : > { %v5312_v12 = vpack.c.bf16 %v2145_v7, %v2145_v7  ;;  %v2149_v1 = vadd.f32 %v2148_v38, %v8017_v42  ;;  %v2150_v4 = vpop.f32.mrb[7].mxu1 }
 0x315   : > { %v5408_v55 = vpack.c.bf16 %v2147_v26, %v2147_v26  ;;  %v2151_v39 = vadd.f32 %v2150_v4, %v8022_v34 }
 0x316   : > { %2746 = vst.msk [vmem:[%s8032_s6 + $0x48] sm:$0xf] %vm2727_vm0, %v5312_v12  ;;  %v5313_v18 = vpack.c.bf16 %v2149_v1, %v2149_v1  ;;  %3116 = vrot.lane.b32.xlu0 %v5312_v12, %s6198_s11  ;;  %3084 = vrot.lane.b32.xlu1 %v5296_v10, %s6198_s11 }
 0x317   : > { %5041 = vst.msk [vmem:[%s8032_s6 + $0x148] sm:$0xf] %vm2727_vm0, %v5408_v55  ;;  %v5409_v17 = vpack.c.bf16 %v2151_v39, %v2151_v39 }
 0x318   : > { %2747 = vst.msk [vmem:[%s8032_s6 + $0x4c] sm:$0xf] %vm2727_vm0, %v5313_v18 }
 0x319   : > { %5042 = vst.msk [vmem:[%s8032_s6 + $0x14c] sm:$0xf] %vm2727_vm0, %v5409_v17 }
 0x31a   : > { %3954 = vrot.lane.b32.xlu0 %v5392_v51, %s6198_s11  ;;  %3086 = vrot.lane.b32.xlu1 %v5297_v37, %s6198_s11 }
 0x31b   : > { %v2074_v16 = vpop.f32.mrb[8].mxu0 }
 0x31c   : > { %v2075_v53 = vadd.f32 %v2074_v16, %v8017_v42  ;;  %v2076_v20 = vpop.f32.mrb[9].mxu0 }
 0x31d   : > { %v2077_v46 = vadd.f32 %v2076_v20, %v8022_v34  ;;  %v2078_v25 = vpop.f32.mrb[10].mxu0 }
 0x31e   : > { %v5298_v45 = vpack.c.bf16 %v2075_v53, %v2075_v53  ;;  %v2079_v15 = vadd.f32 %v2078_v25, %v8017_v42  ;;  %v2080_v60 = vpop.f32.mrb[11].mxu0  ;;  %3986 = vrot.lane.b32.xlu0 %v5408_v55, %s6198_s11  ;;  %3118 = vrot.lane.b32.xlu1 %v5313_v18, %s6198_s11 }
 0x31f   : > { %v5394_v21 = vpack.c.bf16 %v2077_v46, %v2077_v46  ;;  %v2081_v47 = vadd.f32 %v2080_v60, %v8022_v34 }
 0x320   : > { %2732 = vst.msk [vmem:[%s8032_s6 + $0x10] sm:$0xf] %vm2727_vm0, %v5298_v45  ;;  %v5299_v29 = vpack.c.bf16 %v2079_v15, %v2079_v15 }
 0x321   : > { %5027 = vst.msk [vmem:[%s8032_s6 + $0x110] sm:$0xf] %vm2727_vm0, %v5394_v21  ;;  %v8101_v49 = vpack.c.bf16 %v2081_v47, %v2081_v47 }
 0x322   : > { %2733 = vst.msk [vmem:[%s8032_s6 + $0x14] sm:$0xf] %vm2727_vm0, %v5299_v29  ;;  %3088 = vrot.lane.b32.xlu0 %v5298_v45, %s6198_s11  ;;  %3956 = vrot.lane.b32.xlu1 %v5393_v35, %s6198_s11 }
 0x323   : > { %5028 = vst.msk [vmem:[%s8032_s6 + $0x114] sm:$0xf] %vm2727_vm0, %v8101_v49 }
 0x326   : > { %3988 = vrot.lane.b32.xlu1 %v5409_v17, %s6198_s11 }
 0x328   : > { %v2154_v24 = vpop.f32.mrb[8].mxu1 }
 0x329   : > { %v2155_v48 = vadd.f32 %v2154_v24, %v8017_v42  ;;  %v2156_v52 = vpop.f32.mrb[9].mxu1 }
 0x32a   : > { %v2157_v43 = vadd.f32 %v2156_v52, %v8022_v34  ;;  %v2158_v28 = vpop.f32.mrb[10].mxu1  ;;  %3090 = vrot.lane.b32.xlu1 %v5299_v29, %s6198_s11 }
 0x32b   : > { %v5314_v40 = vpack.c.bf16 %v2155_v48, %v2155_v48  ;;  %v2159_v0 = vadd.f32 %v2158_v28, %v8017_v42  ;;  %v2160_v30 = vpop.f32.mrb[11].mxu1  ;;  %v2084_v3 = vpop.f32.mrb[12].mxu0 }
 0x32c   : > { %v5410_v13 = vpack.c.bf16 %v2157_v43, %v2157_v43  ;;  %v2161_v5 = vadd.f32 %v2160_v30, %v8022_v34  ;;  %v2085_v50 = vadd.f32 %v2084_v3, %v8017_v42  ;;  %v2086_v41 = vpop.f32.mrb[13].mxu0 }
 0x32d   : > { %2748 = vst.msk [vmem:[%s8032_s6 + $0x50] sm:$0xf] %vm2727_vm0, %v5314_v40  ;;  %v5315_v9 = vpack.c.bf16 %v2159_v0, %v2159_v0  ;;  %v2087_v61 = vadd.f32 %v2086_v41, %v8022_v34  ;;  %v2088_v31 = vpop.f32.mrb[14].mxu0  ;;  %3120 = vrot.lane.b32.xlu0 %v5314_v40, %s6198_s11 }
 0x32e   : > { %5043 = vst.msk [vmem:[%s8032_s6 + $0x150] sm:$0xf] %vm2727_vm0, %v5410_v13  ;;  %v8123_v62 = vpack.c.bf16 %v2161_v5, %v2161_v5  ;;  %v5300_v27 = vpack.c.bf16 %v2085_v50, %v2085_v50  ;;  %v2089_v22 = vadd.f32 %v2088_v31, %v8017_v42  ;;  %v2090_v23 = vpop.f32.mrb[15].mxu0 }
 0x32f   : > { %2749 = vst.msk [vmem:[%s8032_s6 + $0x54] sm:$0xf] %vm2727_vm0, %v5315_v9  ;;  %v8128_v6 = vpack.c.bf16 %v2087_v61, %v2087_v61  ;;  %v2091_v44 = vadd.f32 %v2090_v23, %v8022_v34  ;;  %3122 = vrot.lane.b32.xlu1 %v5315_v9, %s6198_s11 }
 0x330   : > { %5044 = vst.msk [vmem:[%s8032_s6 + $0x154] sm:$0xf] %vm2727_vm0, %v8123_v62  ;;  %2734 = vst.msk [vmem:[%s8032_s6 + $0x18] sm:$0xf] %vm2727_vm0, %v5300_v27  ;;  %v8136_v54 = vpack.c.bf16 %v2089_v22, %v2089_v22 }
 0x331   : > { %v2164_v2 = vpop.f32.mrb[12].mxu1  ;;  %5029 = vst.msk [vmem:[%s8032_s6 + $0x118] sm:$0xf] %vm2727_vm0, %v8128_v6  ;;  %v8142_v33 = vpack.c.bf16 %v2091_v44, %v2091_v44  ;;  %3958 = vrot.lane.b32.xlu0 %v5394_v21, %s6198_s11 }
 0x332   : > { %v2165_v14 = vadd.f32 %v2164_v2, %v8017_v42  ;;  %v2166_v58 = vpop.f32.mrb[13].mxu1  ;;  %2735 = vst.msk [vmem:[%s8032_s6 + $0x1c] sm:$0xf] %vm2727_vm0, %v8136_v54 }
 0x333   : > { %v2167_v36 = vadd.f32 %v2166_v58, %v8022_v34  ;;  %v2168_v63 = vpop.f32.mrb[14].mxu1  ;;  %5030 = vst.msk [vmem:[%s8032_s6 + $0x11c] sm:$0xf] %vm2727_vm0, %v8142_v33  ;;  %v2094_v8 = vpop.f32.mrb[16].mxu0  ;;  %3960 = vrot.lane.b32.xlu1 %v8101_v49, %s6198_s11 }
 0x334   : > { %v5316_v56 = vpack.c.bf16 %v2165_v14, %v2165_v14  ;;  %v2169_v10 = vadd.f32 %v2168_v63, %v8017_v42  ;;  %v2170_v59 = vpop.f32.mrb[15].mxu1  ;;  %v2095_v37 = vadd.f32 %v2094_v8, %v8017_v42  ;;  %v2096_v35 = vpop.f32.mrb[17].mxu0 }
 0x335   : > { %v8154_v51 = vpack.c.bf16 %v2167_v36, %v2167_v36  ;;  %v2171_v11 = vadd.f32 %v2170_v59, %v8022_v34  ;;  %v2097_v7 = vadd.f32 %v2096_v35, %v8022_v34  ;;  %v2098_v19 = vpop.f32.mrb[18].mxu0  ;;  %3990 = vrot.lane.b32.xlu0 %v5410_v13, %s6198_s11 }
 0x336   : > { %2750 = vst.msk [vmem:[%s8032_s6 + $0x58] sm:$0xf] %vm2727_vm0, %v5316_v56  ;;  %v5317_v32 = vpack.c.bf16 %v2169_v10, %v2169_v10  ;;  %v8168_v38 = vpack.c.bf16 %v2095_v37, %v2095_v37  ;;  %v2099_v12 = vadd.f32 %v2098_v19, %v8017_v42  ;;  %v2100_v1 = vpop.f32.mrb[19].mxu0 }
 0x337   : > { %5045 = vst.msk [vmem:[%s8032_s6 + $0x158] sm:$0xf] %vm2727_vm0, %v8154_v51  ;;  %v8166_v26 = vpack.c.bf16 %v2171_v11, %v2171_v11  ;;  %v8173_v4 = vpack.c.bf16 %v2097_v7, %v2097_v7  ;;  %v2101_v55 = vadd.f32 %v2100_v1, %v8022_v34  ;;  %3992 = vrot.lane.b32.xlu1 %v8123_v62, %s6198_s11 }
 0x338   : > { %2751 = vst.msk [vmem:[%s8032_s6 + $0x5c] sm:$0xf] %vm2727_vm0, %v5317_v32  ;;  %2736 = vst.msk [vmem:[%s8032_s6 + $0x20] sm:$0xf] %vm2727_vm0, %v8168_v38  ;;  %v8182_v39 = vpack.c.bf16 %v2099_v12, %v2099_v12 }
 0x339   : > { %5046 = vst.msk [vmem:[%s8032_s6 + $0x15c] sm:$0xf] %vm2727_vm0, %v8166_v26  ;;  %v2174_v18 = vpop.f32.mrb[16].mxu1  ;;  %5031 = vst.msk [vmem:[%s8032_s6 + $0x120] sm:$0xf] %vm2727_vm0, %v8173_v4  ;;  %v8189_v17 = vpack.c.bf16 %v2101_v55, %v2101_v55  ;;  %3092 = vrot.lane.b32.xlu0 %v5300_v27, %s6198_s11 }
 0x33a   : > { %v2175_v16 = vadd.f32 %v2174_v18, %v8017_v42  ;;  %v2176_v53 = vpop.f32.mrb[17].mxu1  ;;  %2737 = vst.msk [vmem:[%s8032_s6 + $0x24] sm:$0xf] %vm2727_vm0, %v8182_v39 }
 0x33b   : > { %v2177_v20 = vadd.f32 %v2176_v53, %v8022_v34  ;;  %v2178_v46 = vpop.f32.mrb[18].mxu1  ;;  %5032 = vst.msk [vmem:[%s8032_s6 + $0x124] sm:$0xf] %vm2727_vm0, %v8189_v17  ;;  %v2104_v60 = vpop.f32.mrb[20].mxu0  ;;  %3094 = vrot.lane.b32.xlu1 %v8136_v54, %s6198_s11 }
 0x33c   : > { %v8200_v25 = vpack.c.bf16 %v2175_v16, %v2175_v16  ;;  %v2179_v45 = vadd.f32 %v2178_v46, %v8017_v42  ;;  %v2180_v15 = vpop.f32.mrb[19].mxu1  ;;  %v2105_v29 = vadd.f32 %v2104_v60, %v8017_v42  ;;  %v2106_v49 = vpop.f32.mrb[21].mxu0 }
 0x33d   : > { %v8203_v21 = vpack.c.bf16 %v2177_v20, %v2177_v20  ;;  %v2181_v47 = vadd.f32 %v2180_v15, %v8022_v34  ;;  %v2107_v48 = vadd.f32 %v2106_v49, %v8022_v34  ;;  %v2108_v52 = vpop.f32.mrb[22].mxu0  ;;  %3124 = vrot.lane.b32.xlu0 %v5316_v56, %s6198_s11 }
 0x33e   : > { %2752 = vst.msk [vmem:[%s8032_s6 + $0x60] sm:$0xf] %vm2727_vm0, %v8200_v25  ;;  %v8212_v24 = vpack.c.bf16 %v2179_v45, %v2179_v45  ;;  %v8221_v28 = vpack.c.bf16 %v2105_v29, %v2105_v29  ;;  %v2109_v40 = vadd.f32 %v2108_v52, %v8017_v42  ;;  %v2110_v0 = vpop.f32.mrb[23].mxu0 }
 0x33f   : > { %5047 = vst.msk [vmem:[%s8032_s6 + $0x160] sm:$0xf] %vm2727_vm0, %v8203_v21  ;;  %v8219_v43 = vpack.c.bf16 %v2181_v47, %v2181_v47  ;;  %v8227_v30 = vpack.c.bf16 %v2107_v48, %v2107_v48  ;;  %v2111_v3 = vadd.f32 %v2110_v0, %v8022_v34  ;;  %3126 = vrot.lane.b32.xlu1 %v5317_v32, %s6198_s11 }
 0x340   : > { %2753 = vst.msk [vmem:[%s8032_s6 + $0x64] sm:$0xf] %vm2727_vm0, %v8212_v24  ;;  %2738 = vst.msk [vmem:[%s8032_s6 + $0x28] sm:$0xf] %vm2727_vm0, %v8221_v28  ;;  %v8236_v13 = vpack.c.bf16 %v2109_v40, %v2109_v40 }
 0x341   : > { %5048 = vst.msk [vmem:[%s8032_s6 + $0x164] sm:$0xf] %vm2727_vm0, %v8219_v43  ;;  %5033 = vst.msk [vmem:[%s8032_s6 + $0x128] sm:$0xf] %vm2727_vm0, %v8227_v30  ;;  %v8243_v5 = vpack.c.bf16 %v2111_v3, %v2111_v3  ;;  %3962 = vrot.lane.b32.xlu0 %v8128_v6, %s6198_s11 }
 0x342   : > { %2739 = vst.msk [vmem:[%s8032_s6 + $0x2c] sm:$0xf] %vm2727_vm0, %v8236_v13 }
 0x343   : > { %5034 = vst.msk [vmem:[%s8032_s6 + $0x12c] sm:$0xf] %vm2727_vm0, %v8243_v5  ;;  %3964 = vrot.lane.b32.xlu1 %v8142_v33, %s6198_s11 }
 0x344   : > { %v2184_v50 = vpop.f32.mrb[20].mxu1 }
 0x345   : > { %v2185_v41 = vadd.f32 %v2184_v50, %v8017_v42  ;;  %v2186_v9 = vpop.f32.mrb[21].mxu1  ;;  %3994 = vrot.lane.b32.xlu0 %v8154_v51, %s6198_s11 }
 0x346   : > { %v2187_v61 = vadd.f32 %v2186_v9, %v8022_v34  ;;  %v2188_v31 = vpop.f32.mrb[22].mxu1 }
 0x347   : > { %v8256_v62 = vpack.c.bf16 %v2185_v41, %v2185_v41  ;;  %v2189_v27 = vadd.f32 %v2188_v31, %v8017_v42  ;;  %v2190_v22 = vpop.f32.mrb[23].mxu1  ;;  %3996 = vrot.lane.b32.xlu1 %v8166_v26, %s6198_s11 }
 0x348   : > { %v8261_v23 = vpack.c.bf16 %v2187_v61, %v2187_v61  ;;  %v2191_v6 = vadd.f32 %v2190_v22, %v8022_v34 }
 0x349   : > { %2754 = vst.msk [vmem:[%s8032_s6 + $0x68] sm:$0xf] %vm2727_vm0, %v8256_v62  ;;  %v8267_v44 = vpack.c.bf16 %v2189_v27, %v2189_v27  ;;  %v2114_v54 = vpop.f32.mrb[24].mxu0  ;;  %3096 = vrot.lane.b32.xlu0 %v8168_v38, %s6198_s11 }
 0x34a   : > { %5049 = vst.msk [vmem:[%s8032_s6 + $0x168] sm:$0xf] %vm2727_vm0, %v8261_v23  ;;  %v8272_v2 = vpack.c.bf16 %v2191_v6, %v2191_v6  ;;  %v2115_v14 = vadd.f32 %v2114_v54, %v8017_v42  ;;  %v2116_v58 = vpop.f32.mrb[25].mxu0 }
 0x34b   : > { %2755 = vst.msk [vmem:[%s8032_s6 + $0x6c] sm:$0xf] %vm2727_vm0, %v8267_v44  ;;  %v2117_v36 = vadd.f32 %v2116_v58, %v8022_v34  ;;  %v2118_v63 = vpop.f32.mrb[26].mxu0  ;;  %3098 = vrot.lane.b32.xlu1 %v8182_v39, %s6198_s11 }
 0x34c   : > { %5050 = vst.msk [vmem:[%s8032_s6 + $0x16c] sm:$0xf] %vm2727_vm0, %v8272_v2  ;;  %v8286_v56 = vpack.c.bf16 %v2115_v14, %v2115_v14  ;;  %v2119_v10 = vadd.f32 %v2118_v63, %v8017_v42  ;;  %v2120_v59 = vpop.f32.mrb[27].mxu0 }
 0x34d   : > { %v2194_v8 = vpop.f32.mrb[24].mxu1  ;;  %v8289_v33 = vpack.c.bf16 %v2117_v36, %v2117_v36  ;;  %v2121_v51 = vadd.f32 %v2120_v59, %v8022_v34  ;;  %3128 = vrot.lane.b32.xlu0 %v8200_v25, %s6198_s11  ;;  %v10262_v25 = vld [vmem:[#allocation49_spill] sm:$0xff] }
 0x34e   : > { %v2195_v11 = vadd.f32 %v2194_v8, %v8017_v42  ;;  %v2196_v37 = vpop.f32.mrb[25].mxu1  ;;  %2740 = vst.msk [vmem:[%s8032_s6 + $0x30] sm:$0xf] %vm2727_vm0, %v8286_v56  ;;  %v8296_v35 = vpack.c.bf16 %v2119_v10, %v2119_v10  ;;  %v1528_v45 = vsub.s32 4, %v10262_v25  ;;  %v1532_v47 = vsub.s32 5, %v10262_v25 }
 0x34f   : > { %v2197_v32 = vadd.f32 %v2196_v37, %v8022_v34  ;;  %v2198_v7 = vpop.f32.mrb[26].mxu1  ;;  %5035 = vst.msk [vmem:[%s8032_s6 + $0x130] sm:$0xf] %vm2727_vm0, %v8289_v33  ;;  %v8304_v19 = vpack.c.bf16 %v2121_v51, %v2121_v51  ;;  %v1524_v31 = vsub.s32 3, %v10262_v25  ;;  %3130 = vrot.lane.b32.xlu1 %v8212_v24, %s6198_s11 }
 0x350   : > { %v8306_v38 = vpack.c.bf16 %v2195_v11, %v2195_v11  ;;  %v2199_v12 = vadd.f32 %v2198_v7, %v8017_v42  ;;  %v2200_v1 = vpop.f32.mrb[27].mxu1  ;;  %2741 = vst.msk [vmem:[%s8032_s6 + $0x34] sm:$0xf] %vm2727_vm0, %v8296_v35  ;;  %v8359_v61 = vrot.slane %v8013_v57, %v1528_v45  ;;  %v8373_v14 = vrot.slane %v8013_v57, %v1532_v47 }
 0x351   : > { %v8314_v55 = vpack.c.bf16 %v2197_v32, %v2197_v32  ;;  %v2201_v26 = vadd.f32 %v2200_v1, %v8022_v34  ;;  %5036 = vst.msk [vmem:[%s8032_s6 + $0x134] sm:$0xf] %vm2727_vm0, %v8304_v19  ;;  %v2124_v16 = vpop.f32.mrb[28].mxu0  ;;  %3966 = vrot.lane.b32.xlu0 %v8173_v4, %s6198_s11  ;;  %v1520_v4 = vsub.s32 2, %v10262_v25  ;;  %v8401_v59 = vrot.slane %v8013_v57, %v1524_v31 }
 0x352   : > { %2756 = vst.msk [vmem:[%s8032_s6 + $0x70] sm:$0xf] %vm2727_vm0, %v8306_v38  ;;  %v8323_v18 = vpack.c.bf16 %v2199_v12, %v2199_v12  ;;  %v2125_v20 = vadd.f32 %v2124_v16, %v8017_v42  ;;  %v2126_v46 = vpop.f32.mrb[29].mxu0 }
 0x353   : > { %5051 = vst.msk [vmem:[%s8032_s6 + $0x170] sm:$0xf] %vm2727_vm0, %v8314_v55  ;;  %v8328_v53 = vpack.c.bf16 %v2201_v26, %v2201_v26  ;;  %v2127_v15 = vadd.f32 %v2126_v46, %v8022_v34  ;;  %v2128_v60 = vpop.f32.mrb[30].mxu0  ;;  %v8392_v63 = vrot.slane %v8013_v57, %v1520_v4  ;;  %3968 = vrot.lane.b32.xlu1 %v8189_v17, %s6198_s11 }
 0x354   : > { %2757 = vst.msk [vmem:[%s8032_s6 + $0x74] sm:$0xf] %vm2727_vm0, %v8323_v18  ;;  %v8344_v29 = vpack.c.bf16 %v2125_v20, %v2125_v20  ;;  %v2129_v39 = vadd.f32 %v2128_v60, %v8017_v42  ;;  %v2130_v49 = vpop.f32.mrb[31].mxu0 }
 0x355   : > { %5052 = vst.msk [vmem:[%s8032_s6 + $0x174] sm:$0xf] %vm2727_vm0, %v8328_v53  ;;  %v2204_v48 = vpop.f32.mrb[28].mxu1  ;;  %v8347_v52 = vpack.c.bf16 %v2127_v15, %v2127_v15  ;;  %v2131_v40 = vadd.f32 %v2130_v49, %v8022_v34  ;;  %3998 = vrot.lane.b32.xlu0 %v8203_v21, %s6198_s11 }
 0x356   : > { %v2205_v0 = vadd.f32 %v2204_v48, %v8017_v42  ;;  %v2206_v3 = vpop.f32.mrb[29].mxu1  ;;  %2742 = vst.msk [vmem:[%s8032_s6 + $0x38] sm:$0xf] %vm2727_vm0, %v8344_v29  ;;  %v8355_v50 = vpack.c.bf16 %v2129_v39, %v2129_v39 }
 0x357   : > { %v2207_v41 = vadd.f32 %v2206_v3, %v8022_v34  ;;  %v2208_v9 = vpop.f32.mrb[30].mxu1  ;;  %5037 = vst.msk [vmem:[%s8032_s6 + $0x138] sm:$0xf] %vm2727_vm0, %v8347_v52  ;;  %v8367_v27 = vpack.c.bf16 %v2131_v40, %v2131_v40  ;;  %4000 = vrot.lane.b32.xlu1 %v8219_v43, %s6198_s11 }
 0x358   : > { %v8369_v22 = vpack.c.bf16 %v2205_v0, %v2205_v0  ;;  %v2209_v6 = vadd.f32 %v2208_v9, %v8017_v42  ;;  %v2210_v54 = vpop.f32.mrb[31].mxu1  ;;  %2743 = vst.msk [vmem:[%s8032_s6 + $0x3c] sm:$0xf] %vm2727_vm0, %v8355_v50 }
 0x359   : > { %v8380_v24 = vpack.c.bf16 %v2207_v41, %v2207_v41  ;;  %v2211_v58 = vadd.f32 %v2210_v54, %v8022_v34  ;;  %5038 = vst.msk [vmem:[%s8032_s6 + $0x13c] sm:$0xf] %vm2727_vm0, %v8367_v27  ;;  %v2440_v36 = vpop.f32.mrb[32].mxu0  ;;  %3100 = vrot.lane.b32.xlu0 %v8221_v28, %s6198_s11 }
 0x35a   : > { %2758 = vst.msk [vmem:[%s8032_s6 + $0x78] sm:$0xf] %vm2727_vm0, %v8369_v22  ;;  %v8389_v42 = vpack.c.bf16 %v2209_v6, %v2209_v6  ;;  %v2441_v34 = vadd.f32 %v2440_v36, %v8359_v61  ;;  %v2442_v10 = vpop.f32.mrb[33].mxu0 }
 0x35b   : > { %5053 = vst.msk [vmem:[%s8032_s6 + $0x178] sm:$0xf] %vm2727_vm0, %v8380_v24  ;;  %v8397_v21 = vpack.c.bf16 %v2211_v58, %v2211_v58  ;;  %v2443_v8 = vadd.f32 %v2442_v10, %v8373_v14  ;;  %v2444_v51 = vpop.f32.mrb[34].mxu0  ;;  %3102 = vrot.lane.b32.xlu1 %v8236_v13, %s6198_s11 }
 0x35c   : > { %2759 = vst.msk [vmem:[%s8032_s6 + $0x7c] sm:$0xf] %vm2727_vm0, %v8389_v42  ;;  %v8414_v11 = vpack.c.bf16 %v2441_v34, %v2441_v34  ;;  %v2445_v57 = vadd.f32 %v2444_v51, %v8359_v61  ;;  %v2446_v37 = vpop.f32.mrb[35].mxu0 }
 0x35d   : > { %5054 = vst.msk [vmem:[%s8032_s6 + $0x17c] sm:$0xf] %vm2727_vm0, %v8397_v21  ;;  %v2247_v32 = vpop.f32.mrb[32].mxu1  ;;  %v8417_v7 = vpack.c.bf16 %v2443_v8, %v2443_v8  ;;  %v2447_v17 = vadd.f32 %v2446_v37, %v8373_v14  ;;  %3132 = vrot.lane.b32.xlu0 %v8256_v62, %s6198_s11 }
 0x35e   : > { %v2248_v12 = vadd.f32 %v2247_v32, %v8392_v63  ;;  %v2249_v1 = vpop.f32.mrb[33].mxu1  ;;  %3048 = vst.msk [vmem:[%s8422_s13] sm:$0xf] %vm2727_vm0, %v8414_v11  ;;  %v8427_v28 = vpack.c.bf16 %v2445_v57, %v2445_v57 }
 0x35f   : > { %v2250_v26 = vadd.f32 %v2249_v1, %v8401_v59  ;;  %v2251_v16 = vpop.f32.mrb[34].mxu1  ;;  %5151 = vst.msk [vmem:[%s8422_s13 + $0x100] sm:$0xf] %vm2727_vm0, %v8417_v7  ;;  %v8435_v20 = vpack.c.bf16 %v2447_v17, %v2447_v17  ;;  %3134 = vrot.lane.b32.xlu1 %v8267_v44, %s6198_s11 }
 0x360   : > { %v8437_v46 = vpack.c.bf16 %v2248_v12, %v2248_v12  ;;  %v2252_v25 = vadd.f32 %v2251_v16, %v8392_v63  ;;  %v2253_v45 = vpop.f32.mrb[35].mxu1  ;;  %3049 = vst.msk [vmem:[%s8422_s13 + $0x4] sm:$0xf] %vm2727_vm0, %v8427_v28 }
 0x361   : > { %v8445_v15 = vpack.c.bf16 %v2250_v26, %v2250_v26  ;;  %v2254_v43 = vadd.f32 %v2253_v45, %v8401_v59  ;;  %5152 = vst.msk [vmem:[%s8422_s13 + $0x104] sm:$0xf] %vm2727_vm0, %v8435_v20  ;;  %v2450_v60 = vpop.f32.mrb[36].mxu0  ;;  %3970 = vrot.lane.b32.xlu0 %v8227_v30, %s6198_s11 }
 0x362   : > { %2888 = vst.msk [vmem:[%s8452_s17] sm:$0xf] %vm2727_vm0, %v8437_v46  ;;  %v8457_v62 = vpack.c.bf16 %v2252_v25, %v2252_v25  ;;  %v2451_v39 = vadd.f32 %v2450_v60, %v8359_v61  ;;  %v2452_v49 = vpop.f32.mrb[37].mxu0 }
 0x363   : > { %5087 = vst.msk [vmem:[%s8452_s17 + $0x100] sm:$0xf] %vm2727_vm0, %v8445_v15  ;;  %v8462_v47 = vpack.c.bf16 %v2254_v43, %v2254_v43  ;;  %v2453_v48 = vadd.f32 %v2452_v49, %v8373_v14  ;;  %v2454_v40 = vpop.f32.mrb[38].mxu0  ;;  %3972 = vrot.lane.b32.xlu1 %v8243_v5, %s6198_s11 }
 0x364   : > { %2889 = vst.msk [vmem:[%s8452_s17 + $0x4] sm:$0xf] %vm2727_vm0, %v8457_v62  ;;  %v8476_v0 = vpack.c.bf16 %v2451_v39, %v2451_v39  ;;  %v2455_v3 = vadd.f32 %v2454_v40, %v8359_v61  ;;  %v2456_v4 = vpop.f32.mrb[39].mxu0 }
 0x365   : > { %5088 = vst.msk [vmem:[%s8452_s17 + $0x104] sm:$0xf] %vm2727_vm0, %v8462_v47  ;;  %v2257_v41 = vpop.f32.mrb[36].mxu1  ;;  %v8479_v13 = vpack.c.bf16 %v2453_v48, %v2453_v48  ;;  %v2457_v9 = vadd.f32 %v2456_v4, %v8373_v14  ;;  %4002 = vrot.lane.b32.xlu0 %v8261_v23, %s6198_s11 }
 0x366   : > { %v2258_v31 = vadd.f32 %v2257_v41, %v8392_v63  ;;  %v2259_v6 = vpop.f32.mrb[37].mxu1  ;;  %3050 = vst.msk [vmem:[%s8422_s13 + $0x8] sm:$0xf] %vm2727_vm0, %v8476_v0  ;;  %v8486_v30 = vpack.c.bf16 %v2455_v3, %v2455_v3 }
 0x367   : > { %v2260_v54 = vadd.f32 %v2259_v6, %v8401_v59  ;;  %v2261_v58 = vpop.f32.mrb[38].mxu1  ;;  %5153 = vst.msk [vmem:[%s8422_s13 + $0x108] sm:$0xf] %vm2727_vm0, %v8479_v13  ;;  %v8494_v36 = vpack.c.bf16 %v2457_v9, %v2457_v9  ;;  %4004 = vrot.lane.b32.xlu1 %v8272_v2, %s6198_s11  ;;  %v3081_v9 = vpop.permute.xlu0 %3080 }
 0x368   : > { %v8496_v34 = vpack.c.bf16 %v2258_v31, %v2258_v31  ;;  %v2262_v10 = vadd.f32 %v2261_v58, %v8392_v63  ;;  %v2263_v8 = vpop.f32.mrb[39].mxu1  ;;  %3051 = vst.msk [vmem:[%s8422_s13 + $0xc] sm:$0xf] %vm2727_vm0, %v8486_v30  ;;  %4895 = vst.msk [vmem:[%s8032_s6 + $0x80] sm:$0xf] %vm2727_vm0, %v3081_v9 }
 0x369   : > { %v8504_v51 = vpack.c.bf16 %v2260_v54, %v2260_v54  ;;  %v2264_v44 = vadd.f32 %v2263_v8, %v8401_v59  ;;  %5154 = vst.msk [vmem:[%s8422_s13 + $0x10c] sm:$0xf] %vm2727_vm0, %v8494_v36  ;;  %v2460_v37 = vpop.f32.mrb[40].mxu0  ;;  %3104 = vrot.lane.b32.xlu0 %v8286_v56, %s6198_s11  ;;  %v3083_v54 = vpop.permute.xlu1 %3082 }
 0x36a   : > { %2890 = vst.msk [vmem:[%s8452_s17 + $0x8] sm:$0xf] %vm2727_vm0, %v8496_v34  ;;  %v8513_v57 = vpack.c.bf16 %v2262_v10, %v2262_v10  ;;  %v2461_v32 = vadd.f32 %v2460_v37, %v8359_v61  ;;  %v2462_v17 = vpop.f32.mrb[41].mxu0  ;;  %4896 = vst.msk [vmem:[%s8032_s6 + $0x84] sm:$0xf] %vm2727_vm0, %v3083_v54 }
 0x36b   : > { %5089 = vst.msk [vmem:[%s8452_s17 + $0x108] sm:$0xf] %vm2727_vm0, %v8504_v51  ;;  %v8518_v23 = vpack.c.bf16 %v2264_v44, %v2264_v44  ;;  %v2463_v12 = vadd.f32 %v2462_v17, %v8373_v14  ;;  %v2464_v1 = vpop.f32.mrb[42].mxu0  ;;  %3106 = vrot.lane.b32.xlu1 %v8296_v35, %s6198_s11 }
 0x36c   : > { %2891 = vst.msk [vmem:[%s8452_s17 + $0xc] sm:$0xf] %vm2727_vm0, %v8513_v57  ;;  %v8532_v26 = vpack.c.bf16 %v2461_v32, %v2461_v32  ;;  %v2465_v16 = vadd.f32 %v2464_v1, %v8359_v61  ;;  %v2466_v25 = vpop.f32.mrb[43].mxu0 }
 0x36d   : > { %5090 = vst.msk [vmem:[%s8452_s17 + $0x10c] sm:$0xf] %vm2727_vm0, %v8518_v23  ;;  %v2267_v45 = vpop.f32.mrb[40].mxu1  ;;  %v8535_v5 = vpack.c.bf16 %v2463_v12, %v2463_v12  ;;  %v2467_v43 = vadd.f32 %v2466_v25, %v8373_v14  ;;  %3136 = vrot.lane.b32.xlu0 %v8306_v38, %s6198_s11 }
 0x36e   : > { %v2268_v60 = vadd.f32 %v2267_v45, %v8392_v63  ;;  %v2269_v39 = vpop.f32.mrb[41].mxu1  ;;  %3052 = vst.msk [vmem:[%s8422_s13 + $0x10] sm:$0xf] %vm2727_vm0, %v8532_v26  ;;  %v8542_v56 = vpack.c.bf16 %v2465_v16, %v2465_v16 }
 0x36f   : > { %v2270_v49 = vadd.f32 %v2269_v39, %v8401_v59  ;;  %v2271_v48 = vpop.f32.mrb[42].mxu1  ;;  %5155 = vst.msk [vmem:[%s8422_s13 + $0x110] sm:$0xf] %vm2727_vm0, %v8535_v5  ;;  %v8550_v40 = vpack.c.bf16 %v2467_v43, %v2467_v43  ;;  %3138 = vrot.lane.b32.xlu1 %v8323_v18, %s6198_s11 }
 0x370   : > { %v8552_v3 = vpack.c.bf16 %v2268_v60, %v2268_v60  ;;  %v2272_v4 = vadd.f32 %v2271_v48, %v8392_v63  ;;  %v2273_v41 = vpop.f32.mrb[43].mxu1  ;;  %3053 = vst.msk [vmem:[%s8422_s13 + $0x14] sm:$0xf] %vm2727_vm0, %v8542_v56 }
 0x371   : > { %v8560_v2 = vpack.c.bf16 %v2270_v49, %v2270_v49  ;;  %v2274_v31 = vadd.f32 %v2273_v41, %v8401_v59  ;;  %5156 = vst.msk [vmem:[%s8422_s13 + $0x114] sm:$0xf] %vm2727_vm0, %v8550_v40  ;;  %v2470_v6 = vpop.f32.mrb[44].mxu0  ;;  %3974 = vrot.lane.b32.xlu0 %v8289_v33, %s6198_s11 }
 0x372   : > { %2892 = vst.msk [vmem:[%s8452_s17 + $0x10] sm:$0xf] %vm2727_vm0, %v8552_v3  ;;  %v8571_v38 = vpack.c.bf16 %v2272_v4, %v2272_v4  ;;  %v2471_v10 = vadd.f32 %v2470_v6, %v8359_v61  ;;  %v2472_v8 = vpop.f32.mrb[45].mxu0 }
 0x373   : > { %5091 = vst.msk [vmem:[%s8452_s17 + $0x110] sm:$0xf] %vm2727_vm0, %v8560_v2  ;;  %v8576_v58 = vpack.c.bf16 %v2274_v31, %v2274_v31  ;;  %v2473_v44 = vadd.f32 %v2472_v8, %v8373_v14  ;;  %v2474_v37 = vpop.f32.mrb[46].mxu0  ;;  %3976 = vrot.lane.b32.xlu1 %v8304_v19, %s6198_s11 }
 0x374   : > { %2893 = vst.msk [vmem:[%s8452_s17 + $0x14] sm:$0xf] %vm2727_vm0, %v8571_v38  ;;  %v8592_v32 = vpack.c.bf16 %v2471_v10, %v2471_v10  ;;  %v2475_v17 = vadd.f32 %v2474_v37, %v8359_v61  ;;  %v2476_v35 = vpop.f32.mrb[47].mxu0 }
 0x375   : > { %5092 = vst.msk [vmem:[%s8452_s17 + $0x114] sm:$0xf] %vm2727_vm0, %v8576_v58  ;;  %v2277_v12 = vpop.f32.mrb[44].mxu1  ;;  %v8595_v1 = vpack.c.bf16 %v2473_v44, %v2473_v44  ;;  %v2477_v16 = vadd.f32 %v2476_v35, %v8373_v14  ;;  %4006 = vrot.lane.b32.xlu0 %v8314_v55, %s6198_s11 }
 0x376   : > { %v2278_v25 = vadd.f32 %v2277_v12, %v8392_v63  ;;  %v2279_v45 = vpop.f32.mrb[45].mxu1  ;;  %3054 = vst.msk [vmem:[%s8422_s13 + $0x18] sm:$0xf] %vm2727_vm0, %v8592_v32  ;;  %v8602_v33 = vpack.c.bf16 %v2475_v17, %v2475_v17 }
 0x377   : > { %v2280_v43 = vadd.f32 %v2279_v45, %v8401_v59  ;;  %v2281_v60 = vpop.f32.mrb[46].mxu1  ;;  %5157 = vst.msk [vmem:[%s8422_s13 + $0x118] sm:$0xf] %vm2727_vm0, %v8595_v1  ;;  %v8610_v39 = vpack.c.bf16 %v2477_v16, %v2477_v16  ;;  %4008 = vrot.lane.b32.xlu1 %v8328_v53, %s6198_s11 }
 0x378   : > { %v8612_v49 = vpack.c.bf16 %v2278_v25, %v2278_v25  ;;  %v2282_v48 = vadd.f32 %v2281_v60, %v8392_v63  ;;  %v2283_v4 = vpop.f32.mrb[47].mxu1  ;;  %3055 = vst.msk [vmem:[%s8422_s13 + $0x1c] sm:$0xf] %vm2727_vm0, %v8602_v33 }
 0x379   : > { %v8620_v41 = vpack.c.bf16 %v2280_v43, %v2280_v43  ;;  %v2284_v18 = vadd.f32 %v2283_v4, %v8401_v59  ;;  %5158 = vst.msk [vmem:[%s8422_s13 + $0x11c] sm:$0xf] %vm2727_vm0, %v8610_v39  ;;  %v2480_v31 = vpop.f32.mrb[48].mxu0  ;;  %3108 = vrot.lane.b32.xlu0 %v8344_v29, %s6198_s11 }
 0x37a   : > { %2894 = vst.msk [vmem:[%s8452_s17 + $0x18] sm:$0xf] %vm2727_vm0, %v8612_v49  ;;  %v8629_v9 = vpack.c.bf16 %v2282_v48, %v2282_v48  ;;  %v2481_v6 = vadd.f32 %v2480_v31, %v8359_v61  ;;  %v2482_v54 = vpop.f32.mrb[49].mxu0 }
 0x37b   : > { %5093 = vst.msk [vmem:[%s8452_s17 + $0x118] sm:$0xf] %vm2727_vm0, %v8620_v41  ;;  %v8634_v55 = vpack.c.bf16 %v2284_v18, %v2284_v18  ;;  %v2483_v10 = vadd.f32 %v2482_v54, %v8373_v14  ;;  %v2484_v8 = vpop.f32.mrb[50].mxu0  ;;  %3110 = vrot.lane.b32.xlu1 %v8355_v50, %s6198_s11 }
 0x37c   : > { %2895 = vst.msk [vmem:[%s8452_s17 + $0x1c] sm:$0xf] %vm2727_vm0, %v8629_v9  ;;  %v8648_v44 = vpack.c.bf16 %v2481_v6, %v2481_v6  ;;  %v2485_v37 = vadd.f32 %v2484_v8, %v8359_v61  ;;  %v2486_v17 = vpop.f32.mrb[51].mxu0 }
 0x37d   : > { %5094 = vst.msk [vmem:[%s8452_s17 + $0x11c] sm:$0xf] %vm2727_vm0, %v8634_v55  ;;  %v2287_v35 = vpop.f32.mrb[48].mxu1  ;;  %v8651_v19 = vpack.c.bf16 %v2483_v10, %v2483_v10  ;;  %v2487_v12 = vadd.f32 %v2486_v17, %v8373_v14  ;;  %3140 = vrot.lane.b32.xlu0 %v8369_v22, %s6198_s11 }
 0x37e   : > { %v2288_v16 = vadd.f32 %v2287_v35, %v8392_v63  ;;  %v2289_v25 = vpop.f32.mrb[49].mxu1  ;;  %3056 = vst.msk [vmem:[%s8422_s13 + $0x20] sm:$0xf] %vm2727_vm0, %v8648_v44  ;;  %v8658_v29 = vpack.c.bf16 %v2485_v37, %v2485_v37  ;;  %v3113_v37 = vpop.permute.xlu0 %3112 }
 0x37f   : > { %v2290_v45 = vadd.f32 %v2289_v25, %v8401_v59  ;;  %v2291_v43 = vpop.f32.mrb[50].mxu1  ;;  %5159 = vst.msk [vmem:[%s8422_s13 + $0x120] sm:$0xf] %vm2727_vm0, %v8651_v19  ;;  %v8666_v60 = vpack.c.bf16 %v2487_v12, %v2487_v12  ;;  %4911 = vst.msk [vmem:[%s8032_s6 + $0xc0] sm:$0xf] %vm2727_vm0, %v3113_v37  ;;  %3142 = vrot.lane.b32.xlu1 %v8389_v42, %s6198_s11 }
 0x380   : > { %v8668_v48 = vpack.c.bf16 %v2288_v16, %v2288_v16  ;;  %v2292_v4 = vadd.f32 %v2291_v43, %v8392_v63  ;;  %v2293_v18 = vpop.f32.mrb[51].mxu1  ;;  %3057 = vst.msk [vmem:[%s8422_s13 + $0x24] sm:$0xf] %vm2727_vm0, %v8658_v29 }
 0x381   : > { %v8676_v31 = vpack.c.bf16 %v2290_v45, %v2290_v45  ;;  %v2294_v53 = vadd.f32 %v2293_v18, %v8401_v59  ;;  %5160 = vst.msk [vmem:[%s8422_s13 + $0x124] sm:$0xf] %vm2727_vm0, %v8666_v60  ;;  %v2490_v54 = vpop.f32.mrb[52].mxu0  ;;  %3978 = vrot.lane.b32.xlu0 %v8347_v52, %s6198_s11  ;;  %v3115_v18 = vpop.permute.xlu1 %3114 }
 0x382   : > { %2896 = vst.msk [vmem:[%s8452_s17 + $0x20] sm:$0xf] %vm2727_vm0, %v8668_v48  ;;  %v8685_v6 = vpack.c.bf16 %v2292_v4, %v2292_v4  ;;  %v2491_v10 = vadd.f32 %v2490_v54, %v8359_v61  ;;  %v2492_v8 = vpop.f32.mrb[53].mxu0  ;;  %4912 = vst.msk [vmem:[%s8032_s6 + $0xc4] sm:$0xf] %vm2727_vm0, %v3115_v18 }
 0x383   : > { %5095 = vst.msk [vmem:[%s8452_s17 + $0x120] sm:$0xf] %vm2727_vm0, %v8676_v31  ;;  %v8690_v22 = vpack.c.bf16 %v2294_v53, %v2294_v53  ;;  %v2493_v17 = vadd.f32 %v2492_v8, %v8373_v14  ;;  %v2494_v35 = vpop.f32.mrb[54].mxu0  ;;  %v3951_v8 = vpop.permute.xlu0 %3950  ;;  %3980 = vrot.lane.b32.xlu1 %v8367_v27, %s6198_s11 }
 0x384   : > { %2897 = vst.msk [vmem:[%s8452_s17 + $0x24] sm:$0xf] %vm2727_vm0, %v8685_v6  ;;  %v8706_v12 = vpack.c.bf16 %v2491_v10, %v2491_v10  ;;  %v2495_v50 = vadd.f32 %v2494_v35, %v8359_v61  ;;  %v2496_v16 = vpop.f32.mrb[55].mxu0  ;;  %5183 = vst.msk [vmem:[%s8032_s6 + $0x180] sm:$0xf] %vm2727_vm0, %v3951_v8 }
 0x385   : > { %5096 = vst.msk [vmem:[%s8452_s17 + $0x124] sm:$0xf] %vm2727_vm0, %v8690_v22  ;;  %v2297_v25 = vpop.f32.mrb[52].mxu1  ;;  %v8709_v45 = vpack.c.bf16 %v2493_v17, %v2493_v17  ;;  %v2497_v43 = vadd.f32 %v2496_v16, %v8373_v14  ;;  %4010 = vrot.lane.b32.xlu0 %v8380_v24, %s6198_s11 }
 0x386   : > { %v2298_v4 = vadd.f32 %v2297_v25, %v8392_v63  ;;  %v2299_v52 = vpop.f32.mrb[53].mxu1  ;;  %3058 = vst.msk [vmem:[%s8422_s13 + $0x28] sm:$0xf] %vm2727_vm0, %v8706_v12  ;;  %v8716_v53 = vpack.c.bf16 %v2495_v50, %v2495_v50 }
 0x387   : > { %v2300_v54 = vadd.f32 %v2299_v52, %v8401_v59  ;;  %v2301_v10 = vpop.f32.mrb[54].mxu1  ;;  %5161 = vst.msk [vmem:[%s8422_s13 + $0x128] sm:$0xf] %vm2727_vm0, %v8709_v45  ;;  %v8726_v37 = vpack.c.bf16 %v2497_v43, %v2497_v43  ;;  %v3953_v43 = vpop.permute.xlu1 %3952  ;;  %4012 = vrot.lane.b32.xlu1 %v8397_v21, %s6198_s11 }
 0x388   : > { %v8728_v17 = vpack.c.bf16 %v2298_v4, %v2298_v4  ;;  %v2302_v35 = vadd.f32 %v2301_v10, %v8392_v63  ;;  %v2303_v50 = vpop.f32.mrb[55].mxu1  ;;  %3059 = vst.msk [vmem:[%s8422_s13 + $0x2c] sm:$0xf] %vm2727_vm0, %v8716_v53  ;;  %5184 = vst.msk [vmem:[%s8032_s6 + $0x184] sm:$0xf] %vm2727_vm0, %v3953_v43 }
 0x389   : > { %10263 = vst [vmem:[#allocation41_spill] sm:$0xff] %v8726_v37  ;;  %v8738_v42 = vpack.c.bf16 %v2300_v54, %v2300_v54  ;;  %v2304_v16 = vadd.f32 %v2303_v50, %v8401_v59  ;;  %5162 = vst.msk [vmem:[%s8422_s13 + $0x12c] sm:$0xf] %vm2727_vm0, %v8726_v37  ;;  %v2500_v24 = vpop.f32.mrb[56].mxu0  ;;  %v3983_v54 = vpop.permute.xlu0 %3982  ;;  %3209 = vrot.lane.b32.xlu0 %v8437_v46, %s6198_s11 }
 0x38a   : > { %2898 = vst.msk [vmem:[%s8452_s17 + $0x28] sm:$0xf] %vm2727_vm0, %v8728_v17  ;;  %v8747_v25 = vpack.c.bf16 %v2302_v35, %v2302_v35  ;;  %v2501_v52 = vadd.f32 %v2500_v24, %v8359_v61  ;;  %v2502_v18 = vpop.f32.mrb[57].mxu0  ;;  %5199 = vst.msk [vmem:[%s8032_s6 + $0x1c0] sm:$0xf] %vm2727_vm0, %v3983_v54 }
 0x38b   : > { %5097 = vst.msk [vmem:[%s8452_s17 + $0x128] sm:$0xf] %vm2727_vm0, %v8738_v42  ;;  %v8752_v4 = vpack.c.bf16 %v2304_v16, %v2304_v16  ;;  %v2503_v10 = vadd.f32 %v2502_v18, %v8373_v14  ;;  %v2504_v8 = vpop.f32.mrb[58].mxu0  ;;  %v3985_v37 = vpop.permute.xlu1 %3984  ;;  %3211 = vrot.lane.b32.xlu1 %v8457_v62, %s6198_s11 }
 0x38c   : > { %2899 = vst.msk [vmem:[%s8452_s17 + $0x2c] sm:$0xf] %vm2727_vm0, %v8747_v25  ;;  %v8770_v35 = vpack.c.bf16 %v2501_v52, %v2501_v52  ;;  %v2505_v27 = vadd.f32 %v2504_v8, %v8359_v61  ;;  %v2506_v50 = vpop.f32.mrb[59].mxu0  ;;  %5200 = vst.msk [vmem:[%s8032_s6 + $0x1c4] sm:$0xf] %vm2727_vm0, %v3985_v37 }
 0x38d   : > { %5098 = vst.msk [vmem:[%s8452_s17 + $0x12c] sm:$0xf] %vm2727_vm0, %v8752_v4  ;;  %v2307_v16 = vpop.f32.mrb[56].mxu1  ;;  %v8773_v24 = vpack.c.bf16 %v2503_v10, %v2503_v10  ;;  %v2507_v43 = vadd.f32 %v2506_v50, %v8373_v14  ;;  %3338 = vrot.lane.b32.xlu0 %v8414_v11, %s6198_s11 }
 0x38e   : > { %v2308_v18 = vadd.f32 %v2307_v16, %v8392_v63  ;;  %v2309_v46 = vpop.f32.mrb[57].mxu1  ;;  %3060 = vst.msk [vmem:[%s8422_s13 + $0x30] sm:$0xf] %vm2727_vm0, %v8770_v35  ;;  %v8780_v54 = vpack.c.bf16 %v2505_v27, %v2505_v27 }
 0x38f   : > { %10264 = vst [vmem:[#allocation79_spill] sm:$0xff] %v8773_v24  ;;  %v2310_v52 = vadd.f32 %v2309_v46, %v8401_v59  ;;  %v2311_v8 = vpop.f32.mrb[58].mxu1  ;;  %5163 = vst.msk [vmem:[%s8422_s13 + $0x130] sm:$0xf] %vm2727_vm0, %v8773_v24  ;;  %v8790_v10 = vpack.c.bf16 %v2507_v43, %v2507_v43  ;;  %v3117_v46 = vpop.permute.xlu0 %3116  ;;  %3340 = vrot.lane.b32.xlu1 %v8427_v28, %s6198_s11 }
 0x390   : > { %10265 = vst [vmem:[#allocation80_spill] sm:$0xff] %v8780_v54  ;;  %v8792_v50 = vpack.c.bf16 %v2308_v18, %v2308_v18  ;;  %v2312_v27 = vadd.f32 %v2311_v8, %v8392_v63  ;;  %v2313_v16 = vpop.f32.mrb[59].mxu1  ;;  %3061 = vst.msk [vmem:[%s8422_s13 + $0x34] sm:$0xf] %vm2727_vm0, %v8780_v54  ;;  %v3085_v18 = vpop.permute.xlu1 %3084 }
 0x391   : > { %10266 = vst [vmem:[#allocation81_spill] sm:$0xff] %v8790_v10  ;;  %v8800_v21 = vpack.c.bf16 %v2310_v52, %v2310_v52  ;;  %v2314_v37 = vadd.f32 %v2313_v16, %v8401_v59  ;;  %4913 = vst.msk [vmem:[%s8032_s6 + $0xc8] sm:$0xf] %vm2727_vm0, %v3117_v46  ;;  %v2510_v11 = vpop.f32.mrb[60].mxu0  ;;  %4079 = vrot.lane.b32.xlu0 %v8445_v15, %s6198_s11 }
 0x392   : > { %5164 = vst.msk [vmem:[%s8422_s13 + $0x134] sm:$0xf] %vm2727_vm0, %v8790_v10  ;;  %2900 = vst.msk [vmem:[%s8452_s17 + $0x30] sm:$0xf] %vm2727_vm0, %v8792_v50  ;;  %v8811_v43 = vpack.c.bf16 %v2312_v27, %v2312_v27  ;;  %v2511_v8 = vadd.f32 %v2510_v11, %v8359_v61  ;;  %v2512_v16 = vpop.f32.mrb[61].mxu0 }
 0x393   : > { %10267 = vst [vmem:[#allocation43_spill] sm:$0xff] %v8800_v21  ;;  %5099 = vst.msk [vmem:[%s8452_s17 + $0x130] sm:$0xf] %vm2727_vm0, %v8800_v21  ;;  %v8816_v52 = vpack.c.bf16 %v2314_v37, %v2314_v37  ;;  %v2513_v27 = vadd.f32 %v2512_v16, %v8373_v14  ;;  %v2514_v46 = vpop.f32.mrb[62].mxu0  ;;  %v3955_v37 = vpop.permute.xlu0 %3954  ;;  %4081 = vrot.lane.b32.xlu1 %v8462_v47, %s6198_s11 }
 0x394   : > { %4897 = vst.msk [vmem:[%s8032_s6 + $0x88] sm:$0xf] %vm2727_vm0, %v3085_v18  ;;  %2901 = vst.msk [vmem:[%s8452_s17 + $0x34] sm:$0xf] %vm2727_vm0, %v8811_v43  ;;  %v8832_v11 = vpack.c.bf16 %v2511_v8, %v2511_v8  ;;  %v2515_v62 = vadd.f32 %v2514_v46, %v8359_v61  ;;  %v2516_v18 = vpop.f32.mrb[63].mxu0  ;;  %v3087_v21 = vpop.permute.xlu1 %3086 }
 0x395   : > { %5100 = vst.msk [vmem:[%s8452_s17 + $0x134] sm:$0xf] %vm2727_vm0, %v8816_v52  ;;  %v2317_v10 = vpop.f32.mrb[60].mxu1  ;;  %5185 = vst.msk [vmem:[%s8032_s6 + $0x188] sm:$0xf] %vm2727_vm0, %v3955_v37  ;;  %v8837_v24 = vpack.c.bf16 %v2513_v27, %v2513_v27  ;;  %v2517_v16 = vadd.f32 %v2516_v18, %v8373_v14  ;;  %4208 = vrot.lane.b32.xlu0 %v8417_v7, %s6198_s11 }
 0x396   : > { %v2318_v15 = vadd.f32 %v2317_v10, %v8392_v63  ;;  %v2319_v54 = vpop.f32.mrb[61].mxu1  ;;  %3062 = vst.msk [vmem:[%s8422_s13 + $0x38] sm:$0xf] %vm2727_vm0, %v8832_v11  ;;  %v8844_v8 = vpack.c.bf16 %v2515_v62, %v2515_v62  ;;  %4898 = vst.msk [vmem:[%s8032_s6 + $0x8c] sm:$0xf] %vm2727_vm0, %v3087_v21 }
 0x397   : > { %10268 = vst [vmem:[#allocation42_spill] sm:$0xff] %v8837_v24  ;;  %v2320_v46 = vadd.f32 %v2319_v54, %v8401_v59  ;;  %v2321_v37 = vpop.f32.mrb[62].mxu1  ;;  %5165 = vst.msk [vmem:[%s8422_s13 + $0x138] sm:$0xf] %vm2727_vm0, %v8837_v24  ;;  %v8854_v10 = vpack.c.bf16 %v2517_v16, %v2517_v16  ;;  %v3987_v54 = vpop.permute.xlu0 %3986  ;;  %4210 = vrot.lane.b32.xlu1 %v8435_v20, %s6198_s11 }
 0x398   : > { %10269 = vst [vmem:[#allocation45_spill] sm:$0xff] %v8844_v8  ;;  %v8856_v27 = vpack.c.bf16 %v2318_v15, %v2318_v15  ;;  %v2322_v62 = vadd.f32 %v2321_v37, %v8392_v63  ;;  %v2323_v18 = vpop.f32.mrb[63].mxu1  ;;  %3063 = vst.msk [vmem:[%s8422_s13 + $0x3c] sm:$0xf] %vm2727_vm0, %v8844_v8  ;;  %v3119_v15 = vpop.permute.xlu1 %3118 }
 0x399   : > { %10270 = vst [vmem:[#allocation44_spill] sm:$0xff] %v8854_v10  ;;  %v8864_v28 = vpack.c.bf16 %v2320_v46, %v2320_v46  ;;  %v2324_v21 = vadd.f32 %v2323_v18, %v8401_v59  ;;  %5201 = vst.msk [vmem:[%s8032_s6 + $0x1c8] sm:$0xf] %vm2727_vm0, %v3987_v54  ;;  %v2520_v7 = vpop.f32.mrb[64].mxu0  ;;  %3213 = vrot.lane.b32.xlu0 %v8496_v34, %s6198_s11 }
 0x39a   : > { %5166 = vst.msk [vmem:[%s8422_s13 + $0x13c] sm:$0xf] %vm2727_vm0, %v8854_v10  ;;  %2902 = vst.msk [vmem:[%s8452_s17 + $0x38] sm:$0xf] %vm2727_vm0, %v8856_v27  ;;  %v8875_v16 = vpack.c.bf16 %v2322_v62, %v2322_v62  ;;  %v2521_v37 = vadd.f32 %v2520_v7, %v8359_v61  ;;  %v2522_v18 = vpop.f32.mrb[65].mxu0 }
 0x39b   : > { %10271 = vst [vmem:[#allocation47_spill] sm:$0xff] %v8864_v28  ;;  %5101 = vst.msk [vmem:[%s8452_s17 + $0x138] sm:$0xf] %vm2727_vm0, %v8864_v28  ;;  %v8880_v46 = vpack.c.bf16 %v2324_v21, %v2324_v21  ;;  %v2523_v62 = vadd.f32 %v2522_v18, %v8373_v14  ;;  %v2524_v54 = vpop.f32.mrb[66].mxu0  ;;  %v3089_v21 = vpop.permute.xlu0 %3088  ;;  %3215 = vrot.lane.b32.xlu1 %v8513_v57, %s6198_s11 }
 0x39c   : > { %4914 = vst.msk [vmem:[%s8032_s6 + $0xcc] sm:$0xf] %vm2727_vm0, %v3119_v15  ;;  %2903 = vst.msk [vmem:[%s8452_s17 + $0x3c] sm:$0xf] %vm2727_vm0, %v8875_v16  ;;  %v8896_v7 = vpack.c.bf16 %v2521_v37, %v2521_v37  ;;  %v2525_v47 = vadd.f32 %v2524_v54, %v8359_v61  ;;  %v2526_v15 = vpop.f32.mrb[67].mxu0  ;;  %v3957_v28 = vpop.permute.xlu1 %3956 }
 0x39d   : > { %10272 = vst [vmem:[#allocation46_spill] sm:$0xff] %v8880_v46  ;;  %5102 = vst.msk [vmem:[%s8452_s17 + $0x13c] sm:$0xf] %vm2727_vm0, %v8880_v46  ;;  %v2327_v10 = vpop.f32.mrb[64].mxu1  ;;  %v8901_v24 = vpack.c.bf16 %v2523_v62, %v2523_v62  ;;  %v2527_v18 = vadd.f32 %v2526_v15, %v8373_v14  ;;  %3342 = vrot.lane.b32.xlu0 %v8476_v0, %s6198_s11 }
 0x39e   : > { %4899 = vst.msk [vmem:[%s8032_s6 + $0x90] sm:$0xf] %vm2727_vm0, %v3089_v21  ;;  %v2328_v34 = vadd.f32 %v2327_v10, %v8392_v63  ;;  %v2329_v8 = vpop.f32.mrb[65].mxu1  ;;  %3064 = vst.msk [vmem:[%s8422_s13 + $0x40] sm:$0xf] %vm2727_vm0, %v8896_v7  ;;  %v8908_v37 = vpack.c.bf16 %v2525_v47, %v2525_v47 }
 0x39f   : > { %10273 = vst [vmem:[#allocation48_spill] sm:$0xff] %v8901_v24  ;;  %v2330_v54 = vadd.f32 %v2329_v8, %v8401_v59  ;;  %v2331_v46 = vpop.f32.mrb[66].mxu1  ;;  %5186 = vst.msk [vmem:[%s8032_s6 + $0x18c] sm:$0xf] %vm2727_vm0, %v3957_v28  ;;  %v8918_v10 = vpack.c.bf16 %v2527_v18, %v2527_v18  ;;  %v3121_v0 = vpop.permute.xlu0 %3120  ;;  %3344 = vrot.lane.b32.xlu1 %v8486_v30, %s6198_s11 }
 0x3a0   : > { %5167 = vst.msk [vmem:[%s8422_s13 + $0x140] sm:$0xf] %vm2727_vm0, %v8901_v24  ;;  %v8920_v62 = vpack.c.bf16 %v2328_v34, %v2328_v34  ;;  %v2332_v21 = vadd.f32 %v2331_v46, %v8392_v63  ;;  %v2333_v47 = vpop.f32.mrb[67].mxu1  ;;  %3065 = vst.msk [vmem:[%s8422_s13 + $0x44] sm:$0xf] %vm2727_vm0, %v8908_v37 }
 0x3a1   : > { %10274 = vst [vmem:[#allocation71_spill] sm:$0xff] %v8918_v10  ;;  %v8928_v8 = vpack.c.bf16 %v2330_v54, %v2330_v54  ;;  %v2334_v20 = vadd.f32 %v2333_v47, %v8401_v59  ;;  %5168 = vst.msk [vmem:[%s8422_s13 + $0x144] sm:$0xf] %vm2727_vm0, %v8918_v10  ;;  %v2530_v46 = vpop.f32.mrb[68].mxu0  ;;  %v3989_v54 = vpop.permute.xlu1 %3988  ;;  %4083 = vrot.lane.b32.xlu0 %v8504_v51, %s6198_s11 }
 0x3a2   : > { %2904 = vst.msk [vmem:[%s8452_s17 + $0x40] sm:$0xf] %vm2727_vm0, %v8920_v62  ;;  %v8937_v28 = vpack.c.bf16 %v2332_v21, %v2332_v21  ;;  %v2531_v18 = vadd.f32 %v2530_v46, %v8359_v61  ;;  %v2532_v34 = vpop.f32.mrb[69].mxu0  ;;  %4915 = vst.msk [vmem:[%s8032_s6 + $0xd0] sm:$0xf] %vm2727_vm0, %v3121_v0 }
 0x3a3   : > { %5103 = vst.msk [vmem:[%s8452_s17 + $0x140] sm:$0xf] %vm2727_vm0, %v8928_v8  ;;  %v8942_v15 = vpack.c.bf16 %v2334_v20, %v2334_v20  ;;  %v2533_v21 = vadd.f32 %v2532_v34, %v8373_v14  ;;  %v2534_v47 = vpop.f32.mrb[70].mxu0  ;;  %5202 = vst.msk [vmem:[%s8032_s6 + $0x1cc] sm:$0xf] %vm2727_vm0, %v3989_v54  ;;  %v3959_v51 = vpop.permute.xlu0 %3958  ;;  %4085 = vrot.lane.b32.xlu1 %v8518_v23, %s6198_s11 }
 0x3a4   : > { %2905 = vst.msk [vmem:[%s8452_s17 + $0x44] sm:$0xf] %vm2727_vm0, %v8937_v28  ;;  %v8960_v20 = vpack.c.bf16 %v2531_v18, %v2531_v18  ;;  %v2535_v57 = vadd.f32 %v2534_v47, %v8359_v61  ;;  %v2536_v46 = vpop.f32.mrb[71].mxu0  ;;  %5187 = vst.msk [vmem:[%s8032_s6 + $0x190] sm:$0xf] %vm2727_vm0, %v3959_v51 }
 0x3a5   : > { %10275 = vst [vmem:[#allocation73_spill] sm:$0xff] %v8942_v15  ;;  %5104 = vst.msk [vmem:[%s8452_s17 + $0x144] sm:$0xf] %vm2727_vm0, %v8942_v15  ;;  %v2337_v0 = vpop.f32.mrb[68].mxu1  ;;  %v8963_v10 = vpack.c.bf16 %v2533_v21, %v2533_v21  ;;  %v2537_v34 = vadd.f32 %v2536_v46, %v8373_v14  ;;  %v3091_v21 = vpop.permute.xlu1 %3090  ;;  %4212 = vrot.lane.b32.xlu0 %v8479_v13, %s6198_s11 }
 0x3a6   : > { %v2338_v54 = vadd.f32 %v2337_v0, %v8392_v63  ;;  %v2339_v24 = vpop.f32.mrb[69].mxu1  ;;  %3066 = vst.msk [vmem:[%s8422_s13 + $0x48] sm:$0xf] %vm2727_vm0, %v8960_v20  ;;  %v8970_v18 = vpack.c.bf16 %v2535_v57, %v2535_v57  ;;  %4900 = vst.msk [vmem:[%s8032_s6 + $0x94] sm:$0xf] %vm2727_vm0, %v3091_v21 }
 0x3a7   : > { %10276 = vst [vmem:[#allocation72_spill] sm:$0xff] %v8963_v10  ;;  %v2340_v47 = vadd.f32 %v2339_v24, %v8401_v59  ;;  %v2341_v15 = vpop.f32.mrb[70].mxu1  ;;  %5169 = vst.msk [vmem:[%s8422_s13 + $0x148] sm:$0xf] %vm2727_vm0, %v8963_v10  ;;  %v8980_v46 = vpack.c.bf16 %v2537_v34, %v2537_v34  ;;  %v3991_v13 = vpop.permute.xlu0 %3990  ;;  %4214 = vrot.lane.b32.xlu1 %v8494_v36, %s6198_s11 }
 0x3a8   : > { %10277 = vst [vmem:[#allocation50_spill] sm:$0xff] %v8970_v18  ;;  %v8982_v0 = vpack.c.bf16 %v2338_v54, %v2338_v54  ;;  %v2342_v57 = vadd.f32 %v2341_v15, %v8392_v63  ;;  %v2343_v24 = vpop.f32.mrb[71].mxu1  ;;  %3067 = vst.msk [vmem:[%s8422_s13 + $0x4c] sm:$0xf] %vm2727_vm0, %v8970_v18 }
 0x3a9   : > { %10278 = vst [vmem:[#allocation74_spill] sm:$0xff] %v8980_v46  ;;  %v8992_v30 = vpack.c.bf16 %v2340_v47, %v2340_v47  ;;  %v2344_v34 = vadd.f32 %v2343_v24, %v8401_v59  ;;  %5170 = vst.msk [vmem:[%s8422_s13 + $0x14c] sm:$0xf] %vm2727_vm0, %v8980_v46  ;;  %v2540_v54 = vpop.f32.mrb[72].mxu0  ;;  %v3123_v24 = vpop.permute.xlu1 %3122  ;;  %3217 = vrot.lane.b32.xlu0 %v8552_v3, %s6198_s11 }
 0x3aa   : > { %2906 = vst.msk [vmem:[%s8452_s17 + $0x48] sm:$0xf] %vm2727_vm0, %v8982_v0  ;;  %v9001_v15 = vpack.c.bf16 %v2342_v57, %v2342_v57  ;;  %v2541_v47 = vadd.f32 %v2540_v54, %v8359_v61  ;;  %v2542_v21 = vpop.f32.mrb[73].mxu0  ;;  %5203 = vst.msk [vmem:[%s8032_s6 + $0x1d0] sm:$0xf] %vm2727_vm0, %v3991_v13 }
 0x3ab   : > { %5105 = vst.msk [vmem:[%s8452_s17 + $0x148] sm:$0xf] %vm2727_vm0, %v8992_v30  ;;  %v9006_v51 = vpack.c.bf16 %v2344_v34, %v2344_v34  ;;  %v2543_v57 = vadd.f32 %v2542_v21, %v8373_v14  ;;  %v2544_v46 = vpop.f32.mrb[74].mxu0  ;;  %4916 = vst.msk [vmem:[%s8032_s6 + $0xd4] sm:$0xf] %vm2727_vm0, %v3123_v24  ;;  %v3093_v3 = vpop.permute.xlu0 %3092  ;;  %3219 = vrot.lane.b32.xlu1 %v8571_v38, %s6198_s11 }
 0x3ac   : > { %2907 = vst.msk [vmem:[%s8452_s17 + $0x4c] sm:$0xf] %vm2727_vm0, %v9001_v15  ;;  %v9024_v34 = vpack.c.bf16 %v2541_v47, %v2541_v47  ;;  %v2545_v23 = vadd.f32 %v2544_v46, %v8359_v61  ;;  %v2546_v54 = vpop.f32.mrb[75].mxu0  ;;  %4901 = vst.msk [vmem:[%s8032_s6 + $0x98] sm:$0xf] %vm2727_vm0, %v3093_v3 }
 0x3ad   : > { %10279 = vst [vmem:[#allocation76_spill] sm:$0xff] %v9006_v51  ;;  %5106 = vst.msk [vmem:[%s8452_s17 + $0x14c] sm:$0xf] %vm2727_vm0, %v9006_v51  ;;  %v2347_v13 = vpop.f32.mrb[72].mxu1  ;;  %v9027_v10 = vpack.c.bf16 %v2543_v57, %v2543_v57  ;;  %v2547_v21 = vadd.f32 %v2546_v54, %v8373_v14  ;;  %v3961_v57 = vpop.permute.xlu1 %3960  ;;  %3346 = vrot.lane.b32.xlu0 %v8532_v26, %s6198_s11 }
 0x3ae   : > { %v2348_v24 = vadd.f32 %v2347_v13, %v8392_v63  ;;  %v2349_v18 = vpop.f32.mrb[73].mxu1  ;;  %3068 = vst.msk [vmem:[%s8422_s13 + $0x50] sm:$0xf] %vm2727_vm0, %v9024_v34  ;;  %v9034_v47 = vpack.c.bf16 %v2545_v23, %v2545_v23  ;;  %5188 = vst.msk [vmem:[%s8032_s6 + $0x194] sm:$0xf] %vm2727_vm0, %v3961_v57 }
 0x3af   : > { %10280 = vst [vmem:[#allocation75_spill] sm:$0xff] %v9027_v10  ;;  %v2350_v46 = vadd.f32 %v2349_v18, %v8401_v59  ;;  %v2351_v51 = vpop.f32.mrb[74].mxu1  ;;  %5171 = vst.msk [vmem:[%s8422_s13 + $0x150] sm:$0xf] %vm2727_vm0, %v9027_v10  ;;  %v9044_v54 = vpack.c.bf16 %v2547_v21, %v2547_v21  ;;  %v3125_v26 = vpop.permute.xlu0 %3124  ;;  %3348 = vrot.lane.b32.xlu1 %v8542_v56, %s6198_s11 }
 0x3b0   : > { %10281 = vst [vmem:[#allocation54_spill] sm:$0xff] %v9034_v47  ;;  %v9046_v13 = vpack.c.bf16 %v2348_v24, %v2348_v24  ;;  %v2352_v23 = vadd.f32 %v2351_v51, %v8392_v63  ;;  %v2353_v18 = vpop.f32.mrb[75].mxu1  ;;  %3069 = vst.msk [vmem:[%s8422_s13 + $0x54] sm:$0xf] %vm2727_vm0, %v9034_v47 }
 0x3b1   : > { %10282 = vst [vmem:[#allocation53_spill] sm:$0xff] %v9044_v54  ;;  %v9056_v36 = vpack.c.bf16 %v2350_v46, %v2350_v46  ;;  %v2354_v21 = vadd.f32 %v2353_v18, %v8401_v59  ;;  %5172 = vst.msk [vmem:[%s8422_s13 + $0x154] sm:$0xf] %vm2727_vm0, %v9044_v54  ;;  %v2550_v24 = vpop.f32.mrb[76].mxu0  ;;  %v3993_v18 = vpop.permute.xlu1 %3992  ;;  %4087 = vrot.lane.b32.xlu0 %v8560_v2, %s6198_s11 }
 0x3b2   : > { %2908 = vst.msk [vmem:[%s8452_s17 + $0x50] sm:$0xf] %vm2727_vm0, %v9046_v13  ;;  %v9065_v51 = vpack.c.bf16 %v2352_v23, %v2352_v23  ;;  %v2551_v46 = vadd.f32 %v2550_v24, %v8359_v61  ;;  %v2552_v57 = vpop.f32.mrb[77].mxu0  ;;  %4917 = vst.msk [vmem:[%s8032_s6 + $0xd8] sm:$0xf] %vm2727_vm0, %v3125_v26 }
 0x3b3   : > { %5107 = vst.msk [vmem:[%s8452_s17 + $0x150] sm:$0xf] %vm2727_vm0, %v9056_v36  ;;  %v9070_v3 = vpack.c.bf16 %v2354_v21, %v2354_v21  ;;  %v2553_v23 = vadd.f32 %v2552_v57, %v8373_v14  ;;  %v2554_v54 = vpop.f32.mrb[78].mxu0  ;;  %5204 = vst.msk [vmem:[%s8032_s6 + $0x1d4] sm:$0xf] %vm2727_vm0, %v3993_v18  ;;  %v3963_v2 = vpop.permute.xlu0 %3962  ;;  %4089 = vrot.lane.b32.xlu1 %v8576_v58, %s6198_s11 }
 0x3b4   : > { %2909 = vst.msk [vmem:[%s8452_s17 + $0x54] sm:$0xf] %vm2727_vm0, %v9065_v51  ;;  %v9088_v21 = vpack.c.bf16 %v2551_v46, %v2551_v46  ;;  %v2555_v38 = vadd.f32 %v2554_v54, %v8359_v61  ;;  %v2556_v24 = vpop.f32.mrb[79].mxu0  ;;  %5189 = vst.msk [vmem:[%s8032_s6 + $0x198] sm:$0xf] %vm2727_vm0, %v3963_v2 }
 0x3b5   : > { %10283 = vst [vmem:[#allocation56_spill] sm:$0xff] %v9070_v3  ;;  %5108 = vst.msk [vmem:[%s8452_s17 + $0x154] sm:$0xf] %vm2727_vm0, %v9070_v3  ;;  %v2357_v26 = vpop.f32.mrb[76].mxu1  ;;  %v9091_v10 = vpack.c.bf16 %v2553_v23, %v2553_v23  ;;  %v2557_v57 = vadd.f32 %v2556_v24, %v8373_v14  ;;  %v3095_v23 = vpop.permute.xlu1 %3094  ;;  %4216 = vrot.lane.b32.xlu0 %v8535_v5, %s6198_s11 }
 0x3b6   : > { %v2358_v18 = vadd.f32 %v2357_v26, %v8392_v63  ;;  %v2359_v47 = vpop.f32.mrb[77].mxu1  ;;  %3070 = vst.msk [vmem:[%s8422_s13 + $0x58] sm:$0xf] %vm2727_vm0, %v9088_v21  ;;  %v9098_v46 = vpack.c.bf16 %v2555_v38, %v2555_v38  ;;  %4902 = vst.msk [vmem:[%s8032_s6 + $0x9c] sm:$0xf] %vm2727_vm0, %v3095_v23 }
 0x3b7   : > { %10284 = vst [vmem:[#allocation55_spill] sm:$0xff] %v9091_v10  ;;  %v2360_v54 = vadd.f32 %v2359_v47, %v8401_v59  ;;  %v2361_v3 = vpop.f32.mrb[78].mxu1  ;;  %5173 = vst.msk [vmem:[%s8422_s13 + $0x158] sm:$0xf] %vm2727_vm0, %v9091_v10  ;;  %v9108_v24 = vpack.c.bf16 %v2557_v57, %v2557_v57  ;;  %v3995_v5 = vpop.permute.xlu0 %3994  ;;  %4218 = vrot.lane.b32.xlu1 %v8550_v40, %s6198_s11 }
 0x3b8   : > { %10285 = vst [vmem:[#allocation58_spill] sm:$0xff] %v9098_v46  ;;  %v9110_v26 = vpack.c.bf16 %v2358_v18, %v2358_v18  ;;  %v2362_v38 = vadd.f32 %v2361_v3, %v8392_v63  ;;  %v2363_v47 = vpop.f32.mrb[79].mxu1  ;;  %3071 = vst.msk [vmem:[%s8422_s13 + $0x5c] sm:$0xf] %vm2727_vm0, %v9098_v46 }
 0x3b9   : > { %10286 = vst [vmem:[#allocation57_spill] sm:$0xff] %v9108_v24  ;;  %v9120_v56 = vpack.c.bf16 %v2360_v54, %v2360_v54  ;;  %v2364_v57 = vadd.f32 %v2363_v47, %v8401_v59  ;;  %5174 = vst.msk [vmem:[%s8422_s13 + $0x15c] sm:$0xf] %vm2727_vm0, %v9108_v24  ;;  %v2560_v18 = vpop.f32.mrb[80].mxu0  ;;  %v3127_v47 = vpop.permute.xlu1 %3126  ;;  %3221 = vrot.lane.b32.xlu0 %v8612_v49, %s6198_s11 }
 0x3ba   : > { %2910 = vst.msk [vmem:[%s8452_s17 + $0x58] sm:$0xf] %vm2727_vm0, %v9110_v26  ;;  %v9129_v3 = vpack.c.bf16 %v2362_v38, %v2362_v38  ;;  %v2561_v54 = vadd.f32 %v2560_v18, %v8359_v61  ;;  %v2562_v23 = vpop.f32.mrb[81].mxu0  ;;  %5205 = vst.msk [vmem:[%s8032_s6 + $0x1d8] sm:$0xf] %vm2727_vm0, %v3995_v5 }
 0x3bb   : > { %5109 = vst.msk [vmem:[%s8452_s17 + $0x158] sm:$0xf] %vm2727_vm0, %v9120_v56  ;;  %v9134_v2 = vpack.c.bf16 %v2364_v57, %v2364_v57  ;;  %v2563_v38 = vadd.f32 %v2562_v23, %v8373_v14  ;;  %v2564_v24 = vpop.f32.mrb[82].mxu0  ;;  %4918 = vst.msk [vmem:[%s8032_s6 + $0xdc] sm:$0xf] %vm2727_vm0, %v3127_v47  ;;  %v3097_v49 = vpop.permute.xlu0 %3096  ;;  %3223 = vrot.lane.b32.xlu1 %v8629_v9, %s6198_s11 }
 0x3bc   : > { %2911 = vst.msk [vmem:[%s8452_s17 + $0x5c] sm:$0xf] %vm2727_vm0, %v9129_v3  ;;  %v9152_v57 = vpack.c.bf16 %v2561_v54, %v2561_v54  ;;  %v2565_v58 = vadd.f32 %v2564_v24, %v8359_v61  ;;  %v2566_v18 = vpop.f32.mrb[83].mxu0  ;;  %4903 = vst.msk [vmem:[%s8032_s6 + $0xa0] sm:$0xf] %vm2727_vm0, %v3097_v49 }
 0x3bd   : > { %10287 = vst [vmem:[#allocation60_spill] sm:$0xff] %v9134_v2  ;;  %5110 = vst.msk [vmem:[%s8452_s17 + $0x15c] sm:$0xf] %vm2727_vm0, %v9134_v2  ;;  %v2367_v5 = vpop.f32.mrb[80].mxu1  ;;  %v9155_v10 = vpack.c.bf16 %v2563_v38, %v2563_v38  ;;  %v2567_v23 = vadd.f32 %v2566_v18, %v8373_v14  ;;  %v3965_v38 = vpop.permute.xlu1 %3964  ;;  %3350 = vrot.lane.b32.xlu0 %v8592_v32, %s6198_s11 }
 0x3be   : > { %v2368_v47 = vadd.f32 %v2367_v5, %v8392_v63  ;;  %v2369_v46 = vpop.f32.mrb[81].mxu1  ;;  %3072 = vst.msk [vmem:[%s8422_s13 + $0x60] sm:$0xf] %vm2727_vm0, %v9152_v57  ;;  %v9162_v54 = vpack.c.bf16 %v2565_v58, %v2565_v58  ;;  %5190 = vst.msk [vmem:[%s8032_s6 + $0x19c] sm:$0xf] %vm2727_vm0, %v3965_v38 }
 0x3bf   : > { %10288 = vst [vmem:[#allocation59_spill] sm:$0xff] %v9155_v10  ;;  %v2370_v24 = vadd.f32 %v2369_v46, %v8401_v59  ;;  %v2371_v2 = vpop.f32.mrb[82].mxu1  ;;  %5175 = vst.msk [vmem:[%s8422_s13 + $0x160] sm:$0xf] %vm2727_vm0, %v9155_v10  ;;  %v9172_v18 = vpack.c.bf16 %v2567_v23, %v2567_v23  ;;  %v3129_v32 = vpop.permute.xlu0 %3128  ;;  %3352 = vrot.lane.b32.xlu1 %v8602_v33, %s6198_s11 }
 0x3c0   : > { %10289 = vst [vmem:[#allocation62_spill] sm:$0xff] %v9162_v54  ;;  %v9174_v5 = vpack.c.bf16 %v2368_v47, %v2368_v47  ;;  %v2372_v58 = vadd.f32 %v2371_v2, %v8392_v63  ;;  %v2373_v46 = vpop.f32.mrb[83].mxu1  ;;  %3073 = vst.msk [vmem:[%s8422_s13 + $0x64] sm:$0xf] %vm2727_vm0, %v9162_v54 }
 0x3c1   : > { %10290 = vst [vmem:[#allocation61_spill] sm:$0xff] %v9172_v18  ;;  %v9184_v40 = vpack.c.bf16 %v2370_v24, %v2370_v24  ;;  %v2374_v23 = vadd.f32 %v2373_v46, %v8401_v59  ;;  %5176 = vst.msk [vmem:[%s8422_s13 + $0x164] sm:$0xf] %vm2727_vm0, %v9172_v18  ;;  %v2570_v47 = vpop.f32.mrb[84].mxu0  ;;  %v3997_v46 = vpop.permute.xlu1 %3996  ;;  %4091 = vrot.lane.b32.xlu0 %v8620_v41, %s6198_s11 }
 0x3c2   : > { %2912 = vst.msk [vmem:[%s8452_s17 + $0x60] sm:$0xf] %vm2727_vm0, %v9174_v5  ;;  %v9193_v2 = vpack.c.bf16 %v2372_v58, %v2372_v58  ;;  %v2571_v24 = vadd.f32 %v2570_v47, %v8359_v61  ;;  %v2572_v38 = vpop.f32.mrb[85].mxu0  ;;  %4919 = vst.msk [vmem:[%s8032_s6 + $0xe0] sm:$0xf] %vm2727_vm0, %v3129_v32 }
 0x3c3   : > { %5111 = vst.msk [vmem:[%s8452_s17 + $0x160] sm:$0xf] %vm2727_vm0, %v9184_v40  ;;  %v9198_v49 = vpack.c.bf16 %v2374_v23, %v2374_v23  ;;  %v2573_v58 = vadd.f32 %v2572_v38, %v8373_v14  ;;  %v2574_v18 = vpop.f32.mrb[86].mxu0  ;;  %5206 = vst.msk [vmem:[%s8032_s6 + $0x1dc] sm:$0xf] %vm2727_vm0, %v3997_v46  ;;  %v3967_v41 = vpop.permute.xlu0 %3966  ;;  %4093 = vrot.lane.b32.xlu1 %v8634_v55, %s6198_s11 }
 0x3c4   : > { %2913 = vst.msk [vmem:[%s8452_s17 + $0x64] sm:$0xf] %vm2727_vm0, %v9193_v2  ;;  %v9216_v23 = vpack.c.bf16 %v2571_v24, %v2571_v24  ;;  %v2575_v9 = vadd.f32 %v2574_v18, %v8359_v61  ;;  %v2576_v47 = vpop.f32.mrb[87].mxu0  ;;  %5191 = vst.msk [vmem:[%s8032_s6 + $0x1a0] sm:$0xf] %vm2727_vm0, %v3967_v41 }
 0x3c5   : > { %10291 = vst [vmem:[#allocation64_spill] sm:$0xff] %v9198_v49  ;;  %5112 = vst.msk [vmem:[%s8452_s17 + $0x164] sm:$0xf] %vm2727_vm0, %v9198_v49  ;;  %v2377_v32 = vpop.f32.mrb[84].mxu1  ;;  %v9219_v10 = vpack.c.bf16 %v2573_v58, %v2573_v58  ;;  %v2577_v38 = vadd.f32 %v2576_v47, %v8373_v14  ;;  %v3099_v58 = vpop.permute.xlu1 %3098  ;;  %4220 = vrot.lane.b32.xlu0 %v8595_v1, %s6198_s11 }
 0x3c6   : > { %v2378_v46 = vadd.f32 %v2377_v32, %v8392_v63  ;;  %v2379_v54 = vpop.f32.mrb[85].mxu1  ;;  %3074 = vst.msk [vmem:[%s8422_s13 + $0x68] sm:$0xf] %vm2727_vm0, %v9216_v23  ;;  %v9226_v24 = vpack.c.bf16 %v2575_v9, %v2575_v9  ;;  %4904 = vst.msk [vmem:[%s8032_s6 + $0xa4] sm:$0xf] %vm2727_vm0, %v3099_v58 }
 0x3c7   : > { %10292 = vst [vmem:[#allocation63_spill] sm:$0xff] %v9219_v10  ;;  %v2380_v18 = vadd.f32 %v2379_v54, %v8401_v59  ;;  %v2381_v49 = vpop.f32.mrb[86].mxu1  ;;  %5177 = vst.msk [vmem:[%s8422_s13 + $0x168] sm:$0xf] %vm2727_vm0, %v9219_v10  ;;  %v9236_v47 = vpack.c.bf16 %v2577_v38, %v2577_v38  ;;  %v3999_v1 = vpop.permute.xlu0 %3998  ;;  %4222 = vrot.lane.b32.xlu1 %v8610_v39, %s6198_s11 }
 0x3c8   : > { %10293 = vst [vmem:[#allocation66_spill] sm:$0xff] %v9226_v24  ;;  %v9238_v32 = vpack.c.bf16 %v2378_v46, %v2378_v46  ;;  %v2382_v9 = vadd.f32 %v2381_v49, %v8392_v63  ;;  %v2383_v54 = vpop.f32.mrb[87].mxu1  ;;  %3075 = vst.msk [vmem:[%s8422_s13 + $0x6c] sm:$0xf] %vm2727_vm0, %v9226_v24 }
 0x3c9   : > { %10294 = vst [vmem:[#allocation65_spill] sm:$0xff] %v9236_v47  ;;  %v9248_v33 = vpack.c.bf16 %v2380_v18, %v2380_v18  ;;  %v2384_v38 = vadd.f32 %v2383_v54, %v8401_v59  ;;  %5178 = vst.msk [vmem:[%s8422_s13 + $0x16c] sm:$0xf] %vm2727_vm0, %v9236_v47  ;;  %v2580_v46 = vpop.f32.mrb[88].mxu0  ;;  %v3131_v54 = vpop.permute.xlu1 %3130  ;;  %3225 = vrot.lane.b32.xlu0 %v8668_v48, %s6198_s11 }
 0x3ca   : > { %2914 = vst.msk [vmem:[%s8452_s17 + $0x68] sm:$0xf] %vm2727_vm0, %v9238_v32  ;;  %v9257_v49 = vpack.c.bf16 %v2382_v9, %v2382_v9  ;;  %v2581_v18 = vadd.f32 %v2580_v46, %v8359_v61  ;;  %v2582_v58 = vpop.f32.mrb[89].mxu0  ;;  %5207 = vst.msk [vmem:[%s8032_s6 + $0x1e0] sm:$0xf] %vm2727_vm0, %v3999_v1 }
 0x3cb   : > { %5113 = vst.msk [vmem:[%s8452_s17 + $0x168] sm:$0xf] %vm2727_vm0, %v9248_v33  ;;  %v9262_v41 = vpack.c.bf16 %v2384_v38, %v2384_v38  ;;  %v2583_v9 = vadd.f32 %v2582_v58, %v8373_v14  ;;  %v2584_v47 = vpop.f32.mrb[90].mxu0  ;;  %4920 = vst.msk [vmem:[%s8032_s6 + $0xe4] sm:$0xf] %vm2727_vm0, %v3131_v54  ;;  %v3101_v48 = vpop.permute.xlu0 %3100  ;;  %3227 = vrot.lane.b32.xlu1 %v8685_v6, %s6198_s11 }
 0x3cc   : > { %2915 = vst.msk [vmem:[%s8452_s17 + $0x6c] sm:$0xf] %vm2727_vm0, %v9257_v49  ;;  %v9280_v38 = vpack.c.bf16 %v2581_v18, %v2581_v18  ;;  %v2585_v55 = vadd.f32 %v2584_v47, %v8359_v61  ;;  %v2586_v46 = vpop.f32.mrb[91].mxu0  ;;  %4905 = vst.msk [vmem:[%s8032_s6 + $0xa8] sm:$0xf] %vm2727_vm0, %v3101_v48 }
 0x3cd   : > { %10295 = vst [vmem:[#allocation30_spill] sm:$0xff] %v9262_v41  ;;  %5114 = vst.msk [vmem:[%s8452_s17 + $0x16c] sm:$0xf] %vm2727_vm0, %v9262_v41  ;;  %v2387_v1 = vpop.f32.mrb[88].mxu1  ;;  %v9283_v10 = vpack.c.bf16 %v2583_v9, %v2583_v9  ;;  %v2587_v58 = vadd.f32 %v2586_v46, %v8373_v14  ;;  %v3969_v9 = vpop.permute.xlu1 %3968  ;;  %3354 = vrot.lane.b32.xlu0 %v8648_v44, %s6198_s11 }
 0x3ce   : > { %v2388_v54 = vadd.f32 %v2387_v1, %v8392_v63  ;;  %v2389_v24 = vpop.f32.mrb[89].mxu1  ;;  %3076 = vst.msk [vmem:[%s8422_s13 + $0x70] sm:$0xf] %vm2727_vm0, %v9280_v38  ;;  %v9290_v18 = vpack.c.bf16 %v2585_v55, %v2585_v55  ;;  %5192 = vst.msk [vmem:[%s8032_s6 + $0x1a4] sm:$0xf] %vm2727_vm0, %v3969_v9 }
 0x3cf   : > { %10296 = vst [vmem:[#allocation29_spill] sm:$0xff] %v9283_v10  ;;  %v2390_v47 = vadd.f32 %v2389_v24, %v8401_v59  ;;  %v2391_v41 = vpop.f32.mrb[90].mxu1  ;;  %5179 = vst.msk [vmem:[%s8422_s13 + $0x170] sm:$0xf] %vm2727_vm0, %v9283_v10  ;;  %v9300_v46 = vpack.c.bf16 %v2587_v58, %v2587_v58  ;;  %v3133_v44 = vpop.permute.xlu0 %3132  ;;  %3356 = vrot.lane.b32.xlu1 %v8658_v29, %s6198_s11 }
 0x3d0   : > { %10297 = vst [vmem:[#allocation67_spill] sm:$0xff] %v9290_v18  ;;  %v9302_v1 = vpack.c.bf16 %v2388_v54, %v2388_v54  ;;  %v2392_v55 = vadd.f32 %v2391_v41, %v8392_v63  ;;  %v2393_v24 = vpop.f32.mrb[91].mxu1  ;;  %3077 = vst.msk [vmem:[%s8422_s13 + $0x74] sm:$0xf] %vm2727_vm0, %v9290_v18 }
 0x3d1   : > { %10298 = vst [vmem:[#allocation31_spill] sm:$0xff] %v9300_v46  ;;  %v9312_v39 = vpack.c.bf16 %v2390_v47, %v2390_v47  ;;  %v2394_v58 = vadd.f32 %v2393_v24, %v8401_v59  ;;  %5180 = vst.msk [vmem:[%s8422_s13 + $0x174] sm:$0xf] %vm2727_vm0, %v9300_v46  ;;  %v2590_v54 = vpop.f32.mrb[92].mxu0  ;;  %v4001_v24 = vpop.permute.xlu1 %4000  ;;  %4095 = vrot.lane.b32.xlu0 %v8676_v31, %s6198_s11 }
 0x3d2   : > { %2916 = vst.msk [vmem:[%s8452_s17 + $0x70] sm:$0xf] %vm2727_vm0, %v9302_v1  ;;  %v9321_v41 = vpack.c.bf16 %v2392_v55, %v2392_v55  ;;  %v2591_v47 = vadd.f32 %v2590_v54, %v8359_v61  ;;  %v2592_v9 = vpop.f32.mrb[93].mxu0  ;;  %4921 = vst.msk [vmem:[%s8032_s6 + $0xe8] sm:$0xf] %vm2727_vm0, %v3133_v44 }
 0x3d3   : > { %5115 = vst.msk [vmem:[%s8452_s17 + $0x170] sm:$0xf] %vm2727_vm0, %v9312_v39  ;;  %v9326_v48 = vpack.c.bf16 %v2394_v58, %v2394_v58  ;;  %v2593_v55 = vadd.f32 %v2592_v9, %v8373_v14  ;;  %v2594_v46 = vpop.f32.mrb[94].mxu0  ;;  %5208 = vst.msk [vmem:[%s8032_s6 + $0x1e4] sm:$0xf] %vm2727_vm0, %v4001_v24  ;;  %v3971_v31 = vpop.permute.xlu0 %3970  ;;  %4097 = vrot.lane.b32.xlu1 %v8690_v22, %s6198_s11 }
 0x3d4   : > { %2917 = vst.msk [vmem:[%s8452_s17 + $0x74] sm:$0xf] %vm2727_vm0, %v9321_v41  ;;  %v9344_v58 = vpack.c.bf16 %v2591_v47, %v2591_v47  ;;  %v2595_v6 = vadd.f32 %v2594_v46, %v8359_v61  ;;  %v2596_v54 = vpop.f32.mrb[95].mxu0  ;;  %5193 = vst.msk [vmem:[%s8032_s6 + $0x1a8] sm:$0xf] %vm2727_vm0, %v3971_v31 }
 0x3d5   : > { %5116 = vst.msk [vmem:[%s8452_s17 + $0x174] sm:$0xf] %vm2727_vm0, %v9326_v48  ;;  %v2397_v44 = vpop.f32.mrb[92].mxu1  ;;  %v9347_v10 = vpack.c.bf16 %v2593_v55, %v2593_v55  ;;  %v2597_v9 = vadd.f32 %v2596_v54, %v8373_v14  ;;  %v3103_v55 = vpop.permute.xlu1 %3102  ;;  %4224 = vrot.lane.b32.xlu0 %v8651_v19, %s6198_s11 }
 0x3d6   : > { %v2398_v24 = vadd.f32 %v2397_v44, %v8392_v63  ;;  %v2399_v18 = vpop.f32.mrb[93].mxu1  ;;  %3078 = vst.msk [vmem:[%s8422_s13 + $0x78] sm:$0xf] %vm2727_vm0, %v9344_v58  ;;  %v9354_v47 = vpack.c.bf16 %v2595_v6, %v2595_v6  ;;  %4906 = vst.msk [vmem:[%s8032_s6 + $0xac] sm:$0xf] %vm2727_vm0, %v3103_v55 }
 0x3d7   : > { %v2400_v61 = vadd.f32 %v2399_v18, %v8401_v59  ;;  %v2401_v46 = vpop.f32.mrb[94].mxu1  ;;  %5181 = vst.msk [vmem:[%s8422_s13 + $0x178] sm:$0xf] %vm2727_vm0, %v9347_v10  ;;  %v9364_v14 = vpack.c.bf16 %v2597_v9, %v2597_v9  ;;  %v4003_v9 = vpop.permute.xlu0 %4002  ;;  %4226 = vrot.lane.b32.xlu1 %v8666_v60, %s6198_s11 }
 0x3d8   : > { %v9366_v6 = vpack.c.bf16 %v2398_v24, %v2398_v24  ;;  %v2402_v54 = vadd.f32 %v2401_v46, %v8392_v63  ;;  %v2403_v18 = vpop.f32.mrb[95].mxu1  ;;  %3079 = vst.msk [vmem:[%s8422_s13 + $0x7c] sm:$0xf] %vm2727_vm0, %v9354_v47  ;;  %5209 = vst.msk [vmem:[%s8032_s6 + $0x1e8] sm:$0xf] %vm2727_vm0, %v4003_v9 }
 0x3d9   : > { %v9376_v29 = vpack.c.bf16 %v2400_v61, %v2400_v61  ;;  %v2404_v44 = vadd.f32 %v2403_v18, %v8401_v59  ;;  %5182 = vst.msk [vmem:[%s8422_s13 + $0x17c] sm:$0xf] %vm2727_vm0, %v9364_v14  ;;  %v3135_v24 = vpop.permute.xlu1 %3134  ;;  %3229 = vrot.lane.b32.xlu0 %v8728_v17, %s6198_s11  ;;  %v10302_v18 = vld [vmem:[#allocation79_spill] sm:$0xff] }
 0x3da   : > { %2918 = vst.msk [vmem:[%s8452_s17 + $0x78] sm:$0xf] %vm2727_vm0, %v9366_v6  ;;  %v9385_v63 = vpack.c.bf16 %v2402_v54, %v2402_v54  ;;  %4922 = vst.msk [vmem:[%s8032_s6 + $0xec] sm:$0xf] %vm2727_vm0, %v3135_v24 }
 0x3db   : > { %5117 = vst.msk [vmem:[%s8452_s17 + $0x178] sm:$0xf] %vm2727_vm0, %v9376_v29  ;;  %v9390_v19 = vpack.c.bf16 %v2404_v44, %v2404_v44  ;;  %v3105_v59 = vpop.permute.xlu0 %3104  ;;  %3231 = vrot.lane.b32.xlu1 %v8747_v25, %s6198_s11 }
 0x3dc   : > { %2919 = vst.msk [vmem:[%s8452_s17 + $0x7c] sm:$0xf] %vm2727_vm0, %v9385_v63  ;;  %4907 = vst.msk [vmem:[%s8032_s6 + $0xb0] sm:$0xf] %vm2727_vm0, %v3105_v59  ;;  %v10303_v59 = vld [vmem:[#allocation81_spill] sm:$0xff] }
 0x3dd   : > { %5118 = vst.msk [vmem:[%s8452_s17 + $0x17c] sm:$0xf] %vm2727_vm0, %v9390_v19  ;;  %v3973_v31 = vpop.permute.xlu1 %3972  ;;  %3358 = vrot.lane.b32.xlu0 %v8706_v12, %s6198_s11 }
 0x3de   : > { %5194 = vst.msk [vmem:[%s8032_s6 + $0x1ac] sm:$0xf] %vm2727_vm0, %v3973_v31 }
 0x3df   : > { %v3137_v22 = vpop.permute.xlu0 %3136  ;;  %3360 = vrot.lane.b32.xlu1 %v8716_v53, %s6198_s11 }
 0x3e0   : > { %4923 = vst.msk [vmem:[%s8032_s6 + $0xf0] sm:$0xf] %vm2727_vm0, %v3137_v22 }
 0x3e1   : > { %v4005_v17 = vpop.permute.xlu1 %4004  ;;  %4099 = vrot.lane.b32.xlu0 %v8738_v42, %s6198_s11 }
 0x3e2   : > { %5210 = vst.msk [vmem:[%s8032_s6 + $0x1ec] sm:$0xf] %vm2727_vm0, %v4005_v17 }
 0x3e3   : > { %v3975_v60 = vpop.permute.xlu0 %3974  ;;  %4101 = vrot.lane.b32.xlu1 %v8752_v4, %s6198_s11 }
 0x3e4   : > { %5195 = vst.msk [vmem:[%s8032_s6 + $0x1b0] sm:$0xf] %vm2727_vm0, %v3975_v60  ;;  %v10306_v60 = vld [vmem:[#allocation42_spill] sm:$0xff] }
 0x3e5   : > { %v3107_v61 = vpop.permute.xlu1 %3106  ;;  %4228 = vrot.lane.b32.xlu0 %v8709_v45, %s6198_s11  ;;  %v10299_v45 = vld [vmem:[#allocation41_spill] sm:$0xff] }
 0x3e6   : > { %4908 = vst.msk [vmem:[%s8032_s6 + $0xb4] sm:$0xf] %vm2727_vm0, %v3107_v61 }
 0x3e7   : > { %v4007_v12 = vpop.permute.xlu0 %4006  ;;  %4230 = vrot.lane.b32.xlu1 %v10299_v45, %s6198_s11 }
 0x3e8   : > { %5211 = vst.msk [vmem:[%s8032_s6 + $0x1f0] sm:$0xf] %vm2727_vm0, %v4007_v12  ;;  %v10307_v12 = vld [vmem:[#allocation46_spill] sm:$0xff] }
 0x3e9   : > { %v3139_v25 = vpop.permute.xlu1 %3138  ;;  %3233 = vrot.lane.b32.xlu0 %v8792_v50, %s6198_s11  ;;  %v10300_v50 = vld [vmem:[#allocation43_spill] sm:$0xff] }
 0x3ea   : > { %4924 = vst.msk [vmem:[%s8032_s6 + $0xf4] sm:$0xf] %vm2727_vm0, %v3139_v25 }
 0x3eb   : > { %v3109_v53 = vpop.permute.xlu0 %3108  ;;  %3235 = vrot.lane.b32.xlu1 %v8811_v43, %s6198_s11 }
 0x3ec   : > { %4909 = vst.msk [vmem:[%s8032_s6 + $0xb8] sm:$0xf] %vm2727_vm0, %v3109_v53 }
 0x3ed   : > { %v3977_v42 = vpop.permute.xlu1 %3976  ;;  %3362 = vrot.lane.b32.xlu0 %v8770_v35, %s6198_s11  ;;  %v10301_v35 = vld [vmem:[#allocation80_spill] sm:$0xff] }
 0x3ee   : > { %5196 = vst.msk [vmem:[%s8032_s6 + $0x1b4] sm:$0xf] %vm2727_vm0, %v3977_v42  ;;  %v10308_v42 = vld [vmem:[#allocation44_spill] sm:$0xff] }
 0x3ef   : > { %v3141_v4 = vpop.permute.xlu0 %3140  ;;  %3364 = vrot.lane.b32.xlu1 %v10301_v35, %s6198_s11 }
 0x3f0   : > { %4925 = vst.msk [vmem:[%s8032_s6 + $0xf8] sm:$0xf] %vm2727_vm0, %v3141_v4 }
 0x3f1   : > { %v4009_v46 = vpop.permute.xlu1 %4008  ;;  %4103 = vrot.lane.b32.xlu0 %v10300_v50, %s6198_s11 }
 0x3f2   : > { %5212 = vst.msk [vmem:[%s8032_s6 + $0x1f4] sm:$0xf] %vm2727_vm0, %v4009_v46 }
 0x3f3   : > { %v3979_v55 = vpop.permute.xlu0 %3978  ;;  %4105 = vrot.lane.b32.xlu1 %v8816_v52, %s6198_s11 }
 0x3f4   : > { %5197 = vst.msk [vmem:[%s8032_s6 + $0x1b8] sm:$0xf] %vm2727_vm0, %v3979_v55 }
 0x3f5   : > { %v3111_v54 = vpop.permute.xlu1 %3110  ;;  %4232 = vrot.lane.b32.xlu0 %v10302_v18, %s6198_s11 }
 0x3f6   : > { %4910 = vst.msk [vmem:[%s8032_s6 + $0xbc] sm:$0xf] %vm2727_vm0, %v3111_v54  ;;  %v10311_v54 = vld [vmem:[#allocation71_spill] sm:$0xff] }
 0x3f7   : > { %v4011_v43 = vpop.permute.xlu0 %4010  ;;  %4234 = vrot.lane.b32.xlu1 %v10303_v59, %s6198_s11 }
 0x3f8   : > { %5213 = vst.msk [vmem:[%s8032_s6 + $0x1f8] sm:$0xf] %vm2727_vm0, %v4011_v43 }
 0x3f9   : > { %v3143_v44 = vpop.permute.xlu1 %3142  ;;  %3237 = vrot.lane.b32.xlu0 %v8856_v27, %s6198_s11  ;;  %v10304_v27 = vld [vmem:[#allocation47_spill] sm:$0xff] }
 0x3fa   : > { %4926 = vst.msk [vmem:[%s8032_s6 + $0xfc] sm:$0xf] %vm2727_vm0, %v3143_v44  ;;  %v10313_v44 = vld [vmem:[#allocation72_spill] sm:$0xff] }
 0x3fb   : > { %v3210_v9 = vpop.permute.xlu0 %3209  ;;  %3239 = vrot.lane.b32.xlu1 %v8875_v16, %s6198_s11 }
 0x3fc   : > { %4927 = vst.msk [vmem:[%s8452_s17 + $0x80] sm:$0xf] %vm2727_vm0, %v3210_v9 }
 0x3fd   : > { %v3981_v24 = vpop.permute.xlu1 %3980  ;;  %3366 = vrot.lane.b32.xlu0 %v8832_v11, %s6198_s11  ;;  %v10305_v11 = vld [vmem:[#allocation45_spill] sm:$0xff] }
 0x3fe   : > { %5198 = vst.msk [vmem:[%s8032_s6 + $0x1bc] sm:$0xf] %vm2727_vm0, %v3981_v24 }
 0x3ff   : > { %v3339_v52 = vpop.permute.xlu0 %3338  ;;  %3368 = vrot.lane.b32.xlu1 %v10305_v11, %s6198_s11 }
 0x400   : > { %4959 = vst.msk [vmem:[%s8422_s13 + $0x80] sm:$0xf] %vm2727_vm0, %v3339_v52  ;;  %v10315_v52 = vld [vmem:[#allocation74_spill] sm:$0xff] }
 0x401   : > { %v4013_v31 = vpop.permute.xlu1 %4012  ;;  %4107 = vrot.lane.b32.xlu0 %v10304_v27, %s6198_s11 }
 0x402   : > { %5214 = vst.msk [vmem:[%s8032_s6 + $0x1fc] sm:$0xf] %vm2727_vm0, %v4013_v31 }
 0x403   : > { %v4080_v22 = vpop.permute.xlu0 %4079  ;;  %4109 = vrot.lane.b32.xlu1 %v10307_v12, %s6198_s11 }
 0x404   : > { %5215 = vst.msk [vmem:[%s8452_s17 + $0x180] sm:$0xf] %vm2727_vm0, %v4080_v22 }
 0x405   : > { %v3212_v17 = vpop.permute.xlu1 %3211  ;;  %4236 = vrot.lane.b32.xlu0 %v10306_v60, %s6198_s11 }
 0x406   : > { %4928 = vst.msk [vmem:[%s8452_s17 + $0x84] sm:$0xf] %vm2727_vm0, %v3212_v17  ;;  %v10317_v17 = vld [vmem:[#allocation75_spill] sm:$0xff] }
 0x407   : > { %v4209_v16 = vpop.permute.xlu0 %4208  ;;  %4238 = vrot.lane.b32.xlu1 %v10308_v42, %s6198_s11  ;;  %v10321_v42 = vld [vmem:[#allocation55_spill] sm:$0xff] }
 0x408   : > { %5247 = vst.msk [vmem:[%s8422_s13 + $0x180] sm:$0xf] %vm2727_vm0, %v4209_v16 }
 0x409   : > { %v3341_v61 = vpop.permute.xlu1 %3340  ;;  %3241 = vrot.lane.b32.xlu0 %v8920_v62, %s6198_s11 }
 0x40a   : > { %4960 = vst.msk [vmem:[%s8422_s13 + $0x84] sm:$0xf] %vm2727_vm0, %v3341_v61  ;;  %v10319_v61 = vld [vmem:[#allocation53_spill] sm:$0xff] }
 0x40b   : > { %v3214_v25 = vpop.permute.xlu0 %3213  ;;  %3243 = vrot.lane.b32.xlu1 %v8937_v28, %s6198_s11 }
 0x40c   : > { %4929 = vst.msk [vmem:[%s8452_s17 + $0x88] sm:$0xf] %vm2727_vm0, %v3214_v25 }
 0x40d   : > { %v4082_v53 = vpop.permute.xlu1 %4081  ;;  %3370 = vrot.lane.b32.xlu0 %v8896_v7, %s6198_s11  ;;  %v10309_v7 = vld [vmem:[#allocation48_spill] sm:$0xff] }
 0x40e   : > { %5216 = vst.msk [vmem:[%s8452_s17 + $0x184] sm:$0xf] %vm2727_vm0, %v4082_v53 }
 0x40f   : > { %v3343_v45 = vpop.permute.xlu0 %3342  ;;  %3372 = vrot.lane.b32.xlu1 %v8908_v37, %s6198_s11 }
 0x410   : > { %4961 = vst.msk [vmem:[%s8422_s13 + $0x88] sm:$0xf] %vm2727_vm0, %v3343_v45 }
 0x411   : > { %v4211_v4 = vpop.permute.xlu1 %4210  ;;  %4111 = vrot.lane.b32.xlu0 %v8928_v8, %s6198_s11  ;;  %v10310_v8 = vld [vmem:[#allocation73_spill] sm:$0xff] }
 0x412   : > { %5248 = vst.msk [vmem:[%s8422_s13 + $0x184] sm:$0xf] %vm2727_vm0, %v4211_v4 }
 0x413   : > { %v4084_v62 = vpop.permute.xlu0 %4083  ;;  %4113 = vrot.lane.b32.xlu1 %v10310_v8, %s6198_s11  ;;  %v10325_v8 = vld [vmem:[#allocation59_spill] sm:$0xff] }
 0x414   : > { %5217 = vst.msk [vmem:[%s8452_s17 + $0x188] sm:$0xf] %vm2727_vm0, %v4084_v62 }
 0x415   : > { %v3216_v46 = vpop.permute.xlu1 %3215  ;;  %4240 = vrot.lane.b32.xlu0 %v10309_v7, %s6198_s11 }
 0x416   : > { %4930 = vst.msk [vmem:[%s8452_s17 + $0x8c] sm:$0xf] %vm2727_vm0, %v3216_v46  ;;  %v10323_v46 = vld [vmem:[#allocation57_spill] sm:$0xff] }
 0x417   : > { %v4213_v28 = vpop.permute.xlu0 %4212  ;;  %4242 = vrot.lane.b32.xlu1 %v10311_v54, %s6198_s11 }
 0x418   : > { %5249 = vst.msk [vmem:[%s8422_s13 + $0x188] sm:$0xf] %vm2727_vm0, %v4213_v28 }
 0x419   : > { %v3345_v50 = vpop.permute.xlu1 %3344  ;;  %3245 = vrot.lane.b32.xlu0 %v8982_v0, %s6198_s11 }
 0x41a   : > { %4962 = vst.msk [vmem:[%s8422_s13 + $0x8c] sm:$0xf] %vm2727_vm0, %v3345_v50 }
 0x41b   : > { %v3218_v37 = vpop.permute.xlu0 %3217  ;;  %3247 = vrot.lane.b32.xlu1 %v9001_v15, %s6198_s11 }
 0x41c   : > { %4931 = vst.msk [vmem:[%s8452_s17 + $0x90] sm:$0xf] %vm2727_vm0, %v3218_v37 }
 0x41d   : > { %v4086_v55 = vpop.permute.xlu1 %4085  ;;  %3374 = vrot.lane.b32.xlu0 %v8960_v20, %s6198_s11  ;;  %v10312_v20 = vld [vmem:[#allocation50_spill] sm:$0xff] }
 0x41e   : > { %5218 = vst.msk [vmem:[%s8452_s17 + $0x18c] sm:$0xf] %vm2727_vm0, %v4086_v55 }
 0x41f   : > { %v3347_v35 = vpop.permute.xlu0 %3346  ;;  %3376 = vrot.lane.b32.xlu1 %v10312_v20, %s6198_s11  ;;  %v10329_v20 = vld [vmem:[#allocation63_spill] sm:$0xff] }
 0x420   : > { %4963 = vst.msk [vmem:[%s8422_s13 + $0x90] sm:$0xf] %vm2727_vm0, %v3347_v35  ;;  %v10327_v35 = vld [vmem:[#allocation61_spill] sm:$0xff] }
 0x421   : > { %v4215_v18 = vpop.permute.xlu1 %4214  ;;  %4115 = vrot.lane.b32.xlu0 %v8992_v30, %s6198_s11  ;;  %v10314_v30 = vld [vmem:[#allocation76_spill] sm:$0xff] }
 0x422   : > { %5250 = vst.msk [vmem:[%s8422_s13 + $0x18c] sm:$0xf] %vm2727_vm0, %v4215_v18 }
 0x423   : > { %v4088_v0 = vpop.permute.xlu0 %4087  ;;  %4117 = vrot.lane.b32.xlu1 %v10314_v30, %s6198_s11  ;;  %v10331_v30 = vld [vmem:[#allocation65_spill] sm:$0xff] }
 0x424   : > { %5219 = vst.msk [vmem:[%s8452_s17 + $0x190] sm:$0xf] %vm2727_vm0, %v4088_v0 }
 0x425   : > { %v3220_v43 = vpop.permute.xlu1 %3219  ;;  %4244 = vrot.lane.b32.xlu0 %v10313_v44, %s6198_s11 }
 0x426   : > { %4932 = vst.msk [vmem:[%s8452_s17 + $0x94] sm:$0xf] %vm2727_vm0, %v3220_v43 }
 0x427   : > { %v4217_v15 = vpop.permute.xlu0 %4216  ;;  %4246 = vrot.lane.b32.xlu1 %v10315_v52, %s6198_s11 }
 0x428   : > { %5251 = vst.msk [vmem:[%s8422_s13 + $0x190] sm:$0xf] %vm2727_vm0, %v4217_v15 }
 0x429   : > { %v3349_v9 = vpop.permute.xlu1 %3348  ;;  %3249 = vrot.lane.b32.xlu0 %v9046_v13, %s6198_s11 }
 0x42a   : > { %4964 = vst.msk [vmem:[%s8422_s13 + $0x94] sm:$0xf] %vm2727_vm0, %v3349_v9 }
 0x42b   : > { %v3222_v24 = vpop.permute.xlu0 %3221  ;;  %3251 = vrot.lane.b32.xlu1 %v9065_v51, %s6198_s11 }
 0x42c   : > { %4933 = vst.msk [vmem:[%s8452_s17 + $0x98] sm:$0xf] %vm2727_vm0, %v3222_v24 }
 0x42d   : > { %v4090_v59 = vpop.permute.xlu1 %4089  ;;  %3378 = vrot.lane.b32.xlu0 %v9024_v34, %s6198_s11  ;;  %v10316_v34 = vld [vmem:[#allocation54_spill] sm:$0xff] }
 0x42e   : > { %5220 = vst.msk [vmem:[%s8452_s17 + $0x194] sm:$0xf] %vm2727_vm0, %v4090_v59 }
 0x42f   : > { %v3351_v31 = vpop.permute.xlu0 %3350  ;;  %3380 = vrot.lane.b32.xlu1 %v10316_v34, %s6198_s11 }
 0x430   : > { %4965 = vst.msk [vmem:[%s8422_s13 + $0x98] sm:$0xf] %vm2727_vm0, %v3351_v31  ;;  %v10333_v31 = vld [vmem:[#allocation29_spill] sm:$0xff] }
 0x431   : > { %v4219_v27 = vpop.permute.xlu1 %4218  ;;  %4119 = vrot.lane.b32.xlu0 %v9056_v36, %s6198_s11  ;;  %v10318_v36 = vld [vmem:[#allocation56_spill] sm:$0xff] }
 0x432   : > { %5252 = vst.msk [vmem:[%s8422_s13 + $0x194] sm:$0xf] %vm2727_vm0, %v4219_v27 }
 0x433   : > { %v4092_v13 = vpop.permute.xlu0 %4091  ;;  %4121 = vrot.lane.b32.xlu1 %v10318_v36, %s6198_s11 }
 0x434   : > { %5221 = vst.msk [vmem:[%s8452_s17 + $0x198] sm:$0xf] %vm2727_vm0, %v4092_v13 }
 0x435   : > { %v3224_v22 = vpop.permute.xlu1 %3223  ;;  %4248 = vrot.lane.b32.xlu0 %v10317_v17, %s6198_s11 }
 0x436   : > { %4934 = vst.msk [vmem:[%s8452_s17 + $0x9c] sm:$0xf] %vm2727_vm0, %v3224_v22  ;;  %v10334_v22 = vld [vmem:[#allocation31_spill] sm:$0xff] }
 0x437   : > { %v4221_v51 = vpop.permute.xlu0 %4220  ;;  %4250 = vrot.lane.b32.xlu1 %v10319_v61, %s6198_s11 }
 0x438   : > { %5253 = vst.msk [vmem:[%s8422_s13 + $0x198] sm:$0xf] %vm2727_vm0, %v4221_v51 }
 0x439   : > { %v3353_v11 = vpop.permute.xlu1 %3352  ;;  %3253 = vrot.lane.b32.xlu0 %v9110_v26, %s6198_s11 }
 0x43a   : > { %4966 = vst.msk [vmem:[%s8422_s13 + $0x9c] sm:$0xf] %vm2727_vm0, %v3353_v11 }
 0x43b   : > { %v3226_v60 = vpop.permute.xlu0 %3225  ;;  %3255 = vrot.lane.b32.xlu1 %v9129_v3, %s6198_s11 }
 0x43c   : > { %4935 = vst.msk [vmem:[%s8452_s17 + $0xa0] sm:$0xf] %vm2727_vm0, %v3226_v60 }
 0x43d   : > { %v4094_v16 = vpop.permute.xlu1 %4093  ;;  %3382 = vrot.lane.b32.xlu0 %v9088_v21, %s6198_s11  ;;  %v10320_v21 = vld [vmem:[#allocation58_spill] sm:$0xff] }
 0x43e   : > { %5222 = vst.msk [vmem:[%s8452_s17 + $0x19c] sm:$0xf] %vm2727_vm0, %v4094_v16 }
 0x43f   : > { %v3355_v12 = vpop.permute.xlu0 %3354  ;;  %3384 = vrot.lane.b32.xlu1 %v10320_v21, %s6198_s11 }
 0x440   : > { %4967 = vst.msk [vmem:[%s8422_s13 + $0xa0] sm:$0xf] %vm2727_vm0, %v3355_v12 }
 0x441   : > { %v4223_v25 = vpop.permute.xlu1 %4222  ;;  %4123 = vrot.lane.b32.xlu0 %v9120_v56, %s6198_s11  ;;  %v10322_v56 = vld [vmem:[#allocation60_spill] sm:$0xff] }
 0x442   : > { %5254 = vst.msk [vmem:[%s8422_s13 + $0x19c] sm:$0xf] %vm2727_vm0, %v4223_v25 }
 0x443   : > { %v4096_v26 = vpop.permute.xlu0 %4095  ;;  %4125 = vrot.lane.b32.xlu1 %v10322_v56, %s6198_s11 }
 0x444   : > { %5223 = vst.msk [vmem:[%s8452_s17 + $0x1a0] sm:$0xf] %vm2727_vm0, %v4096_v26 }
 0x445   : > { %v3228_v53 = vpop.permute.xlu1 %3227  ;;  %4252 = vrot.lane.b32.xlu0 %v10321_v42, %s6198_s11 }
 0x446   : > { %4936 = vst.msk [vmem:[%s8452_s17 + $0xa4] sm:$0xf] %vm2727_vm0, %v3228_v53 }
 0x447   : > { %v4225_v3 = vpop.permute.xlu0 %4224  ;;  %4254 = vrot.lane.b32.xlu1 %v10323_v46, %s6198_s11 }
 0x448   : > { %5255 = vst.msk [vmem:[%s8422_s13 + $0x1a0] sm:$0xf] %vm2727_vm0, %v4225_v3 }
 0x449   : > { %v3357_v45 = vpop.permute.xlu1 %3356  ;;  %3257 = vrot.lane.b32.xlu0 %v9174_v5, %s6198_s11 }
 0x44a   : > { %4968 = vst.msk [vmem:[%s8422_s13 + $0xa4] sm:$0xf] %vm2727_vm0, %v3357_v45 }
 0x44b   : > { %v3230_v4 = vpop.permute.xlu0 %3229  ;;  %3259 = vrot.lane.b32.xlu1 %v9193_v2, %s6198_s11 }
 0x44c   : > { %4937 = vst.msk [vmem:[%s8452_s17 + $0xa8] sm:$0xf] %vm2727_vm0, %v3230_v4 }
 0x44d   : > { %v4098_v62 = vpop.permute.xlu1 %4097  ;;  %3386 = vrot.lane.b32.xlu0 %v9152_v57, %s6198_s11  ;;  %v10324_v57 = vld [vmem:[#allocation62_spill] sm:$0xff] }
 0x44e   : > { %5224 = vst.msk [vmem:[%s8452_s17 + $0x1a4] sm:$0xf] %vm2727_vm0, %v4098_v62 }
 0x44f   : > { %v3359_v7 = vpop.permute.xlu0 %3358  ;;  %3388 = vrot.lane.b32.xlu1 %v10324_v57, %s6198_s11 }
 0x450   : > { %4969 = vst.msk [vmem:[%s8422_s13 + $0xa8] sm:$0xf] %vm2727_vm0, %v3359_v7 }
 0x451   : > { %v4227_v28 = vpop.permute.xlu1 %4226  ;;  %4127 = vrot.lane.b32.xlu0 %v9184_v40, %s6198_s11  ;;  %v10326_v40 = vld [vmem:[#allocation64_spill] sm:$0xff] }
 0x452   : > { %5256 = vst.msk [vmem:[%s8422_s13 + $0x1a4] sm:$0xf] %vm2727_vm0, %v4227_v28 }
 0x453   : > { %v4100_v5 = vpop.permute.xlu0 %4099  ;;  %4129 = vrot.lane.b32.xlu1 %v10326_v40, %s6198_s11 }
 0x454   : > { %5225 = vst.msk [vmem:[%s8452_s17 + $0x1a8] sm:$0xf] %vm2727_vm0, %v4100_v5 }
 0x455   : > { %v3232_v50 = vpop.permute.xlu1 %3231  ;;  %4256 = vrot.lane.b32.xlu0 %v10325_v8, %s6198_s11 }
 0x456   : > { %4938 = vst.msk [vmem:[%s8452_s17 + $0xac] sm:$0xf] %vm2727_vm0, %v3232_v50 }
 0x457   : > { %v4229_v2 = vpop.permute.xlu0 %4228  ;;  %4258 = vrot.lane.b32.xlu1 %v10327_v35, %s6198_s11 }
 0x458   : > { %5257 = vst.msk [vmem:[%s8422_s13 + $0x1a8] sm:$0xf] %vm2727_vm0, %v4229_v2 }
 0x459   : > { %v3361_v37 = vpop.permute.xlu1 %3360  ;;  %3261 = vrot.lane.b32.xlu0 %v9238_v32, %s6198_s11 }
 0x45a   : > { %4970 = vst.msk [vmem:[%s8422_s13 + $0xac] sm:$0xf] %vm2727_vm0, %v3361_v37 }
 0x45b   : > { %v3234_v55 = vpop.permute.xlu0 %3233  ;;  %3263 = vrot.lane.b32.xlu1 %v9257_v49, %s6198_s11 }
 0x45c   : > { %4939 = vst.msk [vmem:[%s8452_s17 + $0xb0] sm:$0xf] %vm2727_vm0, %v3234_v55 }
 0x45d   : > { %v4102_v54 = vpop.permute.xlu1 %4101  ;;  %3390 = vrot.lane.b32.xlu0 %v9216_v23, %s6198_s11  ;;  %v10328_v23 = vld [vmem:[#allocation66_spill] sm:$0xff] }
 0x45e   : > { %5226 = vst.msk [vmem:[%s8452_s17 + $0x1ac] sm:$0xf] %vm2727_vm0, %v4102_v54 }
 0x45f   : > { %v3363_v18 = vpop.permute.xlu0 %3362  ;;  %3392 = vrot.lane.b32.xlu1 %v10328_v23, %s6198_s11 }
 0x460   : > { %4971 = vst.msk [vmem:[%s8422_s13 + $0xb0] sm:$0xf] %vm2727_vm0, %v3363_v18 }
 0x461   : > { %v4231_v0 = vpop.permute.xlu1 %4230  ;;  %4131 = vrot.lane.b32.xlu0 %v9248_v33, %s6198_s11  ;;  %v10330_v33 = vld [vmem:[#allocation30_spill] sm:$0xff] }
 0x462   : > { %5258 = vst.msk [vmem:[%s8422_s13 + $0x1ac] sm:$0xf] %vm2727_vm0, %v4231_v0 }
 0x463   : > { %v4104_v32 = vpop.permute.xlu0 %4103  ;;  %4133 = vrot.lane.b32.xlu1 %v10330_v33, %s6198_s11 }
 0x464   : > { %5227 = vst.msk [vmem:[%s8452_s17 + $0x1b0] sm:$0xf] %vm2727_vm0, %v4104_v32 }
 0x465   : > { %v3236_v43 = vpop.permute.xlu1 %3235  ;;  %4260 = vrot.lane.b32.xlu0 %v10329_v20, %s6198_s11 }
 0x466   : > { %4940 = vst.msk [vmem:[%s8452_s17 + $0xb4] sm:$0xf] %vm2727_vm0, %v3236_v43 }
 0x467   : > { %v4233_v49 = vpop.permute.xlu0 %4232  ;;  %4262 = vrot.lane.b32.xlu1 %v10331_v30, %s6198_s11 }
 0x468   : > { %5259 = vst.msk [vmem:[%s8422_s13 + $0x1b0] sm:$0xf] %vm2727_vm0, %v4233_v49 }
 0x469   : > { %v3365_v44 = vpop.permute.xlu1 %3364  ;;  %3265 = vrot.lane.b32.xlu0 %v9302_v1, %s6198_s11 }
 0x46a   : > { %4972 = vst.msk [vmem:[%s8422_s13 + $0xb4] sm:$0xf] %vm2727_vm0, %v3365_v44 }
 0x46b   : > { %v3238_v15 = vpop.permute.xlu0 %3237  ;;  %3267 = vrot.lane.b32.xlu1 %v9321_v41, %s6198_s11 }
 0x46c   : > { %4941 = vst.msk [vmem:[%s8452_s17 + $0xb8] sm:$0xf] %vm2727_vm0, %v3238_v15 }
 0x46d   : > { %v4106_v9 = vpop.permute.xlu1 %4105  ;;  %3394 = vrot.lane.b32.xlu0 %v9280_v38, %s6198_s11  ;;  %v10332_v38 = vld [vmem:[#allocation67_spill] sm:$0xff] }
 0x46e   : > { %5228 = vst.msk [vmem:[%s8452_s17 + $0x1b4] sm:$0xf] %vm2727_vm0, %v4106_v9 }
 0x46f   : > { %v3367_v24 = vpop.permute.xlu0 %3366  ;;  %3396 = vrot.lane.b32.xlu1 %v10332_v38, %s6198_s11 }
 0x470   : > { %4973 = vst.msk [vmem:[%s8422_s13 + $0xb8] sm:$0xf] %vm2727_vm0, %v3367_v24 }
 0x471   : > { %v4235_v59 = vpop.permute.xlu1 %4234  ;;  %4135 = vrot.lane.b32.xlu0 %v9312_v39, %s6198_s11 }
 0x472   : > { %5260 = vst.msk [vmem:[%s8422_s13 + $0x1b4] sm:$0xf] %vm2727_vm0, %v4235_v59 }
 0x473   : > { %v4108_v1 = vpop.permute.xlu0 %4107  ;;  %4137 = vrot.lane.b32.xlu1 %v9326_v48, %s6198_s11 }
 0x474   : > { %5229 = vst.msk [vmem:[%s8452_s17 + $0x1b8] sm:$0xf] %vm2727_vm0, %v4108_v1 }
 0x475   : > { %v3240_v52 = vpop.permute.xlu1 %3239  ;;  %4264 = vrot.lane.b32.xlu0 %v10333_v31, %s6198_s11 }
 0x476   : > { %4942 = vst.msk [vmem:[%s8452_s17 + $0xbc] sm:$0xf] %vm2727_vm0, %v3240_v52 }
 0x477   : > { %v4237_v41 = vpop.permute.xlu0 %4236  ;;  %4266 = vrot.lane.b32.xlu1 %v10334_v22, %s6198_s11 }
 0x478   : > { %5261 = vst.msk [vmem:[%s8422_s13 + $0x1b8] sm:$0xf] %vm2727_vm0, %v4237_v41 }
 0x479   : > { %v3369_v27 = vpop.permute.xlu1 %3368  ;;  %3269 = vrot.lane.b32.xlu0 %v9366_v6, %s6198_s11 }
 0x47a   : > { %4974 = vst.msk [vmem:[%s8422_s13 + $0xbc] sm:$0xf] %vm2727_vm0, %v3369_v27 }
 0x47b   : > { %v3242_v39 = vpop.permute.xlu0 %3241  ;;  %3271 = vrot.lane.b32.xlu1 %v9385_v63, %s6198_s11 }
 0x47c   : > { %4943 = vst.msk [vmem:[%s8452_s17 + $0xc0] sm:$0xf] %vm2727_vm0, %v3242_v39 }
 0x47d   : > { %v4110_v13 = vpop.permute.xlu1 %4109  ;;  %3398 = vrot.lane.b32.xlu0 %v9344_v58, %s6198_s11 }
 0x47e   : > { %5230 = vst.msk [vmem:[%s8452_s17 + $0x1bc] sm:$0xf] %vm2727_vm0, %v4110_v13 }
 0x47f   : > { %v3371_v48 = vpop.permute.xlu0 %3370  ;;  %3400 = vrot.lane.b32.xlu1 %v9354_v47, %s6198_s11 }
 0x480   : > { %4975 = vst.msk [vmem:[%s8422_s13 + $0xc0] sm:$0xf] %vm2727_vm0, %v3371_v48 }
 0x481   : > { %v4239_v34 = vpop.permute.xlu1 %4238  ;;  %4139 = vrot.lane.b32.xlu0 %v9376_v29, %s6198_s11 }
 0x482   : > { %5262 = vst.msk [vmem:[%s8422_s13 + $0x1bc] sm:$0xf] %vm2727_vm0, %v4239_v34 }
 0x483   : > { %v4112_v6 = vpop.permute.xlu0 %4111  ;;  %4141 = vrot.lane.b32.xlu1 %v9390_v19, %s6198_s11 }
 0x484   : > { %5231 = vst.msk [vmem:[%s8452_s17 + $0x1c0] sm:$0xf] %vm2727_vm0, %v4112_v6 }
 0x485   : > { %v3244_v58 = vpop.permute.xlu1 %3243  ;;  %4268 = vrot.lane.b32.xlu0 %v9347_v10, %s6198_s11 }
 0x486   : > { %4944 = vst.msk [vmem:[%s8452_s17 + $0xc4] sm:$0xf] %vm2727_vm0, %v3244_v58 }
 0x487   : > { %v4241_v63 = vpop.permute.xlu0 %4240  ;;  %4270 = vrot.lane.b32.xlu1 %v9364_v14, %s6198_s11 }
 0x488   : > { %5263 = vst.msk [vmem:[%s8422_s13 + $0x1c0] sm:$0xf] %vm2727_vm0, %v4241_v63 }
 0x489   : > { %v3373_v29 = vpop.permute.xlu1 %3372 }
 0x48a   : > { %4976 = vst.msk [vmem:[%s8422_s13 + $0xc4] sm:$0xf] %vm2727_vm0, %v3373_v29 }
 0x48b   : > { %v3246_v17 = vpop.permute.xlu0 %3245 }
 0x48c   : > { %4945 = vst.msk [vmem:[%s8452_s17 + $0xc8] sm:$0xf] %vm2727_vm0, %v3246_v17 }
 0x48d   : > { %v4114_v47 = vpop.permute.xlu1 %4113 }
 0x48e   : > { %5232 = vst.msk [vmem:[%s8452_s17 + $0x1c4] sm:$0xf] %vm2727_vm0, %v4114_v47 }
 0x48f   : > { %v3375_v10 = vpop.permute.xlu0 %3374 }
 0x490   : > { %4977 = vst.msk [vmem:[%s8422_s13 + $0xc8] sm:$0xf] %vm2727_vm0, %v3375_v10 }
 0x491   : > { %v4243_v19 = vpop.permute.xlu1 %4242 }
 0x492   : > { %5264 = vst.msk [vmem:[%s8422_s13 + $0x1c4] sm:$0xf] %vm2727_vm0, %v4243_v19 }
 0x493   : > { %v4116_v51 = vpop.permute.xlu0 %4115 }
 0x494   : > { %5233 = vst.msk [vmem:[%s8452_s17 + $0x1c8] sm:$0xf] %vm2727_vm0, %v4116_v51 }
 0x495   : > { %v3248_v11 = vpop.permute.xlu1 %3247 }
 0x496   : > { %4946 = vst.msk [vmem:[%s8452_s17 + $0xcc] sm:$0xf] %vm2727_vm0, %v3248_v11 }
 0x497   : > { %v4245_v14 = vpop.permute.xlu0 %4244 }
 0x498   : > { %5265 = vst.msk [vmem:[%s8422_s13 + $0x1c8] sm:$0xf] %vm2727_vm0, %v4245_v14 }
 0x499   : > { %v3377_v36 = vpop.permute.xlu1 %3376 }
 0x49a   : > { %4978 = vst.msk [vmem:[%s8422_s13 + $0xcc] sm:$0xf] %vm2727_vm0, %v3377_v36 }
 0x49b   : > { %v3250_v60 = vpop.permute.xlu0 %3249 }
 0x49c   : > { %4947 = vst.msk [vmem:[%s8452_s17 + $0xd0] sm:$0xf] %vm2727_vm0, %v3250_v60 }
 0x49d   : > { %v4118_v16 = vpop.permute.xlu1 %4117 }
 0x49e   : > { %5234 = vst.msk [vmem:[%s8452_s17 + $0x1cc] sm:$0xf] %vm2727_vm0, %v4118_v16 }
 0x49f   : > { %v3379_v61 = vpop.permute.xlu0 %3378 }
 0x4a0   : > { %4979 = vst.msk [vmem:[%s8422_s13 + $0xd0] sm:$0xf] %vm2727_vm0, %v3379_v61 }
 0x4a1   : > { %v4247_v12 = vpop.permute.xlu1 %4246 }
 0x4a2   : > { %5266 = vst.msk [vmem:[%s8422_s13 + $0x1cc] sm:$0xf] %vm2727_vm0, %v4247_v12 }
 0x4a3   : > { %v4120_v25 = vpop.permute.xlu0 %4119 }
 0x4a4   : > { %5235 = vst.msk [vmem:[%s8452_s17 + $0x1d0] sm:$0xf] %vm2727_vm0, %v4120_v25 }
 0x4a5   : > { %v3252_v26 = vpop.permute.xlu1 %3251 }
 0x4a6   : > { %4948 = vst.msk [vmem:[%s8452_s17 + $0xd4] sm:$0xf] %vm2727_vm0, %v3252_v26 }
 0x4a7   : > { %v4249_v53 = vpop.permute.xlu0 %4248 }
 0x4a8   : > { %5267 = vst.msk [vmem:[%s8422_s13 + $0x1d0] sm:$0xf] %vm2727_vm0, %v4249_v53 }
 0x4a9   : > { %v3381_v21 = vpop.permute.xlu1 %3380 }
 0x4aa   : > { %4980 = vst.msk [vmem:[%s8422_s13 + $0xd4] sm:$0xf] %vm2727_vm0, %v3381_v21 }
 0x4ab   : > { %v3254_v42 = vpop.permute.xlu0 %3253 }
 0x4ac   : > { %4949 = vst.msk [vmem:[%s8452_s17 + $0xd8] sm:$0xf] %vm2727_vm0, %v3254_v42 }
 0x4ad   : > { %v4122_v3 = vpop.permute.xlu1 %4121 }
 0x4ae   : > { %5236 = vst.msk [vmem:[%s8452_s17 + $0x1d4] sm:$0xf] %vm2727_vm0, %v4122_v3 }
 0x4af   : > { %v3383_v45 = vpop.permute.xlu0 %3382 }
 0x4b0   : > { %4981 = vst.msk [vmem:[%s8422_s13 + $0xd8] sm:$0xf] %vm2727_vm0, %v3383_v45 }
 0x4b1   : > { %v4251_v56 = vpop.permute.xlu1 %4250 }
 0x4b2   : > { %5268 = vst.msk [vmem:[%s8422_s13 + $0x1d4] sm:$0xf] %vm2727_vm0, %v4251_v56 }
 0x4b3   : > { %v4124_v4 = vpop.permute.xlu0 %4123 }
 0x4b4   : > { %5237 = vst.msk [vmem:[%s8452_s17 + $0x1d8] sm:$0xf] %vm2727_vm0, %v4124_v4 }
 0x4b5   : > { %v3256_v62 = vpop.permute.xlu1 %3255 }
 0x4b6   : > { %4950 = vst.msk [vmem:[%s8452_s17 + $0xdc] sm:$0xf] %vm2727_vm0, %v3256_v62 }
 0x4b7   : > { %v4253_v46 = vpop.permute.xlu0 %4252 }
 0x4b8   : > { %5269 = vst.msk [vmem:[%s8422_s13 + $0x1d8] sm:$0xf] %vm2727_vm0, %v4253_v46 }
 0x4b9   : > { %v3385_v7 = vpop.permute.xlu1 %3384 }
 0x4ba   : > { %4982 = vst.msk [vmem:[%s8422_s13 + $0xdc] sm:$0xf] %vm2727_vm0, %v3385_v7 }
 0x4bb   : > { %v3258_v28 = vpop.permute.xlu0 %3257 }
 0x4bc   : > { %4951 = vst.msk [vmem:[%s8452_s17 + $0xe0] sm:$0xf] %vm2727_vm0, %v3258_v28 }
 0x4bd   : > { %v4126_v5 = vpop.permute.xlu1 %4125 }
 0x4be   : > { %5238 = vst.msk [vmem:[%s8452_s17 + $0x1dc] sm:$0xf] %vm2727_vm0, %v4126_v5 }
 0x4bf   : > { %v3387_v50 = vpop.permute.xlu0 %3386 }
 0x4c0   : > { %4983 = vst.msk [vmem:[%s8422_s13 + $0xe0] sm:$0xf] %vm2727_vm0, %v3387_v50 }
 0x4c1   : > { %v4255_v57 = vpop.permute.xlu1 %4254 }
 0x4c2   : > { %5270 = vst.msk [vmem:[%s8422_s13 + $0x1dc] sm:$0xf] %vm2727_vm0, %v4255_v57 }
 0x4c3   : > { %v4128_v8 = vpop.permute.xlu0 %4127 }
 0x4c4   : > { %5239 = vst.msk [vmem:[%s8452_s17 + $0x1e0] sm:$0xf] %vm2727_vm0, %v4128_v8 }
 0x4c5   : > { %v3260_v2 = vpop.permute.xlu1 %3259 }
 0x4c6   : > { %4952 = vst.msk [vmem:[%s8452_s17 + $0xe4] sm:$0xf] %vm2727_vm0, %v3260_v2 }
 0x4c7   : > { %v4257_v37 = vpop.permute.xlu0 %4256 }
 0x4c8   : > { %5271 = vst.msk [vmem:[%s8422_s13 + $0x1e0] sm:$0xf] %vm2727_vm0, %v4257_v37 }
 0x4c9   : > { %v3389_v40 = vpop.permute.xlu1 %3388 }
 0x4ca   : > { %4984 = vst.msk [vmem:[%s8422_s13 + $0xe4] sm:$0xf] %vm2727_vm0, %v3389_v40 }
 0x4cb   : > { %v3262_v55 = vpop.permute.xlu0 %3261 }
 0x4cc   : > { %4953 = vst.msk [vmem:[%s8452_s17 + $0xe8] sm:$0xf] %vm2727_vm0, %v3262_v55 }
 0x4cd   : > { %v4130_v54 = vpop.permute.xlu1 %4129 }
 0x4ce   : > { %5240 = vst.msk [vmem:[%s8452_s17 + $0x1e4] sm:$0xf] %vm2727_vm0, %v4130_v54 }
 0x4cf   : > { %v3391_v35 = vpop.permute.xlu0 %3390 }
 0x4d0   : > { %4985 = vst.msk [vmem:[%s8422_s13 + $0xe8] sm:$0xf] %vm2727_vm0, %v3391_v35 }
 0x4d1   : > { %v4259_v18 = vpop.permute.xlu1 %4258 }
 0x4d2   : > { %5272 = vst.msk [vmem:[%s8422_s13 + $0x1e4] sm:$0xf] %vm2727_vm0, %v4259_v18 }
 0x4d3   : > { %v4132_v0 = vpop.permute.xlu0 %4131 }
 0x4d4   : > { %5241 = vst.msk [vmem:[%s8452_s17 + $0x1e8] sm:$0xf] %vm2727_vm0, %v4132_v0 }
 0x4d5   : > { %v3264_v32 = vpop.permute.xlu1 %3263 }
 0x4d6   : > { %4954 = vst.msk [vmem:[%s8452_s17 + $0xec] sm:$0xf] %vm2727_vm0, %v3264_v32 }
 0x4d7   : > { %v4261_v43 = vpop.permute.xlu0 %4260 }
 0x4d8   : > { %5273 = vst.msk [vmem:[%s8422_s13 + $0x1e8] sm:$0xf] %vm2727_vm0, %v4261_v43 }
 0x4d9   : > { %v3393_v23 = vpop.permute.xlu1 %3392 }
 0x4da   : > { %4986 = vst.msk [vmem:[%s8422_s13 + $0xec] sm:$0xf] %vm2727_vm0, %v3393_v23 }
 0x4db   : > { %v3266_v20 = vpop.permute.xlu0 %3265 }
 0x4dc   : > { %4955 = vst.msk [vmem:[%s8452_s17 + $0xf0] sm:$0xf] %vm2727_vm0, %v3266_v20 }
 0x4dd   : > { %v4134_v49 = vpop.permute.xlu1 %4133 }
 0x4de   : > { %5242 = vst.msk [vmem:[%s8452_s17 + $0x1ec] sm:$0xf] %vm2727_vm0, %v4134_v49 }
 0x4df   : > { %v3395_v44 = vpop.permute.xlu0 %3394 }
 0x4e0   : > { %4987 = vst.msk [vmem:[%s8422_s13 + $0xf0] sm:$0xf] %vm2727_vm0, %v3395_v44 }
 0x4e1   : > { %v4263_v33 = vpop.permute.xlu1 %4262 }
 0x4e2   : > { %5274 = vst.msk [vmem:[%s8422_s13 + $0x1ec] sm:$0xf] %vm2727_vm0, %v4263_v33 }
 0x4e3   : > { %v4136_v15 = vpop.permute.xlu0 %4135 }
 0x4e4   : > { %5243 = vst.msk [vmem:[%s8452_s17 + $0x1f0] sm:$0xf] %vm2727_vm0, %v4136_v15 }
 0x4e5   : > { %v3268_v9 = vpop.permute.xlu1 %3267 }
 0x4e6   : > { %4956 = vst.msk [vmem:[%s8452_s17 + $0xf4] sm:$0xf] %vm2727_vm0, %v3268_v9 }
 0x4e7   : > { %v4265_v30 = vpop.permute.xlu0 %4264 }
 0x4e8   : > { %5275 = vst.msk [vmem:[%s8422_s13 + $0x1f0] sm:$0xf] %vm2727_vm0, %v4265_v30 }
 0x4e9   : > { %v3397_v24 = vpop.permute.xlu1 %3396 }
 0x4ea   : > { %4988 = vst.msk [vmem:[%s8422_s13 + $0xf4] sm:$0xf] %vm2727_vm0, %v3397_v24 }
 0x4eb   : > { %v3270_v59 = vpop.permute.xlu0 %3269 }
 0x4ec   : > { %4957 = vst.msk [vmem:[%s8452_s17 + $0xf8] sm:$0xf] %vm2727_vm0, %v3270_v59 }
 0x4ed   : > { %v4138_v1 = vpop.permute.xlu1 %4137 }
 0x4ee   : > { %5244 = vst.msk [vmem:[%s8452_s17 + $0x1f4] sm:$0xf] %vm2727_vm0, %v4138_v1 }
 0x4ef   : > { %v3399_v52 = vpop.permute.xlu0 %3398 }
 0x4f0   : > { %4989 = vst.msk [vmem:[%s8422_s13 + $0xf8] sm:$0xf] %vm2727_vm0, %v3399_v52 }
 0x4f1   : > { %v4267_v38 = vpop.permute.xlu1 %4266 }
 0x4f2   : > { %5276 = vst.msk [vmem:[%s8422_s13 + $0x1f4] sm:$0xf] %vm2727_vm0, %v4267_v38 }
 0x4f3   : > { %v4140_v31 = vpop.permute.xlu0 %4139 }
 0x4f4   : > { %5245 = vst.msk [vmem:[%s8452_s17 + $0x1f8] sm:$0xf] %vm2727_vm0, %v4140_v31 }
 0x4f5   : > { %v3272_v41 = vpop.permute.xlu1 %3271 }
 0x4f6   : > { %4958 = vst.msk [vmem:[%s8452_s17 + $0xfc] sm:$0xf] %vm2727_vm0, %v3272_v41 }
 0x4f7   : > { %v4269_v27 = vpop.permute.xlu0 %4268 }
 0x4f8   : > { %5277 = vst.msk [vmem:[%s8422_s13 + $0x1f8] sm:$0xf] %vm2727_vm0, %v4269_v27 }
 0x4f9   : > { %v3401_v39 = vpop.permute.xlu1 %3400 }
 0x4fa   : > { %4990 = vst.msk [vmem:[%s8422_s13 + $0xfc] sm:$0xf] %vm2727_vm0, %v3401_v39 }
 0x4fd   : > { %v4142_v13 = vpop.permute.xlu1 %4141 }
 0x4fe   : > { %5246 = vst.msk [vmem:[%s8452_s17 + $0x1fc] sm:$0xf] %vm2727_vm0, %v4142_v13 }
 0x501   : > { %v4271_v22 = vpop.permute.xlu1 %4270 }
 0x502   : > { %5278 = vst.msk [vmem:[%s8422_s13 + $0x1fc] sm:$0xf] %vm2727_vm0, %v4271_v22 }
 0x503   : > { %s5282_s14 = sshll.u32 %s6171_s27, 5  ;;  %s5283_s12 = sshll.u32 %s6175_s28, 8 }
 0x504   : > { %s4360_s19 = sadd.s32 %s5283_s12, %s5282_s14  ;;  %s4379_s21 = sshll.u32 %s8032_s6, 4  ;;  %s4380_s21 = int_to_ptr.vmem [resolvable:$true] %s4379_s21 }
 0x505   : > { %s9883_s15 = sshll.u32 %s4360_s19, 6  ;;  %s6199_s23 = smov 2048  }
 0x506   : > { %s4362_s10 = scalar_lea.hbm %s9978_s5, %s9883_s15  ;;  %5536 = sst [smem:[#allocation16]] (%p6439_p4), %s6199_s23 }
 0x507   : > { %s6200_s3 = smov 4096   ;;  %s6201_s27 = smov 32  }
 0x508   : > { %5537 = sst [smem:[#allocation16 + $0x1]] (%p6439_p4), %s6200_s3  ;;  %s6202_s28 = smov 64  }
 0x509   : > { %5538 = sst [smem:[#allocation16 + $0x2]] (%p6439_p4), %s6201_s27  ;;  %s6203_s4 = smov 4  }
 0x50a   : > { %5539 = sst [smem:[#allocation16 + $0x3]] (%p6439_p4), %s6202_s28  ;;  %s6204_s16 = smov [#allocation15]  }
 0x50b   : > { %5540 = sst [smem:[#allocation16 + $0x4]] (%p6439_p4), %s6202_s28  ;;  %s6205_s6 = smov 0  }
 0x50c   : > { %5541 = sst [smem:[#allocation16 + $0x5]] (%p6439_p4), %s6203_s4 }
 0x50d   : > { %5542 = dma.general (%p6439_p4), %s4380_s21, 8192, %s4362_s10, %s4338_s18, %s6204_s16, [#allocation16], %s6205_s6, 0  }
 0x50e   : > { %s10335_s14 = sld [smem:[#allocation86_spill]]  ;;  %s4426_s19 = sshll.u32 %s8452_s17, 4  ;;  %s4427_s19 = int_to_ptr.vmem [resolvable:$true] %s4426_s19 }
 0x50f   : > { %s6206_s9 = smov 2048   ;;  %s6207_s18 = smov 4096  }
 0x510   : > { %5543 = sst [smem:[#allocation18]] (%p6439_p4), %s6206_s9  ;;  %s6208_s21 = smov 32  }
 0x511   : > { %5544 = sst [smem:[#allocation18 + $0x1]] (%p6439_p4), %s6207_s18  ;;  %s6209_s20 = smov 64  }
 0x512   : > { %5545 = sst [smem:[#allocation18 + $0x2]] (%p6439_p4), %s6208_s21  ;;  %s6210_s10 = smov 4  }
 0x513   : > { %5546 = sst [smem:[#allocation18 + $0x3]] (%p6439_p4), %s6209_s20  ;;  %s6211_s23 = smov [#allocation17]  }
 0x514   : > { %s4409_s12 = scalar_lea.hbm %s10335_s14, %s9883_s15  ;;  %5547 = sst [smem:[#allocation18 + $0x4]] (%p6439_p4), %s6209_s20 }
 0x515   : > { %5548 = sst [smem:[#allocation18 + $0x5]] (%p6439_p4), %s6210_s10  ;;  %s6212_s17 = smov 0  }
 0x516   : > { %5549 = dma.general (%p6439_p4), %s4427_s19, 8192, %s4409_s12, %s9878_s22, %s6211_s23, [#allocation18], %s6212_s17, 0  }
 0x517   : > { %s10336_s28 = sld [smem:[#allocation87_spill]]  ;;  %s4473_s16 = sshll.u32 %s8422_s13, 4  ;;  %s4474_s16 = int_to_ptr.vmem [resolvable:$true] %s4473_s16 }
 0x518   : > { %s6213_s6 = smov 2048   ;;  %s6214_s11 = smov 4096  }
 0x519   : > { %5550 = sst [smem:[#allocation20]] (%p6439_p4), %s6213_s6  ;;  %s6215_s1 = smov 32  }
 0x51a   : > { %5551 = sst [smem:[#allocation20 + $0x1]] (%p6439_p4), %s6214_s11  ;;  %s6216_s14 = smov 64  }
 0x51b   : > { %5552 = sst [smem:[#allocation20 + $0x2]] (%p6439_p4), %s6215_s1  ;;  %s6217_s12 = smov 4  }
 0x51c   : > { %5553 = sst [smem:[#allocation20 + $0x3]] (%p6439_p4), %s6216_s14  ;;  %s6219_s13 = smov 0  }
 0x51d   : > { %s4456_s4 = scalar_lea.hbm %s10336_s28, %s9883_s15  ;;  %5554 = sst [smem:[#allocation20 + $0x4]] (%p6439_p4), %s6216_s14 }
 0x51e   : > { %5555 = sst [smem:[#allocation20 + $0x5]] (%p6439_p4), %s6217_s12  ;;  %s6218_s15 = smov [#allocation19]  }
 0x51f   : > { %5556 = dma.general (%p6439_p4), %s4474_s16, 8192, %s4456_s4, %s9878_s22, %s6218_s15, [#allocation20], %s6219_s13, 0  }
 0x520 PF: > { %s10337_s19 = sld [smem:[#allocation26_spill]]  ;;  %s10338_s9 = sld [smem:[#allocation27_spill]] }
 0x521   : > { %p5596_p6 = scmp.ge.s32.totalorder %s6187_s8, 2 }
 0x526   : > { %s4501_s18 = sand.u32 1, %s10337_s19   ;;  %p10339_p8 = scmp.ne.s32.totalorder %s10338_s9, 0 }
 0x527   : > { %s4502_s21 = scalar_lea.sflag [#allocation4], %s4501_s18 }
 0x528   : > { %p5578_p3 = pnand %p5596_p6, %p10339_p8 }
 0x52a   : > { %6150 = dma.done.wait (!%p5578_p3), %s4502_s21, 8192  }
 0x52b   : > { %6152 = vsyncadd (!%p5578_p3), %s4502_s21, 4294959104  ;;  %s10340_s20 = sadd.s32 4294967294, %s6187_s8  }
 0x52c   : > { %s4510_s10 = sand.u32 1, %s10340_s20  }
 0x52d   : > { %s4511_s23 = scalar_lea.sflag [#allocation13], %s4510_s10 }
 0x52e   : > { %6154 = dma.done.wait (!%p5578_p3), %s4511_s23, 16384  }
 0x52f   : > { %6156 = vsyncadd (!%p5578_p3), %s4511_s23, 4294950912  ;;  %s29_s8 = sadd.s32 1, %s6187_s8   ;;  %s10341_s7 = sld [smem:[#allocation28_spill]] }
 0x530   : > { %p26_p4 = scmp.ge.s32.totalorder %s29_s8, 6   ;;  %s10342_s22 = smov %s10355_s24 }
 0x531   : > { %s10343_s24 = smov %s6163_s25  ;;  %s10344_s25 = smov %s6167_s26 }
 0x532   : > { %s10345_s26 = smov %s6452_s2  ;;  %s10346_s27 = smov %s6179_s29 }
 0x533   : > { %s10347_s28 = smov %s6183_s30  ;;  %s10349_s30 = smov %s10342_s22 }
 0x534   :  { %28 = sbr.rel (!%p26_p4) target bundleno = 18 (0x12), region = 157 }
 0x535   : > { %s10348_s29 = smov %s10341_s7 }
 0x53b   :  { %4525 = vsyncpa [#allocation3], 1 }
 0x53c   :  { %4527 = vsyncpa [#allocation3 + $0x1], 1 }
 0x53d   :  { %4528 = vsyncpa [#allocation6], 1 }
 0x53e   :  { %4529 = vsyncpa [#allocation9], 1 }
 0x53f   :  { %4530 = vsyncpa [#allocation4], 1 }
 0x540   :  { %4532 = vsyncpa [#allocation4 + $0x1], 1 }
 0x541   :  { %4533 = vsyncpa [#allocation13], 1 }
 0x542   :  { %4535 = vsyncpa [#allocation13 + $0x1], 1 }

</bundles_post_ra>
